<compile_context>
chip_gen: v7x
topology: tpu7x:2x2x1
jax: 0.10.0
libtpu: 0.0.40
codegen_flags: <defaults>
</compile_context>

<pallas_src>
import functools
from itertools import combinations

import jax
import jax.numpy as jnp
from jax.experimental import pallas as pl
from jax.experimental.pallas import tpu as pltpu


# ----------------------------------------------------------------------------
# helpers
# ----------------------------------------------------------------------------

def _pick_spatial_tile(hw):
    """Largest lane-dense tile that divides the flattened spatial size."""
    for t in (1024, 512, 256, 128):
        if hw % t == 0:
            return t
    return hw


# ----------------------------------------------------------------------------
# 3x3 conv + ReLU extractors, fused over (scale, batch) in one pallas_call
# ----------------------------------------------------------------------------

def _conv3x3_relu_kernel(x_ref, w_ref, b_ref, o_ref, *, cout, cin, hh, ww):
    # x_ref: (cin, hh+2, ww+2) padded input for one (scale, batch) element
    # w_ref: (cout, cin*9) this scale's weights; b_ref: (cout, 1)
    # o_ref: (cout, hh, ww)
    for co in range(cout):
        acc = jnp.zeros((hh, ww), jnp.float32)
        for ci in range(cin):
            for ky in range(3):
                for kx in range(3):
                    t = ci * 9 + ky * 3 + kx
                    wv = w_ref[co:co + 1, t:t + 1]               # (1,1) scalar
                    tap = x_ref[ci, ky:ky + hh, kx:kx + ww]      # (hh,ww)
                    acc = acc + wv * tap
        acc = acc + b_ref[co:co + 1, 0:1]
        o_ref[co, :, :] = jnp.maximum(acc, 0.0).astype(o_ref.dtype)


def conv3x3_relu_all_scales(images, w, b):
    """images (S,B,Cin,H,W), w (S,Cout,Cin,3,3), b (S,Cout)
       -> features (S*B, Cout, H, W)  (NCHW, scales stacked along batch)."""
    S, B, Cin, H, W = images.shape
    Cout = w.shape[1]
    xpad = jnp.pad(images, ((0, 0), (0, 0), (0, 0), (1, 1), (1, 1)))
    w3 = w.reshape(S, Cout, Cin * 9)
    b3 = b.reshape(S, Cout, 1)
    kern = functools.partial(_conv3x3_relu_kernel, cout=Cout, cin=Cin, hh=H, ww=W)
    return pl.pallas_call(
        kern,
        out_shape=jax.ShapeDtypeStruct((S * B, Cout, H, W), jnp.float32),
        grid_spec=pltpu.PrefetchScalarGridSpec(
            num_scalar_prefetch=0,
            grid=(S, B),
            in_specs=[
                pl.BlockSpec((None, None, Cin, H + 2, W + 2),
                             lambda s, bb: (s, bb, 0, 0, 0)),
                pl.BlockSpec((None, Cout, Cin * 9), lambda s, bb: (s, 0, 0)),
                pl.BlockSpec((None, Cout, 1), lambda s, bb: (s, 0, 0)),
            ],
            out_specs=pl.BlockSpec((None, Cout, H, W),
                                   lambda s, bb: (s * B + bb, 0, 0, 0)),
        ),
        compiler_params=pltpu.CompilerParams(
            dimension_semantics=("parallel", "parallel")),
    )(xpad, w3, b3)


# ----------------------------------------------------------------------------
# Fused detector + discriminator 1x1 heads (+ optional masking epilogue)
# ----------------------------------------------------------------------------

def _heads_masked_kernel(x_ref, w_ref, b_ref, m_ref, pred_ref, adv_ref, *,
                         cpred, cdisc, num_masks):
    h = jnp.dot(w_ref[...], x_ref[...], preferred_element_type=jnp.float32)
    h = h + b_ref[...]
    pred_ref[...] = h[:cpred].astype(pred_ref.dtype)
    adv = h[cpred:cpred + cdisc]
    for nm in range(num_masks):
        adv_ref[nm, :, :] = (adv * m_ref[nm:nm + 1, :]).astype(adv_ref.dtype)


def _heads_plain_kernel(x_ref, w_ref, b_ref, pred_ref, adv_ref, *, cpred, cdisc):
    h = jnp.dot(w_ref[...], x_ref[...], preferred_element_type=jnp.float32)
    h = h + b_ref[...]
    pred_ref[...] = h[:cpred].astype(pred_ref.dtype)
    adv_ref[...] = h[cpred:cpred + cdisc].astype(adv_ref.dtype)


def fused_heads(feats2d, w_heads, b_heads, masks2d, cpred, cdisc):
    """feats2d (N, Cf, HW); w_heads (cpred+cdisc, Cf); b_heads (cpred+cdisc, 1);
       masks2d (N, NM, HW) or None.
       Returns pred (N, cpred, HW) and adv (N, NM, cdisc, HW) if masked,
       else adv (N, cdisc, HW)."""
    N, Cf, HW = feats2d.shape
    nh = cpred + cdisc
    t = _pick_spatial_tile(HW)
    grid = (N, HW // t)
    x_spec = pl.BlockSpec((None, Cf, t), lambda n, m: (n, 0, m))
    w_spec = pl.BlockSpec((nh, Cf), lambda n, m: (0, 0))
    b_spec = pl.BlockSpec((nh, 1), lambda n, m: (0, 0))
    pred_spec = pl.BlockSpec((None, cpred, t), lambda n, m: (n, 0, m))
    cparams = pltpu.CompilerParams(dimension_semantics=("parallel", "parallel"))

    if masks2d is not None:
        NM = masks2d.shape[1]
        kern = functools.partial(_heads_masked_kernel, cpred=cpred, cdisc=cdisc,
                                 num_masks=NM)
        m_spec = pl.BlockSpec((None, NM, t), lambda n, m: (n, 0, m))
        adv_spec = pl.BlockSpec((None, NM, cdisc, t), lambda n, m: (n, 0, 0, m))
        out_shape = (jax.ShapeDtypeStruct((N, cpred, HW), jnp.float32),
                     jax.ShapeDtypeStruct((N, NM, cdisc, HW), jnp.float32))
        return pl.pallas_call(
            kern, out_shape=out_shape,
            grid_spec=pltpu.PrefetchScalarGridSpec(
                num_scalar_prefetch=0, grid=grid,
                in_specs=[x_spec, w_spec, b_spec, m_spec],
                out_specs=(pred_spec, adv_spec)),
            compiler_params=cparams,
        )(feats2d, w_heads, b_heads, masks2d)

    kern = functools.partial(_heads_plain_kernel, cpred=cpred, cdisc=cdisc)
    adv_spec = pl.BlockSpec((None, cdisc, t), lambda n, m: (n, 0, m))
    out_shape = (jax.ShapeDtypeStruct((N, cpred, HW), jnp.float32),
                 jax.ShapeDtypeStruct((N, cdisc, HW), jnp.float32))
    return pl.pallas_call(
        kern, out_shape=out_shape,
        grid_spec=pltpu.PrefetchScalarGridSpec(
            num_scalar_prefetch=0, grid=grid,
            in_specs=[x_spec, w_spec, b_spec],
            out_specs=(pred_spec, adv_spec)),
        compiler_params=cparams,
    )(feats2d, w_heads, b_heads)


# ----------------------------------------------------------------------------
# Lane-dense 1x1-conv matmul for the gradient penalty (custom_vjp)
# ----------------------------------------------------------------------------

def _cm_matmul_kernel(x_ref, w_ref, b_ref, o_ref):
    h = jnp.dot(w_ref[...], x_ref[...], preferred_element_type=jnp.float32)
    o_ref[...] = (h + b_ref[...]).astype(o_ref.dtype)


def cm_matmul(x3, w, b_col):
    """x3 (N, K, M); w (Cout, K); b_col (Cout, 1) -> (N, Cout, M)."""
    N, K, M = x3.shape
    Cout = w.shape[0]
    t = _pick_spatial_tile(M)
    return pl.pallas_call(
        _cm_matmul_kernel,
        out_shape=jax.ShapeDtypeStruct((N, Cout, M), jnp.float32),
        grid_spec=pltpu.PrefetchScalarGridSpec(
            num_scalar_prefetch=0,
            grid=(N, M // t),
            in_specs=[
                pl.BlockSpec((None, K, t), lambda n, m: (n, 0, m)),
                pl.BlockSpec((Cout, K), lambda n, m: (0, 0)),
                pl.BlockSpec((Cout, 1), lambda n, m: (0, 0)),
            ],
            out_specs=pl.BlockSpec((None, Cout, t), lambda n, m: (n, 0, m)),
        ),
        compiler_params=pltpu.CompilerParams(
            dimension_semantics=("parallel", "parallel")),
    )(x3, w, b_col)


@jax.custom_vjp
def disc_apply(x3, w, b_col):
    return cm_matmul(x3, w, b_col)


def _disc_apply_fwd(x3, w, b_col):
    return cm_matmul(x3, w, b_col), (x3, w)


def _disc_apply_bwd(res, g):
    x3, w = res
    # dX = W^T @ g via the same lane-dense Pallas kernel; only the tiny
    # (Cout,K) weight is transposed, never the activations.
    dx = cm_matmul(g, w.T, jnp.zeros((w.shape[1], 1), g.dtype))
    dw = jnp.einsum('bcm,bkm->ck', g, x3)      # not on the GP path -> DCE'd
    db = jnp.sum(g, axis=(0, 2))[:, None]
    return dx, dw, db


disc_apply.defvjp(_disc_apply_fwd, _disc_apply_bwd)


# ----------------------------------------------------------------------------
# Tiled sum-of-squared-differences reduction (broadcast target in-kernel)
# ----------------------------------------------------------------------------

def _sse_kernel(x_ref, y_ref, o_ref, *, tile_rows, rows_valid, mask_rows):
    i = pl.program_id(0)

    @pl.when(i == 0)
    def _init():
        o_ref[...] = jnp.zeros_like(o_ref)

    d = x_ref[...] - y_ref[...]          # y broadcasts over rows or columns
    if mask_rows:
        rid = jax.lax.broadcasted_iota(jnp.int32, d.shape, 0) + i * tile_rows
        d = jnp.where(rid < rows_valid, d, 0.0)
    o_ref[...] += jnp.sum(d * d, axis=(0, 1), keepdims=True)


def pallas_sse(x2d, y2d, *, max_block_bytes=2 * 1024 * 1024):
    """Sum of squared differences.  y2d may be (R,C), (1,C) or (R,1); it is
    broadcast inside the kernel and never materialized at full size."""
    x2d = x2d.astype(jnp.float32)
    y2d = y2d.astype(jnp.float32)
    R, C = x2d.shape
    Ry, Cy = y2d.shape
    max_rows = max(8, max_block_bytes // (C * 4))
    if R <= max_rows:
        tr, Rp = R, R
    else:
        tr = (max_rows // 8) * 8
        Rp = ((R + tr - 1) // tr) * tr
    mask_rows = Rp != R
    if mask_rows:
        x2d = jnp.pad(x2d, ((0, Rp - R), (0, 0)))
        if Ry != 1:
            y2d = jnp.pad(y2d, ((0, Rp - R), (0, 0)))
    y_rows = 1 if Ry == 1 else tr
    y_map = (lambda i: (0, 0)) if Ry == 1 else (lambda i: (i, 0))
    out = pl.pallas_call(
        functools.partial(_sse_kernel, tile_rows=tr, rows_valid=R,
                          mask_rows=mask_rows),
        out_shape=jax.ShapeDtypeStruct((1, 1), jnp.float32),
        grid_spec=pltpu.PrefetchScalarGridSpec(
            num_scalar_prefetch=0,
            grid=(Rp // tr,),
            in_specs=[pl.BlockSpec((tr, C), lambda i: (i, 0)),
                      pl.BlockSpec((y_rows, Cy), y_map)],
            out_specs=pl.BlockSpec((1, 1), lambda i: (0, 0)),
        ),
        compiler_params=pltpu.CompilerParams(
            dimension_semantics=("arbitrary",)),
    )(x2d, y2d)
    return out[0, 0]


# ----------------------------------------------------------------------------
# Losses and gradient penalty
# ----------------------------------------------------------------------------

def detector_loss(pred2d, heat2d, num_scales):
    # TODO(synk): original DetectorLoss code not provided; surrogate = per-scale
    # MSE of detector predictions vs targets['heatmaps'], fused into one Pallas
    # reduction (all valid scales share a shape here).
    per_scale_size = pred2d.size // num_scales
    sse = pallas_sse(pred2d.reshape(-1, pred2d.shape[-1]),
                     heat2d.reshape(-1, heat2d.shape[-1]))
    det_loss = sse / per_scale_size / num_scales
    return det_loss, {'det_loss': det_loss}


def discriminator_loss(adv2d, masks_stacked, valid_scale, cdisc, normalize):
    # TODO(synk): original DiscriminatorLoss code not provided; surrogate =
    # (optionally mask-normalized) MSE against a per-scale one-hot domain target
    # that is broadcast inside the SSE kernel.
    S = len(valid_scale)
    B = masks_stacked.shape[1]
    hw = adv2d.shape[-1]
    total = jnp.float32(0.0)
    for k, i in enumerate(valid_scale):
        adv_i = adv2d[k * B:(k + 1) * B]
        x = adv_i.reshape(-1, hw)                 # rows ordered (..., channel)
        reps = x.shape[0] // cdisc
        onehot = jax.nn.one_hot(i % cdisc, cdisc, dtype=jnp.float32)
        ycol = jnp.tile(onehot, reps)[:, None]    # (rows, 1), broadcast in-kernel
        sse = pallas_sse(x, ycol)
        if normalize:
            denom = jnp.sum(masks_stacked[k]) * cdisc + 1e-6
        else:
            denom = float(x.size)
        total = total + sse / denom
    dis_loss = total / S
    return dis_loss, {'dis_loss': dis_loss}


def gradient_penalty(feats2d, w_disc, b_disc_col, valid_scale, batch, rng):
    S = len(valid_scale)
    pairs = list(combinations(range(S), 2))
    disc = lambda x: disc_apply(x, w_disc, b_disc_col)
    penalty = jnp.float32(0.0)
    for idx, (ki, kj) in enumerate(pairs):
        key = jax.random.fold_in(rng, idx)
        alpha = jax.random.uniform(key, (batch, 1, 1), dtype=jnp.float32)
        fi = feats2d[ki * batch:(ki + 1) * batch]
        fj = feats2d[kj * batch:(kj + 1) * batch]
        interpolated = alpha * fi + (1.0 - alpha) * fj
        pred, vjp_fn = jax.vjp(disc, interpolated)
        (grads,) = vjp_fn(jnp.ones_like(pred))
        grads = grads.reshape(batch, -1)
        gn = jnp.sqrt(jnp.sum(grads ** 2, axis=1) + 1e-12)
        penalty = penalty + jnp.mean((gn - 1.0) ** 2)
    return penalty / len(pairs)


# ----------------------------------------------------------------------------
# ModelWithLoss forward
# ----------------------------------------------------------------------------

def model_with_loss_forward(params, images, targets, cfg, rng):
    valid_scale = cfg['valid_scale']
    S = len(valid_scale)
    B, Cin, H, W = images[valid_scale[0]].shape
    HW = H * W

    # ---- extractors: single fused Pallas conv over the (scale, batch) grid ----
    # (assumes all valid scales share a spatial shape so they can be batched)
    imgs = jnp.stack([images[i] for i in valid_scale])              # (S,B,Cin,H,W)
    w_ext = jnp.stack([params['ext'][i]['w'] for i in valid_scale])
    b_ext = jnp.stack([params['ext'][i]['b'] for i in valid_scale])
    feats = conv3x3_relu_all_scales(imgs, w_ext, b_ext)             # (S*B,Cf,H,W)
    Cf = feats.shape[1]
    feats2d = feats.reshape(S * B, Cf, HW)                          # free reshape

    # ---- fused det + disc 1x1 heads, masking fused into the epilogue ----------
    cpred = params['det']['w'].shape[0]
    cdisc = params['disc']['w'].shape[0]
    w_heads = jnp.concatenate([params['det']['w'].reshape(cpred, Cf),
                               params['disc']['w'].reshape(cdisc, Cf)], axis=0)
    b_heads = jnp.concatenate([params['det']['b'], params['disc']['b']])[:, None]
    masks_stacked = jnp.stack([targets[i]['binary_masks'] for i in valid_scale])
    if cfg['discriminator_masking']:
        masks2d = masks_stacked.reshape(S * B, masks_stacked.shape[2], HW)
        pred2d, adv2d = fused_heads(feats2d, w_heads, b_heads, masks2d,
                                    cpred, cdisc)
    else:
        pred2d, adv2d = fused_heads(feats2d, w_heads, b_heads, None,
                                    cpred, cdisc)

    # ---- losses ----------------------------------------------------------------
    heat2d = jnp.stack([targets[i]['heatmaps'] for i in valid_scale]
                       ).reshape(S * B, cpred, HW)
    det_loss, det_loss_dict = detector_loss(pred2d, heat2d, S)
    dis_loss, dis_loss_dict = discriminator_loss(
        adv2d, masks_stacked, valid_scale, cdisc, cfg['normalize_loss'])
    loss_dict = {**det_loss_dict, **dis_loss_dict}

    if cfg['gp'] and S >= 2:
        w_disc = params['disc']['w'].reshape(cdisc, Cf)
        b_disc_col = params['disc']['b'][:, None]
        penalty = gradient_penalty(feats2d, w_disc, b_disc_col,
                                   valid_scale, B, rng)
        dis_loss = dis_loss + cfg['gp_weight'] * penalty
        loss_dict['gradient_penalty'] = jax.lax.stop_gradient(penalty)

    return det_loss, dis_loss, loss_dict


def init_params(key, num_scales, cin, cfeat, cpred, cdisc):
    keys = jax.random.split(key, num_scales + 2)
    params = {'ext': []}
    for s in range(num_scales):
        kw, kb = jax.random.split(keys[s])
        params['ext'].append({
            'w': 0.1 * jax.random.normal(kw, (cfeat, cin, 3, 3), jnp.float32),
            'b': 0.01 * jax.random.normal(kb, (cfeat,), jnp.float32),
        })
    kw, kb = jax.random.split(keys[num_scales])
    params['det'] = {
        'w': 0.1 * jax.random.normal(kw, (cpred, cfeat, 1, 1), jnp.float32),
        'b': 0.01 * jax.random.normal(kb, (cpred,), jnp.float32)}
    kw, kb = jax.random.split(keys[num_scales + 1])
    params['disc'] = {
        'w': 0.1 * jax.random.normal(kw, (cdisc, cfeat, 1, 1), jnp.float32),
        'b': 0.01 * jax.random.normal(kb, (cdisc,), jnp.float32)}
    return params


if __name__ == "__main__":
    key = jax.random.PRNGKey(0)
    B, CIN, H, W = 2, 3, 16, 16
    CFEAT, CPRED, CDISC, NMASK = 8, 4, 2, 2
    NUM_SCALES = 2

    cfg = dict(valid_scale=[0, 1], discriminator_masking=True,
               normalize_loss=True, gp=True, gp_weight=10.0)

    k_img, k_param, k_tgt, k_gp = jax.random.split(key, 4)

    images = [jax.random.normal(jax.random.fold_in(k_img, s),
                                (B, CIN, H, W), jnp.float32)
              for s in range(NUM_SCALES)]

    targets = []
    for s in range(NUM_SCALES):
        kh, km = jax.random.split(jax.random.fold_in(k_tgt, s))
        heat = jax.random.uniform(kh, (B, CPRED, H, W), jnp.float32)
        mask = (jax.random.uniform(km, (B, NMASK, H, W)) > 0.5).astype(jnp.float32)
        targets.append({'heatmaps': heat, 'binary_masks': mask})

    params = init_params(k_param, NUM_SCALES, CIN, CFEAT, CPRED, CDISC)

    det_loss, dis_loss, loss_dict = model_with_loss_forward(
        params, images, targets, cfg, k_gp)
    jax.block_until_ready((det_loss, dis_loss, loss_dict))
    print("KERNEL_OK")
</pallas_src>

<mosaic_0001>
module attributes {stable_mosaic.version = 11 : i64} {
  func.func @_conv3x3_relu_kernel(%arg0: i32, %arg1: i32, %arg2: memref<1x1x3x18x18xf32, #tpu.memory_space<vmem>>, %arg3: memref<1x8x27xf32, #tpu.memory_space<vmem>>, %arg4: memref<1x8x1xf32, #tpu.memory_space<vmem>>, %arg5: memref<1x8x16x16xf32, #tpu.memory_space<vmem>>) attributes {dimension_semantics = [#tpu.dimension_semantics<parallel>, #tpu.dimension_semantics<parallel>], iteration_bounds = array<i64: 2, 2>, scalar_prefetch = 0 : i64, scratch_operands = 0 : i64, tpu.core_type = #tpu.core_type<tc>, window_params = [{transform_indices = @transform_0, window_bounds = array<i64: 1, 1, 3, 18, 18>}, {transform_indices = @transform_1, window_bounds = array<i64: 1, 8, 27>}, {transform_indices = @transform_2, window_bounds = array<i64: 1, 8, 1>}, {transform_indices = @transform_3, window_bounds = array<i64: 1, 8, 16, 16>}]} {
    %cst = arith.constant 0.000000e+00 : f32
    %0 = vector.broadcast %cst : f32 to vector<16x16xf32>
    %c0 = arith.constant 0 : index
    %c0_0 = arith.constant 0 : index
    %c0_1 = arith.constant 0 : index
    %1 = vector.load %arg3[%c0, %c0_0, %c0_1] : memref<1x8x27xf32, #tpu.memory_space<vmem>>, vector<1x1x1xf32>
    %2 = vector.shape_cast %1 : vector<1x1x1xf32> to vector<1x1xf32>
    %c0_2 = arith.constant 0 : index
    %c0_3 = arith.constant 0 : index
    %c0_4 = arith.constant 0 : index
    %c0_5 = arith.constant 0 : index
    %c0_6 = arith.constant 0 : index
    %3 = vector.load %arg2[%c0_2, %c0_3, %c0_4, %c0_5, %c0_6] : memref<1x1x3x18x18xf32, #tpu.memory_space<vmem>>, vector<1x1x1x16x16xf32>
    %4 = vector.shape_cast %3 : vector<1x1x1x16x16xf32> to vector<16x16xf32>
    %5 = vector.broadcast %2 : vector<1x1xf32> to vector<16x16xf32>
    %6 = arith.mulf %5, %4 : vector<16x16xf32>
    %7 = arith.addf %0, %6 : vector<16x16xf32>
    %c0_7 = arith.constant 0 : index
    %c0_8 = arith.constant 0 : index
    %c1 = arith.constant 1 : index
    %8 = vector.load %arg3[%c0_7, %c0_8, %c1] : memref<1x8x27xf32, #tpu.memory_space<vmem>>, vector<1x1x1xf32>
    %9 = vector.shape_cast %8 : vector<1x1x1xf32> to vector<1x1xf32>
    %c0_9 = arith.constant 0 : index
    %c0_10 = arith.constant 0 : index
    %c0_11 = arith.constant 0 : index
    %c0_12 = arith.constant 0 : index
    %c1_13 = arith.constant 1 : index
    %10 = vector.load %arg2[%c0_9, %c0_10, %c0_11, %c0_12, %c1_13] : memref<1x1x3x18x18xf32, #tpu.memory_space<vmem>>, vector<1x1x1x16x16xf32>
    %11 = vector.shape_cast %10 : vector<1x1x1x16x16xf32> to vector<16x16xf32>
    %12 = vector.broadcast %9 : vector<1x1xf32> to vector<16x16xf32>
    %13 = arith.mulf %12, %11 : vector<16x16xf32>
    %14 = arith.addf %7, %13 : vector<16x16xf32>
    %c0_14 = arith.constant 0 : index
    %c0_15 = arith.constant 0 : index
    %c2 = arith.constant 2 : index
    %15 = vector.load %arg3[%c0_14, %c0_15, %c2] : memref<1x8x27xf32, #tpu.memory_space<vmem>>, vector<1x1x1xf32>
    %16 = vector.shape_cast %15 : vector<1x1x1xf32> to vector<1x1xf32>
    %c0_16 = arith.constant 0 : index
    %c0_17 = arith.constant 0 : index
    %c0_18 = arith.constant 0 : index
    %c0_19 = arith.constant 0 : index
    %c2_20 = arith.constant 2 : index
    %17 = vector.load %arg2[%c0_16, %c0_17, %c0_18, %c0_19, %c2_20] : memref<1x1x3x18x18xf32, #tpu.memory_space<vmem>>, vector<1x1x1x16x16xf32>
    %18 = vector.shape_cast %17 : vector<1x1x1x16x16xf32> to vector<16x16xf32>
    %19 = vector.broadcast %16 : vector<1x1xf32> to vector<16x16xf32>
    %20 = arith.mulf %19, %18 : vector<16x16xf32>
    %21 = arith.addf %14, %20 : vector<16x16xf32>
    %c0_21 = arith.constant 0 : index
    %c0_22 = arith.constant 0 : index
    %c3 = arith.constant 3 : index
    %22 = vector.load %arg3[%c0_21, %c0_22, %c3] : memref<1x8x27xf32, #tpu.memory_space<vmem>>, vector<1x1x1xf32>
    %23 = vector.shape_cast %22 : vector<1x1x1xf32> to vector<1x1xf32>
    %c0_23 = arith.constant 0 : index
    %c0_24 = arith.constant 0 : index
    %c0_25 = arith.constant 0 : index
    %c1_26 = arith.constant 1 : index
    %c0_27 = arith.constant 0 : index
    %24 = vector.load %arg2[%c0_23, %c0_24, %c0_25, %c1_26, %c0_27] : memref<1x1x3x18x18xf32, #tpu.memory_space<vmem>>, vector<1x1x1x16x16xf32>
    %25 = vector.shape_cast %24 : vector<1x1x1x16x16xf32> to vector<16x16xf32>
    %26 = vector.broadcast %23 : vector<1x1xf32> to vector<16x16xf32>
    %27 = arith.mulf %26, %25 : vector<16x16xf32>
    %28 = arith.addf %21, %27 : vector<16x16xf32>
    %c0_28 = arith.constant 0 : index
    %c0_29 = arith.constant 0 : index
    %c4 = arith.constant 4 : index
    %29 = vector.load %arg3[%c0_28, %c0_29, %c4] : memref<1x8x27xf32, #tpu.memory_space<vmem>>, vector<1x1x1xf32>
    %30 = vector.shape_cast %29 : vector<1x1x1xf32> to vector<1x1xf32>
    %c0_30 = arith.constant 0 : index
    %c0_31 = arith.constant 0 : index
    %c0_32 = arith.constant 0 : index
    %c1_33 = arith.constant 1 : index
    %c1_34 = arith.constant 1 : index
    %31 = vector.load %arg2[%c0_30, %c0_31, %c0_32, %c1_33, %c1_34] : memref<1x1x3x18x18xf32, #tpu.memory_space<vmem>>, vector<1x1x1x16x16xf32>
    %32 = vector.shape_cast %31 : vector<1x1x1x16x16xf32> to vector<16x16xf32>
    %33 = vector.broadcast %30 : vector<1x1xf32> to vector<16x16xf32>
    %34 = arith.mulf %33, %32 : vector<16x16xf32>
    %35 = arith.addf %28, %34 : vector<16x16xf32>
    %c0_35 = arith.constant 0 : index
    %c0_36 = arith.constant 0 : index
    %c5 = arith.constant 5 : index
    %36 = vector.load %arg3[%c0_35, %c0_36, %c5] : memref<1x8x27xf32, #tpu.memory_space<vmem>>, vector<1x1x1xf32>
    %37 = vector.shape_cast %36 : vector<1x1x1xf32> to vector<1x1xf32>
    %c0_37 = arith.constant 0 : index
    %c0_38 = arith.constant 0 : index
    %c0_39 = arith.constant 0 : index
    %c1_40 = arith.constant 1 : index
    %c2_41 = arith.constant 2 : index
    %38 = vector.load %arg2[%c0_37, %c0_38, %c0_39, %c1_40, %c2_41] : memref<1x1x3x18x18xf32, #tpu.memory_space<vmem>>, vector<1x1x1x16x16xf32>
    %39 = vector.shape_cast %38 : vector<1x1x1x16x16xf32> to vector<16x16xf32>
    %40 = vector.broadcast %37 : vector<1x1xf32> to vector<16x16xf32>
    %41 = arith.mulf %40, %39 : vector<16x16xf32>
    %42 = arith.addf %35, %41 : vector<16x16xf32>
    %c0_42 = arith.constant 0 : index
    %c0_43 = arith.constant 0 : index
    %c6 = arith.constant 6 : index
    %43 = vector.load %arg3[%c0_42, %c0_43, %c6] : memref<1x8x27xf32, #tpu.memory_space<vmem>>, vector<1x1x1xf32>
    %44 = vector.shape_cast %43 : vector<1x1x1xf32> to vector<1x1xf32>
    %c0_44 = arith.constant 0 : index
    %c0_45 = arith.constant 0 : index
    %c0_46 = arith.constant 0 : index
    %c2_47 = arith.constant 2 : index
    %c0_48 = arith.constant 0 : index
    %45 = vector.load %arg2[%c0_44, %c0_45, %c0_46, %c2_47, %c0_48] : memref<1x1x3x18x18xf32, #tpu.memory_space<vmem>>, vector<1x1x1x16x16xf32>
    %46 = vector.shape_cast %45 : vector<1x1x1x16x16xf32> to vector<16x16xf32>
    %47 = vector.broadcast %44 : vector<1x1xf32> to vector<16x16xf32>
    %48 = arith.mulf %47, %46 : vector<16x16xf32>
    %49 = arith.addf %42, %48 : vector<16x16xf32>
    %c0_49 = arith.constant 0 : index
    %c0_50 = arith.constant 0 : index
    %c7 = arith.constant 7 : index
    %50 = vector.load %arg3[%c0_49, %c0_50, %c7] : memref<1x8x27xf32, #tpu.memory_space<vmem>>, vector<1x1x1xf32>
    %51 = vector.shape_cast %50 : vector<1x1x1xf32> to vector<1x1xf32>
    %c0_51 = arith.constant 0 : index
    %c0_52 = arith.constant 0 : index
    %c0_53 = arith.constant 0 : index
    %c2_54 = arith.constant 2 : index
    %c1_55 = arith.constant 1 : index
    %52 = vector.load %arg2[%c0_51, %c0_52, %c0_53, %c2_54, %c1_55] : memref<1x1x3x18x18xf32, #tpu.memory_space<vmem>>, vector<1x1x1x16x16xf32>
    %53 = vector.shape_cast %52 : vector<1x1x1x16x16xf32> to vector<16x16xf32>
    %54 = vector.broadcast %51 : vector<1x1xf32> to vector<16x16xf32>
    %55 = arith.mulf %54, %53 : vector<16x16xf32>
    %56 = arith.addf %49, %55 : vector<16x16xf32>
    %c0_56 = arith.constant 0 : index
    %c0_57 = arith.constant 0 : index
    %c8 = arith.constant 8 : index
    %57 = vector.load %arg3[%c0_56, %c0_57, %c8] : memref<1x8x27xf32, #tpu.memory_space<vmem>>, vector<1x1x1xf32>
    %58 = vector.shape_cast %57 : vector<1x1x1xf32> to vector<1x1xf32>
    %c0_58 = arith.constant 0 : index
    %c0_59 = arith.constant 0 : index
    %c0_60 = arith.constant 0 : index
    %c2_61 = arith.constant 2 : index
    %c2_62 = arith.constant 2 : index
    %59 = vector.load %arg2[%c0_58, %c0_59, %c0_60, %c2_61, %c2_62] : memref<1x1x3x18x18xf32, #tpu.memory_space<vmem>>, vector<1x1x1x16x16xf32>
    %60 = vector.shape_cast %59 : vector<1x1x1x16x16xf32> to vector<16x16xf32>
    %61 = vector.broadcast %58 : vector<1x1xf32> to vector<16x16xf32>
    %62 = arith.mulf %61, %60 : vector<16x16xf32>
    %63 = arith.addf %56, %62 : vector<16x16xf32>
    %c0_63 = arith.constant 0 : index
    %c0_64 = arith.constant 0 : index
    %c9 = arith.constant 9 : index
    %64 = vector.load %arg3[%c0_63, %c0_64, %c9] : memref<1x8x27xf32, #tpu.memory_space<vmem>>, vector<1x1x1xf32>
    %65 = vector.shape_cast %64 : vector<1x1x1xf32> to vector<1x1xf32>
    %c0_65 = arith.constant 0 : index
    %c0_66 = arith.constant 0 : index
    %c1_67 = arith.constant 1 : index
    %c0_68 = arith.constant 0 : index
    %c0_69 = arith.constant 0 : index
    %66 = vector.load %arg2[%c0_65, %c0_66, %c1_67, %c0_68, %c0_69] : memref<1x1x3x18x18xf32, #tpu.memory_space<vmem>>, vector<1x1x1x16x16xf32>
    %67 = vector.shape_cast %66 : vector<1x1x1x16x16xf32> to vector<16x16xf32>
    %68 = vector.broadcast %65 : vector<1x1xf32> to vector<16x16xf32>
    %69 = arith.mulf %68, %67 : vector<16x16xf32>
    %70 = arith.addf %63, %69 : vector<16x16xf32>
    %c0_70 = arith.constant 0 : index
    %c0_71 = arith.constant 0 : index
    %c10 = arith.constant 10 : index
    %71 = vector.load %arg3[%c0_70, %c0_71, %c10] : memref<1x8x27xf32, #tpu.memory_space<vmem>>, vector<1x1x1xf32>
    %72 = vector.shape_cast %71 : vector<1x1x1xf32> to vector<1x1xf32>
    %c0_72 = arith.constant 0 : index
    %c0_73 = arith.constant 0 : index
    %c1_74 = arith.constant 1 : index
    %c0_75 = arith.constant 0 : index
    %c1_76 = arith.constant 1 : index
    %73 = vector.load %arg2[%c0_72, %c0_73, %c1_74, %c0_75, %c1_76] : memref<1x1x3x18x18xf32, #tpu.memory_space<vmem>>, vector<1x1x1x16x16xf32>
    %74 = vector.shape_cast %73 : vector<1x1x1x16x16xf32> to vector<16x16xf32>
    %75 = vector.broadcast %72 : vector<1x1xf32> to vector<16x16xf32>
    %76 = arith.mulf %75, %74 : vector<16x16xf32>
    %77 = arith.addf %70, %76 : vector<16x16xf32>
    %c0_77 = arith.constant 0 : index
    %c0_78 = arith.constant 0 : index
    %c11 = arith.constant 11 : index
    %78 = vector.load %arg3[%c0_77, %c0_78, %c11] : memref<1x8x27xf32, #tpu.memory_space<vmem>>, vector<1x1x1xf32>
    %79 = vector.shape_cast %78 : vector<1x1x1xf32> to vector<1x1xf32>
    %c0_79 = arith.constant 0 : index
    %c0_80 = arith.constant 0 : index
    %c1_81 = arith.constant 1 : index
    %c0_82 = arith.constant 0 : index
    %c2_83 = arith.constant 2 : index
    %80 = vector.load %arg2[%c0_79, %c0_80, %c1_81, %c0_82, %c2_83] : memref<1x1x3x18x18xf32, #tpu.memory_space<vmem>>, vector<1x1x1x16x16xf32>
    %81 = vector.shape_cast %80 : vector<1x1x1x16x16xf32> to vector<16x16xf32>
    %82 = vector.broadcast %79 : vector<1x1xf32> to vector<16x16xf32>
    %83 = arith.mulf %82, %81 : vector<16x16xf32>
    %84 = arith.addf %77, %83 : vector<16x16xf32>
    %c0_84 = arith.constant 0 : index
    %c0_85 = arith.constant 0 : index
    %c12 = arith.constant 12 : index
    %85 = vector.load %arg3[%c0_84, %c0_85, %c12] : memref<1x8x27xf32, #tpu.memory_space<vmem>>, vector<1x1x1xf32>
    %86 = vector.shape_cast %85 : vector<1x1x1xf32> to vector<1x1xf32>
    %c0_86 = arith.constant 0 : index
    %c0_87 = arith.constant 0 : index
    %c1_88 = arith.constant 1 : index
    %c1_89 = arith.constant 1 : index
    %c0_90 = arith.constant 0 : index
    %87 = vector.load %arg2[%c0_86, %c0_87, %c1_88, %c1_89, %c0_90] : memref<1x1x3x18x18xf32, #tpu.memory_space<vmem>>, vector<1x1x1x16x16xf32>
    %88 = vector.shape_cast %87 : vector<1x1x1x16x16xf32> to vector<16x16xf32>
    %89 = vector.broadcast %86 : vector<1x1xf32> to vector<16x16xf32>
    %90 = arith.mulf %89, %88 : vector<16x16xf32>
    %91 = arith.addf %84, %90 : vector<16x16xf32>
    %c0_91 = arith.constant 0 : index
    %c0_92 = arith.constant 0 : index
    %c13 = arith.constant 13 : index
    %92 = vector.load %arg3[%c0_91, %c0_92, %c13] : memref<1x8x27xf32, #tpu.memory_space<vmem>>, vector<1x1x1xf32>
    %93 = vector.shape_cast %92 : vector<1x1x1xf32> to vector<1x1xf32>
    %c0_93 = arith.constant 0 : index
    %c0_94 = arith.constant 0 : index
    %c1_95 = arith.constant 1 : index
    %c1_96 = arith.constant 1 : index
    %c1_97 = arith.constant 1 : index
    %94 = vector.load %arg2[%c0_93, %c0_94, %c1_95, %c1_96, %c1_97] : memref<1x1x3x18x18xf32, #tpu.memory_space<vmem>>, vector<1x1x1x16x16xf32>
    %95 = vector.shape_cast %94 : vector<1x1x1x16x16xf32> to vector<16x16xf32>
    %96 = vector.broadcast %93 : vector<1x1xf32> to vector<16x16xf32>
    %97 = arith.mulf %96, %95 : vector<16x16xf32>
    %98 = arith.addf %91, %97 : vector<16x16xf32>
    %c0_98 = arith.constant 0 : index
    %c0_99 = arith.constant 0 : index
    %c14 = arith.constant 14 : index
    %99 = vector.load %arg3[%c0_98, %c0_99, %c14] : memref<1x8x27xf32, #tpu.memory_space<vmem>>, vector<1x1x1xf32>
    %100 = vector.shape_cast %99 : vector<1x1x1xf32> to vector<1x1xf32>
    %c0_100 = arith.constant 0 : index
    %c0_101 = arith.constant 0 : index
    %c1_102 = arith.constant 1 : index
    %c1_103 = arith.constant 1 : index
    %c2_104 = arith.constant 2 : index
    %101 = vector.load %arg2[%c0_100, %c0_101, %c1_102, %c1_103, %c2_104] : memref<1x1x3x18x18xf32, #tpu.memory_space<vmem>>, vector<1x1x1x16x16xf32>
    %102 = vector.shape_cast %101 : vector<1x1x1x16x16xf32> to vector<16x16xf32>
    %103 = vector.broadcast %100 : vector<1x1xf32> to vector<16x16xf32>
    %104 = arith.mulf %103, %102 : vector<16x16xf32>
    %105 = arith.addf %98, %104 : vector<16x16xf32>
    %c0_105 = arith.constant 0 : index
    %c0_106 = arith.constant 0 : index
    %c15 = arith.constant 15 : index
    %106 = vector.load %arg3[%c0_105, %c0_106, %c15] : memref<1x8x27xf32, #tpu.memory_space<vmem>>, vector<1x1x1xf32>
    %107 = vector.shape_cast %106 : vector<1x1x1xf32> to vector<1x1xf32>
    %c0_107 = arith.constant 0 : index
    %c0_108 = arith.constant 0 : index
    %c1_109 = arith.constant 1 : index
    %c2_110 = arith.constant 2 : index
    %c0_111 = arith.constant 0 : index
    %108 = vector.load %arg2[%c0_107, %c0_108, %c1_109, %c2_110, %c0_111] : memref<1x1x3x18x18xf32, #tpu.memory_space<vmem>>, vector<1x1x1x16x16xf32>
    %109 = vector.shape_cast %108 : vector<1x1x1x16x16xf32> to vector<16x16xf32>
    %110 = vector.broadcast %107 : vector<1x1xf32> to vector<16x16xf32>
    %111 = arith.mulf %110, %109 : vector<16x16xf32>
    %112 = arith.addf %105, %111 : vector<16x16xf32>
    %c0_112 = arith.constant 0 : index
    %c0_113 = arith.constant 0 : index
    %c16 = arith.constant 16 : index
    %113 = vector.load %arg3[%c0_112, %c0_113, %c16] : memref<1x8x27xf32, #tpu.memory_space<vmem>>, vector<1x1x1xf32>
    %114 = vector.shape_cast %113 : vector<1x1x1xf32> to vector<1x1xf32>
    %c0_114 = arith.constant 0 : index
    %c0_115 = arith.constant 0 : index
    %c1_116 = arith.constant 1 : index
    %c2_117 = arith.constant 2 : index
    %c1_118 = arith.constant 1 : index
    %115 = vector.load %arg2[%c0_114, %c0_115, %c1_116, %c2_117, %c1_118] : memref<1x1x3x18x18xf32, #tpu.memory_space<vmem>>, vector<1x1x1x16x16xf32>
    %116 = vector.shape_cast %115 : vector<1x1x1x16x16xf32> to vector<16x16xf32>
    %117 = vector.broadcast %114 : vector<1x1xf32> to vector<16x16xf32>
    %118 = arith.mulf %117, %116 : vector<16x16xf32>
    %119 = arith.addf %112, %118 : vector<16x16xf32>
    %c0_119 = arith.constant 0 : index
    %c0_120 = arith.constant 0 : index
    %c17 = arith.constant 17 : index
    %120 = vector.load %arg3[%c0_119, %c0_120, %c17] : memref<1x8x27xf32, #tpu.memory_space<vmem>>, vector<1x1x1xf32>
    %121 = vector.shape_cast %120 : vector<1x1x1xf32> to vector<1x1xf32>
    %c0_121 = arith.constant 0 : index
    %c0_122 = arith.constant 0 : index
    %c1_123 = arith.constant 1 : index
    %c2_124 = arith.constant 2 : index
    %c2_125 = arith.constant 2 : index
    %122 = vector.load %arg2[%c0_121, %c0_122, %c1_123, %c2_124, %c2_125] : memref<1x1x3x18x18xf32, #tpu.memory_space<vmem>>, vector<1x1x1x16x16xf32>
    %123 = vector.shape_cast %122 : vector<1x1x1x16x16xf32> to vector<16x16xf32>
    %124 = vector.broadcast %121 : vector<1x1xf32> to vector<16x16xf32>
    %125 = arith.mulf %124, %123 : vector<16x16xf32>
    %126 = arith.addf %119, %125 : vector<16x16xf32>
    %c0_126 = arith.constant 0 : index
    %c0_127 = arith.constant 0 : index
    %c18 = arith.constant 18 : index
    %127 = vector.load %arg3[%c0_126, %c0_127, %c18] : memref<1x8x27xf32, #tpu.memory_space<vmem>>, vector<1x1x1xf32>
    %128 = vector.shape_cast %127 : vector<1x1x1xf32> to vector<1x1xf32>
    %c0_128 = arith.constant 0 : index
    %c0_129 = arith.constant 0 : index
    %c2_130 = arith.constant 2 : index
    %c0_131 = arith.constant 0 : index
    %c0_132 = arith.constant 0 : index
    %129 = vector.load %arg2[%c0_128, %c0_129, %c2_130, %c0_131, %c0_132] : memref<1x1x3x18x18xf32, #tpu.memory_space<vmem>>, vector<1x1x1x16x16xf32>
    %130 = vector.shape_cast %129 : vector<1x1x1x16x16xf32> to vector<16x16xf32>
    %131 = vector.broadcast %128 : vector<1x1xf32> to vector<16x16xf32>
    %132 = arith.mulf %131, %130 : vector<16x16xf32>
    %133 = arith.addf %126, %132 : vector<16x16xf32>
    %c0_133 = arith.constant 0 : index
    %c0_134 = arith.constant 0 : index
    %c19 = arith.constant 19 : index
    %134 = vector.load %arg3[%c0_133, %c0_134, %c19] : memref<1x8x27xf32, #tpu.memory_space<vmem>>, vector<1x1x1xf32>
    %135 = vector.shape_cast %134 : vector<1x1x1xf32> to vector<1x1xf32>
    %c0_135 = arith.constant 0 : index
    %c0_136 = arith.constant 0 : index
    %c2_137 = arith.constant 2 : index
    %c0_138 = arith.constant 0 : index
    %c1_139 = arith.constant 1 : index
    %136 = vector.load %arg2[%c0_135, %c0_136, %c2_137, %c0_138, %c1_139] : memref<1x1x3x18x18xf32, #tpu.memory_space<vmem>>, vector<1x1x1x16x16xf32>
    %137 = vector.shape_cast %136 : vector<1x1x1x16x16xf32> to vector<16x16xf32>
    %138 = vector.broadcast %135 : vector<1x1xf32> to vector<16x16xf32>
    %139 = arith.mulf %138, %137 : vector<16x16xf32>
    %140 = arith.addf %133, %139 : vector<16x16xf32>
    %c0_140 = arith.constant 0 : index
    %c0_141 = arith.constant 0 : index
    %c20 = arith.constant 20 : index
    %141 = vector.load %arg3[%c0_140, %c0_141, %c20] : memref<1x8x27xf32, #tpu.memory_space<vmem>>, vector<1x1x1xf32>
    %142 = vector.shape_cast %141 : vector<1x1x1xf32> to vector<1x1xf32>
    %c0_142 = arith.constant 0 : index
    %c0_143 = arith.constant 0 : index
    %c2_144 = arith.constant 2 : index
    %c0_145 = arith.constant 0 : index
    %c2_146 = arith.constant 2 : index
    %143 = vector.load %arg2[%c0_142, %c0_143, %c2_144, %c0_145, %c2_146] : memref<1x1x3x18x18xf32, #tpu.memory_space<vmem>>, vector<1x1x1x16x16xf32>
    %144 = vector.shape_cast %143 : vector<1x1x1x16x16xf32> to vector<16x16xf32>
    %145 = vector.broadcast %142 : vector<1x1xf32> to vector<16x16xf32>
    %146 = arith.mulf %145, %144 : vector<16x16xf32>
    %147 = arith.addf %140, %146 : vector<16x16xf32>
    %c0_147 = arith.constant 0 : index
    %c0_148 = arith.constant 0 : index
    %c21 = arith.constant 21 : index
    %148 = vector.load %arg3[%c0_147, %c0_148, %c21] : memref<1x8x27xf32, #tpu.memory_space<vmem>>, vector<1x1x1xf32>
    %149 = vector.shape_cast %148 : vector<1x1x1xf32> to vector<1x1xf32>
    %c0_149 = arith.constant 0 : index
    %c0_150 = arith.constant 0 : index
    %c2_151 = arith.constant 2 : index
    %c1_152 = arith.constant 1 : index
    %c0_153 = arith.constant 0 : index
    %150 = vector.load %arg2[%c0_149, %c0_150, %c2_151, %c1_152, %c0_153] : memref<1x1x3x18x18xf32, #tpu.memory_space<vmem>>, vector<1x1x1x16x16xf32>
    %151 = vector.shape_cast %150 : vector<1x1x1x16x16xf32> to vector<16x16xf32>
    %152 = vector.broadcast %149 : vector<1x1xf32> to vector<16x16xf32>
    %153 = arith.mulf %152, %151 : vector<16x16xf32>
    %154 = arith.addf %147, %153 : vector<16x16xf32>
    %c0_154 = arith.constant 0 : index
    %c0_155 = arith.constant 0 : index
    %c22 = arith.constant 22 : index
    %155 = vector.load %arg3[%c0_154, %c0_155, %c22] : memref<1x8x27xf32, #tpu.memory_space<vmem>>, vector<1x1x1xf32>
    %156 = vector.shape_cast %155 : vector<1x1x1xf32> to vector<1x1xf32>
    %c0_156 = arith.constant 0 : index
    %c0_157 = arith.constant 0 : index
    %c2_158 = arith.constant 2 : index
    %c1_159 = arith.constant 1 : index
    %c1_160 = arith.constant 1 : index
    %157 = vector.load %arg2[%c0_156, %c0_157, %c2_158, %c1_159, %c1_160] : memref<1x1x3x18x18xf32, #tpu.memory_space<vmem>>, vector<1x1x1x16x16xf32>
    %158 = vector.shape_cast %157 : vector<1x1x1x16x16xf32> to vector<16x16xf32>
    %159 = vector.broadcast %156 : vector<1x1xf32> to vector<16x16xf32>
    %160 = arith.mulf %159, %158 : vector<16x16xf32>
    %161 = arith.addf %154, %160 : vector<16x16xf32>
    %c0_161 = arith.constant 0 : index
    %c0_162 = arith.constant 0 : index
    %c23 = arith.constant 23 : index
    %162 = vector.load %arg3[%c0_161, %c0_162, %c23] : memref<1x8x27xf32, #tpu.memory_space<vmem>>, vector<1x1x1xf32>
    %163 = vector.shape_cast %162 : vector<1x1x1xf32> to vector<1x1xf32>
    %c0_163 = arith.constant 0 : index
    %c0_164 = arith.constant 0 : index
    %c2_165 = arith.constant 2 : index
    %c1_166 = arith.constant 1 : index
    %c2_167 = arith.constant 2 : index
    %164 = vector.load %arg2[%c0_163, %c0_164, %c2_165, %c1_166, %c2_167] : memref<1x1x3x18x18xf32, #tpu.memory_space<vmem>>, vector<1x1x1x16x16xf32>
    %165 = vector.shape_cast %164 : vector<1x1x1x16x16xf32> to vector<16x16xf32>
    %166 = vector.broadcast %163 : vector<1x1xf32> to vector<16x16xf32>
    %167 = arith.mulf %166, %165 : vector<16x16xf32>
    %168 = arith.addf %161, %167 : vector<16x16xf32>
    %c0_168 = arith.constant 0 : index
    %c0_169 = arith.constant 0 : index
    %c24 = arith.constant 24 : index
    %169 = vector.load %arg3[%c0_168, %c0_169, %c24] : memref<1x8x27xf32, #tpu.memory_space<vmem>>, vector<1x1x1xf32>
    %170 = vector.shape_cast %169 : vector<1x1x1xf32> to vector<1x1xf32>
    %c0_170 = arith.constant 0 : index
    %c0_171 = arith.constant 0 : index
    %c2_172 = arith.constant 2 : index
    %c2_173 = arith.constant 2 : index
    %c0_174 = arith.constant 0 : index
    %171 = vector.load %arg2[%c0_170, %c0_171, %c2_172, %c2_173, %c0_174] : memref<1x1x3x18x18xf32, #tpu.memory_space<vmem>>, vector<1x1x1x16x16xf32>
    %172 = vector.shape_cast %171 : vector<1x1x1x16x16xf32> to vector<16x16xf32>
    %173 = vector.broadcast %170 : vector<1x1xf32> to vector<16x16xf32>
    %174 = arith.mulf %173, %172 : vector<16x16xf32>
    %175 = arith.addf %168, %174 : vector<16x16xf32>
    %c0_175 = arith.constant 0 : index
    %c0_176 = arith.constant 0 : index
    %c25 = arith.constant 25 : index
    %176 = vector.load %arg3[%c0_175, %c0_176, %c25] : memref<1x8x27xf32, #tpu.memory_space<vmem>>, vector<1x1x1xf32>
    %177 = vector.shape_cast %176 : vector<1x1x1xf32> to vector<1x1xf32>
    %c0_177 = arith.constant 0 : index
    %c0_178 = arith.constant 0 : index
    %c2_179 = arith.constant 2 : index
    %c2_180 = arith.constant 2 : index
    %c1_181 = arith.constant 1 : index
    %178 = vector.load %arg2[%c0_177, %c0_178, %c2_179, %c2_180, %c1_181] : memref<1x1x3x18x18xf32, #tpu.memory_space<vmem>>, vector<1x1x1x16x16xf32>
    %179 = vector.shape_cast %178 : vector<1x1x1x16x16xf32> to vector<16x16xf32>
    %180 = vector.broadcast %177 : vector<1x1xf32> to vector<16x16xf32>
    %181 = arith.mulf %180, %179 : vector<16x16xf32>
    %182 = arith.addf %175, %181 : vector<16x16xf32>
    %c0_182 = arith.constant 0 : index
    %c0_183 = arith.constant 0 : index
    %c26 = arith.constant 26 : index
    %183 = vector.load %arg3[%c0_182, %c0_183, %c26] : memref<1x8x27xf32, #tpu.memory_space<vmem>>, vector<1x1x1xf32>
    %184 = vector.shape_cast %183 : vector<1x1x1xf32> to vector<1x1xf32>
    %c0_184 = arith.constant 0 : index
    %c0_185 = arith.constant 0 : index
    %c2_186 = arith.constant 2 : index
    %c2_187 = arith.constant 2 : index
    %c2_188 = arith.constant 2 : index
    %185 = vector.load %arg2[%c0_184, %c0_185, %c2_186, %c2_187, %c2_188] : memref<1x1x3x18x18xf32, #tpu.memory_space<vmem>>, vector<1x1x1x16x16xf32>
    %186 = vector.shape_cast %185 : vector<1x1x1x16x16xf32> to vector<16x16xf32>
    %187 = vector.broadcast %184 : vector<1x1xf32> to vector<16x16xf32>
    %188 = arith.mulf %187, %186 : vector<16x16xf32>
    %189 = arith.addf %182, %188 : vector<16x16xf32>
    %c0_189 = arith.constant 0 : index
    %c0_190 = arith.constant 0 : index
    %c0_191 = arith.constant 0 : index
    %190 = vector.load %arg4[%c0_189, %c0_190, %c0_191] : memref<1x8x1xf32, #tpu.memory_space<vmem>>, vector<1x1x1xf32>
    %191 = vector.shape_cast %190 : vector<1x1x1xf32> to vector<1x1xf32>
    %192 = vector.broadcast %191 : vector<1x1xf32> to vector<16x16xf32>
    %193 = arith.addf %189, %192 : vector<16x16xf32>
    %cst_192 = arith.constant 0.000000e+00 : f32
    %194 = vector.broadcast %cst_192 : f32 to vector<16x16xf32>
    %195 = arith.maximumf %193, %194 : vector<16x16xf32>
    %c0_193 = arith.constant 0 : index
    %c0_194 = arith.constant 0 : index
    %c0_195 = arith.constant 0 : index
    %c0_196 = arith.constant 0 : index
    %196 = vector.load %arg5[%c0_193, %c0_194, %c0_195, %c0_196] : memref<1x8x16x16xf32, #tpu.memory_space<vmem>>, vector<1x1x16x16xf32>
    %197 = vector.shape_cast %196 : vector<1x1x16x16xf32> to vector<16x16xf32>
    %198 = vector.shape_cast %195 : vector<16x16xf32> to vector<1x1x16x16xf32>
    tpu.vector_store %arg5[%c0_193, %c0_194, %c0_195, %c0_196], %198 {strides = array<i32>} : memref<1x8x16x16xf32, #tpu.memory_space<vmem>>, vector<1x1x16x16xf32>,
    %cst_197 = arith.constant 0.000000e+00 : f32
    %199 = vector.broadcast %cst_197 : f32 to vector<16x16xf32>
    %c0_198 = arith.constant 0 : index
    %c1_199 = arith.constant 1 : index
    %c0_200 = arith.constant 0 : index
    %200 = vector.load %arg3[%c0_198, %c1_199, %c0_200] : memref<1x8x27xf32, #tpu.memory_space<vmem>>, vector<1x1x1xf32>
    %201 = vector.shape_cast %200 : vector<1x1x1xf32> to vector<1x1xf32>
    %c0_201 = arith.constant 0 : index
    %c0_202 = arith.constant 0 : index
    %c0_203 = arith.constant 0 : index
    %c0_204 = arith.constant 0 : index
    %c0_205 = arith.constant 0 : index
    %202 = vector.load %arg2[%c0_201, %c0_202, %c0_203, %c0_204, %c0_205] : memref<1x1x3x18x18xf32, #tpu.memory_space<vmem>>, vector<1x1x1x16x16xf32>
    %203 = vector.shape_cast %202 : vector<1x1x1x16x16xf32> to vector<16x16xf32>
    %204 = vector.broadcast %201 : vector<1x1xf32> to vector<16x16xf32>
    %205 = arith.mulf %204, %203 : vector<16x16xf32>
    %206 = arith.addf %199, %205 : vector<16x16xf32>
    %c0_206 = arith.constant 0 : index
    %c1_207 = arith.constant 1 : index
    %c1_208 = arith.constant 1 : index
    %207 = vector.load %arg3[%c0_206, %c1_207, %c1_208] : memref<1x8x27xf32, #tpu.memory_space<vmem>>, vector<1x1x1xf32>
    %208 = vector.shape_cast %207 : vector<1x1x1xf32> to vector<1x1xf32>
    %c0_209 = arith.constant 0 : index
    %c0_210 = arith.constant 0 : index
    %c0_211 = arith.constant 0 : index
    %c0_212 = arith.constant 0 : index
    %c1_213 = arith.constant 1 : index
    %209 = vector.load %arg2[%c0_209, %c0_210, %c0_211, %c0_212, %c1_213] : memref<1x1x3x18x18xf32, #tpu.memory_space<vmem>>, vector<1x1x1x16x16xf32>
    %210 = vector.shape_cast %209 : vector<1x1x1x16x16xf32> to vector<16x16xf32>
    %211 = vector.broadcast %208 : vector<1x1xf32> to vector<16x16xf32>
    %212 = arith.mulf %211, %210 : vector<16x16xf32>
    %213 = arith.addf %206, %212 : vector<16x16xf32>
    %c0_214 = arith.constant 0 : index
    %c1_215 = arith.constant 1 : index
    %c2_216 = arith.constant 2 : index
    %214 = vector.load %arg3[%c0_214, %c1_215, %c2_216] : memref<1x8x27xf32, #tpu.memory_space<vmem>>, vector<1x1x1xf32>
    %215 = vector.shape_cast %214 : vector<1x1x1xf32> to vector<1x1xf32>
    %c0_217 = arith.constant 0 : index
    %c0_218 = arith.constant 0 : index
    %c0_219 = arith.constant 0 : index
    %c0_220 = arith.constant 0 : index
    %c2_221 = arith.constant 2 : index
    %216 = vector.load %arg2[%c0_217, %c0_218, %c0_219, %c0_220, %c2_221] : memref<1x1x3x18x18xf32, #tpu.memory_space<vmem>>, vector<1x1x1x16x16xf32>
    %217 = vector.shape_cast %216 : vector<1x1x1x16x16xf32> to vector<16x16xf32>
    %218 = vector.broadcast %215 : vector<1x1xf32> to vector<16x16xf32>
    %219 = arith.mulf %218, %217 : vector<16x16xf32>
    %220 = arith.addf %213, %219 : vector<16x16xf32>
    %c0_222 = arith.constant 0 : index
    %c1_223 = arith.constant 1 : index
    %c3_224 = arith.constant 3 : index
    %221 = vector.load %arg3[%c0_222, %c1_223, %c3_224] : memref<1x8x27xf32, #tpu.memory_space<vmem>>, vector<1x1x1xf32>
    %222 = vector.shape_cast %221 : vector<1x1x1xf32> to vector<1x1xf32>
    %c0_225 = arith.constant 0 : index
    %c0_226 = arith.constant 0 : index
    %c0_227 = arith.constant 0 : index
    %c1_228 = arith.constant 1 : index
    %c0_229 = arith.constant 0 : index
    %223 = vector.load %arg2[%c0_225, %c0_226, %c0_227, %c1_228, %c0_229] : memref<1x1x3x18x18xf32, #tpu.memory_space<vmem>>, vector<1x1x1x16x16xf32>
    %224 = vector.shape_cast %223 : vector<1x1x1x16x16xf32> to vector<16x16xf32>
    %225 = vector.broadcast %222 : vector<1x1xf32> to vector<16x16xf32>
    %226 = arith.mulf %225, %224 : vector<16x16xf32>
    %227 = arith.addf %220, %226 : vector<16x16xf32>
    %c0_230 = arith.constant 0 : index
    %c1_231 = arith.constant 1 : index
    %c4_232 = arith.constant 4 : index
    %228 = vector.load %arg3[%c0_230, %c1_231, %c4_232] : memref<1x8x27xf32, #tpu.memory_space<vmem>>, vector<1x1x1xf32>
    %229 = vector.shape_cast %228 : vector<1x1x1xf32> to vector<1x1xf32>
    %c0_233 = arith.constant 0 : index
    %c0_234 = arith.constant 0 : index
    %c0_235 = arith.constant 0 : index
    %c1_236 = arith.constant 1 : index
    %c1_237 = arith.constant 1 : index
    %230 = vector.load %arg2[%c0_233, %c0_234, %c0_235, %c1_236, %c1_237] : memref<1x1x3x18x18xf32, #tpu.memory_space<vmem>>, vector<1x1x1x16x16xf32>
    %231 = vector.shape_cast %230 : vector<1x1x1x16x16xf32> to vector<16x16xf32>
    %232 = vector.broadcast %229 : vector<1x1xf32> to vector<16x16xf32>
    %233 = arith.mulf %232, %231 : vector<16x16xf32>
    %234 = arith.addf %227, %233 : vector<16x16xf32>
    %c0_238 = arith.constant 0 : index
    %c1_239 = arith.constant 1 : index
    %c5_240 = arith.constant 5 : index
    %235 = vector.load %arg3[%c0_238, %c1_239, %c5_240] : memref<1x8x27xf32, #tpu.memory_space<vmem>>, vector<1x1x1xf32>
    %236 = vector.shape_cast %235 : vector<1x1x1xf32> to vector<1x1xf32>
    %c0_241 = arith.constant 0 : index
    %c0_242 = arith.constant 0 : index
    %c0_243 = arith.constant 0 : index
    %c1_244 = arith.constant 1 : index
    %c2_245 = arith.constant 2 : index
    %237 = vector.load %arg2[%c0_241, %c0_242, %c0_243, %c1_244, %c2_245] : memref<1x1x3x18x18xf32, #tpu.memory_space<vmem>>, vector<1x1x1x16x16xf32>
    %238 = vector.shape_cast %237 : vector<1x1x1x16x16xf32> to vector<16x16xf32>
    %239 = vector.broadcast %236 : vector<1x1xf32> to vector<16x16xf32>
    %240 = arith.mulf %239, %238 : vector<16x16xf32>
    %241 = arith.addf %234, %240 : vector<16x16xf32>
    %c0_246 = arith.constant 0 : index
    %c1_247 = arith.constant 1 : index
    %c6_248 = arith.constant 6 : index
    %242 = vector.load %arg3[%c0_246, %c1_247, %c6_248] : memref<1x8x27xf32, #tpu.memory_space<vmem>>, vector<1x1x1xf32>
    %243 = vector.shape_cast %242 : vector<1x1x1xf32> to vector<1x1xf32>
    %c0_249 = arith.constant 0 : index
    %c0_250 = arith.constant 0 : index
    %c0_251 = arith.constant 0 : index
    %c2_252 = arith.constant 2 : index
    %c0_253 = arith.constant 0 : index
    %244 = vector.load %arg2[%c0_249, %c0_250, %c0_251, %c2_252, %c0_253] : memref<1x1x3x18x18xf32, #tpu.memory_space<vmem>>, vector<1x1x1x16x16xf32>
    %245 = vector.shape_cast %244 : vector<1x1x1x16x16xf32> to vector<16x16xf32>
    %246 = vector.broadcast %243 : vector<1x1xf32> to vector<16x16xf32>
    %247 = arith.mulf %246, %245 : vector<16x16xf32>
    %248 = arith.addf %241, %247 : vector<16x16xf32>
    %c0_254 = arith.constant 0 : index
    %c1_255 = arith.constant 1 : index
    %c7_256 = arith.constant 7 : index
    %249 = vector.load %arg3[%c0_254, %c1_255, %c7_256] : memref<1x8x27xf32, #tpu.memory_space<vmem>>, vector<1x1x1xf32>
    %250 = vector.shape_cast %249 : vector<1x1x1xf32> to vector<1x1xf32>
    %c0_257 = arith.constant 0 : index
    %c0_258 = arith.constant 0 : index
    %c0_259 = arith.constant 0 : index
    %c2_260 = arith.constant 2 : index
    %c1_261 = arith.constant 1 : index
    %251 = vector.load %arg2[%c0_257, %c0_258, %c0_259, %c2_260, %c1_261] : memref<1x1x3x18x18xf32, #tpu.memory_space<vmem>>, vector<1x1x1x16x16xf32>
    %252 = vector.shape_cast %251 : vector<1x1x1x16x16xf32> to vector<16x16xf32>
    %253 = vector.broadcast %250 : vector<1x1xf32> to vector<16x16xf32>
    %254 = arith.mulf %253, %252 : vector<16x16xf32>
    %255 = arith.addf %248, %254 : vector<16x16xf32>
    %c0_262 = arith.constant 0 : index
    %c1_263 = arith.constant 1 : index
    %c8_264 = arith.constant 8 : index
    %256 = vector.load %arg3[%c0_262, %c1_263, %c8_264] : memref<1x8x27xf32, #tpu.memory_space<vmem>>, vector<1x1x1xf32>
    %257 = vector.shape_cast %256 : vector<1x1x1xf32> to vector<1x1xf32>
    %c0_265 = arith.constant 0 : index
    %c0_266 = arith.constant 0 : index
    %c0_267 = arith.constant 0 : index
    %c2_268 = arith.constant 2 : index
    %c2_269 = arith.constant 2 : index
    %258 = vector.load %arg2[%c0_265, %c0_266, %c0_267, %c2_268, %c2_269] : memref<1x1x3x18x18xf32, #tpu.memory_space<vmem>>, vector<1x1x1x16x16xf32>
    %259 = vector.shape_cast %258 : vector<1x1x1x16x16xf32> to vector<16x16xf32>
    %260 = vector.broadcast %257 : vector<1x1xf32> to vector<16x16xf32>
    %261 = arith.mulf %260, %259 : vector<16x16xf32>
    %262 = arith.addf %255, %261 : vector<16x16xf32>
    %c0_270 = arith.constant 0 : index
    %c1_271 = arith.constant 1 : index
    %c9_272 = arith.constant 9 : index
    %263 = vector.load %arg3[%c0_270, %c1_271, %c9_272] : memref<1x8x27xf32, #tpu.memory_space<vmem>>, vector<1x1x1xf32>
    %264 = vector.shape_cast %263 : vector<1x1x1xf32> to vector<1x1xf32>
    %c0_273 = arith.constant 0 : index
    %c0_274 = arith.constant 0 : index
    %c1_275 = arith.constant 1 : index
    %c0_276 = arith.constant 0 : index
    %c0_277 = arith.constant 0 : index
    %265 = vector.load %arg2[%c0_273, %c0_274, %c1_275, %c0_276, %c0_277] : memref<1x1x3x18x18xf32, #tpu.memory_space<vmem>>, vector<1x1x1x16x16xf32>
    %266 = vector.shape_cast %265 : vector<1x1x1x16x16xf32> to vector<16x16xf32>
    %267 = vector.broadcast %264 : vector<1x1xf32> to vector<16x16xf32>
    %268 = arith.mulf %267, %266 : vector<16x16xf32>
    %269 = arith.addf %262, %268 : vector<16x16xf32>
    %c0_278 = arith.constant 0 : index
    %c1_279 = arith.constant 1 : index
    %c10_280 = arith.constant 10 : index
    %270 = vector.load %arg3[%c0_278, %c1_279, %c10_280] : memref<1x8x27xf32, #tpu.memory_space<vmem>>, vector<1x1x1xf32>
    %271 = vector.shape_cast %270 : vector<1x1x1xf32> to vector<1x1xf32>
    %c0_281 = arith.constant 0 : index
    %c0_282 = arith.constant 0 : index
    %c1_283 = arith.constant 1 : index
    %c0_284 = arith.constant 0 : index
    %c1_285 = arith.constant 1 : index
    %272 = vector.load %arg2[%c0_281, %c0_282, %c1_283, %c0_284, %c1_285] : memref<1x1x3x18x18xf32, #tpu.memory_space<vmem>>, vector<1x1x1x16x16xf32>
    %273 = vector.shape_cast %272 : vector<1x1x1x16x16xf32> to vector<16x16xf32>
    %274 = vector.broadcast %271 : vector<1x1xf32> to vector<16x16xf32>
    %275 = arith.mulf %274, %273 : vector<16x16xf32>
    %276 = arith.addf %269, %275 : vector<16x16xf32>
    %c0_286 = arith.constant 0 : index
    %c1_287 = arith.constant 1 : index
    %c11_288 = arith.constant 11 : index
    %277 = vector.load %arg3[%c0_286, %c1_287, %c11_288] : memref<1x8x27xf32, #tpu.memory_space<vmem>>, vector<1x1x1xf32>
    %278 = vector.shape_cast %277 : vector<1x1x1xf32> to vector<1x1xf32>
    %c0_289 = arith.constant 0 : index
    %c0_290 = arith.constant 0 : index
    %c1_291 = arith.constant 1 : index
    %c0_292 = arith.constant 0 : index
    %c2_293 = arith.constant 2 : index
    %279 = vector.load %arg2[%c0_289, %c0_290, %c1_291, %c0_292, %c2_293] : memref<1x1x3x18x18xf32, #tpu.memory_space<vmem>>, vector<1x1x1x16x16xf32>
    %280 = vector.shape_cast %279 : vector<1x1x1x16x16xf32> to vector<16x16xf32>
    %281 = vector.broadcast %278 : vector<1x1xf32> to vector<16x16xf32>
    %282 = arith.mulf %281, %280 : vector<16x16xf32>
    %283 = arith.addf %276, %282 : vector<16x16xf32>
    %c0_294 = arith.constant 0 : index
    %c1_295 = arith.constant 1 : index
    %c12_296 = arith.constant 12 : index
    %284 = vector.load %arg3[%c0_294, %c1_295, %c12_296] : memref<1x8x27xf32, #tpu.memory_space<vmem>>, vector<1x1x1xf32>
    %285 = vector.shape_cast %284 : vector<1x1x1xf32> to vector<1x1xf32>
    %c0_297 = arith.constant 0 : index
    %c0_298 = arith.constant 0 : index
    %c1_299 = arith.constant 1 : index
    %c1_300 = arith.constant 1 : index
    %c0_301 = arith.constant 0 : index
    %286 = vector.load %arg2[%c0_297, %c0_298, %c1_299, %c1_300, %c0_301] : memref<1x1x3x18x18xf32, #tpu.memory_space<vmem>>, vector<1x1x1x16x16xf32>
    %287 = vector.shape_cast %286 : vector<1x1x1x16x16xf32> to vector<16x16xf32>
    %288 = vector.broadcast %285 : vector<1x1xf32> to vector<16x16xf32>
    %289 = arith.mulf %288, %287 : vector<16x16xf32>
    %290 = arith.addf %283, %289 : vector<16x16xf32>
    %c0_302 = arith.constant 0 : index
    %c1_303 = arith.constant 1 : index
    %c13_304 = arith.constant 13 : index
    %291 = vector.load %arg3[%c0_302, %c1_303, %c13_304] : memref<1x8x27xf32, #tpu.memory_space<vmem>>, vector<1x1x1xf32>
    %292 = vector.shape_cast %291 : vector<1x1x1xf32> to vector<1x1xf32>
    %c0_305 = arith.constant 0 : index
    %c0_306 = arith.constant 0 : index
    %c1_307 = arith.constant 1 : index
    %c1_308 = arith.constant 1 : index
    %c1_309 = arith.constant 1 : index
    %293 = vector.load %arg2[%c0_305, %c0_306, %c1_307, %c1_308, %c1_309] : memref<1x1x3x18x18xf32, #tpu.memory_space<vmem>>, vector<1x1x1x16x16xf32>
    %294 = vector.shape_cast %293 : vector<1x1x1x16x16xf32> to vector<16x16xf32>
    %295 = vector.broadcast %292 : vector<1x1xf32> to vector<16x16xf32>
    %296 = arith.mulf %295, %294 : vector<16x16xf32>
    %297 = arith.addf %290, %296 : vector<16x16xf32>
    %c0_310 = arith.constant 0 : index
    %c1_311 = arith.constant 1 : index
    %c14_312 = arith.constant 14 : index
    %298 = vector.load %arg3[%c0_310, %c1_311, %c14_312] : memref<1x8x27xf32, #tpu.memory_space<vmem>>, vector<1x1x1xf32>
    %299 = vector.shape_cast %298 : vector<1x1x1xf32> to vector<1x1xf32>
    %c0_313 = arith.constant 0 : index
    %c0_314 = arith.constant 0 : index
    %c1_315 = arith.constant 1 : index
    %c1_316 = arith.constant 1 : index
    %c2_317 = arith.constant 2 : index
    %300 = vector.load %arg2[%c0_313, %c0_314, %c1_315, %c1_316, %c2_317] : memref<1x1x3x18x18xf32, #tpu.memory_space<vmem>>, vector<1x1x1x16x16xf32>
    %301 = vector.shape_cast %300 : vector<1x1x1x16x16xf32> to vector<16x16xf32>
    %302 = vector.broadcast %299 : vector<1x1xf32> to vector<16x16xf32>
    %303 = arith.mulf %302, %301 : vector<16x16xf32>
    %304 = arith.addf %297, %303 : vector<16x16xf32>
    %c0_318 = arith.constant 0 : index
    %c1_319 = arith.constant 1 : index
    %c15_320 = arith.constant 15 : index
    %305 = vector.load %arg3[%c0_318, %c1_319, %c15_320] : memref<1x8x27xf32, #tpu.memory_space<vmem>>, vector<1x1x1xf32>
    %306 = vector.shape_cast %305 : vector<1x1x1xf32> to vector<1x1xf32>
    %c0_321 = arith.constant 0 : index
    %c0_322 = arith.constant 0 : index
    %c1_323 = arith.constant 1 : index
    %c2_324 = arith.constant 2 : index
    %c0_325 = arith.constant 0 : index
    %307 = vector.load %arg2[%c0_321, %c0_322, %c1_323, %c2_324, %c0_325] : memref<1x1x3x18x18xf32, #tpu.memory_space<vmem>>, vector<1x1x1x16x16xf32>
    %308 = vector.shape_cast %307 : vector<1x1x1x16x16xf32> to vector<16x16xf32>
    %309 = vector.broadcast %306 : vector<1x1xf32> to vector<16x16xf32>
    %310 = arith.mulf %309, %308 : vector<16x16xf32>
    %311 = arith.addf %304, %310 : vector<16x16xf32>
    %c0_326 = arith.constant 0 : index
    %c1_327 = arith.constant 1 : index
    %c16_328 = arith.constant 16 : index
    %312 = vector.load %arg3[%c0_326, %c1_327, %c16_328] : memref<1x8x27xf32, #tpu.memory_space<vmem>>, vector<1x1x1xf32>
    %313 = vector.shape_cast %312 : vector<1x1x1xf32> to vector<1x1xf32>
    %c0_329 = arith.constant 0 : index
    %c0_330 = arith.constant 0 : index
    %c1_331 = arith.constant 1 : index
    %c2_332 = arith.constant 2 : index
    %c1_333 = arith.constant 1 : index
    %314 = vector.load %arg2[%c0_329, %c0_330, %c1_331, %c2_332, %c1_333] : memref<1x1x3x18x18xf32, #tpu.memory_space<vmem>>, vector<1x1x1x16x16xf32>
    %315 = vector.shape_cast %314 : vector<1x1x1x16x16xf32> to vector<16x16xf32>
    %316 = vector.broadcast %313 : vector<1x1xf32> to vector<16x16xf32>
    %317 = arith.mulf %316, %315 : vector<16x16xf32>
    %318 = arith.addf %311, %317 : vector<16x16xf32>
    %c0_334 = arith.constant 0 : index
    %c1_335 = arith.constant 1 : index
    %c17_336 = arith.constant 17 : index
    %319 = vector.load %arg3[%c0_334, %c1_335, %c17_336] : memref<1x8x27xf32, #tpu.memory_space<vmem>>, vector<1x1x1xf32>
    %320 = vector.shape_cast %319 : vector<1x1x1xf32> to vector<1x1xf32>
    %c0_337 = arith.constant 0 : index
    %c0_338 = arith.constant 0 : index
    %c1_339 = arith.constant 1 : index
    %c2_340 = arith.constant 2 : index
    %c2_341 = arith.constant 2 : index
    %321 = vector.load %arg2[%c0_337, %c0_338, %c1_339, %c2_340, %c2_341] : memref<1x1x3x18x18xf32, #tpu.memory_space<vmem>>, vector<1x1x1x16x16xf32>
    %322 = vector.shape_cast %321 : vector<1x1x1x16x16xf32> to vector<16x16xf32>
    %323 = vector.broadcast %320 : vector<1x1xf32> to vector<16x16xf32>
    %324 = arith.mulf %323, %322 : vector<16x16xf32>
    %325 = arith.addf %318, %324 : vector<16x16xf32>
    %c0_342 = arith.constant 0 : index
    %c1_343 = arith.constant 1 : index
    %c18_344 = arith.constant 18 : index
    %326 = vector.load %arg3[%c0_342, %c1_343, %c18_344] : memref<1x8x27xf32, #tpu.memory_space<vmem>>, vector<1x1x1xf32>
    %327 = vector.shape_cast %326 : vector<1x1x1xf32> to vector<1x1xf32>
    %c0_345 = arith.constant 0 : index
    %c0_346 = arith.constant 0 : index
    %c2_347 = arith.constant 2 : index
    %c0_348 = arith.constant 0 : index
    %c0_349 = arith.constant 0 : index
    %328 = vector.load %arg2[%c0_345, %c0_346, %c2_347, %c0_348, %c0_349] : memref<1x1x3x18x18xf32, #tpu.memory_space<vmem>>, vector<1x1x1x16x16xf32>
    %329 = vector.shape_cast %328 : vector<1x1x1x16x16xf32> to vector<16x16xf32>
    %330 = vector.broadcast %327 : vector<1x1xf32> to vector<16x16xf32>
    %331 = arith.mulf %330, %329 : vector<16x16xf32>
    %332 = arith.addf %325, %331 : vector<16x16xf32>
    %c0_350 = arith.constant 0 : index
    %c1_351 = arith.constant 1 : index
    %c19_352 = arith.constant 19 : index
    %333 = vector.load %arg3[%c0_350, %c1_351, %c19_352] : memref<1x8x27xf32, #tpu.memory_space<vmem>>, vector<1x1x1xf32>
    %334 = vector.shape_cast %333 : vector<1x1x1xf32> to vector<1x1xf32>
    %c0_353 = arith.constant 0 : index
    %c0_354 = arith.constant 0 : index
    %c2_355 = arith.constant 2 : index
    %c0_356 = arith.constant 0 : index
    %c1_357 = arith.constant 1 : index
    %335 = vector.load %arg2[%c0_353, %c0_354, %c2_355, %c0_356, %c1_357] : memref<1x1x3x18x18xf32, #tpu.memory_space<vmem>>, vector<1x1x1x16x16xf32>
    %336 = vector.shape_cast %335 : vector<1x1x1x16x16xf32> to vector<16x16xf32>
    %337 = vector.broadcast %334 : vector<1x1xf32> to vector<16x16xf32>
    %338 = arith.mulf %337, %336 : vector<16x16xf32>
    %339 = arith.addf %332, %338 : vector<16x16xf32>
    %c0_358 = arith.constant 0 : index
    %c1_359 = arith.constant 1 : index
    %c20_360 = arith.constant 20 : index
    %340 = vector.load %arg3[%c0_358, %c1_359, %c20_360] : memref<1x8x27xf32, #tpu.memory_space<vmem>>, vector<1x1x1xf32>
    %341 = vector.shape_cast %340 : vector<1x1x1xf32> to vector<1x1xf32>
    %c0_361 = arith.constant 0 : index
    %c0_362 = arith.constant 0 : index
    %c2_363 = arith.constant 2 : index
    %c0_364 = arith.constant 0 : index
    %c2_365 = arith.constant 2 : index
    %342 = vector.load %arg2[%c0_361, %c0_362, %c2_363, %c0_364, %c2_365] : memref<1x1x3x18x18xf32, #tpu.memory_space<vmem>>, vector<1x1x1x16x16xf32>
    %343 = vector.shape_cast %342 : vector<1x1x1x16x16xf32> to vector<16x16xf32>
    %344 = vector.broadcast %341 : vector<1x1xf32> to vector<16x16xf32>
    %345 = arith.mulf %344, %343 : vector<16x16xf32>
    %346 = arith.addf %339, %345 : vector<16x16xf32>
    %c0_366 = arith.constant 0 : index
    %c1_367 = arith.constant 1 : index
    %c21_368 = arith.constant 21 : index
    %347 = vector.load %arg3[%c0_366, %c1_367, %c21_368] : memref<1x8x27xf32, #tpu.memory_space<vmem>>, vector<1x1x1xf32>
    %348 = vector.shape_cast %347 : vector<1x1x1xf32> to vector<1x1xf32>
    %c0_369 = arith.constant 0 : index
    %c0_370 = arith.constant 0 : index
    %c2_371 = arith.constant 2 : index
    %c1_372 = arith.constant 1 : index
    %c0_373 = arith.constant 0 : index
    %349 = vector.load %arg2[%c0_369, %c0_370, %c2_371, %c1_372, %c0_373] : memref<1x1x3x18x18xf32, #tpu.memory_space<vmem>>, vector<1x1x1x16x16xf32>
    %350 = vector.shape_cast %349 : vector<1x1x1x16x16xf32> to vector<16x16xf32>
    %351 = vector.broadcast %348 : vector<1x1xf32> to vector<16x16xf32>
    %352 = arith.mulf %351, %350 : vector<16x16xf32>
    %353 = arith.addf %346, %352 : vector<16x16xf32>
    %c0_374 = arith.constant 0 : index
    %c1_375 = arith.constant 1 : index
    %c22_376 = arith.constant 22 : index
    %354 = vector.load %arg3[%c0_374, %c1_375, %c22_376] : memref<1x8x27xf32, #tpu.memory_space<vmem>>, vector<1x1x1xf32>
    %355 = vector.shape_cast %354 : vector<1x1x1xf32> to vector<1x1xf32>
    %c0_377 = arith.constant 0 : index
    %c0_378 = arith.constant 0 : index
    %c2_379 = arith.constant 2 : index
    %c1_380 = arith.constant 1 : index
    %c1_381 = arith.constant 1 : index
    %356 = vector.load %arg2[%c0_377, %c0_378, %c2_379, %c1_380, %c1_381] : memref<1x1x3x18x18xf32, #tpu.memory_space<vmem>>, vector<1x1x1x16x16xf32>
    %357 = vector.shape_cast %356 : vector<1x1x1x16x16xf32> to vector<16x16xf32>
    %358 = vector.broadcast %355 : vector<1x1xf32> to vector<16x16xf32>
    %359 = arith.mulf %358, %357 : vector<16x16xf32>
    %360 = arith.addf %353, %359 : vector<16x16xf32>
    %c0_382 = arith.constant 0 : index
    %c1_383 = arith.constant 1 : index
    %c23_384 = arith.constant 23 : index
    %361 = vector.load %arg3[%c0_382, %c1_383, %c23_384] : memref<1x8x27xf32, #tpu.memory_space<vmem>>, vector<1x1x1xf32>
    %362 = vector.shape_cast %361 : vector<1x1x1xf32> to vector<1x1xf32>
    %c0_385 = arith.constant 0 : index
    %c0_386 = arith.constant 0 : index
    %c2_387 = arith.constant 2 : index
    %c1_388 = arith.constant 1 : index
    %c2_389 = arith.constant 2 : index
    %363 = vector.load %arg2[%c0_385, %c0_386, %c2_387, %c1_388, %c2_389] : memref<1x1x3x18x18xf32, #tpu.memory_space<vmem>>, vector<1x1x1x16x16xf32>
    %364 = vector.shape_cast %363 : vector<1x1x1x16x16xf32> to vector<16x16xf32>
    %365 = vector.broadcast %362 : vector<1x1xf32> to vector<16x16xf32>
    %366 = arith.mulf %365, %364 : vector<16x16xf32>
    %367 = arith.addf %360, %366 : vector<16x16xf32>
    %c0_390 = arith.constant 0 : index
    %c1_391 = arith.constant 1 : index
    %c24_392 = arith.constant 24 : index
    %368 = vector.load %arg3[%c0_390, %c1_391, %c24_392] : memref<1x8x27xf32, #tpu.memory_space<vmem>>, vector<1x1x1xf32>
    %369 = vector.shape_cast %368 : vector<1x1x1xf32> to vector<1x1xf32>
    %c0_393 = arith.constant 0 : index
    %c0_394 = arith.constant 0 : index
    %c2_395 = arith.constant 2 : index
    %c2_396 = arith.constant 2 : index
    %c0_397 = arith.constant 0 : index
    %370 = vector.load %arg2[%c0_393, %c0_394, %c2_395, %c2_396, %c0_397] : memref<1x1x3x18x18xf32, #tpu.memory_space<vmem>>, vector<1x1x1x16x16xf32>
    %371 = vector.shape_cast %370 : vector<1x1x1x16x16xf32> to vector<16x16xf32>
    %372 = vector.broadcast %369 : vector<1x1xf32> to vector<16x16xf32>
    %373 = arith.mulf %372, %371 : vector<16x16xf32>
    %374 = arith.addf %367, %373 : vector<16x16xf32>
    %c0_398 = arith.constant 0 : index
    %c1_399 = arith.constant 1 : index
    %c25_400 = arith.constant 25 : index
    %375 = vector.load %arg3[%c0_398, %c1_399, %c25_400] : memref<1x8x27xf32, #tpu.memory_space<vmem>>, vector<1x1x1xf32>
    %376 = vector.shape_cast %375 : vector<1x1x1xf32> to vector<1x1xf32>
    %c0_401 = arith.constant 0 : index
    %c0_402 = arith.constant 0 : index
    %c2_403 = arith.constant 2 : index
    %c2_404 = arith.constant 2 : index
    %c1_405 = arith.constant 1 : index
    %377 = vector.load %arg2[%c0_401, %c0_402, %c2_403, %c2_404, %c1_405] : memref<1x1x3x18x18xf32, #tpu.memory_space<vmem>>, vector<1x1x1x16x16xf32>
    %378 = vector.shape_cast %377 : vector<1x1x1x16x16xf32> to vector<16x16xf32>
    %379 = vector.broadcast %376 : vector<1x1xf32> to vector<16x16xf32>
    %380 = arith.mulf %379, %378 : vector<16x16xf32>
    %381 = arith.addf %374, %380 : vector<16x16xf32>
    %c0_406 = arith.constant 0 : index
    %c1_407 = arith.constant 1 : index
    %c26_408 = arith.constant 26 : index
    %382 = vector.load %arg3[%c0_406, %c1_407, %c26_408] : memref<1x8x27xf32, #tpu.memory_space<vmem>>, vector<1x1x1xf32>
    %383 = vector.shape_cast %382 : vector<1x1x1xf32> to vector<1x1xf32>
    %c0_409 = arith.constant 0 : index
    %c0_410 = arith.constant 0 : index
    %c2_411 = arith.constant 2 : index
    %c2_412 = arith.constant 2 : index
    %c2_413 = arith.constant 2 : index
    %384 = vector.load %arg2[%c0_409, %c0_410, %c2_411, %c2_412, %c2_413] : memref<1x1x3x18x18xf32, #tpu.memory_space<vmem>>, vector<1x1x1x16x16xf32>
    %385 = vector.shape_cast %384 : vector<1x1x1x16x16xf32> to vector<16x16xf32>
    %386 = vector.broadcast %383 : vector<1x1xf32> to vector<16x16xf32>
    %387 = arith.mulf %386, %385 : vector<16x16xf32>
    %388 = arith.addf %381, %387 : vector<16x16xf32>
    %c0_414 = arith.constant 0 : index
    %c1_415 = arith.constant 1 : index
    %c0_416 = arith.constant 0 : index
    %389 = vector.load %arg4[%c0_414, %c1_415, %c0_416] : memref<1x8x1xf32, #tpu.memory_space<vmem>>, vector<1x1x1xf32>
    %390 = vector.shape_cast %389 : vector<1x1x1xf32> to vector<1x1xf32>
    %391 = vector.broadcast %390 : vector<1x1xf32> to vector<16x16xf32>
    %392 = arith.addf %388, %391 : vector<16x16xf32>
    %cst_417 = arith.constant 0.000000e+00 : f32
    %393 = vector.broadcast %cst_417 : f32 to vector<16x16xf32>
    %394 = arith.maximumf %392, %393 : vector<16x16xf32>
    %c0_418 = arith.constant 0 : index
    %c1_419 = arith.constant 1 : index
    %c0_420 = arith.constant 0 : index
    %c0_421 = arith.constant 0 : index
    %395 = vector.load %arg5[%c0_418, %c1_419, %c0_420, %c0_421] : memref<1x8x16x16xf32, #tpu.memory_space<vmem>>, vector<1x1x16x16xf32>
    %396 = vector.shape_cast %395 : vector<1x1x16x16xf32> to vector<16x16xf32>
    %397 = vector.shape_cast %394 : vector<16x16xf32> to vector<1x1x16x16xf32>
    tpu.vector_store %arg5[%c0_418, %c1_419, %c0_420, %c0_421], %397 {strides = array<i32>} : memref<1x8x16x16xf32, #tpu.memory_space<vmem>>, vector<1x1x16x16xf32>,
    %cst_422 = arith.constant 0.000000e+00 : f32
    %398 = vector.broadcast %cst_422 : f32 to vector<16x16xf32>
    %c0_423 = arith.constant 0 : index
    %c2_424 = arith.constant 2 : index
    %c0_425 = arith.constant 0 : index
    %399 = vector.load %arg3[%c0_423, %c2_424, %c0_425] : memref<1x8x27xf32, #tpu.memory_space<vmem>>, vector<1x1x1xf32>
    %400 = vector.shape_cast %399 : vector<1x1x1xf32> to vector<1x1xf32>
    %c0_426 = arith.constant 0 : index
    %c0_427 = arith.constant 0 : index
    %c0_428 = arith.constant 0 : index
    %c0_429 = arith.constant 0 : index
    %c0_430 = arith.constant 0 : index
    %401 = vector.load %arg2[%c0_426, %c0_427, %c0_428, %c0_429, %c0_430] : memref<1x1x3x18x18xf32, #tpu.memory_space<vmem>>, vector<1x1x1x16x16xf32>
    %402 = vector.shape_cast %401 : vector<1x1x1x16x16xf32> to vector<16x16xf32>
    %403 = vector.broadcast %400 : vector<1x1xf32> to vector<16x16xf32>
    %404 = arith.mulf %403, %402 : vector<16x16xf32>
    %405 = arith.addf %398, %404 : vector<16x16xf32>
    %c0_431 = arith.constant 0 : index
    %c2_432 = arith.constant 2 : index
    %c1_433 = arith.constant 1 : index
    %406 = vector.load %arg3[%c0_431, %c2_432, %c1_433] : memref<1x8x27xf32, #tpu.memory_space<vmem>>, vector<1x1x1xf32>
    %407 = vector.shape_cast %406 : vector<1x1x1xf32> to vector<1x1xf32>
    %c0_434 = arith.constant 0 : index
    %c0_435 = arith.constant 0 : index
    %c0_436 = arith.constant 0 : index
    %c0_437 = arith.constant 0 : index
    %c1_438 = arith.constant 1 : index
    %408 = vector.load %arg2[%c0_434, %c0_435, %c0_436, %c0_437, %c1_438] : memref<1x1x3x18x18xf32, #tpu.memory_space<vmem>>, vector<1x1x1x16x16xf32>
    %409 = vector.shape_cast %408 : vector<1x1x1x16x16xf32> to vector<16x16xf32>
    %410 = vector.broadcast %407 : vector<1x1xf32> to vector<16x16xf32>
    %411 = arith.mulf %410, %409 : vector<16x16xf32>
    %412 = arith.addf %405, %411 : vector<16x16xf32>
    %c0_439 = arith.constant 0 : index
    %c2_440 = arith.constant 2 : index
    %c2_441 = arith.constant 2 : index
    %413 = vector.load %arg3[%c0_439, %c2_440, %c2_441] : memref<1x8x27xf32, #tpu.memory_space<vmem>>, vector<1x1x1xf32>
    %414 = vector.shape_cast %413 : vector<1x1x1xf32> to vector<1x1xf32>
    %c0_442 = arith.constant 0 : index
    %c0_443 = arith.constant 0 : index
    %c0_444 = arith.constant 0 : index
    %c0_445 = arith.constant 0 : index
    %c2_446 = arith.constant 2 : index
    %415 = vector.load %arg2[%c0_442, %c0_443, %c0_444, %c0_445, %c2_446] : memref<1x1x3x18x18xf32, #tpu.memory_space<vmem>>, vector<1x1x1x16x16xf32>
    %416 = vector.shape_cast %415 : vector<1x1x1x16x16xf32> to vector<16x16xf32>
    %417 = vector.broadcast %414 : vector<1x1xf32> to vector<16x16xf32>
    %418 = arith.mulf %417, %416 : vector<16x16xf32>
    %419 = arith.addf %412, %418 : vector<16x16xf32>
    %c0_447 = arith.constant 0 : index
    %c2_448 = arith.constant 2 : index
    %c3_449 = arith.constant 3 : index
    %420 = vector.load %arg3[%c0_447, %c2_448, %c3_449] : memref<1x8x27xf32, #tpu.memory_space<vmem>>, vector<1x1x1xf32>
    %421 = vector.shape_cast %420 : vector<1x1x1xf32> to vector<1x1xf32>
    %c0_450 = arith.constant 0 : index
    %c0_451 = arith.constant 0 : index
    %c0_452 = arith.constant 0 : index
    %c1_453 = arith.constant 1 : index
    %c0_454 = arith.constant 0 : index
    %422 = vector.load %arg2[%c0_450, %c0_451, %c0_452, %c1_453, %c0_454] : memref<1x1x3x18x18xf32, #tpu.memory_space<vmem>>, vector<1x1x1x16x16xf32>
    %423 = vector.shape_cast %422 : vector<1x1x1x16x16xf32> to vector<16x16xf32>
    %424 = vector.broadcast %421 : vector<1x1xf32> to vector<16x16xf32>
    %425 = arith.mulf %424, %423 : vector<16x16xf32>
    %426 = arith.addf %419, %425 : vector<16x16xf32>
    %c0_455 = arith.constant 0 : index
    %c2_456 = arith.constant 2 : index
    %c4_457 = arith.constant 4 : index
    %427 = vector.load %arg3[%c0_455, %c2_456, %c4_457] : memref<1x8x27xf32, #tpu.memory_space<vmem>>, vector<1x1x1xf32>
    %428 = vector.shape_cast %427 : vector<1x1x1xf32> to vector<1x1xf32>
    %c0_458 = arith.constant 0 : index
    %c0_459 = arith.constant 0 : index
    %c0_460 = arith.constant 0 : index
    %c1_461 = arith.constant 1 : index
    %c1_462 = arith.constant 1 : index
    %429 = vector.load %arg2[%c0_458, %c0_459, %c0_460, %c1_461, %c1_462] : memref<1x1x3x18x18xf32, #tpu.memory_space<vmem>>, vector<1x1x1x16x16xf32>
    %430 = vector.shape_cast %429 : vector<1x1x1x16x16xf32> to vector<16x16xf32>
    %431 = vector.broadcast %428 : vector<1x1xf32> to vector<16x16xf32>
    %432 = arith.mulf %431, %430 : vector<16x16xf32>
    %433 = arith.addf %426, %432 : vector<16x16xf32>
    %c0_463 = arith.constant 0 : index
    %c2_464 = arith.constant 2 : index
    %c5_465 = arith.constant 5 : index
    %434 = vector.load %arg3[%c0_463, %c2_464, %c5_465] : memref<1x8x27xf32, #tpu.memory_space<vmem>>, vector<1x1x1xf32>
    %435 = vector.shape_cast %434 : vector<1x1x1xf32> to vector<1x1xf32>
    %c0_466 = arith.constant 0 : index
    %c0_467 = arith.constant 0 : index
    %c0_468 = arith.constant 0 : index
    %c1_469 = arith.constant 1 : index
    %c2_470 = arith.constant 2 : index
    %436 = vector.load %arg2[%c0_466, %c0_467, %c0_468, %c1_469, %c2_470] : memref<1x1x3x18x18xf32, #tpu.memory_space<vmem>>, vector<1x1x1x16x16xf32>
    %437 = vector.shape_cast %436 : vector<1x1x1x16x16xf32> to vector<16x16xf32>
    %438 = vector.broadcast %435 : vector<1x1xf32> to vector<16x16xf32>
    %439 = arith.mulf %438, %437 : vector<16x16xf32>
    %440 = arith.addf %433, %439 : vector<16x16xf32>
    %c0_471 = arith.constant 0 : index
    %c2_472 = arith.constant 2 : index
    %c6_473 = arith.constant 6 : index
    %441 = vector.load %arg3[%c0_471, %c2_472, %c6_473] : memref<1x8x27xf32, #tpu.memory_space<vmem>>, vector<1x1x1xf32>
    %442 = vector.shape_cast %441 : vector<1x1x1xf32> to vector<1x1xf32>
    %c0_474 = arith.constant 0 : index
    %c0_475 = arith.constant 0 : index
    %c0_476 = arith.constant 0 : index
    %c2_477 = arith.constant 2 : index
    %c0_478 = arith.constant 0 : index
    %443 = vector.load %arg2[%c0_474, %c0_475, %c0_476, %c2_477, %c0_478] : memref<1x1x3x18x18xf32, #tpu.memory_space<vmem>>, vector<1x1x1x16x16xf32>
    %444 = vector.shape_cast %443 : vector<1x1x1x16x16xf32> to vector<16x16xf32>
    %445 = vector.broadcast %442 : vector<1x1xf32> to vector<16x16xf32>
    %446 = arith.mulf %445, %444 : vector<16x16xf32>
    %447 = arith.addf %440, %446 : vector<16x16xf32>
    %c0_479 = arith.constant 0 : index
    %c2_480 = arith.constant 2 : index
    %c7_481 = arith.constant 7 : index
    %448 = vector.load %arg3[%c0_479, %c2_480, %c7_481] : memref<1x8x27xf32, #tpu.memory_space<vmem>>, vector<1x1x1xf32>
    %449 = vector.shape_cast %448 : vector<1x1x1xf32> to vector<1x1xf32>
    %c0_482 = arith.constant 0 : index
    %c0_483 = arith.constant 0 : index
    %c0_484 = arith.constant 0 : index
    %c2_485 = arith.constant 2 : index
    %c1_486 = arith.constant 1 : index
    %450 = vector.load %arg2[%c0_482, %c0_483, %c0_484, %c2_485, %c1_486] : memref<1x1x3x18x18xf32, #tpu.memory_space<vmem>>, vector<1x1x1x16x16xf32>
    %451 = vector.shape_cast %450 : vector<1x1x1x16x16xf32> to vector<16x16xf32>
    %452 = vector.broadcast %449 : vector<1x1xf32> to vector<16x16xf32>
    %453 = arith.mulf %452, %451 : vector<16x16xf32>
    %454 = arith.addf %447, %453 : vector<16x16xf32>
    %c0_487 = arith.constant 0 : index
    %c2_488 = arith.constant 2 : index
    %c8_489 = arith.constant 8 : index
    %455 = vector.load %arg3[%c0_487, %c2_488, %c8_489] : memref<1x8x27xf32, #tpu.memory_space<vmem>>, vector<1x1x1xf32>
    %456 = vector.shape_cast %455 : vector<1x1x1xf32> to vector<1x1xf32>
    %c0_490 = arith.constant 0 : index
    %c0_491 = arith.constant 0 : index
    %c0_492 = arith.constant 0 : index
    %c2_493 = arith.constant 2 : index
    %c2_494 = arith.constant 2 : index
    %457 = vector.load %arg2[%c0_490, %c0_491, %c0_492, %c2_493, %c2_494] : memref<1x1x3x18x18xf32, #tpu.memory_space<vmem>>, vector<1x1x1x16x16xf32>
    %458 = vector.shape_cast %457 : vector<1x1x1x16x16xf32> to vector<16x16xf32>
    %459 = vector.broadcast %456 : vector<1x1xf32> to vector<16x16xf32>
    %460 = arith.mulf %459, %458 : vector<16x16xf32>
    %461 = arith.addf %454, %460 : vector<16x16xf32>
    %c0_495 = arith.constant 0 : index
    %c2_496 = arith.constant 2 : index
    %c9_497 = arith.constant 9 : index
    %462 = vector.load %arg3[%c0_495, %c2_496, %c9_497] : memref<1x8x27xf32, #tpu.memory_space<vmem>>, vector<1x1x1xf32>
    %463 = vector.shape_cast %462 : vector<1x1x1xf32> to vector<1x1xf32>
    %c0_498 = arith.constant 0 : index
    %c0_499 = arith.constant 0 : index
    %c1_500 = arith.constant 1 : index
    %c0_501 = arith.constant 0 : index
    %c0_502 = arith.constant 0 : index
    %464 = vector.load %arg2[%c0_498, %c0_499, %c1_500, %c0_501, %c0_502] : memref<1x1x3x18x18xf32, #tpu.memory_space<vmem>>, vector<1x1x1x16x16xf32>
    %465 = vector.shape_cast %464 : vector<1x1x1x16x16xf32> to vector<16x16xf32>
    %466 = vector.broadcast %463 : vector<1x1xf32> to vector<16x16xf32>
    %467 = arith.mulf %466, %465 : vector<16x16xf32>
    %468 = arith.addf %461, %467 : vector<16x16xf32>
    %c0_503 = arith.constant 0 : index
    %c2_504 = arith.constant 2 : index
    %c10_505 = arith.constant 10 : index
    %469 = vector.load %arg3[%c0_503, %c2_504, %c10_505] : memref<1x8x27xf32, #tpu.memory_space<vmem>>, vector<1x1x1xf32>
    %470 = vector.shape_cast %469 : vector<1x1x1xf32> to vector<1x1xf32>
    %c0_506 = arith.constant 0 : index
    %c0_507 = arith.constant 0 : index
    %c1_508 = arith.constant 1 : index
    %c0_509 = arith.constant 0 : index
    %c1_510 = arith.constant 1 : index
    %471 = vector.load %arg2[%c0_506, %c0_507, %c1_508, %c0_509, %c1_510] : memref<1x1x3x18x18xf32, #tpu.memory_space<vmem>>, vector<1x1x1x16x16xf32>
    %472 = vector.shape_cast %471 : vector<1x1x1x16x16xf32> to vector<16x16xf32>
    %473 = vector.broadcast %470 : vector<1x1xf32> to vector<16x16xf32>
    %474 = arith.mulf %473, %472 : vector<16x16xf32>
    %475 = arith.addf %468, %474 : vector<16x16xf32>
    %c0_511 = arith.constant 0 : index
    %c2_512 = arith.constant 2 : index
    %c11_513 = arith.constant 11 : index
    %476 = vector.load %arg3[%c0_511, %c2_512, %c11_513] : memref<1x8x27xf32, #tpu.memory_space<vmem>>, vector<1x1x1xf32>
    %477 = vector.shape_cast %476 : vector<1x1x1xf32> to vector<1x1xf32>
    %c0_514 = arith.constant 0 : index
    %c0_515 = arith.constant 0 : index
    %c1_516 = arith.constant 1 : index
    %c0_517 = arith.constant 0 : index
    %c2_518 = arith.constant 2 : index
    %478 = vector.load %arg2[%c0_514, %c0_515, %c1_516, %c0_517, %c2_518] : memref<1x1x3x18x18xf32, #tpu.memory_space<vmem>>, vector<1x1x1x16x16xf32>
    %479 = vector.shape_cast %478 : vector<1x1x1x16x16xf32> to vector<16x16xf32>
    %480 = vector.broadcast %477 : vector<1x1xf32> to vector<16x16xf32>
    %481 = arith.mulf %480, %479 : vector<16x16xf32>
    %482 = arith.addf %475, %481 : vector<16x16xf32>
    %c0_519 = arith.constant 0 : index
    %c2_520 = arith.constant 2 : index
    %c12_521 = arith.constant 12 : index
    %483 = vector.load %arg3[%c0_519, %c2_520, %c12_521] : memref<1x8x27xf32, #tpu.memory_space<vmem>>, vector<1x1x1xf32>
    %484 = vector.shape_cast %483 : vector<1x1x1xf32> to vector<1x1xf32>
    %c0_522 = arith.constant 0 : index
    %c0_523 = arith.constant 0 : index
    %c1_524 = arith.constant 1 : index
    %c1_525 = arith.constant 1 : index
    %c0_526 = arith.constant 0 : index
    %485 = vector.load %arg2[%c0_522, %c0_523, %c1_524, %c1_525, %c0_526] : memref<1x1x3x18x18xf32, #tpu.memory_space<vmem>>, vector<1x1x1x16x16xf32>
    %486 = vector.shape_cast %485 : vector<1x1x1x16x16xf32> to vector<16x16xf32>
    %487 = vector.broadcast %484 : vector<1x1xf32> to vector<16x16xf32>
    %488 = arith.mulf %487, %486 : vector<16x16xf32>
    %489 = arith.addf %482, %488 : vector<16x16xf32>
    %c0_527 = arith.constant 0 : index
    %c2_528 = arith.constant 2 : index
    %c13_529 = arith.constant 13 : index
    %490 = vector.load %arg3[%c0_527, %c2_528, %c13_529] : memref<1x8x27xf32, #tpu.memory_space<vmem>>, vector<1x1x1xf32>
    %491 = vector.shape_cast %490 : vector<1x1x1xf32> to vector<1x1xf32>
    %c0_530 = arith.constant 0 : index
    %c0_531 = arith.constant 0 : index
    %c1_532 = arith.constant 1 : index
    %c1_533 = arith.constant 1 : index
    %c1_534 = arith.constant 1 : index
    %492 = vector.load %arg2[%c0_530, %c0_531, %c1_532, %c1_533, %c1_534] : memref<1x1x3x18x18xf32, #tpu.memory_space<vmem>>, vector<1x1x1x16x16xf32>
    %493 = vector.shape_cast %492 : vector<1x1x1x16x16xf32> to vector<16x16xf32>
    %494 = vector.broadcast %491 : vector<1x1xf32> to vector<16x16xf32>
    %495 = arith.mulf %494, %493 : vector<16x16xf32>
    %496 = arith.addf %489, %495 : vector<16x16xf32>
    %c0_535 = arith.constant 0 : index
    %c2_536 = arith.constant 2 : index
    %c14_537 = arith.constant 14 : index
    %497 = vector.load %arg3[%c0_535, %c2_536, %c14_537] : memref<1x8x27xf32, #tpu.memory_space<vmem>>, vector<1x1x1xf32>
    %498 = vector.shape_cast %497 : vector<1x1x1xf32> to vector<1x1xf32>
    %c0_538 = arith.constant 0 : index
    %c0_539 = arith.constant 0 : index
    %c1_540 = arith.constant 1 : index
    %c1_541 = arith.constant 1 : index
    %c2_542 = arith.constant 2 : index
    %499 = vector.load %arg2[%c0_538, %c0_539, %c1_540, %c1_541, %c2_542] : memref<1x1x3x18x18xf32, #tpu.memory_space<vmem>>, vector<1x1x1x16x16xf32>
    %500 = vector.shape_cast %499 : vector<1x1x1x16x16xf32> to vector<16x16xf32>
    %501 = vector.broadcast %498 : vector<1x1xf32> to vector<16x16xf32>
    %502 = arith.mulf %501, %500 : vector<16x16xf32>
    %503 = arith.addf %496, %502 : vector<16x16xf32>
    %c0_543 = arith.constant 0 : index
    %c2_544 = arith.constant 2 : index
    %c15_545 = arith.constant 15 : index
    %504 = vector.load %arg3[%c0_543, %c2_544, %c15_545] : memref<1x8x27xf32, #tpu.memory_space<vmem>>, vector<1x1x1xf32>
    %505 = vector.shape_cast %504 : vector<1x1x1xf32> to vector<1x1xf32>
    %c0_546 = arith.constant 0 : index
    %c0_547 = arith.constant 0 : index
    %c1_548 = arith.constant 1 : index
    %c2_549 = arith.constant 2 : index
    %c0_550 = arith.constant 0 : index
    %506 = vector.load %arg2[%c0_546, %c0_547, %c1_548, %c2_549, %c0_550] : memref<1x1x3x18x18xf32, #tpu.memory_space<vmem>>, vector<1x1x1x16x16xf32>
    %507 = vector.shape_cast %506 : vector<1x1x1x16x16xf32> to vector<16x16xf32>
    %508 = vector.broadcast %505 : vector<1x1xf32> to vector<16x16xf32>
    %509 = arith.mulf %508, %507 : vector<16x16xf32>
    %510 = arith.addf %503, %509 : vector<16x16xf32>
    %c0_551 = arith.constant 0 : index
    %c2_552 = arith.constant 2 : index
    %c16_553 = arith.constant 16 : index
    %511 = vector.load %arg3[%c0_551, %c2_552, %c16_553] : memref<1x8x27xf32, #tpu.memory_space<vmem>>, vector<1x1x1xf32>
    %512 = vector.shape_cast %511 : vector<1x1x1xf32> to vector<1x1xf32>
    %c0_554 = arith.constant 0 : index
    %c0_555 = arith.constant 0 : index
    %c1_556 = arith.constant 1 : index
    %c2_557 = arith.constant 2 : index
    %c1_558 = arith.constant 1 : index
    %513 = vector.load %arg2[%c0_554, %c0_555, %c1_556, %c2_557, %c1_558] : memref<1x1x3x18x18xf32, #tpu.memory_space<vmem>>, vector<1x1x1x16x16xf32>
    %514 = vector.shape_cast %513 : vector<1x1x1x16x16xf32> to vector<16x16xf32>
    %515 = vector.broadcast %512 : vector<1x1xf32> to vector<16x16xf32>
    %516 = arith.mulf %515, %514 : vector<16x16xf32>
    %517 = arith.addf %510, %516 : vector<16x16xf32>
    %c0_559 = arith.constant 0 : index
    %c2_560 = arith.constant 2 : index
    %c17_561 = arith.constant 17 : index
    %518 = vector.load %arg3[%c0_559, %c2_560, %c17_561] : memref<1x8x27xf32, #tpu.memory_space<vmem>>, vector<1x1x1xf32>
    %519 = vector.shape_cast %518 : vector<1x1x1xf32> to vector<1x1xf32>
    %c0_562 = arith.constant 0 : index
    %c0_563 = arith.constant 0 : index
    %c1_564 = arith.constant 1 : index
    %c2_565 = arith.constant 2 : index
    %c2_566 = arith.constant 2 : index
    %520 = vector.load %arg2[%c0_562, %c0_563, %c1_564, %c2_565, %c2_566] : memref<1x1x3x18x18xf32, #tpu.memory_space<vmem>>, vector<1x1x1x16x16xf32>
    %521 = vector.shape_cast %520 : vector<1x1x1x16x16xf32> to vector<16x16xf32>
    %522 = vector.broadcast %519 : vector<1x1xf32> to vector<16x16xf32>
    %523 = arith.mulf %522, %521 : vector<16x16xf32>
    %524 = arith.addf %517, %523 : vector<16x16xf32>
    %c0_567 = arith.constant 0 : index
    %c2_568 = arith.constant 2 : index
    %c18_569 = arith.constant 18 : index
    %525 = vector.load %arg3[%c0_567, %c2_568, %c18_569] : memref<1x8x27xf32, #tpu.memory_space<vmem>>, vector<1x1x1xf32>
    %526 = vector.shape_cast %525 : vector<1x1x1xf32> to vector<1x1xf32>
    %c0_570 = arith.constant 0 : index
    %c0_571 = arith.constant 0 : index
    %c2_572 = arith.constant 2 : index
    %c0_573 = arith.constant 0 : index
    %c0_574 = arith.constant 0 : index
    %527 = vector.load %arg2[%c0_570, %c0_571, %c2_572, %c0_573, %c0_574] : memref<1x1x3x18x18xf32, #tpu.memory_space<vmem>>, vector<1x1x1x16x16xf32>
    %528 = vector.shape_cast %527 : vector<1x1x1x16x16xf32> to vector<16x16xf32>
    %529 = vector.broadcast %526 : vector<1x1xf32> to vector<16x16xf32>
    %530 = arith.mulf %529, %528 : vector<16x16xf32>
    %531 = arith.addf %524, %530 : vector<16x16xf32>
    %c0_575 = arith.constant 0 : index
    %c2_576 = arith.constant 2 : index
    %c19_577 = arith.constant 19 : index
    %532 = vector.load %arg3[%c0_575, %c2_576, %c19_577] : memref<1x8x27xf32, #tpu.memory_space<vmem>>, vector<1x1x1xf32>
    %533 = vector.shape_cast %532 : vector<1x1x1xf32> to vector<1x1xf32>
    %c0_578 = arith.constant 0 : index
    %c0_579 = arith.constant 0 : index
    %c2_580 = arith.constant 2 : index
    %c0_581 = arith.constant 0 : index
    %c1_582 = arith.constant 1 : index
    %534 = vector.load %arg2[%c0_578, %c0_579, %c2_580, %c0_581, %c1_582] : memref<1x1x3x18x18xf32, #tpu.memory_space<vmem>>, vector<1x1x1x16x16xf32>
    %535 = vector.shape_cast %534 : vector<1x1x1x16x16xf32> to vector<16x16xf32>
    %536 = vector.broadcast %533 : vector<1x1xf32> to vector<16x16xf32>
    %537 = arith.mulf %536, %535 : vector<16x16xf32>
    %538 = arith.addf %531, %537 : vector<16x16xf32>
    %c0_583 = arith.constant 0 : index
    %c2_584 = arith.constant 2 : index
    %c20_585 = arith.constant 20 : index
    %539 = vector.load %arg3[%c0_583, %c2_584, %c20_585] : memref<1x8x27xf32, #tpu.memory_space<vmem>>, vector<1x1x1xf32>
    %540 = vector.shape_cast %539 : vector<1x1x1xf32> to vector<1x1xf32>
    %c0_586 = arith.constant 0 : index
    %c0_587 = arith.constant 0 : index
    %c2_588 = arith.constant 2 : index
    %c0_589 = arith.constant 0 : index
    %c2_590 = arith.constant 2 : index
    %541 = vector.load %arg2[%c0_586, %c0_587, %c2_588, %c0_589, %c2_590] : memref<1x1x3x18x18xf32, #tpu.memory_space<vmem>>, vector<1x1x1x16x16xf32>
    %542 = vector.shape_cast %541 : vector<1x1x1x16x16xf32> to vector<16x16xf32>
    %543 = vector.broadcast %540 : vector<1x1xf32> to vector<16x16xf32>
    %544 = arith.mulf %543, %542 : vector<16x16xf32>
    %545 = arith.addf %538, %544 : vector<16x16xf32>
    %c0_591 = arith.constant 0 : index
    %c2_592 = arith.constant 2 : index
    %c21_593 = arith.constant 21 : index
    %546 = vector.load %arg3[%c0_591, %c2_592, %c21_593] : memref<1x8x27xf32, #tpu.memory_space<vmem>>, vector<1x1x1xf32>
    %547 = vector.shape_cast %546 : vector<1x1x1xf32> to vector<1x1xf32>
    %c0_594 = arith.constant 0 : index
    %c0_595 = arith.constant 0 : index
    %c2_596 = arith.constant 2 : index
    %c1_597 = arith.constant 1 : index
    %c0_598 = arith.constant 0 : index
    %548 = vector.load %arg2[%c0_594, %c0_595, %c2_596, %c1_597, %c0_598] : memref<1x1x3x18x18xf32, #tpu.memory_space<vmem>>, vector<1x1x1x16x16xf32>
    %549 = vector.shape_cast %548 : vector<1x1x1x16x16xf32> to vector<16x16xf32>
    %550 = vector.broadcast %547 : vector<1x1xf32> to vector<16x16xf32>
    %551 = arith.mulf %550, %549 : vector<16x16xf32>
    %552 = arith.addf %545, %551 : vector<16x16xf32>
    %c0_599 = arith.constant 0 : index
    %c2_600 = arith.constant 2 : index
    %c22_601 = arith.constant 22 : index
    %553 = vector.load %arg3[%c0_599, %c2_600, %c22_601] : memref<1x8x27xf32, #tpu.memory_space<vmem>>, vector<1x1x1xf32>
    %554 = vector.shape_cast %553 : vector<1x1x1xf32> to vector<1x1xf32>
    %c0_602 = arith.constant 0 : index
    %c0_603 = arith.constant 0 : index
    %c2_604 = arith.constant 2 : index
    %c1_605 = arith.constant 1 : index
    %c1_606 = arith.constant 1 : index
    %555 = vector.load %arg2[%c0_602, %c0_603, %c2_604, %c1_605, %c1_606] : memref<1x1x3x18x18xf32, #tpu.memory_space<vmem>>, vector<1x1x1x16x16xf32>
    %556 = vector.shape_cast %555 : vector<1x1x1x16x16xf32> to vector<16x16xf32>
    %557 = vector.broadcast %554 : vector<1x1xf32> to vector<16x16xf32>
    %558 = arith.mulf %557, %556 : vector<16x16xf32>
    %559 = arith.addf %552, %558 : vector<16x16xf32>
    %c0_607 = arith.constant 0 : index
    %c2_608 = arith.constant 2 : index
    %c23_609 = arith.constant 23 : index
    %560 = vector.load %arg3[%c0_607, %c2_608, %c23_609] : memref<1x8x27xf32, #tpu.memory_space<vmem>>, vector<1x1x1xf32>
    %561 = vector.shape_cast %560 : vector<1x1x1xf32> to vector<1x1xf32>
    %c0_610 = arith.constant 0 : index
    %c0_611 = arith.constant 0 : index
    %c2_612 = arith.constant 2 : index
    %c1_613 = arith.constant 1 : index
    %c2_614 = arith.constant 2 : index
    %562 = vector.load %arg2[%c0_610, %c0_611, %c2_612, %c1_613, %c2_614] : memref<1x1x3x18x18xf32, #tpu.memory_space<vmem>>, vector<1x1x1x16x16xf32>
    %563 = vector.shape_cast %562 : vector<1x1x1x16x16xf32> to vector<16x16xf32>
    %564 = vector.broadcast %561 : vector<1x1xf32> to vector<16x16xf32>
    %565 = arith.mulf %564, %563 : vector<16x16xf32>
    %566 = arith.addf %559, %565 : vector<16x16xf32>
    %c0_615 = arith.constant 0 : index
    %c2_616 = arith.constant 2 : index
    %c24_617 = arith.constant 24 : index
    %567 = vector.load %arg3[%c0_615, %c2_616, %c24_617] : memref<1x8x27xf32, #tpu.memory_space<vmem>>, vector<1x1x1xf32>
    %568 = vector.shape_cast %567 : vector<1x1x1xf32> to vector<1x1xf32>
    %c0_618 = arith.constant 0 : index
    %c0_619 = arith.constant 0 : index
    %c2_620 = arith.constant 2 : index
    %c2_621 = arith.constant 2 : index
    %c0_622 = arith.constant 0 : index
    %569 = vector.load %arg2[%c0_618, %c0_619, %c2_620, %c2_621, %c0_622] : memref<1x1x3x18x18xf32, #tpu.memory_space<vmem>>, vector<1x1x1x16x16xf32>
    %570 = vector.shape_cast %569 : vector<1x1x1x16x16xf32> to vector<16x16xf32>
    %571 = vector.broadcast %568 : vector<1x1xf32> to vector<16x16xf32>
    %572 = arith.mulf %571, %570 : vector<16x16xf32>
    %573 = arith.addf %566, %572 : vector<16x16xf32>
    %c0_623 = arith.constant 0 : index
    %c2_624 = arith.constant 2 : index
    %c25_625 = arith.constant 25 : index
    %574 = vector.load %arg3[%c0_623, %c2_624, %c25_625] : memref<1x8x27xf32, #tpu.memory_space<vmem>>, vector<1x1x1xf32>
    %575 = vector.shape_cast %574 : vector<1x1x1xf32> to vector<1x1xf32>
    %c0_626 = arith.constant 0 : index
    %c0_627 = arith.constant 0 : index
    %c2_628 = arith.constant 2 : index
    %c2_629 = arith.constant 2 : index
    %c1_630 = arith.constant 1 : index
    %576 = vector.load %arg2[%c0_626, %c0_627, %c2_628, %c2_629, %c1_630] : memref<1x1x3x18x18xf32, #tpu.memory_space<vmem>>, vector<1x1x1x16x16xf32>
    %577 = vector.shape_cast %576 : vector<1x1x1x16x16xf32> to vector<16x16xf32>
    %578 = vector.broadcast %575 : vector<1x1xf32> to vector<16x16xf32>
    %579 = arith.mulf %578, %577 : vector<16x16xf32>
    %580 = arith.addf %573, %579 : vector<16x16xf32>
    %c0_631 = arith.constant 0 : index
    %c2_632 = arith.constant 2 : index
    %c26_633 = arith.constant 26 : index
    %581 = vector.load %arg3[%c0_631, %c2_632, %c26_633] : memref<1x8x27xf32, #tpu.memory_space<vmem>>, vector<1x1x1xf32>
    %582 = vector.shape_cast %581 : vector<1x1x1xf32> to vector<1x1xf32>
    %c0_634 = arith.constant 0 : index
    %c0_635 = arith.constant 0 : index
    %c2_636 = arith.constant 2 : index
    %c2_637 = arith.constant 2 : index
    %c2_638 = arith.constant 2 : index
    %583 = vector.load %arg2[%c0_634, %c0_635, %c2_636, %c2_637, %c2_638] : memref<1x1x3x18x18xf32, #tpu.memory_space<vmem>>, vector<1x1x1x16x16xf32>
    %584 = vector.shape_cast %583 : vector<1x1x1x16x16xf32> to vector<16x16xf32>
    %585 = vector.broadcast %582 : vector<1x1xf32> to vector<16x16xf32>
    %586 = arith.mulf %585, %584 : vector<16x16xf32>
    %587 = arith.addf %580, %586 : vector<16x16xf32>
    %c0_639 = arith.constant 0 : index
    %c2_640 = arith.constant 2 : index
    %c0_641 = arith.constant 0 : index
    %588 = vector.load %arg4[%c0_639, %c2_640, %c0_641] : memref<1x8x1xf32, #tpu.memory_space<vmem>>, vector<1x1x1xf32>
    %589 = vector.shape_cast %588 : vector<1x1x1xf32> to vector<1x1xf32>
    %590 = vector.broadcast %589 : vector<1x1xf32> to vector<16x16xf32>
    %591 = arith.addf %587, %590 : vector<16x16xf32>
    %cst_642 = arith.constant 0.000000e+00 : f32
    %592 = vector.broadcast %cst_642 : f32 to vector<16x16xf32>
    %593 = arith.maximumf %591, %592 : vector<16x16xf32>
    %c0_643 = arith.constant 0 : index
    %c2_644 = arith.constant 2 : index
    %c0_645 = arith.constant 0 : index
    %c0_646 = arith.constant 0 : index
    %594 = vector.load %arg5[%c0_643, %c2_644, %c0_645, %c0_646] : memref<1x8x16x16xf32, #tpu.memory_space<vmem>>, vector<1x1x16x16xf32>
    %595 = vector.shape_cast %594 : vector<1x1x16x16xf32> to vector<16x16xf32>
    %596 = vector.shape_cast %593 : vector<16x16xf32> to vector<1x1x16x16xf32>
    tpu.vector_store %arg5[%c0_643, %c2_644, %c0_645, %c0_646], %596 {strides = array<i32>} : memref<1x8x16x16xf32, #tpu.memory_space<vmem>>, vector<1x1x16x16xf32>,
    %cst_647 = arith.constant 0.000000e+00 : f32
    %597 = vector.broadcast %cst_647 : f32 to vector<16x16xf32>
    %c0_648 = arith.constant 0 : index
    %c3_649 = arith.constant 3 : index
    %c0_650 = arith.constant 0 : index
    %598 = vector.load %arg3[%c0_648, %c3_649, %c0_650] : memref<1x8x27xf32, #tpu.memory_space<vmem>>, vector<1x1x1xf32>
    %599 = vector.shape_cast %598 : vector<1x1x1xf32> to vector<1x1xf32>
    %c0_651 = arith.constant 0 : index
    %c0_652 = arith.constant 0 : index
    %c0_653 = arith.constant 0 : index
    %c0_654 = arith.constant 0 : index
    %c0_655 = arith.constant 0 : index
    %600 = vector.load %arg2[%c0_651, %c0_652, %c0_653, %c0_654, %c0_655] : memref<1x1x3x18x18xf32, #tpu.memory_space<vmem>>, vector<1x1x1x16x16xf32>
    %601 = vector.shape_cast %600 : vector<1x1x1x16x16xf32> to vector<16x16xf32>
    %602 = vector.broadcast %599 : vector<1x1xf32> to vector<16x16xf32>
    %603 = arith.mulf %602, %601 : vector<16x16xf32>
    %604 = arith.addf %597, %603 : vector<16x16xf32>
    %c0_656 = arith.constant 0 : index
    %c3_657 = arith.constant 3 : index
    %c1_658 = arith.constant 1 : index
    %605 = vector.load %arg3[%c0_656, %c3_657, %c1_658] : memref<1x8x27xf32, #tpu.memory_space<vmem>>, vector<1x1x1xf32>
    %606 = vector.shape_cast %605 : vector<1x1x1xf32> to vector<1x1xf32>
    %c0_659 = arith.constant 0 : index
    %c0_660 = arith.constant 0 : index
    %c0_661 = arith.constant 0 : index
    %c0_662 = arith.constant 0 : index
    %c1_663 = arith.constant 1 : index
    %607 = vector.load %arg2[%c0_659, %c0_660, %c0_661, %c0_662, %c1_663] : memref<1x1x3x18x18xf32, #tpu.memory_space<vmem>>, vector<1x1x1x16x16xf32>
    %608 = vector.shape_cast %607 : vector<1x1x1x16x16xf32> to vector<16x16xf32>
    %609 = vector.broadcast %606 : vector<1x1xf32> to vector<16x16xf32>
    %610 = arith.mulf %609, %608 : vector<16x16xf32>
    %611 = arith.addf %604, %610 : vector<16x16xf32>
    %c0_664 = arith.constant 0 : index
    %c3_665 = arith.constant 3 : index
    %c2_666 = arith.constant 2 : index
    %612 = vector.load %arg3[%c0_664, %c3_665, %c2_666] : memref<1x8x27xf32, #tpu.memory_space<vmem>>, vector<1x1x1xf32>
    %613 = vector.shape_cast %612 : vector<1x1x1xf32> to vector<1x1xf32>
    %c0_667 = arith.constant 0 : index
    %c0_668 = arith.constant 0 : index
    %c0_669 = arith.constant 0 : index
    %c0_670 = arith.constant 0 : index
    %c2_671 = arith.constant 2 : index
    %614 = vector.load %arg2[%c0_667, %c0_668, %c0_669, %c0_670, %c2_671] : memref<1x1x3x18x18xf32, #tpu.memory_space<vmem>>, vector<1x1x1x16x16xf32>
    %615 = vector.shape_cast %614 : vector<1x1x1x16x16xf32> to vector<16x16xf32>
    %616 = vector.broadcast %613 : vector<1x1xf32> to vector<16x16xf32>
    %617 = arith.mulf %616, %615 : vector<16x16xf32>
    %618 = arith.addf %611, %617 : vector<16x16xf32>
    %c0_672 = arith.constant 0 : index
    %c3_673 = arith.constant 3 : index
    %c3_674 = arith.constant 3 : index
    %619 = vector.load %arg3[%c0_672, %c3_673, %c3_674] : memref<1x8x27xf32, #tpu.memory_space<vmem>>, vector<1x1x1xf32>
    %620 = vector.shape_cast %619 : vector<1x1x1xf32> to vector<1x1xf32>
    %c0_675 = arith.constant 0 : index
    %c0_676 = arith.constant 0 : index
    %c0_677 = arith.constant 0 : index
    %c1_678 = arith.constant 1 : index
    %c0_679 = arith.constant 0 : index
    %621 = vector.load %arg2[%c0_675, %c0_676, %c0_677, %c1_678, %c0_679] : memref<1x1x3x18x18xf32, #tpu.memory_space<vmem>>, vector<1x1x1x16x16xf32>
    %622 = vector.shape_cast %621 : vector<1x1x1x16x16xf32> to vector<16x16xf32>
    %623 = vector.broadcast %620 : vector<1x1xf32> to vector<16x16xf32>
    %624 = arith.mulf %623, %622 : vector<16x16xf32>
    %625 = arith.addf %618, %624 : vector<16x16xf32>
    %c0_680 = arith.constant 0 : index
    %c3_681 = arith.constant 3 : index
    %c4_682 = arith.constant 4 : index
    %626 = vector.load %arg3[%c0_680, %c3_681, %c4_682] : memref<1x8x27xf32, #tpu.memory_space<vmem>>, vector<1x1x1xf32>
    %627 = vector.shape_cast %626 : vector<1x1x1xf32> to vector<1x1xf32>
    %c0_683 = arith.constant 0 : index
    %c0_684 = arith.constant 0 : index
    %c0_685 = arith.constant 0 : index
    %c1_686 = arith.constant 1 : index
    %c1_687 = arith.constant 1 : index
    %628 = vector.load %arg2[%c0_683, %c0_684, %c0_685, %c1_686, %c1_687] : memref<1x1x3x18x18xf32, #tpu.memory_space<vmem>>, vector<1x1x1x16x16xf32>
    %629 = vector.shape_cast %628 : vector<1x1x1x16x16xf32> to vector<16x16xf32>
    %630 = vector.broadcast %627 : vector<1x1xf32> to vector<16x16xf32>
    %631 = arith.mulf %630, %629 : vector<16x16xf32>
    %632 = arith.addf %625, %631 : vector<16x16xf32>
    %c0_688 = arith.constant 0 : index
    %c3_689 = arith.constant 3 : index
    %c5_690 = arith.constant 5 : index
    %633 = vector.load %arg3[%c0_688, %c3_689, %c5_690] : memref<1x8x27xf32, #tpu.memory_space<vmem>>, vector<1x1x1xf32>
    %634 = vector.shape_cast %633 : vector<1x1x1xf32> to vector<1x1xf32>
    %c0_691 = arith.constant 0 : index
    %c0_692 = arith.constant 0 : index
    %c0_693 = arith.constant 0 : index
    %c1_694 = arith.constant 1 : index
    %c2_695 = arith.constant 2 : index
    %635 = vector.load %arg2[%c0_691, %c0_692, %c0_693, %c1_694, %c2_695] : memref<1x1x3x18x18xf32, #tpu.memory_space<vmem>>, vector<1x1x1x16x16xf32>
    %636 = vector.shape_cast %635 : vector<1x1x1x16x16xf32> to vector<16x16xf32>
    %637 = vector.broadcast %634 : vector<1x1xf32> to vector<16x16xf32>
    %638 = arith.mulf %637, %636 : vector<16x16xf32>
    %639 = arith.addf %632, %638 : vector<16x16xf32>
    %c0_696 = arith.constant 0 : index
    %c3_697 = arith.constant 3 : index
    %c6_698 = arith.constant 6 : index
    %640 = vector.load %arg3[%c0_696, %c3_697, %c6_698] : memref<1x8x27xf32, #tpu.memory_space<vmem>>, vector<1x1x1xf32>
    %641 = vector.shape_cast %640 : vector<1x1x1xf32> to vector<1x1xf32>
    %c0_699 = arith.constant 0 : index
    %c0_700 = arith.constant 0 : index
    %c0_701 = arith.constant 0 : index
    %c2_702 = arith.constant 2 : index
    %c0_703 = arith.constant 0 : index
    %642 = vector.load %arg2[%c0_699, %c0_700, %c0_701, %c2_702, %c0_703] : memref<1x1x3x18x18xf32, #tpu.memory_space<vmem>>, vector<1x1x1x16x16xf32>
    %643 = vector.shape_cast %642 : vector<1x1x1x16x16xf32> to vector<16x16xf32>
    %644 = vector.broadcast %641 : vector<1x1xf32> to vector<16x16xf32>
    %645 = arith.mulf %644, %643 : vector<16x16xf32>
    %646 = arith.addf %639, %645 : vector<16x16xf32>
    %c0_704 = arith.constant 0 : index
    %c3_705 = arith.constant 3 : index
    %c7_706 = arith.constant 7 : index
    %647 = vector.load %arg3[%c0_704, %c3_705, %c7_706] : memref<1x8x27xf32, #tpu.memory_space<vmem>>, vector<1x1x1xf32>
    %648 = vector.shape_cast %647 : vector<1x1x1xf32> to vector<1x1xf32>
    %c0_707 = arith.constant 0 : index
    %c0_708 = arith.constant 0 : index
    %c0_709 = arith.constant 0 : index
    %c2_710 = arith.constant 2 : index
    %c1_711 = arith.constant 1 : index
    %649 = vector.load %arg2[%c0_707, %c0_708, %c0_709, %c2_710, %c1_711] : memref<1x1x3x18x18xf32, #tpu.memory_space<vmem>>, vector<1x1x1x16x16xf32>
    %650 = vector.shape_cast %649 : vector<1x1x1x16x16xf32> to vector<16x16xf32>
    %651 = vector.broadcast %648 : vector<1x1xf32> to vector<16x16xf32>
    %652 = arith.mulf %651, %650 : vector<16x16xf32>
    %653 = arith.addf %646, %652 : vector<16x16xf32>
    %c0_712 = arith.constant 0 : index
    %c3_713 = arith.constant 3 : index
    %c8_714 = arith.constant 8 : index
    %654 = vector.load %arg3[%c0_712, %c3_713, %c8_714] : memref<1x8x27xf32, #tpu.memory_space<vmem>>, vector<1x1x1xf32>
    %655 = vector.shape_cast %654 : vector<1x1x1xf32> to vector<1x1xf32>
    %c0_715 = arith.constant 0 : index
    %c0_716 = arith.constant 0 : index
    %c0_717 = arith.constant 0 : index
    %c2_718 = arith.constant 2 : index
    %c2_719 = arith.constant 2 : index
    %656 = vector.load %arg2[%c0_715, %c0_716, %c0_717, %c2_718, %c2_719] : memref<1x1x3x18x18xf32, #tpu.memory_space<vmem>>, vector<1x1x1x16x16xf32>
    %657 = vector.shape_cast %656 : vector<1x1x1x16x16xf32> to vector<16x16xf32>
    %658 = vector.broadcast %655 : vector<1x1xf32> to vector<16x16xf32>
    %659 = arith.mulf %658, %657 : vector<16x16xf32>
    %660 = arith.addf %653, %659 : vector<16x16xf32>
    %c0_720 = arith.constant 0 : index
    %c3_721 = arith.constant 3 : index
    %c9_722 = arith.constant 9 : index
    %661 = vector.load %arg3[%c0_720, %c3_721, %c9_722] : memref<1x8x27xf32, #tpu.memory_space<vmem>>, vector<1x1x1xf32>
    %662 = vector.shape_cast %661 : vector<1x1x1xf32> to vector<1x1xf32>
    %c0_723 = arith.constant 0 : index
    %c0_724 = arith.constant 0 : index
    %c1_725 = arith.constant 1 : index
    %c0_726 = arith.constant 0 : index
    %c0_727 = arith.constant 0 : index
    %663 = vector.load %arg2[%c0_723, %c0_724, %c1_725, %c0_726, %c0_727] : memref<1x1x3x18x18xf32, #tpu.memory_space<vmem>>, vector<1x1x1x16x16xf32>
    %664 = vector.shape_cast %663 : vector<1x1x1x16x16xf32> to vector<16x16xf32>
    %665 = vector.broadcast %662 : vector<1x1xf32> to vector<16x16xf32>
    %666 = arith.mulf %665, %664 : vector<16x16xf32>
    %667 = arith.addf %660, %666 : vector<16x16xf32>
    %c0_728 = arith.constant 0 : index
    %c3_729 = arith.constant 3 : index
    %c10_730 = arith.constant 10 : index
    %668 = vector.load %arg3[%c0_728, %c3_729, %c10_730] : memref<1x8x27xf32, #tpu.memory_space<vmem>>, vector<1x1x1xf32>
    %669 = vector.shape_cast %668 : vector<1x1x1xf32> to vector<1x1xf32>
    %c0_731 = arith.constant 0 : index
    %c0_732 = arith.constant 0 : index
    %c1_733 = arith.constant 1 : index
    %c0_734 = arith.constant 0 : index
    %c1_735 = arith.constant 1 : index
    %670 = vector.load %arg2[%c0_731, %c0_732, %c1_733, %c0_734, %c1_735] : memref<1x1x3x18x18xf32, #tpu.memory_space<vmem>>, vector<1x1x1x16x16xf32>
    %671 = vector.shape_cast %670 : vector<1x1x1x16x16xf32> to vector<16x16xf32>
    %672 = vector.broadcast %669 : vector<1x1xf32> to vector<16x16xf32>
    %673 = arith.mulf %672, %671 : vector<16x16xf32>
    %674 = arith.addf %667, %673 : vector<16x16xf32>
    %c0_736 = arith.constant 0 : index
    %c3_737 = arith.constant 3 : index
    %c11_738 = arith.constant 11 : index
    %675 = vector.load %arg3[%c0_736, %c3_737, %c11_738] : memref<1x8x27xf32, #tpu.memory_space<vmem>>, vector<1x1x1xf32>
    %676 = vector.shape_cast %675 : vector<1x1x1xf32> to vector<1x1xf32>
    %c0_739 = arith.constant 0 : index
    %c0_740 = arith.constant 0 : index
    %c1_741 = arith.constant 1 : index
    %c0_742 = arith.constant 0 : index
    %c2_743 = arith.constant 2 : index
    %677 = vector.load %arg2[%c0_739, %c0_740, %c1_741, %c0_742, %c2_743] : memref<1x1x3x18x18xf32, #tpu.memory_space<vmem>>, vector<1x1x1x16x16xf32>
    %678 = vector.shape_cast %677 : vector<1x1x1x16x16xf32> to vector<16x16xf32>
    %679 = vector.broadcast %676 : vector<1x1xf32> to vector<16x16xf32>
    %680 = arith.mulf %679, %678 : vector<16x16xf32>
    %681 = arith.addf %674, %680 : vector<16x16xf32>
    %c0_744 = arith.constant 0 : index
    %c3_745 = arith.constant 3 : index
    %c12_746 = arith.constant 12 : index
    %682 = vector.load %arg3[%c0_744, %c3_745, %c12_746] : memref<1x8x27xf32, #tpu.memory_space<vmem>>, vector<1x1x1xf32>
    %683 = vector.shape_cast %682 : vector<1x1x1xf32> to vector<1x1xf32>
    %c0_747 = arith.constant 0 : index
    %c0_748 = arith.constant 0 : index
    %c1_749 = arith.constant 1 : index
    %c1_750 = arith.constant 1 : index
    %c0_751 = arith.constant 0 : index
    %684 = vector.load %arg2[%c0_747, %c0_748, %c1_749, %c1_750, %c0_751] : memref<1x1x3x18x18xf32, #tpu.memory_space<vmem>>, vector<1x1x1x16x16xf32>
    %685 = vector.shape_cast %684 : vector<1x1x1x16x16xf32> to vector<16x16xf32>
    %686 = vector.broadcast %683 : vector<1x1xf32> to vector<16x16xf32>
    %687 = arith.mulf %686, %685 : vector<16x16xf32>
    %688 = arith.addf %681, %687 : vector<16x16xf32>
    %c0_752 = arith.constant 0 : index
    %c3_753 = arith.constant 3 : index
    %c13_754 = arith.constant 13 : index
    %689 = vector.load %arg3[%c0_752, %c3_753, %c13_754] : memref<1x8x27xf32, #tpu.memory_space<vmem>>, vector<1x1x1xf32>
    %690 = vector.shape_cast %689 : vector<1x1x1xf32> to vector<1x1xf32>
    %c0_755 = arith.constant 0 : index
    %c0_756 = arith.constant 0 : index
    %c1_757 = arith.constant 1 : index
    %c1_758 = arith.constant 1 : index
    %c1_759 = arith.constant 1 : index
    %691 = vector.load %arg2[%c0_755, %c0_756, %c1_757, %c1_758, %c1_759] : memref<1x1x3x18x18xf32, #tpu.memory_space<vmem>>, vector<1x1x1x16x16xf32>
    %692 = vector.shape_cast %691 : vector<1x1x1x16x16xf32> to vector<16x16xf32>
    %693 = vector.broadcast %690 : vector<1x1xf32> to vector<16x16xf32>
    %694 = arith.mulf %693, %692 : vector<16x16xf32>
    %695 = arith.addf %688, %694 : vector<16x16xf32>
    %c0_760 = arith.constant 0 : index
    %c3_761 = arith.constant 3 : index
    %c14_762 = arith.constant 14 : index
    %696 = vector.load %arg3[%c0_760, %c3_761, %c14_762] : memref<1x8x27xf32, #tpu.memory_space<vmem>>, vector<1x1x1xf32>
    %697 = vector.shape_cast %696 : vector<1x1x1xf32> to vector<1x1xf32>
    %c0_763 = arith.constant 0 : index
    %c0_764 = arith.constant 0 : index
    %c1_765 = arith.constant 1 : index
    %c1_766 = arith.constant 1 : index
    %c2_767 = arith.constant 2 : index
    %698 = vector.load %arg2[%c0_763, %c0_764, %c1_765, %c1_766, %c2_767] : memref<1x1x3x18x18xf32, #tpu.memory_space<vmem>>, vector<1x1x1x16x16xf32>
    %699 = vector.shape_cast %698 : vector<1x1x1x16x16xf32> to vector<16x16xf32>
    %700 = vector.broadcast %697 : vector<1x1xf32> to vector<16x16xf32>
    %701 = arith.mulf %700, %699 : vector<16x16xf32>
    %702 = arith.addf %695, %701 : vector<16x16xf32>
    %c0_768 = arith.constant 0 : index
    %c3_769 = arith.constant 3 : index
    %c15_770 = arith.constant 15 : index
    %703 = vector.load %arg3[%c0_768, %c3_769, %c15_770] : memref<1x8x27xf32, #tpu.memory_space<vmem>>, vector<1x1x1xf32>
    %704 = vector.shape_cast %703 : vector<1x1x1xf32> to vector<1x1xf32>
    %c0_771 = arith.constant 0 : index
    %c0_772 = arith.constant 0 : index
    %c1_773 = arith.constant 1 : index
    %c2_774 = arith.constant 2 : index
    %c0_775 = arith.constant 0 : index
    %705 = vector.load %arg2[%c0_771, %c0_772, %c1_773, %c2_774, %c0_775] : memref<1x1x3x18x18xf32, #tpu.memory_space<vmem>>, vector<1x1x1x16x16xf32>
    %706 = vector.shape_cast %705 : vector<1x1x1x16x16xf32> to vector<16x16xf32>
    %707 = vector.broadcast %704 : vector<1x1xf32> to vector<16x16xf32>
    %708 = arith.mulf %707, %706 : vector<16x16xf32>
    %709 = arith.addf %702, %708 : vector<16x16xf32>
    %c0_776 = arith.constant 0 : index
    %c3_777 = arith.constant 3 : index
    %c16_778 = arith.constant 16 : index
    %710 = vector.load %arg3[%c0_776, %c3_777, %c16_778] : memref<1x8x27xf32, #tpu.memory_space<vmem>>, vector<1x1x1xf32>
    %711 = vector.shape_cast %710 : vector<1x1x1xf32> to vector<1x1xf32>
    %c0_779 = arith.constant 0 : index
    %c0_780 = arith.constant 0 : index
    %c1_781 = arith.constant 1 : index
    %c2_782 = arith.constant 2 : index
    %c1_783 = arith.constant 1 : index
    %712 = vector.load %arg2[%c0_779, %c0_780, %c1_781, %c2_782, %c1_783] : memref<1x1x3x18x18xf32, #tpu.memory_space<vmem>>, vector<1x1x1x16x16xf32>
    %713 = vector.shape_cast %712 : vector<1x1x1x16x16xf32> to vector<16x16xf32>
    %714 = vector.broadcast %711 : vector<1x1xf32> to vector<16x16xf32>
    %715 = arith.mulf %714, %713 : vector<16x16xf32>
    %716 = arith.addf %709, %715 : vector<16x16xf32>
    %c0_784 = arith.constant 0 : index
    %c3_785 = arith.constant 3 : index
    %c17_786 = arith.constant 17 : index
    %717 = vector.load %arg3[%c0_784, %c3_785, %c17_786] : memref<1x8x27xf32, #tpu.memory_space<vmem>>, vector<1x1x1xf32>
    %718 = vector.shape_cast %717 : vector<1x1x1xf32> to vector<1x1xf32>
    %c0_787 = arith.constant 0 : index
    %c0_788 = arith.constant 0 : index
    %c1_789 = arith.constant 1 : index
    %c2_790 = arith.constant 2 : index
    %c2_791 = arith.constant 2 : index
    %719 = vector.load %arg2[%c0_787, %c0_788, %c1_789, %c2_790, %c2_791] : memref<1x1x3x18x18xf32, #tpu.memory_space<vmem>>, vector<1x1x1x16x16xf32>
    %720 = vector.shape_cast %719 : vector<1x1x1x16x16xf32> to vector<16x16xf32>
    %721 = vector.broadcast %718 : vector<1x1xf32> to vector<16x16xf32>
    %722 = arith.mulf %721, %720 : vector<16x16xf32>
    %723 = arith.addf %716, %722 : vector<16x16xf32>
    %c0_792 = arith.constant 0 : index
    %c3_793 = arith.constant 3 : index
    %c18_794 = arith.constant 18 : index
    %724 = vector.load %arg3[%c0_792, %c3_793, %c18_794] : memref<1x8x27xf32, #tpu.memory_space<vmem>>, vector<1x1x1xf32>
    %725 = vector.shape_cast %724 : vector<1x1x1xf32> to vector<1x1xf32>
    %c0_795 = arith.constant 0 : index
    %c0_796 = arith.constant 0 : index
    %c2_797 = arith.constant 2 : index
    %c0_798 = arith.constant 0 : index
    %c0_799 = arith.constant 0 : index
    %726 = vector.load %arg2[%c0_795, %c0_796, %c2_797, %c0_798, %c0_799] : memref<1x1x3x18x18xf32, #tpu.memory_space<vmem>>, vector<1x1x1x16x16xf32>
    %727 = vector.shape_cast %726 : vector<1x1x1x16x16xf32> to vector<16x16xf32>
    %728 = vector.broadcast %725 : vector<1x1xf32> to vector<16x16xf32>
    %729 = arith.mulf %728, %727 : vector<16x16xf32>
    %730 = arith.addf %723, %729 : vector<16x16xf32>
    %c0_800 = arith.constant 0 : index
    %c3_801 = arith.constant 3 : index
    %c19_802 = arith.constant 19 : index
    %731 = vector.load %arg3[%c0_800, %c3_801, %c19_802] : memref<1x8x27xf32, #tpu.memory_space<vmem>>, vector<1x1x1xf32>
    %732 = vector.shape_cast %731 : vector<1x1x1xf32> to vector<1x1xf32>
    %c0_803 = arith.constant 0 : index
    %c0_804 = arith.constant 0 : index
    %c2_805 = arith.constant 2 : index
    %c0_806 = arith.constant 0 : index
    %c1_807 = arith.constant 1 : index
    %733 = vector.load %arg2[%c0_803, %c0_804, %c2_805, %c0_806, %c1_807] : memref<1x1x3x18x18xf32, #tpu.memory_space<vmem>>, vector<1x1x1x16x16xf32>
    %734 = vector.shape_cast %733 : vector<1x1x1x16x16xf32> to vector<16x16xf32>
    %735 = vector.broadcast %732 : vector<1x1xf32> to vector<16x16xf32>
    %736 = arith.mulf %735, %734 : vector<16x16xf32>
    %737 = arith.addf %730, %736 : vector<16x16xf32>
    %c0_808 = arith.constant 0 : index
    %c3_809 = arith.constant 3 : index
    %c20_810 = arith.constant 20 : index
    %738 = vector.load %arg3[%c0_808, %c3_809, %c20_810] : memref<1x8x27xf32, #tpu.memory_space<vmem>>, vector<1x1x1xf32>
    %739 = vector.shape_cast %738 : vector<1x1x1xf32> to vector<1x1xf32>
    %c0_811 = arith.constant 0 : index
    %c0_812 = arith.constant 0 : index
    %c2_813 = arith.constant 2 : index
    %c0_814 = arith.constant 0 : index
    %c2_815 = arith.constant 2 : index
    %740 = vector.load %arg2[%c0_811, %c0_812, %c2_813, %c0_814, %c2_815] : memref<1x1x3x18x18xf32, #tpu.memory_space<vmem>>, vector<1x1x1x16x16xf32>
    %741 = vector.shape_cast %740 : vector<1x1x1x16x16xf32> to vector<16x16xf32>
    %742 = vector.broadcast %739 : vector<1x1xf32> to vector<16x16xf32>
    %743 = arith.mulf %742, %741 : vector<16x16xf32>
    %744 = arith.addf %737, %743 : vector<16x16xf32>
    %c0_816 = arith.constant 0 : index
    %c3_817 = arith.constant 3 : index
    %c21_818 = arith.constant 21 : index
    %745 = vector.load %arg3[%c0_816, %c3_817, %c21_818] : memref<1x8x27xf32, #tpu.memory_space<vmem>>, vector<1x1x1xf32>
    %746 = vector.shape_cast %745 : vector<1x1x1xf32> to vector<1x1xf32>
    %c0_819 = arith.constant 0 : index
    %c0_820 = arith.constant 0 : index
    %c2_821 = arith.constant 2 : index
    %c1_822 = arith.constant 1 : index
    %c0_823 = arith.constant 0 : index
    %747 = vector.load %arg2[%c0_819, %c0_820, %c2_821, %c1_822, %c0_823] : memref<1x1x3x18x18xf32, #tpu.memory_space<vmem>>, vector<1x1x1x16x16xf32>
    %748 = vector.shape_cast %747 : vector<1x1x1x16x16xf32> to vector<16x16xf32>
    %749 = vector.broadcast %746 : vector<1x1xf32> to vector<16x16xf32>
    %750 = arith.mulf %749, %748 : vector<16x16xf32>
    %751 = arith.addf %744, %750 : vector<16x16xf32>
    %c0_824 = arith.constant 0 : index
    %c3_825 = arith.constant 3 : index
    %c22_826 = arith.constant 22 : index
    %752 = vector.load %arg3[%c0_824, %c3_825, %c22_826] : memref<1x8x27xf32, #tpu.memory_space<vmem>>, vector<1x1x1xf32>
    %753 = vector.shape_cast %752 : vector<1x1x1xf32> to vector<1x1xf32>
    %c0_827 = arith.constant 0 : index
    %c0_828 = arith.constant 0 : index
    %c2_829 = arith.constant 2 : index
    %c1_830 = arith.constant 1 : index
    %c1_831 = arith.constant 1 : index
    %754 = vector.load %arg2[%c0_827, %c0_828, %c2_829, %c1_830, %c1_831] : memref<1x1x3x18x18xf32, #tpu.memory_space<vmem>>, vector<1x1x1x16x16xf32>
    %755 = vector.shape_cast %754 : vector<1x1x1x16x16xf32> to vector<16x16xf32>
    %756 = vector.broadcast %753 : vector<1x1xf32> to vector<16x16xf32>
    %757 = arith.mulf %756, %755 : vector<16x16xf32>
    %758 = arith.addf %751, %757 : vector<16x16xf32>
    %c0_832 = arith.constant 0 : index
    %c3_833 = arith.constant 3 : index
    %c23_834 = arith.constant 23 : index
    %759 = vector.load %arg3[%c0_832, %c3_833, %c23_834] : memref<1x8x27xf32, #tpu.memory_space<vmem>>, vector<1x1x1xf32>
    %760 = vector.shape_cast %759 : vector<1x1x1xf32> to vector<1x1xf32>
    %c0_835 = arith.constant 0 : index
    %c0_836 = arith.constant 0 : index
    %c2_837 = arith.constant 2 : index
    %c1_838 = arith.constant 1 : index
    %c2_839 = arith.constant 2 : index
    %761 = vector.load %arg2[%c0_835, %c0_836, %c2_837, %c1_838, %c2_839] : memref<1x1x3x18x18xf32, #tpu.memory_space<vmem>>, vector<1x1x1x16x16xf32>
    %762 = vector.shape_cast %761 : vector<1x1x1x16x16xf32> to vector<16x16xf32>
    %763 = vector.broadcast %760 : vector<1x1xf32> to vector<16x16xf32>
    %764 = arith.mulf %763, %762 : vector<16x16xf32>
    %765 = arith.addf %758, %764 : vector<16x16xf32>
    %c0_840 = arith.constant 0 : index
    %c3_841 = arith.constant 3 : index
    %c24_842 = arith.constant 24 : index
    %766 = vector.load %arg3[%c0_840, %c3_841, %c24_842] : memref<1x8x27xf32, #tpu.memory_space<vmem>>, vector<1x1x1xf32>
    %767 = vector.shape_cast %766 : vector<1x1x1xf32> to vector<1x1xf32>
    %c0_843 = arith.constant 0 : index
    %c0_844 = arith.constant 0 : index
    %c2_845 = arith.constant 2 : index
    %c2_846 = arith.constant 2 : index
    %c0_847 = arith.constant 0 : index
    %768 = vector.load %arg2[%c0_843, %c0_844, %c2_845, %c2_846, %c0_847] : memref<1x1x3x18x18xf32, #tpu.memory_space<vmem>>, vector<1x1x1x16x16xf32>
    %769 = vector.shape_cast %768 : vector<1x1x1x16x16xf32> to vector<16x16xf32>
    %770 = vector.broadcast %767 : vector<1x1xf32> to vector<16x16xf32>
    %771 = arith.mulf %770, %769 : vector<16x16xf32>
    %772 = arith.addf %765, %771 : vector<16x16xf32>
    %c0_848 = arith.constant 0 : index
    %c3_849 = arith.constant 3 : index
    %c25_850 = arith.constant 25 : index
    %773 = vector.load %arg3[%c0_848, %c3_849, %c25_850] : memref<1x8x27xf32, #tpu.memory_space<vmem>>, vector<1x1x1xf32>
    %774 = vector.shape_cast %773 : vector<1x1x1xf32> to vector<1x1xf32>
    %c0_851 = arith.constant 0 : index
    %c0_852 = arith.constant 0 : index
    %c2_853 = arith.constant 2 : index
    %c2_854 = arith.constant 2 : index
    %c1_855 = arith.constant 1 : index
    %775 = vector.load %arg2[%c0_851, %c0_852, %c2_853, %c2_854, %c1_855] : memref<1x1x3x18x18xf32, #tpu.memory_space<vmem>>, vector<1x1x1x16x16xf32>
    %776 = vector.shape_cast %775 : vector<1x1x1x16x16xf32> to vector<16x16xf32>
    %777 = vector.broadcast %774 : vector<1x1xf32> to vector<16x16xf32>
    %778 = arith.mulf %777, %776 : vector<16x16xf32>
    %779 = arith.addf %772, %778 : vector<16x16xf32>
    %c0_856 = arith.constant 0 : index
    %c3_857 = arith.constant 3 : index
    %c26_858 = arith.constant 26 : index
    %780 = vector.load %arg3[%c0_856, %c3_857, %c26_858] : memref<1x8x27xf32, #tpu.memory_space<vmem>>, vector<1x1x1xf32>
    %781 = vector.shape_cast %780 : vector<1x1x1xf32> to vector<1x1xf32>
    %c0_859 = arith.constant 0 : index
    %c0_860 = arith.constant 0 : index
    %c2_861 = arith.constant 2 : index
    %c2_862 = arith.constant 2 : index
    %c2_863 = arith.constant 2 : index
    %782 = vector.load %arg2[%c0_859, %c0_860, %c2_861, %c2_862, %c2_863] : memref<1x1x3x18x18xf32, #tpu.memory_space<vmem>>, vector<1x1x1x16x16xf32>
    %783 = vector.shape_cast %782 : vector<1x1x1x16x16xf32> to vector<16x16xf32>
    %784 = vector.broadcast %781 : vector<1x1xf32> to vector<16x16xf32>
    %785 = arith.mulf %784, %783 : vector<16x16xf32>
    %786 = arith.addf %779, %785 : vector<16x16xf32>
    %c0_864 = arith.constant 0 : index
    %c3_865 = arith.constant 3 : index
    %c0_866 = arith.constant 0 : index
    %787 = vector.load %arg4[%c0_864, %c3_865, %c0_866] : memref<1x8x1xf32, #tpu.memory_space<vmem>>, vector<1x1x1xf32>
    %788 = vector.shape_cast %787 : vector<1x1x1xf32> to vector<1x1xf32>
    %789 = vector.broadcast %788 : vector<1x1xf32> to vector<16x16xf32>
    %790 = arith.addf %786, %789 : vector<16x16xf32>
    %cst_867 = arith.constant 0.000000e+00 : f32
    %791 = vector.broadcast %cst_867 : f32 to vector<16x16xf32>
    %792 = arith.maximumf %790, %791 : vector<16x16xf32>
    %c0_868 = arith.constant 0 : index
    %c3_869 = arith.constant 3 : index
    %c0_870 = arith.constant 0 : index
    %c0_871 = arith.constant 0 : index
    %793 = vector.load %arg5[%c0_868, %c3_869, %c0_870, %c0_871] : memref<1x8x16x16xf32, #tpu.memory_space<vmem>>, vector<1x1x16x16xf32>
    %794 = vector.shape_cast %793 : vector<1x1x16x16xf32> to vector<16x16xf32>
    %795 = vector.shape_cast %792 : vector<16x16xf32> to vector<1x1x16x16xf32>
    tpu.vector_store %arg5[%c0_868, %c3_869, %c0_870, %c0_871], %795 {strides = array<i32>} : memref<1x8x16x16xf32, #tpu.memory_space<vmem>>, vector<1x1x16x16xf32>,
    %cst_872 = arith.constant 0.000000e+00 : f32
    %796 = vector.broadcast %cst_872 : f32 to vector<16x16xf32>
    %c0_873 = arith.constant 0 : index
    %c4_874 = arith.constant 4 : index
    %c0_875 = arith.constant 0 : index
    %797 = vector.load %arg3[%c0_873, %c4_874, %c0_875] : memref<1x8x27xf32, #tpu.memory_space<vmem>>, vector<1x1x1xf32>
    %798 = vector.shape_cast %797 : vector<1x1x1xf32> to vector<1x1xf32>
    %c0_876 = arith.constant 0 : index
    %c0_877 = arith.constant 0 : index
    %c0_878 = arith.constant 0 : index
    %c0_879 = arith.constant 0 : index
    %c0_880 = arith.constant 0 : index
    %799 = vector.load %arg2[%c0_876, %c0_877, %c0_878, %c0_879, %c0_880] : memref<1x1x3x18x18xf32, #tpu.memory_space<vmem>>, vector<1x1x1x16x16xf32>
    %800 = vector.shape_cast %799 : vector<1x1x1x16x16xf32> to vector<16x16xf32>
    %801 = vector.broadcast %798 : vector<1x1xf32> to vector<16x16xf32>
    %802 = arith.mulf %801, %800 : vector<16x16xf32>
    %803 = arith.addf %796, %802 : vector<16x16xf32>
    %c0_881 = arith.constant 0 : index
    %c4_882 = arith.constant 4 : index
    %c1_883 = arith.constant 1 : index
    %804 = vector.load %arg3[%c0_881, %c4_882, %c1_883] : memref<1x8x27xf32, #tpu.memory_space<vmem>>, vector<1x1x1xf32>
    %805 = vector.shape_cast %804 : vector<1x1x1xf32> to vector<1x1xf32>
    %c0_884 = arith.constant 0 : index
    %c0_885 = arith.constant 0 : index
    %c0_886 = arith.constant 0 : index
    %c0_887 = arith.constant 0 : index
    %c1_888 = arith.constant 1 : index
    %806 = vector.load %arg2[%c0_884, %c0_885, %c0_886, %c0_887, %c1_888] : memref<1x1x3x18x18xf32, #tpu.memory_space<vmem>>, vector<1x1x1x16x16xf32>
    %807 = vector.shape_cast %806 : vector<1x1x1x16x16xf32> to vector<16x16xf32>
    %808 = vector.broadcast %805 : vector<1x1xf32> to vector<16x16xf32>
    %809 = arith.mulf %808, %807 : vector<16x16xf32>
    %810 = arith.addf %803, %809 : vector<16x16xf32>
    %c0_889 = arith.constant 0 : index
    %c4_890 = arith.constant 4 : index
    %c2_891 = arith.constant 2 : index
    %811 = vector.load %arg3[%c0_889, %c4_890, %c2_891] : memref<1x8x27xf32, #tpu.memory_space<vmem>>, vector<1x1x1xf32>
    %812 = vector.shape_cast %811 : vector<1x1x1xf32> to vector<1x1xf32>
    %c0_892 = arith.constant 0 : index
    %c0_893 = arith.constant 0 : index
    %c0_894 = arith.constant 0 : index
    %c0_895 = arith.constant 0 : index
    %c2_896 = arith.constant 2 : index
    %813 = vector.load %arg2[%c0_892, %c0_893, %c0_894, %c0_895, %c2_896] : memref<1x1x3x18x18xf32, #tpu.memory_space<vmem>>, vector<1x1x1x16x16xf32>
    %814 = vector.shape_cast %813 : vector<1x1x1x16x16xf32> to vector<16x16xf32>
    %815 = vector.broadcast %812 : vector<1x1xf32> to vector<16x16xf32>
    %816 = arith.mulf %815, %814 : vector<16x16xf32>
    %817 = arith.addf %810, %816 : vector<16x16xf32>
    %c0_897 = arith.constant 0 : index
    %c4_898 = arith.constant 4 : index
    %c3_899 = arith.constant 3 : index
    %818 = vector.load %arg3[%c0_897, %c4_898, %c3_899] : memref<1x8x27xf32, #tpu.memory_space<vmem>>, vector<1x1x1xf32>
    %819 = vector.shape_cast %818 : vector<1x1x1xf32> to vector<1x1xf32>
    %c0_900 = arith.constant 0 : index
    %c0_901 = arith.constant 0 : index
    %c0_902 = arith.constant 0 : index
    %c1_903 = arith.constant 1 : index
    %c0_904 = arith.constant 0 : index
    %820 = vector.load %arg2[%c0_900, %c0_901, %c0_902, %c1_903, %c0_904] : memref<1x1x3x18x18xf32, #tpu.memory_space<vmem>>, vector<1x1x1x16x16xf32>
    %821 = vector.shape_cast %820 : vector<1x1x1x16x16xf32> to vector<16x16xf32>
    %822 = vector.broadcast %819 : vector<1x1xf32> to vector<16x16xf32>
    %823 = arith.mulf %822, %821 : vector<16x16xf32>
    %824 = arith.addf %817, %823 : vector<16x16xf32>
    %c0_905 = arith.constant 0 : index
    %c4_906 = arith.constant 4 : index
    %c4_907 = arith.constant 4 : index
    %825 = vector.load %arg3[%c0_905, %c4_906, %c4_907] : memref<1x8x27xf32, #tpu.memory_space<vmem>>, vector<1x1x1xf32>
    %826 = vector.shape_cast %825 : vector<1x1x1xf32> to vector<1x1xf32>
    %c0_908 = arith.constant 0 : index
    %c0_909 = arith.constant 0 : index
    %c0_910 = arith.constant 0 : index
    %c1_911 = arith.constant 1 : index
    %c1_912 = arith.constant 1 : index
    %827 = vector.load %arg2[%c0_908, %c0_909, %c0_910, %c1_911, %c1_912] : memref<1x1x3x18x18xf32, #tpu.memory_space<vmem>>, vector<1x1x1x16x16xf32>
    %828 = vector.shape_cast %827 : vector<1x1x1x16x16xf32> to vector<16x16xf32>
    %829 = vector.broadcast %826 : vector<1x1xf32> to vector<16x16xf32>
    %830 = arith.mulf %829, %828 : vector<16x16xf32>
    %831 = arith.addf %824, %830 : vector<16x16xf32>
    %c0_913 = arith.constant 0 : index
    %c4_914 = arith.constant 4 : index
    %c5_915 = arith.constant 5 : index
    %832 = vector.load %arg3[%c0_913, %c4_914, %c5_915] : memref<1x8x27xf32, #tpu.memory_space<vmem>>, vector<1x1x1xf32>
    %833 = vector.shape_cast %832 : vector<1x1x1xf32> to vector<1x1xf32>
    %c0_916 = arith.constant 0 : index
    %c0_917 = arith.constant 0 : index
    %c0_918 = arith.constant 0 : index
    %c1_919 = arith.constant 1 : index
    %c2_920 = arith.constant 2 : index
    %834 = vector.load %arg2[%c0_916, %c0_917, %c0_918, %c1_919, %c2_920] : memref<1x1x3x18x18xf32, #tpu.memory_space<vmem>>, vector<1x1x1x16x16xf32>
    %835 = vector.shape_cast %834 : vector<1x1x1x16x16xf32> to vector<16x16xf32>
    %836 = vector.broadcast %833 : vector<1x1xf32> to vector<16x16xf32>
    %837 = arith.mulf %836, %835 : vector<16x16xf32>
    %838 = arith.addf %831, %837 : vector<16x16xf32>
    %c0_921 = arith.constant 0 : index
    %c4_922 = arith.constant 4 : index
    %c6_923 = arith.constant 6 : index
    %839 = vector.load %arg3[%c0_921, %c4_922, %c6_923] : memref<1x8x27xf32, #tpu.memory_space<vmem>>, vector<1x1x1xf32>
    %840 = vector.shape_cast %839 : vector<1x1x1xf32> to vector<1x1xf32>
    %c0_924 = arith.constant 0 : index
    %c0_925 = arith.constant 0 : index
    %c0_926 = arith.constant 0 : index
    %c2_927 = arith.constant 2 : index
    %c0_928 = arith.constant 0 : index
    %841 = vector.load %arg2[%c0_924, %c0_925, %c0_926, %c2_927, %c0_928] : memref<1x1x3x18x18xf32, #tpu.memory_space<vmem>>, vector<1x1x1x16x16xf32>
    %842 = vector.shape_cast %841 : vector<1x1x1x16x16xf32> to vector<16x16xf32>
    %843 = vector.broadcast %840 : vector<1x1xf32> to vector<16x16xf32>
    %844 = arith.mulf %843, %842 : vector<16x16xf32>
    %845 = arith.addf %838, %844 : vector<16x16xf32>
    %c0_929 = arith.constant 0 : index
    %c4_930 = arith.constant 4 : index
    %c7_931 = arith.constant 7 : index
    %846 = vector.load %arg3[%c0_929, %c4_930, %c7_931] : memref<1x8x27xf32, #tpu.memory_space<vmem>>, vector<1x1x1xf32>
    %847 = vector.shape_cast %846 : vector<1x1x1xf32> to vector<1x1xf32>
    %c0_932 = arith.constant 0 : index
    %c0_933 = arith.constant 0 : index
    %c0_934 = arith.constant 0 : index
    %c2_935 = arith.constant 2 : index
    %c1_936 = arith.constant 1 : index
    %848 = vector.load %arg2[%c0_932, %c0_933, %c0_934, %c2_935, %c1_936] : memref<1x1x3x18x18xf32, #tpu.memory_space<vmem>>, vector<1x1x1x16x16xf32>
    %849 = vector.shape_cast %848 : vector<1x1x1x16x16xf32> to vector<16x16xf32>
    %850 = vector.broadcast %847 : vector<1x1xf32> to vector<16x16xf32>
    %851 = arith.mulf %850, %849 : vector<16x16xf32>
    %852 = arith.addf %845, %851 : vector<16x16xf32>
    %c0_937 = arith.constant 0 : index
    %c4_938 = arith.constant 4 : index
    %c8_939 = arith.constant 8 : index
    %853 = vector.load %arg3[%c0_937, %c4_938, %c8_939] : memref<1x8x27xf32, #tpu.memory_space<vmem>>, vector<1x1x1xf32>
    %854 = vector.shape_cast %853 : vector<1x1x1xf32> to vector<1x1xf32>
    %c0_940 = arith.constant 0 : index
    %c0_941 = arith.constant 0 : index
    %c0_942 = arith.constant 0 : index
    %c2_943 = arith.constant 2 : index
    %c2_944 = arith.constant 2 : index
    %855 = vector.load %arg2[%c0_940, %c0_941, %c0_942, %c2_943, %c2_944] : memref<1x1x3x18x18xf32, #tpu.memory_space<vmem>>, vector<1x1x1x16x16xf32>
    %856 = vector.shape_cast %855 : vector<1x1x1x16x16xf32> to vector<16x16xf32>
    %857 = vector.broadcast %854 : vector<1x1xf32> to vector<16x16xf32>
    %858 = arith.mulf %857, %856 : vector<16x16xf32>
    %859 = arith.addf %852, %858 : vector<16x16xf32>
    %c0_945 = arith.constant 0 : index
    %c4_946 = arith.constant 4 : index
    %c9_947 = arith.constant 9 : index
    %860 = vector.load %arg3[%c0_945, %c4_946, %c9_947] : memref<1x8x27xf32, #tpu.memory_space<vmem>>, vector<1x1x1xf32>
    %861 = vector.shape_cast %860 : vector<1x1x1xf32> to vector<1x1xf32>
    %c0_948 = arith.constant 0 : index
    %c0_949 = arith.constant 0 : index
    %c1_950 = arith.constant 1 : index
    %c0_951 = arith.constant 0 : index
    %c0_952 = arith.constant 0 : index
    %862 = vector.load %arg2[%c0_948, %c0_949, %c1_950, %c0_951, %c0_952] : memref<1x1x3x18x18xf32, #tpu.memory_space<vmem>>, vector<1x1x1x16x16xf32>
    %863 = vector.shape_cast %862 : vector<1x1x1x16x16xf32> to vector<16x16xf32>
    %864 = vector.broadcast %861 : vector<1x1xf32> to vector<16x16xf32>
    %865 = arith.mulf %864, %863 : vector<16x16xf32>
    %866 = arith.addf %859, %865 : vector<16x16xf32>
    %c0_953 = arith.constant 0 : index
    %c4_954 = arith.constant 4 : index
    %c10_955 = arith.constant 10 : index
    %867 = vector.load %arg3[%c0_953, %c4_954, %c10_955] : memref<1x8x27xf32, #tpu.memory_space<vmem>>, vector<1x1x1xf32>
    %868 = vector.shape_cast %867 : vector<1x1x1xf32> to vector<1x1xf32>
    %c0_956 = arith.constant 0 : index
    %c0_957 = arith.constant 0 : index
    %c1_958 = arith.constant 1 : index
    %c0_959 = arith.constant 0 : index
    %c1_960 = arith.constant 1 : index
    %869 = vector.load %arg2[%c0_956, %c0_957, %c1_958, %c0_959, %c1_960] : memref<1x1x3x18x18xf32, #tpu.memory_space<vmem>>, vector<1x1x1x16x16xf32>
    %870 = vector.shape_cast %869 : vector<1x1x1x16x16xf32> to vector<16x16xf32>
    %871 = vector.broadcast %868 : vector<1x1xf32> to vector<16x16xf32>
    %872 = arith.mulf %871, %870 : vector<16x16xf32>
    %873 = arith.addf %866, %872 : vector<16x16xf32>
    %c0_961 = arith.constant 0 : index
    %c4_962 = arith.constant 4 : index
    %c11_963 = arith.constant 11 : index
    %874 = vector.load %arg3[%c0_961, %c4_962, %c11_963] : memref<1x8x27xf32, #tpu.memory_space<vmem>>, vector<1x1x1xf32>
    %875 = vector.shape_cast %874 : vector<1x1x1xf32> to vector<1x1xf32>
    %c0_964 = arith.constant 0 : index
    %c0_965 = arith.constant 0 : index
    %c1_966 = arith.constant 1 : index
    %c0_967 = arith.constant 0 : index
    %c2_968 = arith.constant 2 : index
    %876 = vector.load %arg2[%c0_964, %c0_965, %c1_966, %c0_967, %c2_968] : memref<1x1x3x18x18xf32, #tpu.memory_space<vmem>>, vector<1x1x1x16x16xf32>
    %877 = vector.shape_cast %876 : vector<1x1x1x16x16xf32> to vector<16x16xf32>
    %878 = vector.broadcast %875 : vector<1x1xf32> to vector<16x16xf32>
    %879 = arith.mulf %878, %877 : vector<16x16xf32>
    %880 = arith.addf %873, %879 : vector<16x16xf32>
    %c0_969 = arith.constant 0 : index
    %c4_970 = arith.constant 4 : index
    %c12_971 = arith.constant 12 : index
    %881 = vector.load %arg3[%c0_969, %c4_970, %c12_971] : memref<1x8x27xf32, #tpu.memory_space<vmem>>, vector<1x1x1xf32>
    %882 = vector.shape_cast %881 : vector<1x1x1xf32> to vector<1x1xf32>
    %c0_972 = arith.constant 0 : index
    %c0_973 = arith.constant 0 : index
    %c1_974 = arith.constant 1 : index
    %c1_975 = arith.constant 1 : index
    %c0_976 = arith.constant 0 : index
    %883 = vector.load %arg2[%c0_972, %c0_973, %c1_974, %c1_975, %c0_976] : memref<1x1x3x18x18xf32, #tpu.memory_space<vmem>>, vector<1x1x1x16x16xf32>
    %884 = vector.shape_cast %883 : vector<1x1x1x16x16xf32> to vector<16x16xf32>
    %885 = vector.broadcast %882 : vector<1x1xf32> to vector<16x16xf32>
    %886 = arith.mulf %885, %884 : vector<16x16xf32>
    %887 = arith.addf %880, %886 : vector<16x16xf32>
    %c0_977 = arith.constant 0 : index
    %c4_978 = arith.constant 4 : index
    %c13_979 = arith.constant 13 : index
    %888 = vector.load %arg3[%c0_977, %c4_978, %c13_979] : memref<1x8x27xf32, #tpu.memory_space<vmem>>, vector<1x1x1xf32>
    %889 = vector.shape_cast %888 : vector<1x1x1xf32> to vector<1x1xf32>
    %c0_980 = arith.constant 0 : index
    %c0_981 = arith.constant 0 : index
    %c1_982 = arith.constant 1 : index
    %c1_983 = arith.constant 1 : index
    %c1_984 = arith.constant 1 : index
    %890 = vector.load %arg2[%c0_980, %c0_981, %c1_982, %c1_983, %c1_984] : memref<1x1x3x18x18xf32, #tpu.memory_space<vmem>>, vector<1x1x1x16x16xf32>
    %891 = vector.shape_cast %890 : vector<1x1x1x16x16xf32> to vector<16x16xf32>
    %892 = vector.broadcast %889 : vector<1x1xf32> to vector<16x16xf32>
    %893 = arith.mulf %892, %891 : vector<16x16xf32>
    %894 = arith.addf %887, %893 : vector<16x16xf32>
    %c0_985 = arith.constant 0 : index
    %c4_986 = arith.constant 4 : index
    %c14_987 = arith.constant 14 : index
    %895 = vector.load %arg3[%c0_985, %c4_986, %c14_987] : memref<1x8x27xf32, #tpu.memory_space<vmem>>, vector<1x1x1xf32>
    %896 = vector.shape_cast %895 : vector<1x1x1xf32> to vector<1x1xf32>
    %c0_988 = arith.constant 0 : index
    %c0_989 = arith.constant 0 : index
    %c1_990 = arith.constant 1 : index
    %c1_991 = arith.constant 1 : index
    %c2_992 = arith.constant 2 : index
    %897 = vector.load %arg2[%c0_988, %c0_989, %c1_990, %c1_991, %c2_992] : memref<1x1x3x18x18xf32, #tpu.memory_space<vmem>>, vector<1x1x1x16x16xf32>
    %898 = vector.shape_cast %897 : vector<1x1x1x16x16xf32> to vector<16x16xf32>
    %899 = vector.broadcast %896 : vector<1x1xf32> to vector<16x16xf32>
    %900 = arith.mulf %899, %898 : vector<16x16xf32>
    %901 = arith.addf %894, %900 : vector<16x16xf32>
    %c0_993 = arith.constant 0 : index
    %c4_994 = arith.constant 4 : index
    %c15_995 = arith.constant 15 : index
    %902 = vector.load %arg3[%c0_993, %c4_994, %c15_995] : memref<1x8x27xf32, #tpu.memory_space<vmem>>, vector<1x1x1xf32>
    %903 = vector.shape_cast %902 : vector<1x1x1xf32> to vector<1x1xf32>
    %c0_996 = arith.constant 0 : index
    %c0_997 = arith.constant 0 : index
    %c1_998 = arith.constant 1 : index
    %c2_999 = arith.constant 2 : index
    %c0_1000 = arith.constant 0 : index
    %904 = vector.load %arg2[%c0_996, %c0_997, %c1_998, %c2_999, %c0_1000] : memref<1x1x3x18x18xf32, #tpu.memory_space<vmem>>, vector<1x1x1x16x16xf32>
    %905 = vector.shape_cast %904 : vector<1x1x1x16x16xf32> to vector<16x16xf32>
    %906 = vector.broadcast %903 : vector<1x1xf32> to vector<16x16xf32>
    %907 = arith.mulf %906, %905 : vector<16x16xf32>
    %908 = arith.addf %901, %907 : vector<16x16xf32>
    %c0_1001 = arith.constant 0 : index
    %c4_1002 = arith.constant 4 : index
    %c16_1003 = arith.constant 16 : index
    %909 = vector.load %arg3[%c0_1001, %c4_1002, %c16_1003] : memref<1x8x27xf32, #tpu.memory_space<vmem>>, vector<1x1x1xf32>
    %910 = vector.shape_cast %909 : vector<1x1x1xf32> to vector<1x1xf32>
    %c0_1004 = arith.constant 0 : index
    %c0_1005 = arith.constant 0 : index
    %c1_1006 = arith.constant 1 : index
    %c2_1007 = arith.constant 2 : index
    %c1_1008 = arith.constant 1 : index
    %911 = vector.load %arg2[%c0_1004, %c0_1005, %c1_1006, %c2_1007, %c1_1008] : memref<1x1x3x18x18xf32, #tpu.memory_space<vmem>>, vector<1x1x1x16x16xf32>
    %912 = vector.shape_cast %911 : vector<1x1x1x16x16xf32> to vector<16x16xf32>
    %913 = vector.broadcast %910 : vector<1x1xf32> to vector<16x16xf32>
    %914 = arith.mulf %913, %912 : vector<16x16xf32>
    %915 = arith.addf %908, %914 : vector<16x16xf32>
    %c0_1009 = arith.constant 0 : index
    %c4_1010 = arith.constant 4 : index
    %c17_1011 = arith.constant 17 : index
    %916 = vector.load %arg3[%c0_1009, %c4_1010, %c17_1011] : memref<1x8x27xf32, #tpu.memory_space<vmem>>, vector<1x1x1xf32>
    %917 = vector.shape_cast %916 : vector<1x1x1xf32> to vector<1x1xf32>
    %c0_1012 = arith.constant 0 : index
    %c0_1013 = arith.constant 0 : index
    %c1_1014 = arith.constant 1 : index
    %c2_1015 = arith.constant 2 : index
    %c2_1016 = arith.constant 2 : index
    %918 = vector.load %arg2[%c0_1012, %c0_1013, %c1_1014, %c2_1015, %c2_1016] : memref<1x1x3x18x18xf32, #tpu.memory_space<vmem>>, vector<1x1x1x16x16xf32>
    %919 = vector.shape_cast %918 : vector<1x1x1x16x16xf32> to vector<16x16xf32>
    %920 = vector.broadcast %917 : vector<1x1xf32> to vector<16x16xf32>
    %921 = arith.mulf %920, %919 : vector<16x16xf32>
    %922 = arith.addf %915, %921 : vector<16x16xf32>
    %c0_1017 = arith.constant 0 : index
    %c4_1018 = arith.constant 4 : index
    %c18_1019 = arith.constant 18 : index
    %923 = vector.load %arg3[%c0_1017, %c4_1018, %c18_1019] : memref<1x8x27xf32, #tpu.memory_space<vmem>>, vector<1x1x1xf32>
    %924 = vector.shape_cast %923 : vector<1x1x1xf32> to vector<1x1xf32>
    %c0_1020 = arith.constant 0 : index
    %c0_1021 = arith.constant 0 : index
    %c2_1022 = arith.constant 2 : index
    %c0_1023 = arith.constant 0 : index
    %c0_1024 = arith.constant 0 : index
    %925 = vector.load %arg2[%c0_1020, %c0_1021, %c2_1022, %c0_1023, %c0_1024] : memref<1x1x3x18x18xf32, #tpu.memory_space<vmem>>, vector<1x1x1x16x16xf32>
    %926 = vector.shape_cast %925 : vector<1x1x1x16x16xf32> to vector<16x16xf32>
    %927 = vector.broadcast %924 : vector<1x1xf32> to vector<16x16xf32>
    %928 = arith.mulf %927, %926 : vector<16x16xf32>
    %929 = arith.addf %922, %928 : vector<16x16xf32>
    %c0_1025 = arith.constant 0 : index
    %c4_1026 = arith.constant 4 : index
    %c19_1027 = arith.constant 19 : index
    %930 = vector.load %arg3[%c0_1025, %c4_1026, %c19_1027] : memref<1x8x27xf32, #tpu.memory_space<vmem>>, vector<1x1x1xf32>
    %931 = vector.shape_cast %930 : vector<1x1x1xf32> to vector<1x1xf32>
    %c0_1028 = arith.constant 0 : index
    %c0_1029 = arith.constant 0 : index
    %c2_1030 = arith.constant 2 : index
    %c0_1031 = arith.constant 0 : index
    %c1_1032 = arith.constant 1 : index
    %932 = vector.load %arg2[%c0_1028, %c0_1029, %c2_1030, %c0_1031, %c1_1032] : memref<1x1x3x18x18xf32, #tpu.memory_space<vmem>>, vector<1x1x1x16x16xf32>
    %933 = vector.shape_cast %932 : vector<1x1x1x16x16xf32> to vector<16x16xf32>
    %934 = vector.broadcast %931 : vector<1x1xf32> to vector<16x16xf32>
    %935 = arith.mulf %934, %933 : vector<16x16xf32>
    %936 = arith.addf %929, %935 : vector<16x16xf32>
    %c0_1033 = arith.constant 0 : index
    %c4_1034 = arith.constant 4 : index
    %c20_1035 = arith.constant 20 : index
    %937 = vector.load %arg3[%c0_1033, %c4_1034, %c20_1035] : memref<1x8x27xf32, #tpu.memory_space<vmem>>, vector<1x1x1xf32>
    %938 = vector.shape_cast %937 : vector<1x1x1xf32> to vector<1x1xf32>
    %c0_1036 = arith.constant 0 : index
    %c0_1037 = arith.constant 0 : index
    %c2_1038 = arith.constant 2 : index
    %c0_1039 = arith.constant 0 : index
    %c2_1040 = arith.constant 2 : index
    %939 = vector.load %arg2[%c0_1036, %c0_1037, %c2_1038, %c0_1039, %c2_1040] : memref<1x1x3x18x18xf32, #tpu.memory_space<vmem>>, vector<1x1x1x16x16xf32>
    %940 = vector.shape_cast %939 : vector<1x1x1x16x16xf32> to vector<16x16xf32>
    %941 = vector.broadcast %938 : vector<1x1xf32> to vector<16x16xf32>
    %942 = arith.mulf %941, %940 : vector<16x16xf32>
    %943 = arith.addf %936, %942 : vector<16x16xf32>
    %c0_1041 = arith.constant 0 : index
    %c4_1042 = arith.constant 4 : index
    %c21_1043 = arith.constant 21 : index
    %944 = vector.load %arg3[%c0_1041, %c4_1042, %c21_1043] : memref<1x8x27xf32, #tpu.memory_space<vmem>>, vector<1x1x1xf32>
    %945 = vector.shape_cast %944 : vector<1x1x1xf32> to vector<1x1xf32>
    %c0_1044 = arith.constant 0 : index
    %c0_1045 = arith.constant 0 : index
    %c2_1046 = arith.constant 2 : index
    %c1_1047 = arith.constant 1 : index
    %c0_1048 = arith.constant 0 : index
    %946 = vector.load %arg2[%c0_1044, %c0_1045, %c2_1046, %c1_1047, %c0_1048] : memref<1x1x3x18x18xf32, #tpu.memory_space<vmem>>, vector<1x1x1x16x16xf32>
    %947 = vector.shape_cast %946 : vector<1x1x1x16x16xf32> to vector<16x16xf32>
    %948 = vector.broadcast %945 : vector<1x1xf32> to vector<16x16xf32>
    %949 = arith.mulf %948, %947 : vector<16x16xf32>
    %950 = arith.addf %943, %949 : vector<16x16xf32>
    %c0_1049 = arith.constant 0 : index
    %c4_1050 = arith.constant 4 : index
    %c22_1051 = arith.constant 22 : index
    %951 = vector.load %arg3[%c0_1049, %c4_1050, %c22_1051] : memref<1x8x27xf32, #tpu.memory_space<vmem>>, vector<1x1x1xf32>
    %952 = vector.shape_cast %951 : vector<1x1x1xf32> to vector<1x1xf32>
    %c0_1052 = arith.constant 0 : index
    %c0_1053 = arith.constant 0 : index
    %c2_1054 = arith.constant 2 : index
    %c1_1055 = arith.constant 1 : index
    %c1_1056 = arith.constant 1 : index
    %953 = vector.load %arg2[%c0_1052, %c0_1053, %c2_1054, %c1_1055, %c1_1056] : memref<1x1x3x18x18xf32, #tpu.memory_space<vmem>>, vector<1x1x1x16x16xf32>
    %954 = vector.shape_cast %953 : vector<1x1x1x16x16xf32> to vector<16x16xf32>
    %955 = vector.broadcast %952 : vector<1x1xf32> to vector<16x16xf32>
    %956 = arith.mulf %955, %954 : vector<16x16xf32>
    %957 = arith.addf %950, %956 : vector<16x16xf32>
    %c0_1057 = arith.constant 0 : index
    %c4_1058 = arith.constant 4 : index
    %c23_1059 = arith.constant 23 : index
    %958 = vector.load %arg3[%c0_1057, %c4_1058, %c23_1059] : memref<1x8x27xf32, #tpu.memory_space<vmem>>, vector<1x1x1xf32>
    %959 = vector.shape_cast %958 : vector<1x1x1xf32> to vector<1x1xf32>
    %c0_1060 = arith.constant 0 : index
    %c0_1061 = arith.constant 0 : index
    %c2_1062 = arith.constant 2 : index
    %c1_1063 = arith.constant 1 : index
    %c2_1064 = arith.constant 2 : index
    %960 = vector.load %arg2[%c0_1060, %c0_1061, %c2_1062, %c1_1063, %c2_1064] : memref<1x1x3x18x18xf32, #tpu.memory_space<vmem>>, vector<1x1x1x16x16xf32>
    %961 = vector.shape_cast %960 : vector<1x1x1x16x16xf32> to vector<16x16xf32>
    %962 = vector.broadcast %959 : vector<1x1xf32> to vector<16x16xf32>
    %963 = arith.mulf %962, %961 : vector<16x16xf32>
    %964 = arith.addf %957, %963 : vector<16x16xf32>
    %c0_1065 = arith.constant 0 : index
    %c4_1066 = arith.constant 4 : index
    %c24_1067 = arith.constant 24 : index
    %965 = vector.load %arg3[%c0_1065, %c4_1066, %c24_1067] : memref<1x8x27xf32, #tpu.memory_space<vmem>>, vector<1x1x1xf32>
    %966 = vector.shape_cast %965 : vector<1x1x1xf32> to vector<1x1xf32>
    %c0_1068 = arith.constant 0 : index
    %c0_1069 = arith.constant 0 : index
    %c2_1070 = arith.constant 2 : index
    %c2_1071 = arith.constant 2 : index
    %c0_1072 = arith.constant 0 : index
    %967 = vector.load %arg2[%c0_1068, %c0_1069, %c2_1070, %c2_1071, %c0_1072] : memref<1x1x3x18x18xf32, #tpu.memory_space<vmem>>, vector<1x1x1x16x16xf32>
    %968 = vector.shape_cast %967 : vector<1x1x1x16x16xf32> to vector<16x16xf32>
    %969 = vector.broadcast %966 : vector<1x1xf32> to vector<16x16xf32>
    %970 = arith.mulf %969, %968 : vector<16x16xf32>
    %971 = arith.addf %964, %970 : vector<16x16xf32>
    %c0_1073 = arith.constant 0 : index
    %c4_1074 = arith.constant 4 : index
    %c25_1075 = arith.constant 25 : index
    %972 = vector.load %arg3[%c0_1073, %c4_1074, %c25_1075] : memref<1x8x27xf32, #tpu.memory_space<vmem>>, vector<1x1x1xf32>
    %973 = vector.shape_cast %972 : vector<1x1x1xf32> to vector<1x1xf32>
    %c0_1076 = arith.constant 0 : index
    %c0_1077 = arith.constant 0 : index
    %c2_1078 = arith.constant 2 : index
    %c2_1079 = arith.constant 2 : index
    %c1_1080 = arith.constant 1 : index
    %974 = vector.load %arg2[%c0_1076, %c0_1077, %c2_1078, %c2_1079, %c1_1080] : memref<1x1x3x18x18xf32, #tpu.memory_space<vmem>>, vector<1x1x1x16x16xf32>
    %975 = vector.shape_cast %974 : vector<1x1x1x16x16xf32> to vector<16x16xf32>
    %976 = vector.broadcast %973 : vector<1x1xf32> to vector<16x16xf32>
    %977 = arith.mulf %976, %975 : vector<16x16xf32>
    %978 = arith.addf %971, %977 : vector<16x16xf32>
    %c0_1081 = arith.constant 0 : index
    %c4_1082 = arith.constant 4 : index
    %c26_1083 = arith.constant 26 : index
    %979 = vector.load %arg3[%c0_1081, %c4_1082, %c26_1083] : memref<1x8x27xf32, #tpu.memory_space<vmem>>, vector<1x1x1xf32>
    %980 = vector.shape_cast %979 : vector<1x1x1xf32> to vector<1x1xf32>
    %c0_1084 = arith.constant 0 : index
    %c0_1085 = arith.constant 0 : index
    %c2_1086 = arith.constant 2 : index
    %c2_1087 = arith.constant 2 : index
    %c2_1088 = arith.constant 2 : index
    %981 = vector.load %arg2[%c0_1084, %c0_1085, %c2_1086, %c2_1087, %c2_1088] : memref<1x1x3x18x18xf32, #tpu.memory_space<vmem>>, vector<1x1x1x16x16xf32>
    %982 = vector.shape_cast %981 : vector<1x1x1x16x16xf32> to vector<16x16xf32>
    %983 = vector.broadcast %980 : vector<1x1xf32> to vector<16x16xf32>
    %984 = arith.mulf %983, %982 : vector<16x16xf32>
    %985 = arith.addf %978, %984 : vector<16x16xf32>
    %c0_1089 = arith.constant 0 : index
    %c4_1090 = arith.constant 4 : index
    %c0_1091 = arith.constant 0 : index
    %986 = vector.load %arg4[%c0_1089, %c4_1090, %c0_1091] : memref<1x8x1xf32, #tpu.memory_space<vmem>>, vector<1x1x1xf32>
    %987 = vector.shape_cast %986 : vector<1x1x1xf32> to vector<1x1xf32>
    %988 = vector.broadcast %987 : vector<1x1xf32> to vector<16x16xf32>
    %989 = arith.addf %985, %988 : vector<16x16xf32>
    %cst_1092 = arith.constant 0.000000e+00 : f32
    %990 = vector.broadcast %cst_1092 : f32 to vector<16x16xf32>
    %991 = arith.maximumf %989, %990 : vector<16x16xf32>
    %c0_1093 = arith.constant 0 : index
    %c4_1094 = arith.constant 4 : index
    %c0_1095 = arith.constant 0 : index
    %c0_1096 = arith.constant 0 : index
    %992 = vector.load %arg5[%c0_1093, %c4_1094, %c0_1095, %c0_1096] : memref<1x8x16x16xf32, #tpu.memory_space<vmem>>, vector<1x1x16x16xf32>
    %993 = vector.shape_cast %992 : vector<1x1x16x16xf32> to vector<16x16xf32>
    %994 = vector.shape_cast %991 : vector<16x16xf32> to vector<1x1x16x16xf32>
    tpu.vector_store %arg5[%c0_1093, %c4_1094, %c0_1095, %c0_1096], %994 {strides = array<i32>} : memref<1x8x16x16xf32, #tpu.memory_space<vmem>>, vector<1x1x16x16xf32>,
    %cst_1097 = arith.constant 0.000000e+00 : f32
    %995 = vector.broadcast %cst_1097 : f32 to vector<16x16xf32>
    %c0_1098 = arith.constant 0 : index
    %c5_1099 = arith.constant 5 : index
    %c0_1100 = arith.constant 0 : index
    %996 = vector.load %arg3[%c0_1098, %c5_1099, %c0_1100] : memref<1x8x27xf32, #tpu.memory_space<vmem>>, vector<1x1x1xf32>
    %997 = vector.shape_cast %996 : vector<1x1x1xf32> to vector<1x1xf32>
    %c0_1101 = arith.constant 0 : index
    %c0_1102 = arith.constant 0 : index
    %c0_1103 = arith.constant 0 : index
    %c0_1104 = arith.constant 0 : index
    %c0_1105 = arith.constant 0 : index
    %998 = vector.load %arg2[%c0_1101, %c0_1102, %c0_1103, %c0_1104, %c0_1105] : memref<1x1x3x18x18xf32, #tpu.memory_space<vmem>>, vector<1x1x1x16x16xf32>
    %999 = vector.shape_cast %998 : vector<1x1x1x16x16xf32> to vector<16x16xf32>
    %1000 = vector.broadcast %997 : vector<1x1xf32> to vector<16x16xf32>
    %1001 = arith.mulf %1000, %999 : vector<16x16xf32>
    %1002 = arith.addf %995, %1001 : vector<16x16xf32>
    %c0_1106 = arith.constant 0 : index
    %c5_1107 = arith.constant 5 : index
    %c1_1108 = arith.constant 1 : index
    %1003 = vector.load %arg3[%c0_1106, %c5_1107, %c1_1108] : memref<1x8x27xf32, #tpu.memory_space<vmem>>, vector<1x1x1xf32>
    %1004 = vector.shape_cast %1003 : vector<1x1x1xf32> to vector<1x1xf32>
    %c0_1109 = arith.constant 0 : index
    %c0_1110 = arith.constant 0 : index
    %c0_1111 = arith.constant 0 : index
    %c0_1112 = arith.constant 0 : index
    %c1_1113 = arith.constant 1 : index
    %1005 = vector.load %arg2[%c0_1109, %c0_1110, %c0_1111, %c0_1112, %c1_1113] : memref<1x1x3x18x18xf32, #tpu.memory_space<vmem>>, vector<1x1x1x16x16xf32>
    %1006 = vector.shape_cast %1005 : vector<1x1x1x16x16xf32> to vector<16x16xf32>
    %1007 = vector.broadcast %1004 : vector<1x1xf32> to vector<16x16xf32>
    %1008 = arith.mulf %1007, %1006 : vector<16x16xf32>
    %1009 = arith.addf %1002, %1008 : vector<16x16xf32>
    %c0_1114 = arith.constant 0 : index
    %c5_1115 = arith.constant 5 : index
    %c2_1116 = arith.constant 2 : index
    %1010 = vector.load %arg3[%c0_1114, %c5_1115, %c2_1116] : memref<1x8x27xf32, #tpu.memory_space<vmem>>, vector<1x1x1xf32>
    %1011 = vector.shape_cast %1010 : vector<1x1x1xf32> to vector<1x1xf32>
    %c0_1117 = arith.constant 0 : index
    %c0_1118 = arith.constant 0 : index
    %c0_1119 = arith.constant 0 : index
    %c0_1120 = arith.constant 0 : index
    %c2_1121 = arith.constant 2 : index
    %1012 = vector.load %arg2[%c0_1117, %c0_1118, %c0_1119, %c0_1120, %c2_1121] : memref<1x1x3x18x18xf32, #tpu.memory_space<vmem>>, vector<1x1x1x16x16xf32>
    %1013 = vector.shape_cast %1012 : vector<1x1x1x16x16xf32> to vector<16x16xf32>
    %1014 = vector.broadcast %1011 : vector<1x1xf32> to vector<16x16xf32>
    %1015 = arith.mulf %1014, %1013 : vector<16x16xf32>
    %1016 = arith.addf %1009, %1015 : vector<16x16xf32>
    %c0_1122 = arith.constant 0 : index
    %c5_1123 = arith.constant 5 : index
    %c3_1124 = arith.constant 3 : index
    %1017 = vector.load %arg3[%c0_1122, %c5_1123, %c3_1124] : memref<1x8x27xf32, #tpu.memory_space<vmem>>, vector<1x1x1xf32>
    %1018 = vector.shape_cast %1017 : vector<1x1x1xf32> to vector<1x1xf32>
    %c0_1125 = arith.constant 0 : index
    %c0_1126 = arith.constant 0 : index
    %c0_1127 = arith.constant 0 : index
    %c1_1128 = arith.constant 1 : index
    %c0_1129 = arith.constant 0 : index
    %1019 = vector.load %arg2[%c0_1125, %c0_1126, %c0_1127, %c1_1128, %c0_1129] : memref<1x1x3x18x18xf32, #tpu.memory_space<vmem>>, vector<1x1x1x16x16xf32>
    %1020 = vector.shape_cast %1019 : vector<1x1x1x16x16xf32> to vector<16x16xf32>
    %1021 = vector.broadcast %1018 : vector<1x1xf32> to vector<16x16xf32>
    %1022 = arith.mulf %1021, %1020 : vector<16x16xf32>
    %1023 = arith.addf %1016, %1022 : vector<16x16xf32>
    %c0_1130 = arith.constant 0 : index
    %c5_1131 = arith.constant 5 : index
    %c4_1132 = arith.constant 4 : index
    %1024 = vector.load %arg3[%c0_1130, %c5_1131, %c4_1132] : memref<1x8x27xf32, #tpu.memory_space<vmem>>, vector<1x1x1xf32>
    %1025 = vector.shape_cast %1024 : vector<1x1x1xf32> to vector<1x1xf32>
    %c0_1133 = arith.constant 0 : index
    %c0_1134 = arith.constant 0 : index
    %c0_1135 = arith.constant 0 : index
    %c1_1136 = arith.constant 1 : index
    %c1_1137 = arith.constant 1 : index
    %1026 = vector.load %arg2[%c0_1133, %c0_1134, %c0_1135, %c1_1136, %c1_1137] : memref<1x1x3x18x18xf32, #tpu.memory_space<vmem>>, vector<1x1x1x16x16xf32>
    %1027 = vector.shape_cast %1026 : vector<1x1x1x16x16xf32> to vector<16x16xf32>
    %1028 = vector.broadcast %1025 : vector<1x1xf32> to vector<16x16xf32>
    %1029 = arith.mulf %1028, %1027 : vector<16x16xf32>
    %1030 = arith.addf %1023, %1029 : vector<16x16xf32>
    %c0_1138 = arith.constant 0 : index
    %c5_1139 = arith.constant 5 : index
    %c5_1140 = arith.constant 5 : index
    %1031 = vector.load %arg3[%c0_1138, %c5_1139, %c5_1140] : memref<1x8x27xf32, #tpu.memory_space<vmem>>, vector<1x1x1xf32>
    %1032 = vector.shape_cast %1031 : vector<1x1x1xf32> to vector<1x1xf32>
    %c0_1141 = arith.constant 0 : index
    %c0_1142 = arith.constant 0 : index
    %c0_1143 = arith.constant 0 : index
    %c1_1144 = arith.constant 1 : index
    %c2_1145 = arith.constant 2 : index
    %1033 = vector.load %arg2[%c0_1141, %c0_1142, %c0_1143, %c1_1144, %c2_1145] : memref<1x1x3x18x18xf32, #tpu.memory_space<vmem>>, vector<1x1x1x16x16xf32>
    %1034 = vector.shape_cast %1033 : vector<1x1x1x16x16xf32> to vector<16x16xf32>
    %1035 = vector.broadcast %1032 : vector<1x1xf32> to vector<16x16xf32>
    %1036 = arith.mulf %1035, %1034 : vector<16x16xf32>
    %1037 = arith.addf %1030, %1036 : vector<16x16xf32>
    %c0_1146 = arith.constant 0 : index
    %c5_1147 = arith.constant 5 : index
    %c6_1148 = arith.constant 6 : index
    %1038 = vector.load %arg3[%c0_1146, %c5_1147, %c6_1148] : memref<1x8x27xf32, #tpu.memory_space<vmem>>, vector<1x1x1xf32>
    %1039 = vector.shape_cast %1038 : vector<1x1x1xf32> to vector<1x1xf32>
    %c0_1149 = arith.constant 0 : index
    %c0_1150 = arith.constant 0 : index
    %c0_1151 = arith.constant 0 : index
    %c2_1152 = arith.constant 2 : index
    %c0_1153 = arith.constant 0 : index
    %1040 = vector.load %arg2[%c0_1149, %c0_1150, %c0_1151, %c2_1152, %c0_1153] : memref<1x1x3x18x18xf32, #tpu.memory_space<vmem>>, vector<1x1x1x16x16xf32>
    %1041 = vector.shape_cast %1040 : vector<1x1x1x16x16xf32> to vector<16x16xf32>
    %1042 = vector.broadcast %1039 : vector<1x1xf32> to vector<16x16xf32>
    %1043 = arith.mulf %1042, %1041 : vector<16x16xf32>
    %1044 = arith.addf %1037, %1043 : vector<16x16xf32>
    %c0_1154 = arith.constant 0 : index
    %c5_1155 = arith.constant 5 : index
    %c7_1156 = arith.constant 7 : index
    %1045 = vector.load %arg3[%c0_1154, %c5_1155, %c7_1156] : memref<1x8x27xf32, #tpu.memory_space<vmem>>, vector<1x1x1xf32>
    %1046 = vector.shape_cast %1045 : vector<1x1x1xf32> to vector<1x1xf32>
    %c0_1157 = arith.constant 0 : index
    %c0_1158 = arith.constant 0 : index
    %c0_1159 = arith.constant 0 : index
    %c2_1160 = arith.constant 2 : index
    %c1_1161 = arith.constant 1 : index
    %1047 = vector.load %arg2[%c0_1157, %c0_1158, %c0_1159, %c2_1160, %c1_1161] : memref<1x1x3x18x18xf32, #tpu.memory_space<vmem>>, vector<1x1x1x16x16xf32>
    %1048 = vector.shape_cast %1047 : vector<1x1x1x16x16xf32> to vector<16x16xf32>
    %1049 = vector.broadcast %1046 : vector<1x1xf32> to vector<16x16xf32>
    %1050 = arith.mulf %1049, %1048 : vector<16x16xf32>
    %1051 = arith.addf %1044, %1050 : vector<16x16xf32>
    %c0_1162 = arith.constant 0 : index
    %c5_1163 = arith.constant 5 : index
    %c8_1164 = arith.constant 8 : index
    %1052 = vector.load %arg3[%c0_1162, %c5_1163, %c8_1164] : memref<1x8x27xf32, #tpu.memory_space<vmem>>, vector<1x1x1xf32>
    %1053 = vector.shape_cast %1052 : vector<1x1x1xf32> to vector<1x1xf32>
    %c0_1165 = arith.constant 0 : index
    %c0_1166 = arith.constant 0 : index
    %c0_1167 = arith.constant 0 : index
    %c2_1168 = arith.constant 2 : index
    %c2_1169 = arith.constant 2 : index
    %1054 = vector.load %arg2[%c0_1165, %c0_1166, %c0_1167, %c2_1168, %c2_1169] : memref<1x1x3x18x18xf32, #tpu.memory_space<vmem>>, vector<1x1x1x16x16xf32>
    %1055 = vector.shape_cast %1054 : vector<1x1x1x16x16xf32> to vector<16x16xf32>
    %1056 = vector.broadcast %1053 : vector<1x1xf32> to vector<16x16xf32>
    %1057 = arith.mulf %1056, %1055 : vector<16x16xf32>
    %1058 = arith.addf %1051, %1057 : vector<16x16xf32>
    %c0_1170 = arith.constant 0 : index
    %c5_1171 = arith.constant 5 : index
    %c9_1172 = arith.constant 9 : index
    %1059 = vector.load %arg3[%c0_1170, %c5_1171, %c9_1172] : memref<1x8x27xf32, #tpu.memory_space<vmem>>, vector<1x1x1xf32>
    %1060 = vector.shape_cast %1059 : vector<1x1x1xf32> to vector<1x1xf32>
    %c0_1173 = arith.constant 0 : index
    %c0_1174 = arith.constant 0 : index
    %c1_1175 = arith.constant 1 : index
    %c0_1176 = arith.constant 0 : index
    %c0_1177 = arith.constant 0 : index
    %1061 = vector.load %arg2[%c0_1173, %c0_1174, %c1_1175, %c0_1176, %c0_1177] : memref<1x1x3x18x18xf32, #tpu.memory_space<vmem>>, vector<1x1x1x16x16xf32>
    %1062 = vector.shape_cast %1061 : vector<1x1x1x16x16xf32> to vector<16x16xf32>
    %1063 = vector.broadcast %1060 : vector<1x1xf32> to vector<16x16xf32>
    %1064 = arith.mulf %1063, %1062 : vector<16x16xf32>
    %1065 = arith.addf %1058, %1064 : vector<16x16xf32>
    %c0_1178 = arith.constant 0 : index
    %c5_1179 = arith.constant 5 : index
    %c10_1180 = arith.constant 10 : index
    %1066 = vector.load %arg3[%c0_1178, %c5_1179, %c10_1180] : memref<1x8x27xf32, #tpu.memory_space<vmem>>, vector<1x1x1xf32>
    %1067 = vector.shape_cast %1066 : vector<1x1x1xf32> to vector<1x1xf32>
    %c0_1181 = arith.constant 0 : index
    %c0_1182 = arith.constant 0 : index
    %c1_1183 = arith.constant 1 : index
    %c0_1184 = arith.constant 0 : index
    %c1_1185 = arith.constant 1 : index
    %1068 = vector.load %arg2[%c0_1181, %c0_1182, %c1_1183, %c0_1184, %c1_1185] : memref<1x1x3x18x18xf32, #tpu.memory_space<vmem>>, vector<1x1x1x16x16xf32>
    %1069 = vector.shape_cast %1068 : vector<1x1x1x16x16xf32> to vector<16x16xf32>
    %1070 = vector.broadcast %1067 : vector<1x1xf32> to vector<16x16xf32>
    %1071 = arith.mulf %1070, %1069 : vector<16x16xf32>
    %1072 = arith.addf %1065, %1071 : vector<16x16xf32>
    %c0_1186 = arith.constant 0 : index
    %c5_1187 = arith.constant 5 : index
    %c11_1188 = arith.constant 11 : index
    %1073 = vector.load %arg3[%c0_1186, %c5_1187, %c11_1188] : memref<1x8x27xf32, #tpu.memory_space<vmem>>, vector<1x1x1xf32>
    %1074 = vector.shape_cast %1073 : vector<1x1x1xf32> to vector<1x1xf32>
    %c0_1189 = arith.constant 0 : index
    %c0_1190 = arith.constant 0 : index
    %c1_1191 = arith.constant 1 : index
    %c0_1192 = arith.constant 0 : index
    %c2_1193 = arith.constant 2 : index
    %1075 = vector.load %arg2[%c0_1189, %c0_1190, %c1_1191, %c0_1192, %c2_1193] : memref<1x1x3x18x18xf32, #tpu.memory_space<vmem>>, vector<1x1x1x16x16xf32>
    %1076 = vector.shape_cast %1075 : vector<1x1x1x16x16xf32> to vector<16x16xf32>
    %1077 = vector.broadcast %1074 : vector<1x1xf32> to vector<16x16xf32>
    %1078 = arith.mulf %1077, %1076 : vector<16x16xf32>
    %1079 = arith.addf %1072, %1078 : vector<16x16xf32>
    %c0_1194 = arith.constant 0 : index
    %c5_1195 = arith.constant 5 : index
    %c12_1196 = arith.constant 12 : index
    %1080 = vector.load %arg3[%c0_1194, %c5_1195, %c12_1196] : memref<1x8x27xf32, #tpu.memory_space<vmem>>, vector<1x1x1xf32>
    %1081 = vector.shape_cast %1080 : vector<1x1x1xf32> to vector<1x1xf32>
    %c0_1197 = arith.constant 0 : index
    %c0_1198 = arith.constant 0 : index
    %c1_1199 = arith.constant 1 : index
    %c1_1200 = arith.constant 1 : index
    %c0_1201 = arith.constant 0 : index
    %1082 = vector.load %arg2[%c0_1197, %c0_1198, %c1_1199, %c1_1200, %c0_1201] : memref<1x1x3x18x18xf32, #tpu.memory_space<vmem>>, vector<1x1x1x16x16xf32>
    %1083 = vector.shape_cast %1082 : vector<1x1x1x16x16xf32> to vector<16x16xf32>
    %1084 = vector.broadcast %1081 : vector<1x1xf32> to vector<16x16xf32>
    %1085 = arith.mulf %1084, %1083 : vector<16x16xf32>
    %1086 = arith.addf %1079, %1085 : vector<16x16xf32>
    %c0_1202 = arith.constant 0 : index
    %c5_1203 = arith.constant 5 : index
    %c13_1204 = arith.constant 13 : index
    %1087 = vector.load %arg3[%c0_1202, %c5_1203, %c13_1204] : memref<1x8x27xf32, #tpu.memory_space<vmem>>, vector<1x1x1xf32>
    %1088 = vector.shape_cast %1087 : vector<1x1x1xf32> to vector<1x1xf32>
    %c0_1205 = arith.constant 0 : index
    %c0_1206 = arith.constant 0 : index
    %c1_1207 = arith.constant 1 : index
    %c1_1208 = arith.constant 1 : index
    %c1_1209 = arith.constant 1 : index
    %1089 = vector.load %arg2[%c0_1205, %c0_1206, %c1_1207, %c1_1208, %c1_1209] : memref<1x1x3x18x18xf32, #tpu.memory_space<vmem>>, vector<1x1x1x16x16xf32>
    %1090 = vector.shape_cast %1089 : vector<1x1x1x16x16xf32> to vector<16x16xf32>
    %1091 = vector.broadcast %1088 : vector<1x1xf32> to vector<16x16xf32>
    %1092 = arith.mulf %1091, %1090 : vector<16x16xf32>
    %1093 = arith.addf %1086, %1092 : vector<16x16xf32>
    %c0_1210 = arith.constant 0 : index
    %c5_1211 = arith.constant 5 : index
    %c14_1212 = arith.constant 14 : index
    %1094 = vector.load %arg3[%c0_1210, %c5_1211, %c14_1212] : memref<1x8x27xf32, #tpu.memory_space<vmem>>, vector<1x1x1xf32>
    %1095 = vector.shape_cast %1094 : vector<1x1x1xf32> to vector<1x1xf32>
    %c0_1213 = arith.constant 0 : index
    %c0_1214 = arith.constant 0 : index
    %c1_1215 = arith.constant 1 : index
    %c1_1216 = arith.constant 1 : index
    %c2_1217 = arith.constant 2 : index
    %1096 = vector.load %arg2[%c0_1213, %c0_1214, %c1_1215, %c1_1216, %c2_1217] : memref<1x1x3x18x18xf32, #tpu.memory_space<vmem>>, vector<1x1x1x16x16xf32>
    %1097 = vector.shape_cast %1096 : vector<1x1x1x16x16xf32> to vector<16x16xf32>
    %1098 = vector.broadcast %1095 : vector<1x1xf32> to vector<16x16xf32>
    %1099 = arith.mulf %1098, %1097 : vector<16x16xf32>
    %1100 = arith.addf %1093, %1099 : vector<16x16xf32>
    %c0_1218 = arith.constant 0 : index
    %c5_1219 = arith.constant 5 : index
    %c15_1220 = arith.constant 15 : index
    %1101 = vector.load %arg3[%c0_1218, %c5_1219, %c15_1220] : memref<1x8x27xf32, #tpu.memory_space<vmem>>, vector<1x1x1xf32>
    %1102 = vector.shape_cast %1101 : vector<1x1x1xf32> to vector<1x1xf32>
    %c0_1221 = arith.constant 0 : index
    %c0_1222 = arith.constant 0 : index
    %c1_1223 = arith.constant 1 : index
    %c2_1224 = arith.constant 2 : index
    %c0_1225 = arith.constant 0 : index
    %1103 = vector.load %arg2[%c0_1221, %c0_1222, %c1_1223, %c2_1224, %c0_1225] : memref<1x1x3x18x18xf32, #tpu.memory_space<vmem>>, vector<1x1x1x16x16xf32>
    %1104 = vector.shape_cast %1103 : vector<1x1x1x16x16xf32> to vector<16x16xf32>
    %1105 = vector.broadcast %1102 : vector<1x1xf32> to vector<16x16xf32>
    %1106 = arith.mulf %1105, %1104 : vector<16x16xf32>
    %1107 = arith.addf %1100, %1106 : vector<16x16xf32>
    %c0_1226 = arith.constant 0 : index
    %c5_1227 = arith.constant 5 : index
    %c16_1228 = arith.constant 16 : index
    %1108 = vector.load %arg3[%c0_1226, %c5_1227, %c16_1228] : memref<1x8x27xf32, #tpu.memory_space<vmem>>, vector<1x1x1xf32>
    %1109 = vector.shape_cast %1108 : vector<1x1x1xf32> to vector<1x1xf32>
    %c0_1229 = arith.constant 0 : index
    %c0_1230 = arith.constant 0 : index
    %c1_1231 = arith.constant 1 : index
    %c2_1232 = arith.constant 2 : index
    %c1_1233 = arith.constant 1 : index
    %1110 = vector.load %arg2[%c0_1229, %c0_1230, %c1_1231, %c2_1232, %c1_1233] : memref<1x1x3x18x18xf32, #tpu.memory_space<vmem>>, vector<1x1x1x16x16xf32>
    %1111 = vector.shape_cast %1110 : vector<1x1x1x16x16xf32> to vector<16x16xf32>
    %1112 = vector.broadcast %1109 : vector<1x1xf32> to vector<16x16xf32>
    %1113 = arith.mulf %1112, %1111 : vector<16x16xf32>
    %1114 = arith.addf %1107, %1113 : vector<16x16xf32>
    %c0_1234 = arith.constant 0 : index
    %c5_1235 = arith.constant 5 : index
    %c17_1236 = arith.constant 17 : index
    %1115 = vector.load %arg3[%c0_1234, %c5_1235, %c17_1236] : memref<1x8x27xf32, #tpu.memory_space<vmem>>, vector<1x1x1xf32>
    %1116 = vector.shape_cast %1115 : vector<1x1x1xf32> to vector<1x1xf32>
    %c0_1237 = arith.constant 0 : index
    %c0_1238 = arith.constant 0 : index
    %c1_1239 = arith.constant 1 : index
    %c2_1240 = arith.constant 2 : index
    %c2_1241 = arith.constant 2 : index
    %1117 = vector.load %arg2[%c0_1237, %c0_1238, %c1_1239, %c2_1240, %c2_1241] : memref<1x1x3x18x18xf32, #tpu.memory_space<vmem>>, vector<1x1x1x16x16xf32>
    %1118 = vector.shape_cast %1117 : vector<1x1x1x16x16xf32> to vector<16x16xf32>
    %1119 = vector.broadcast %1116 : vector<1x1xf32> to vector<16x16xf32>
    %1120 = arith.mulf %1119, %1118 : vector<16x16xf32>
    %1121 = arith.addf %1114, %1120 : vector<16x16xf32>
    %c0_1242 = arith.constant 0 : index
    %c5_1243 = arith.constant 5 : index
    %c18_1244 = arith.constant 18 : index
    %1122 = vector.load %arg3[%c0_1242, %c5_1243, %c18_1244] : memref<1x8x27xf32, #tpu.memory_space<vmem>>, vector<1x1x1xf32>
    %1123 = vector.shape_cast %1122 : vector<1x1x1xf32> to vector<1x1xf32>
    %c0_1245 = arith.constant 0 : index
    %c0_1246 = arith.constant 0 : index
    %c2_1247 = arith.constant 2 : index
    %c0_1248 = arith.constant 0 : index
    %c0_1249 = arith.constant 0 : index
    %1124 = vector.load %arg2[%c0_1245, %c0_1246, %c2_1247, %c0_1248, %c0_1249] : memref<1x1x3x18x18xf32, #tpu.memory_space<vmem>>, vector<1x1x1x16x16xf32>
    %1125 = vector.shape_cast %1124 : vector<1x1x1x16x16xf32> to vector<16x16xf32>
    %1126 = vector.broadcast %1123 : vector<1x1xf32> to vector<16x16xf32>
    %1127 = arith.mulf %1126, %1125 : vector<16x16xf32>
    %1128 = arith.addf %1121, %1127 : vector<16x16xf32>
    %c0_1250 = arith.constant 0 : index
    %c5_1251 = arith.constant 5 : index
    %c19_1252 = arith.constant 19 : index
    %1129 = vector.load %arg3[%c0_1250, %c5_1251, %c19_1252] : memref<1x8x27xf32, #tpu.memory_space<vmem>>, vector<1x1x1xf32>
    %1130 = vector.shape_cast %1129 : vector<1x1x1xf32> to vector<1x1xf32>
    %c0_1253 = arith.constant 0 : index
    %c0_1254 = arith.constant 0 : index
    %c2_1255 = arith.constant 2 : index
    %c0_1256 = arith.constant 0 : index
    %c1_1257 = arith.constant 1 : index
    %1131 = vector.load %arg2[%c0_1253, %c0_1254, %c2_1255, %c0_1256, %c1_1257] : memref<1x1x3x18x18xf32, #tpu.memory_space<vmem>>, vector<1x1x1x16x16xf32>
    %1132 = vector.shape_cast %1131 : vector<1x1x1x16x16xf32> to vector<16x16xf32>
    %1133 = vector.broadcast %1130 : vector<1x1xf32> to vector<16x16xf32>
    %1134 = arith.mulf %1133, %1132 : vector<16x16xf32>
    %1135 = arith.addf %1128, %1134 : vector<16x16xf32>
    %c0_1258 = arith.constant 0 : index
    %c5_1259 = arith.constant 5 : index
    %c20_1260 = arith.constant 20 : index
    %1136 = vector.load %arg3[%c0_1258, %c5_1259, %c20_1260] : memref<1x8x27xf32, #tpu.memory_space<vmem>>, vector<1x1x1xf32>
    %1137 = vector.shape_cast %1136 : vector<1x1x1xf32> to vector<1x1xf32>
    %c0_1261 = arith.constant 0 : index
    %c0_1262 = arith.constant 0 : index
    %c2_1263 = arith.constant 2 : index
    %c0_1264 = arith.constant 0 : index
    %c2_1265 = arith.constant 2 : index
    %1138 = vector.load %arg2[%c0_1261, %c0_1262, %c2_1263, %c0_1264, %c2_1265] : memref<1x1x3x18x18xf32, #tpu.memory_space<vmem>>, vector<1x1x1x16x16xf32>
    %1139 = vector.shape_cast %1138 : vector<1x1x1x16x16xf32> to vector<16x16xf32>
    %1140 = vector.broadcast %1137 : vector<1x1xf32> to vector<16x16xf32>
    %1141 = arith.mulf %1140, %1139 : vector<16x16xf32>
    %1142 = arith.addf %1135, %1141 : vector<16x16xf32>
    %c0_1266 = arith.constant 0 : index
    %c5_1267 = arith.constant 5 : index
    %c21_1268 = arith.constant 21 : index
    %1143 = vector.load %arg3[%c0_1266, %c5_1267, %c21_1268] : memref<1x8x27xf32, #tpu.memory_space<vmem>>, vector<1x1x1xf32>
    %1144 = vector.shape_cast %1143 : vector<1x1x1xf32> to vector<1x1xf32>
    %c0_1269 = arith.constant 0 : index
    %c0_1270 = arith.constant 0 : index
    %c2_1271 = arith.constant 2 : index
    %c1_1272 = arith.constant 1 : index
    %c0_1273 = arith.constant 0 : index
    %1145 = vector.load %arg2[%c0_1269, %c0_1270, %c2_1271, %c1_1272, %c0_1273] : memref<1x1x3x18x18xf32, #tpu.memory_space<vmem>>, vector<1x1x1x16x16xf32>
    %1146 = vector.shape_cast %1145 : vector<1x1x1x16x16xf32> to vector<16x16xf32>
    %1147 = vector.broadcast %1144 : vector<1x1xf32> to vector<16x16xf32>
    %1148 = arith.mulf %1147, %1146 : vector<16x16xf32>
    %1149 = arith.addf %1142, %1148 : vector<16x16xf32>
    %c0_1274 = arith.constant 0 : index
    %c5_1275 = arith.constant 5 : index
    %c22_1276 = arith.constant 22 : index
    %1150 = vector.load %arg3[%c0_1274, %c5_1275, %c22_1276] : memref<1x8x27xf32, #tpu.memory_space<vmem>>, vector<1x1x1xf32>
    %1151 = vector.shape_cast %1150 : vector<1x1x1xf32> to vector<1x1xf32>
    %c0_1277 = arith.constant 0 : index
    %c0_1278 = arith.constant 0 : index
    %c2_1279 = arith.constant 2 : index
    %c1_1280 = arith.constant 1 : index
    %c1_1281 = arith.constant 1 : index
    %1152 = vector.load %arg2[%c0_1277, %c0_1278, %c2_1279, %c1_1280, %c1_1281] : memref<1x1x3x18x18xf32, #tpu.memory_space<vmem>>, vector<1x1x1x16x16xf32>
    %1153 = vector.shape_cast %1152 : vector<1x1x1x16x16xf32> to vector<16x16xf32>
    %1154 = vector.broadcast %1151 : vector<1x1xf32> to vector<16x16xf32>
    %1155 = arith.mulf %1154, %1153 : vector<16x16xf32>
    %1156 = arith.addf %1149, %1155 : vector<16x16xf32>
    %c0_1282 = arith.constant 0 : index
    %c5_1283 = arith.constant 5 : index
    %c23_1284 = arith.constant 23 : index
    %1157 = vector.load %arg3[%c0_1282, %c5_1283, %c23_1284] : memref<1x8x27xf32, #tpu.memory_space<vmem>>, vector<1x1x1xf32>
    %1158 = vector.shape_cast %1157 : vector<1x1x1xf32> to vector<1x1xf32>
    %c0_1285 = arith.constant 0 : index
    %c0_1286 = arith.constant 0 : index
    %c2_1287 = arith.constant 2 : index
    %c1_1288 = arith.constant 1 : index
    %c2_1289 = arith.constant 2 : index
    %1159 = vector.load %arg2[%c0_1285, %c0_1286, %c2_1287, %c1_1288, %c2_1289] : memref<1x1x3x18x18xf32, #tpu.memory_space<vmem>>, vector<1x1x1x16x16xf32>
    %1160 = vector.shape_cast %1159 : vector<1x1x1x16x16xf32> to vector<16x16xf32>
    %1161 = vector.broadcast %1158 : vector<1x1xf32> to vector<16x16xf32>
    %1162 = arith.mulf %1161, %1160 : vector<16x16xf32>
    %1163 = arith.addf %1156, %1162 : vector<16x16xf32>
    %c0_1290 = arith.constant 0 : index
    %c5_1291 = arith.constant 5 : index
    %c24_1292 = arith.constant 24 : index
    %1164 = vector.load %arg3[%c0_1290, %c5_1291, %c24_1292] : memref<1x8x27xf32, #tpu.memory_space<vmem>>, vector<1x1x1xf32>
    %1165 = vector.shape_cast %1164 : vector<1x1x1xf32> to vector<1x1xf32>
    %c0_1293 = arith.constant 0 : index
    %c0_1294 = arith.constant 0 : index
    %c2_1295 = arith.constant 2 : index
    %c2_1296 = arith.constant 2 : index
    %c0_1297 = arith.constant 0 : index
    %1166 = vector.load %arg2[%c0_1293, %c0_1294, %c2_1295, %c2_1296, %c0_1297] : memref<1x1x3x18x18xf32, #tpu.memory_space<vmem>>, vector<1x1x1x16x16xf32>
    %1167 = vector.shape_cast %1166 : vector<1x1x1x16x16xf32> to vector<16x16xf32>
    %1168 = vector.broadcast %1165 : vector<1x1xf32> to vector<16x16xf32>
    %1169 = arith.mulf %1168, %1167 : vector<16x16xf32>
    %1170 = arith.addf %1163, %1169 : vector<16x16xf32>
    %c0_1298 = arith.constant 0 : index
    %c5_1299 = arith.constant 5 : index
    %c25_1300 = arith.constant 25 : index
    %1171 = vector.load %arg3[%c0_1298, %c5_1299, %c25_1300] : memref<1x8x27xf32, #tpu.memory_space<vmem>>, vector<1x1x1xf32>
    %1172 = vector.shape_cast %1171 : vector<1x1x1xf32> to vector<1x1xf32>
    %c0_1301 = arith.constant 0 : index
    %c0_1302 = arith.constant 0 : index
    %c2_1303 = arith.constant 2 : index
    %c2_1304 = arith.constant 2 : index
    %c1_1305 = arith.constant 1 : index
    %1173 = vector.load %arg2[%c0_1301, %c0_1302, %c2_1303, %c2_1304, %c1_1305] : memref<1x1x3x18x18xf32, #tpu.memory_space<vmem>>, vector<1x1x1x16x16xf32>
    %1174 = vector.shape_cast %1173 : vector<1x1x1x16x16xf32> to vector<16x16xf32>
    %1175 = vector.broadcast %1172 : vector<1x1xf32> to vector<16x16xf32>
    %1176 = arith.mulf %1175, %1174 : vector<16x16xf32>
    %1177 = arith.addf %1170, %1176 : vector<16x16xf32>
    %c0_1306 = arith.constant 0 : index
    %c5_1307 = arith.constant 5 : index
    %c26_1308 = arith.constant 26 : index
    %1178 = vector.load %arg3[%c0_1306, %c5_1307, %c26_1308] : memref<1x8x27xf32, #tpu.memory_space<vmem>>, vector<1x1x1xf32>
    %1179 = vector.shape_cast %1178 : vector<1x1x1xf32> to vector<1x1xf32>
    %c0_1309 = arith.constant 0 : index
    %c0_1310 = arith.constant 0 : index
    %c2_1311 = arith.constant 2 : index
    %c2_1312 = arith.constant 2 : index
    %c2_1313 = arith.constant 2 : index
    %1180 = vector.load %arg2[%c0_1309, %c0_1310, %c2_1311, %c2_1312, %c2_1313] : memref<1x1x3x18x18xf32, #tpu.memory_space<vmem>>, vector<1x1x1x16x16xf32>
    %1181 = vector.shape_cast %1180 : vector<1x1x1x16x16xf32> to vector<16x16xf32>
    %1182 = vector.broadcast %1179 : vector<1x1xf32> to vector<16x16xf32>
    %1183 = arith.mulf %1182, %1181 : vector<16x16xf32>
    %1184 = arith.addf %1177, %1183 : vector<16x16xf32>
    %c0_1314 = arith.constant 0 : index
    %c5_1315 = arith.constant 5 : index
    %c0_1316 = arith.constant 0 : index
    %1185 = vector.load %arg4[%c0_1314, %c5_1315, %c0_1316] : memref<1x8x1xf32, #tpu.memory_space<vmem>>, vector<1x1x1xf32>
    %1186 = vector.shape_cast %1185 : vector<1x1x1xf32> to vector<1x1xf32>
    %1187 = vector.broadcast %1186 : vector<1x1xf32> to vector<16x16xf32>
    %1188 = arith.addf %1184, %1187 : vector<16x16xf32>
    %cst_1317 = arith.constant 0.000000e+00 : f32
    %1189 = vector.broadcast %cst_1317 : f32 to vector<16x16xf32>
    %1190 = arith.maximumf %1188, %1189 : vector<16x16xf32>
    %c0_1318 = arith.constant 0 : index
    %c5_1319 = arith.constant 5 : index
    %c0_1320 = arith.constant 0 : index
    %c0_1321 = arith.constant 0 : index
    %1191 = vector.load %arg5[%c0_1318, %c5_1319, %c0_1320, %c0_1321] : memref<1x8x16x16xf32, #tpu.memory_space<vmem>>, vector<1x1x16x16xf32>
    %1192 = vector.shape_cast %1191 : vector<1x1x16x16xf32> to vector<16x16xf32>
    %1193 = vector.shape_cast %1190 : vector<16x16xf32> to vector<1x1x16x16xf32>
    tpu.vector_store %arg5[%c0_1318, %c5_1319, %c0_1320, %c0_1321], %1193 {strides = array<i32>} : memref<1x8x16x16xf32, #tpu.memory_space<vmem>>, vector<1x1x16x16xf32>,
    %cst_1322 = arith.constant 0.000000e+00 : f32
    %1194 = vector.broadcast %cst_1322 : f32 to vector<16x16xf32>
    %c0_1323 = arith.constant 0 : index
    %c6_1324 = arith.constant 6 : index
    %c0_1325 = arith.constant 0 : index
    %1195 = vector.load %arg3[%c0_1323, %c6_1324, %c0_1325] : memref<1x8x27xf32, #tpu.memory_space<vmem>>, vector<1x1x1xf32>
    %1196 = vector.shape_cast %1195 : vector<1x1x1xf32> to vector<1x1xf32>
    %c0_1326 = arith.constant 0 : index
    %c0_1327 = arith.constant 0 : index
    %c0_1328 = arith.constant 0 : index
    %c0_1329 = arith.constant 0 : index
    %c0_1330 = arith.constant 0 : index
    %1197 = vector.load %arg2[%c0_1326, %c0_1327, %c0_1328, %c0_1329, %c0_1330] : memref<1x1x3x18x18xf32, #tpu.memory_space<vmem>>, vector<1x1x1x16x16xf32>
    %1198 = vector.shape_cast %1197 : vector<1x1x1x16x16xf32> to vector<16x16xf32>
    %1199 = vector.broadcast %1196 : vector<1x1xf32> to vector<16x16xf32>
    %1200 = arith.mulf %1199, %1198 : vector<16x16xf32>
    %1201 = arith.addf %1194, %1200 : vector<16x16xf32>
    %c0_1331 = arith.constant 0 : index
    %c6_1332 = arith.constant 6 : index
    %c1_1333 = arith.constant 1 : index
    %1202 = vector.load %arg3[%c0_1331, %c6_1332, %c1_1333] : memref<1x8x27xf32, #tpu.memory_space<vmem>>, vector<1x1x1xf32>
    %1203 = vector.shape_cast %1202 : vector<1x1x1xf32> to vector<1x1xf32>
    %c0_1334 = arith.constant 0 : index
    %c0_1335 = arith.constant 0 : index
    %c0_1336 = arith.constant 0 : index
    %c0_1337 = arith.constant 0 : index
    %c1_1338 = arith.constant 1 : index
    %1204 = vector.load %arg2[%c0_1334, %c0_1335, %c0_1336, %c0_1337, %c1_1338] : memref<1x1x3x18x18xf32, #tpu.memory_space<vmem>>, vector<1x1x1x16x16xf32>
    %1205 = vector.shape_cast %1204 : vector<1x1x1x16x16xf32> to vector<16x16xf32>
    %1206 = vector.broadcast %1203 : vector<1x1xf32> to vector<16x16xf32>
    %1207 = arith.mulf %1206, %1205 : vector<16x16xf32>
    %1208 = arith.addf %1201, %1207 : vector<16x16xf32>
    %c0_1339 = arith.constant 0 : index
    %c6_1340 = arith.constant 6 : index
    %c2_1341 = arith.constant 2 : index
    %1209 = vector.load %arg3[%c0_1339, %c6_1340, %c2_1341] : memref<1x8x27xf32, #tpu.memory_space<vmem>>, vector<1x1x1xf32>
    %1210 = vector.shape_cast %1209 : vector<1x1x1xf32> to vector<1x1xf32>
    %c0_1342 = arith.constant 0 : index
    %c0_1343 = arith.constant 0 : index
    %c0_1344 = arith.constant 0 : index
    %c0_1345 = arith.constant 0 : index
    %c2_1346 = arith.constant 2 : index
    %1211 = vector.load %arg2[%c0_1342, %c0_1343, %c0_1344, %c0_1345, %c2_1346] : memref<1x1x3x18x18xf32, #tpu.memory_space<vmem>>, vector<1x1x1x16x16xf32>
    %1212 = vector.shape_cast %1211 : vector<1x1x1x16x16xf32> to vector<16x16xf32>
    %1213 = vector.broadcast %1210 : vector<1x1xf32> to vector<16x16xf32>
    %1214 = arith.mulf %1213, %1212 : vector<16x16xf32>
    %1215 = arith.addf %1208, %1214 : vector<16x16xf32>
    %c0_1347 = arith.constant 0 : index
    %c6_1348 = arith.constant 6 : index
    %c3_1349 = arith.constant 3 : index
    %1216 = vector.load %arg3[%c0_1347, %c6_1348, %c3_1349] : memref<1x8x27xf32, #tpu.memory_space<vmem>>, vector<1x1x1xf32>
    %1217 = vector.shape_cast %1216 : vector<1x1x1xf32> to vector<1x1xf32>
    %c0_1350 = arith.constant 0 : index
    %c0_1351 = arith.constant 0 : index
    %c0_1352 = arith.constant 0 : index
    %c1_1353 = arith.constant 1 : index
    %c0_1354 = arith.constant 0 : index
    %1218 = vector.load %arg2[%c0_1350, %c0_1351, %c0_1352, %c1_1353, %c0_1354] : memref<1x1x3x18x18xf32, #tpu.memory_space<vmem>>, vector<1x1x1x16x16xf32>
    %1219 = vector.shape_cast %1218 : vector<1x1x1x16x16xf32> to vector<16x16xf32>
    %1220 = vector.broadcast %1217 : vector<1x1xf32> to vector<16x16xf32>
    %1221 = arith.mulf %1220, %1219 : vector<16x16xf32>
    %1222 = arith.addf %1215, %1221 : vector<16x16xf32>
    %c0_1355 = arith.constant 0 : index
    %c6_1356 = arith.constant 6 : index
    %c4_1357 = arith.constant 4 : index
    %1223 = vector.load %arg3[%c0_1355, %c6_1356, %c4_1357] : memref<1x8x27xf32, #tpu.memory_space<vmem>>, vector<1x1x1xf32>
    %1224 = vector.shape_cast %1223 : vector<1x1x1xf32> to vector<1x1xf32>
    %c0_1358 = arith.constant 0 : index
    %c0_1359 = arith.constant 0 : index
    %c0_1360 = arith.constant 0 : index
    %c1_1361 = arith.constant 1 : index
    %c1_1362 = arith.constant 1 : index
    %1225 = vector.load %arg2[%c0_1358, %c0_1359, %c0_1360, %c1_1361, %c1_1362] : memref<1x1x3x18x18xf32, #tpu.memory_space<vmem>>, vector<1x1x1x16x16xf32>
    %1226 = vector.shape_cast %1225 : vector<1x1x1x16x16xf32> to vector<16x16xf32>
    %1227 = vector.broadcast %1224 : vector<1x1xf32> to vector<16x16xf32>
    %1228 = arith.mulf %1227, %1226 : vector<16x16xf32>
    %1229 = arith.addf %1222, %1228 : vector<16x16xf32>
    %c0_1363 = arith.constant 0 : index
    %c6_1364 = arith.constant 6 : index
    %c5_1365 = arith.constant 5 : index
    %1230 = vector.load %arg3[%c0_1363, %c6_1364, %c5_1365] : memref<1x8x27xf32, #tpu.memory_space<vmem>>, vector<1x1x1xf32>
    %1231 = vector.shape_cast %1230 : vector<1x1x1xf32> to vector<1x1xf32>
    %c0_1366 = arith.constant 0 : index
    %c0_1367 = arith.constant 0 : index
    %c0_1368 = arith.constant 0 : index
    %c1_1369 = arith.constant 1 : index
    %c2_1370 = arith.constant 2 : index
    %1232 = vector.load %arg2[%c0_1366, %c0_1367, %c0_1368, %c1_1369, %c2_1370] : memref<1x1x3x18x18xf32, #tpu.memory_space<vmem>>, vector<1x1x1x16x16xf32>
    %1233 = vector.shape_cast %1232 : vector<1x1x1x16x16xf32> to vector<16x16xf32>
    %1234 = vector.broadcast %1231 : vector<1x1xf32> to vector<16x16xf32>
    %1235 = arith.mulf %1234, %1233 : vector<16x16xf32>
    %1236 = arith.addf %1229, %1235 : vector<16x16xf32>
    %c0_1371 = arith.constant 0 : index
    %c6_1372 = arith.constant 6 : index
    %c6_1373 = arith.constant 6 : index
    %1237 = vector.load %arg3[%c0_1371, %c6_1372, %c6_1373] : memref<1x8x27xf32, #tpu.memory_space<vmem>>, vector<1x1x1xf32>
    %1238 = vector.shape_cast %1237 : vector<1x1x1xf32> to vector<1x1xf32>
    %c0_1374 = arith.constant 0 : index
    %c0_1375 = arith.constant 0 : index
    %c0_1376 = arith.constant 0 : index
    %c2_1377 = arith.constant 2 : index
    %c0_1378 = arith.constant 0 : index
    %1239 = vector.load %arg2[%c0_1374, %c0_1375, %c0_1376, %c2_1377, %c0_1378] : memref<1x1x3x18x18xf32, #tpu.memory_space<vmem>>, vector<1x1x1x16x16xf32>
    %1240 = vector.shape_cast %1239 : vector<1x1x1x16x16xf32> to vector<16x16xf32>
    %1241 = vector.broadcast %1238 : vector<1x1xf32> to vector<16x16xf32>
    %1242 = arith.mulf %1241, %1240 : vector<16x16xf32>
    %1243 = arith.addf %1236, %1242 : vector<16x16xf32>
    %c0_1379 = arith.constant 0 : index
    %c6_1380 = arith.constant 6 : index
    %c7_1381 = arith.constant 7 : index
    %1244 = vector.load %arg3[%c0_1379, %c6_1380, %c7_1381] : memref<1x8x27xf32, #tpu.memory_space<vmem>>, vector<1x1x1xf32>
    %1245 = vector.shape_cast %1244 : vector<1x1x1xf32> to vector<1x1xf32>
    %c0_1382 = arith.constant 0 : index
    %c0_1383 = arith.constant 0 : index
    %c0_1384 = arith.constant 0 : index
    %c2_1385 = arith.constant 2 : index
    %c1_1386 = arith.constant 1 : index
    %1246 = vector.load %arg2[%c0_1382, %c0_1383, %c0_1384, %c2_1385, %c1_1386] : memref<1x1x3x18x18xf32, #tpu.memory_space<vmem>>, vector<1x1x1x16x16xf32>
    %1247 = vector.shape_cast %1246 : vector<1x1x1x16x16xf32> to vector<16x16xf32>
    %1248 = vector.broadcast %1245 : vector<1x1xf32> to vector<16x16xf32>
    %1249 = arith.mulf %1248, %1247 : vector<16x16xf32>
    %1250 = arith.addf %1243, %1249 : vector<16x16xf32>
    %c0_1387 = arith.constant 0 : index
    %c6_1388 = arith.constant 6 : index
    %c8_1389 = arith.constant 8 : index
    %1251 = vector.load %arg3[%c0_1387, %c6_1388, %c8_1389] : memref<1x8x27xf32, #tpu.memory_space<vmem>>, vector<1x1x1xf32>
    %1252 = vector.shape_cast %1251 : vector<1x1x1xf32> to vector<1x1xf32>
    %c0_1390 = arith.constant 0 : index
    %c0_1391 = arith.constant 0 : index
    %c0_1392 = arith.constant 0 : index
    %c2_1393 = arith.constant 2 : index
    %c2_1394 = arith.constant 2 : index
    %1253 = vector.load %arg2[%c0_1390, %c0_1391, %c0_1392, %c2_1393, %c2_1394] : memref<1x1x3x18x18xf32, #tpu.memory_space<vmem>>, vector<1x1x1x16x16xf32>
    %1254 = vector.shape_cast %1253 : vector<1x1x1x16x16xf32> to vector<16x16xf32>
    %1255 = vector.broadcast %1252 : vector<1x1xf32> to vector<16x16xf32>
    %1256 = arith.mulf %1255, %1254 : vector<16x16xf32>
    %1257 = arith.addf %1250, %1256 : vector<16x16xf32>
    %c0_1395 = arith.constant 0 : index
    %c6_1396 = arith.constant 6 : index
    %c9_1397 = arith.constant 9 : index
    %1258 = vector.load %arg3[%c0_1395, %c6_1396, %c9_1397] : memref<1x8x27xf32, #tpu.memory_space<vmem>>, vector<1x1x1xf32>
    %1259 = vector.shape_cast %1258 : vector<1x1x1xf32> to vector<1x1xf32>
    %c0_1398 = arith.constant 0 : index
    %c0_1399 = arith.constant 0 : index
    %c1_1400 = arith.constant 1 : index
    %c0_1401 = arith.constant 0 : index
    %c0_1402 = arith.constant 0 : index
    %1260 = vector.load %arg2[%c0_1398, %c0_1399, %c1_1400, %c0_1401, %c0_1402] : memref<1x1x3x18x18xf32, #tpu.memory_space<vmem>>, vector<1x1x1x16x16xf32>
    %1261 = vector.shape_cast %1260 : vector<1x1x1x16x16xf32> to vector<16x16xf32>
    %1262 = vector.broadcast %1259 : vector<1x1xf32> to vector<16x16xf32>
    %1263 = arith.mulf %1262, %1261 : vector<16x16xf32>
    %1264 = arith.addf %1257, %1263 : vector<16x16xf32>
    %c0_1403 = arith.constant 0 : index
    %c6_1404 = arith.constant 6 : index
    %c10_1405 = arith.constant 10 : index
    %1265 = vector.load %arg3[%c0_1403, %c6_1404, %c10_1405] : memref<1x8x27xf32, #tpu.memory_space<vmem>>, vector<1x1x1xf32>
    %1266 = vector.shape_cast %1265 : vector<1x1x1xf32> to vector<1x1xf32>
    %c0_1406 = arith.constant 0 : index
    %c0_1407 = arith.constant 0 : index
    %c1_1408 = arith.constant 1 : index
    %c0_1409 = arith.constant 0 : index
    %c1_1410 = arith.constant 1 : index
    %1267 = vector.load %arg2[%c0_1406, %c0_1407, %c1_1408, %c0_1409, %c1_1410] : memref<1x1x3x18x18xf32, #tpu.memory_space<vmem>>, vector<1x1x1x16x16xf32>
    %1268 = vector.shape_cast %1267 : vector<1x1x1x16x16xf32> to vector<16x16xf32>
    %1269 = vector.broadcast %1266 : vector<1x1xf32> to vector<16x16xf32>
    %1270 = arith.mulf %1269, %1268 : vector<16x16xf32>
    %1271 = arith.addf %1264, %1270 : vector<16x16xf32>
    %c0_1411 = arith.constant 0 : index
    %c6_1412 = arith.constant 6 : index
    %c11_1413 = arith.constant 11 : index
    %1272 = vector.load %arg3[%c0_1411, %c6_1412, %c11_1413] : memref<1x8x27xf32, #tpu.memory_space<vmem>>, vector<1x1x1xf32>
    %1273 = vector.shape_cast %1272 : vector<1x1x1xf32> to vector<1x1xf32>
    %c0_1414 = arith.constant 0 : index
    %c0_1415 = arith.constant 0 : index
    %c1_1416 = arith.constant 1 : index
    %c0_1417 = arith.constant 0 : index
    %c2_1418 = arith.constant 2 : index
    %1274 = vector.load %arg2[%c0_1414, %c0_1415, %c1_1416, %c0_1417, %c2_1418] : memref<1x1x3x18x18xf32, #tpu.memory_space<vmem>>, vector<1x1x1x16x16xf32>
    %1275 = vector.shape_cast %1274 : vector<1x1x1x16x16xf32> to vector<16x16xf32>
    %1276 = vector.broadcast %1273 : vector<1x1xf32> to vector<16x16xf32>
    %1277 = arith.mulf %1276, %1275 : vector<16x16xf32>
    %1278 = arith.addf %1271, %1277 : vector<16x16xf32>
    %c0_1419 = arith.constant 0 : index
    %c6_1420 = arith.constant 6 : index
    %c12_1421 = arith.constant 12 : index
    %1279 = vector.load %arg3[%c0_1419, %c6_1420, %c12_1421] : memref<1x8x27xf32, #tpu.memory_space<vmem>>, vector<1x1x1xf32>
    %1280 = vector.shape_cast %1279 : vector<1x1x1xf32> to vector<1x1xf32>
    %c0_1422 = arith.constant 0 : index
    %c0_1423 = arith.constant 0 : index
    %c1_1424 = arith.constant 1 : index
    %c1_1425 = arith.constant 1 : index
    %c0_1426 = arith.constant 0 : index
    %1281 = vector.load %arg2[%c0_1422, %c0_1423, %c1_1424, %c1_1425, %c0_1426] : memref<1x1x3x18x18xf32, #tpu.memory_space<vmem>>, vector<1x1x1x16x16xf32>
    %1282 = vector.shape_cast %1281 : vector<1x1x1x16x16xf32> to vector<16x16xf32>
    %1283 = vector.broadcast %1280 : vector<1x1xf32> to vector<16x16xf32>
    %1284 = arith.mulf %1283, %1282 : vector<16x16xf32>
    %1285 = arith.addf %1278, %1284 : vector<16x16xf32>
    %c0_1427 = arith.constant 0 : index
    %c6_1428 = arith.constant 6 : index
    %c13_1429 = arith.constant 13 : index
    %1286 = vector.load %arg3[%c0_1427, %c6_1428, %c13_1429] : memref<1x8x27xf32, #tpu.memory_space<vmem>>, vector<1x1x1xf32>
    %1287 = vector.shape_cast %1286 : vector<1x1x1xf32> to vector<1x1xf32>
    %c0_1430 = arith.constant 0 : index
    %c0_1431 = arith.constant 0 : index
    %c1_1432 = arith.constant 1 : index
    %c1_1433 = arith.constant 1 : index
    %c1_1434 = arith.constant 1 : index
    %1288 = vector.load %arg2[%c0_1430, %c0_1431, %c1_1432, %c1_1433, %c1_1434] : memref<1x1x3x18x18xf32, #tpu.memory_space<vmem>>, vector<1x1x1x16x16xf32>
    %1289 = vector.shape_cast %1288 : vector<1x1x1x16x16xf32> to vector<16x16xf32>
    %1290 = vector.broadcast %1287 : vector<1x1xf32> to vector<16x16xf32>
    %1291 = arith.mulf %1290, %1289 : vector<16x16xf32>
    %1292 = arith.addf %1285, %1291 : vector<16x16xf32>
    %c0_1435 = arith.constant 0 : index
    %c6_1436 = arith.constant 6 : index
    %c14_1437 = arith.constant 14 : index
    %1293 = vector.load %arg3[%c0_1435, %c6_1436, %c14_1437] : memref<1x8x27xf32, #tpu.memory_space<vmem>>, vector<1x1x1xf32>
    %1294 = vector.shape_cast %1293 : vector<1x1x1xf32> to vector<1x1xf32>
    %c0_1438 = arith.constant 0 : index
    %c0_1439 = arith.constant 0 : index
    %c1_1440 = arith.constant 1 : index
    %c1_1441 = arith.constant 1 : index
    %c2_1442 = arith.constant 2 : index
    %1295 = vector.load %arg2[%c0_1438, %c0_1439, %c1_1440, %c1_1441, %c2_1442] : memref<1x1x3x18x18xf32, #tpu.memory_space<vmem>>, vector<1x1x1x16x16xf32>
    %1296 = vector.shape_cast %1295 : vector<1x1x1x16x16xf32> to vector<16x16xf32>
    %1297 = vector.broadcast %1294 : vector<1x1xf32> to vector<16x16xf32>
    %1298 = arith.mulf %1297, %1296 : vector<16x16xf32>
    %1299 = arith.addf %1292, %1298 : vector<16x16xf32>
    %c0_1443 = arith.constant 0 : index
    %c6_1444 = arith.constant 6 : index
    %c15_1445 = arith.constant 15 : index
    %1300 = vector.load %arg3[%c0_1443, %c6_1444, %c15_1445] : memref<1x8x27xf32, #tpu.memory_space<vmem>>, vector<1x1x1xf32>
    %1301 = vector.shape_cast %1300 : vector<1x1x1xf32> to vector<1x1xf32>
    %c0_1446 = arith.constant 0 : index
    %c0_1447 = arith.constant 0 : index
    %c1_1448 = arith.constant 1 : index
    %c2_1449 = arith.constant 2 : index
    %c0_1450 = arith.constant 0 : index
    %1302 = vector.load %arg2[%c0_1446, %c0_1447, %c1_1448, %c2_1449, %c0_1450] : memref<1x1x3x18x18xf32, #tpu.memory_space<vmem>>, vector<1x1x1x16x16xf32>
    %1303 = vector.shape_cast %1302 : vector<1x1x1x16x16xf32> to vector<16x16xf32>
    %1304 = vector.broadcast %1301 : vector<1x1xf32> to vector<16x16xf32>
    %1305 = arith.mulf %1304, %1303 : vector<16x16xf32>
    %1306 = arith.addf %1299, %1305 : vector<16x16xf32>
    %c0_1451 = arith.constant 0 : index
    %c6_1452 = arith.constant 6 : index
    %c16_1453 = arith.constant 16 : index
    %1307 = vector.load %arg3[%c0_1451, %c6_1452, %c16_1453] : memref<1x8x27xf32, #tpu.memory_space<vmem>>, vector<1x1x1xf32>
    %1308 = vector.shape_cast %1307 : vector<1x1x1xf32> to vector<1x1xf32>
    %c0_1454 = arith.constant 0 : index
    %c0_1455 = arith.constant 0 : index
    %c1_1456 = arith.constant 1 : index
    %c2_1457 = arith.constant 2 : index
    %c1_1458 = arith.constant 1 : index
    %1309 = vector.load %arg2[%c0_1454, %c0_1455, %c1_1456, %c2_1457, %c1_1458] : memref<1x1x3x18x18xf32, #tpu.memory_space<vmem>>, vector<1x1x1x16x16xf32>
    %1310 = vector.shape_cast %1309 : vector<1x1x1x16x16xf32> to vector<16x16xf32>
    %1311 = vector.broadcast %1308 : vector<1x1xf32> to vector<16x16xf32>
    %1312 = arith.mulf %1311, %1310 : vector<16x16xf32>
    %1313 = arith.addf %1306, %1312 : vector<16x16xf32>
    %c0_1459 = arith.constant 0 : index
    %c6_1460 = arith.constant 6 : index
    %c17_1461 = arith.constant 17 : index
    %1314 = vector.load %arg3[%c0_1459, %c6_1460, %c17_1461] : memref<1x8x27xf32, #tpu.memory_space<vmem>>, vector<1x1x1xf32>
    %1315 = vector.shape_cast %1314 : vector<1x1x1xf32> to vector<1x1xf32>
    %c0_1462 = arith.constant 0 : index
    %c0_1463 = arith.constant 0 : index
    %c1_1464 = arith.constant 1 : index
    %c2_1465 = arith.constant 2 : index
    %c2_1466 = arith.constant 2 : index
    %1316 = vector.load %arg2[%c0_1462, %c0_1463, %c1_1464, %c2_1465, %c2_1466] : memref<1x1x3x18x18xf32, #tpu.memory_space<vmem>>, vector<1x1x1x16x16xf32>
    %1317 = vector.shape_cast %1316 : vector<1x1x1x16x16xf32> to vector<16x16xf32>
    %1318 = vector.broadcast %1315 : vector<1x1xf32> to vector<16x16xf32>
    %1319 = arith.mulf %1318, %1317 : vector<16x16xf32>
    %1320 = arith.addf %1313, %1319 : vector<16x16xf32>
    %c0_1467 = arith.constant 0 : index
    %c6_1468 = arith.constant 6 : index
    %c18_1469 = arith.constant 18 : index
    %1321 = vector.load %arg3[%c0_1467, %c6_1468, %c18_1469] : memref<1x8x27xf32, #tpu.memory_space<vmem>>, vector<1x1x1xf32>
    %1322 = vector.shape_cast %1321 : vector<1x1x1xf32> to vector<1x1xf32>
    %c0_1470 = arith.constant 0 : index
    %c0_1471 = arith.constant 0 : index
    %c2_1472 = arith.constant 2 : index
    %c0_1473 = arith.constant 0 : index
    %c0_1474 = arith.constant 0 : index
    %1323 = vector.load %arg2[%c0_1470, %c0_1471, %c2_1472, %c0_1473, %c0_1474] : memref<1x1x3x18x18xf32, #tpu.memory_space<vmem>>, vector<1x1x1x16x16xf32>
    %1324 = vector.shape_cast %1323 : vector<1x1x1x16x16xf32> to vector<16x16xf32>
    %1325 = vector.broadcast %1322 : vector<1x1xf32> to vector<16x16xf32>
    %1326 = arith.mulf %1325, %1324 : vector<16x16xf32>
    %1327 = arith.addf %1320, %1326 : vector<16x16xf32>
    %c0_1475 = arith.constant 0 : index
    %c6_1476 = arith.constant 6 : index
    %c19_1477 = arith.constant 19 : index
    %1328 = vector.load %arg3[%c0_1475, %c6_1476, %c19_1477] : memref<1x8x27xf32, #tpu.memory_space<vmem>>, vector<1x1x1xf32>
    %1329 = vector.shape_cast %1328 : vector<1x1x1xf32> to vector<1x1xf32>
    %c0_1478 = arith.constant 0 : index
    %c0_1479 = arith.constant 0 : index
    %c2_1480 = arith.constant 2 : index
    %c0_1481 = arith.constant 0 : index
    %c1_1482 = arith.constant 1 : index
    %1330 = vector.load %arg2[%c0_1478, %c0_1479, %c2_1480, %c0_1481, %c1_1482] : memref<1x1x3x18x18xf32, #tpu.memory_space<vmem>>, vector<1x1x1x16x16xf32>
    %1331 = vector.shape_cast %1330 : vector<1x1x1x16x16xf32> to vector<16x16xf32>
    %1332 = vector.broadcast %1329 : vector<1x1xf32> to vector<16x16xf32>
    %1333 = arith.mulf %1332, %1331 : vector<16x16xf32>
    %1334 = arith.addf %1327, %1333 : vector<16x16xf32>
    %c0_1483 = arith.constant 0 : index
    %c6_1484 = arith.constant 6 : index
    %c20_1485 = arith.constant 20 : index
    %1335 = vector.load %arg3[%c0_1483, %c6_1484, %c20_1485] : memref<1x8x27xf32, #tpu.memory_space<vmem>>, vector<1x1x1xf32>
    %1336 = vector.shape_cast %1335 : vector<1x1x1xf32> to vector<1x1xf32>
    %c0_1486 = arith.constant 0 : index
    %c0_1487 = arith.constant 0 : index
    %c2_1488 = arith.constant 2 : index
    %c0_1489 = arith.constant 0 : index
    %c2_1490 = arith.constant 2 : index
    %1337 = vector.load %arg2[%c0_1486, %c0_1487, %c2_1488, %c0_1489, %c2_1490] : memref<1x1x3x18x18xf32, #tpu.memory_space<vmem>>, vector<1x1x1x16x16xf32>
    %1338 = vector.shape_cast %1337 : vector<1x1x1x16x16xf32> to vector<16x16xf32>
    %1339 = vector.broadcast %1336 : vector<1x1xf32> to vector<16x16xf32>
    %1340 = arith.mulf %1339, %1338 : vector<16x16xf32>
    %1341 = arith.addf %1334, %1340 : vector<16x16xf32>
    %c0_1491 = arith.constant 0 : index
    %c6_1492 = arith.constant 6 : index
    %c21_1493 = arith.constant 21 : index
    %1342 = vector.load %arg3[%c0_1491, %c6_1492, %c21_1493] : memref<1x8x27xf32, #tpu.memory_space<vmem>>, vector<1x1x1xf32>
    %1343 = vector.shape_cast %1342 : vector<1x1x1xf32> to vector<1x1xf32>
    %c0_1494 = arith.constant 0 : index
    %c0_1495 = arith.constant 0 : index
    %c2_1496 = arith.constant 2 : index
    %c1_1497 = arith.constant 1 : index
    %c0_1498 = arith.constant 0 : index
    %1344 = vector.load %arg2[%c0_1494, %c0_1495, %c2_1496, %c1_1497, %c0_1498] : memref<1x1x3x18x18xf32, #tpu.memory_space<vmem>>, vector<1x1x1x16x16xf32>
    %1345 = vector.shape_cast %1344 : vector<1x1x1x16x16xf32> to vector<16x16xf32>
    %1346 = vector.broadcast %1343 : vector<1x1xf32> to vector<16x16xf32>
    %1347 = arith.mulf %1346, %1345 : vector<16x16xf32>
    %1348 = arith.addf %1341, %1347 : vector<16x16xf32>
    %c0_1499 = arith.constant 0 : index
    %c6_1500 = arith.constant 6 : index
    %c22_1501 = arith.constant 22 : index
    %1349 = vector.load %arg3[%c0_1499, %c6_1500, %c22_1501] : memref<1x8x27xf32, #tpu.memory_space<vmem>>, vector<1x1x1xf32>
    %1350 = vector.shape_cast %1349 : vector<1x1x1xf32> to vector<1x1xf32>
    %c0_1502 = arith.constant 0 : index
    %c0_1503 = arith.constant 0 : index
    %c2_1504 = arith.constant 2 : index
    %c1_1505 = arith.constant 1 : index
    %c1_1506 = arith.constant 1 : index
    %1351 = vector.load %arg2[%c0_1502, %c0_1503, %c2_1504, %c1_1505, %c1_1506] : memref<1x1x3x18x18xf32, #tpu.memory_space<vmem>>, vector<1x1x1x16x16xf32>
    %1352 = vector.shape_cast %1351 : vector<1x1x1x16x16xf32> to vector<16x16xf32>
    %1353 = vector.broadcast %1350 : vector<1x1xf32> to vector<16x16xf32>
    %1354 = arith.mulf %1353, %1352 : vector<16x16xf32>
    %1355 = arith.addf %1348, %1354 : vector<16x16xf32>
    %c0_1507 = arith.constant 0 : index
    %c6_1508 = arith.constant 6 : index
    %c23_1509 = arith.constant 23 : index
    %1356 = vector.load %arg3[%c0_1507, %c6_1508, %c23_1509] : memref<1x8x27xf32, #tpu.memory_space<vmem>>, vector<1x1x1xf32>
    %1357 = vector.shape_cast %1356 : vector<1x1x1xf32> to vector<1x1xf32>
    %c0_1510 = arith.constant 0 : index
    %c0_1511 = arith.constant 0 : index
    %c2_1512 = arith.constant 2 : index
    %c1_1513 = arith.constant 1 : index
    %c2_1514 = arith.constant 2 : index
    %1358 = vector.load %arg2[%c0_1510, %c0_1511, %c2_1512, %c1_1513, %c2_1514] : memref<1x1x3x18x18xf32, #tpu.memory_space<vmem>>, vector<1x1x1x16x16xf32>
    %1359 = vector.shape_cast %1358 : vector<1x1x1x16x16xf32> to vector<16x16xf32>
    %1360 = vector.broadcast %1357 : vector<1x1xf32> to vector<16x16xf32>
    %1361 = arith.mulf %1360, %1359 : vector<16x16xf32>
    %1362 = arith.addf %1355, %1361 : vector<16x16xf32>
    %c0_1515 = arith.constant 0 : index
    %c6_1516 = arith.constant 6 : index
    %c24_1517 = arith.constant 24 : index
    %1363 = vector.load %arg3[%c0_1515, %c6_1516, %c24_1517] : memref<1x8x27xf32, #tpu.memory_space<vmem>>, vector<1x1x1xf32>
    %1364 = vector.shape_cast %1363 : vector<1x1x1xf32> to vector<1x1xf32>
    %c0_1518 = arith.constant 0 : index
    %c0_1519 = arith.constant 0 : index
    %c2_1520 = arith.constant 2 : index
    %c2_1521 = arith.constant 2 : index
    %c0_1522 = arith.constant 0 : index
    %1365 = vector.load %arg2[%c0_1518, %c0_1519, %c2_1520, %c2_1521, %c0_1522] : memref<1x1x3x18x18xf32, #tpu.memory_space<vmem>>, vector<1x1x1x16x16xf32>
    %1366 = vector.shape_cast %1365 : vector<1x1x1x16x16xf32> to vector<16x16xf32>
    %1367 = vector.broadcast %1364 : vector<1x1xf32> to vector<16x16xf32>
    %1368 = arith.mulf %1367, %1366 : vector<16x16xf32>
    %1369 = arith.addf %1362, %1368 : vector<16x16xf32>
    %c0_1523 = arith.constant 0 : index
    %c6_1524 = arith.constant 6 : index
    %c25_1525 = arith.constant 25 : index
    %1370 = vector.load %arg3[%c0_1523, %c6_1524, %c25_1525] : memref<1x8x27xf32, #tpu.memory_space<vmem>>, vector<1x1x1xf32>
    %1371 = vector.shape_cast %1370 : vector<1x1x1xf32> to vector<1x1xf32>
    %c0_1526 = arith.constant 0 : index
    %c0_1527 = arith.constant 0 : index
    %c2_1528 = arith.constant 2 : index
    %c2_1529 = arith.constant 2 : index
    %c1_1530 = arith.constant 1 : index
    %1372 = vector.load %arg2[%c0_1526, %c0_1527, %c2_1528, %c2_1529, %c1_1530] : memref<1x1x3x18x18xf32, #tpu.memory_space<vmem>>, vector<1x1x1x16x16xf32>
    %1373 = vector.shape_cast %1372 : vector<1x1x1x16x16xf32> to vector<16x16xf32>
    %1374 = vector.broadcast %1371 : vector<1x1xf32> to vector<16x16xf32>
    %1375 = arith.mulf %1374, %1373 : vector<16x16xf32>
    %1376 = arith.addf %1369, %1375 : vector<16x16xf32>
    %c0_1531 = arith.constant 0 : index
    %c6_1532 = arith.constant 6 : index
    %c26_1533 = arith.constant 26 : index
    %1377 = vector.load %arg3[%c0_1531, %c6_1532, %c26_1533] : memref<1x8x27xf32, #tpu.memory_space<vmem>>, vector<1x1x1xf32>
    %1378 = vector.shape_cast %1377 : vector<1x1x1xf32> to vector<1x1xf32>
    %c0_1534 = arith.constant 0 : index
    %c0_1535 = arith.constant 0 : index
    %c2_1536 = arith.constant 2 : index
    %c2_1537 = arith.constant 2 : index
    %c2_1538 = arith.constant 2 : index
    %1379 = vector.load %arg2[%c0_1534, %c0_1535, %c2_1536, %c2_1537, %c2_1538] : memref<1x1x3x18x18xf32, #tpu.memory_space<vmem>>, vector<1x1x1x16x16xf32>
    %1380 = vector.shape_cast %1379 : vector<1x1x1x16x16xf32> to vector<16x16xf32>
    %1381 = vector.broadcast %1378 : vector<1x1xf32> to vector<16x16xf32>
    %1382 = arith.mulf %1381, %1380 : vector<16x16xf32>
    %1383 = arith.addf %1376, %1382 : vector<16x16xf32>
    %c0_1539 = arith.constant 0 : index
    %c6_1540 = arith.constant 6 : index
    %c0_1541 = arith.constant 0 : index
    %1384 = vector.load %arg4[%c0_1539, %c6_1540, %c0_1541] : memref<1x8x1xf32, #tpu.memory_space<vmem>>, vector<1x1x1xf32>
    %1385 = vector.shape_cast %1384 : vector<1x1x1xf32> to vector<1x1xf32>
    %1386 = vector.broadcast %1385 : vector<1x1xf32> to vector<16x16xf32>
    %1387 = arith.addf %1383, %1386 : vector<16x16xf32>
    %cst_1542 = arith.constant 0.000000e+00 : f32
    %1388 = vector.broadcast %cst_1542 : f32 to vector<16x16xf32>
    %1389 = arith.maximumf %1387, %1388 : vector<16x16xf32>
    %c0_1543 = arith.constant 0 : index
    %c6_1544 = arith.constant 6 : index
    %c0_1545 = arith.constant 0 : index
    %c0_1546 = arith.constant 0 : index
    %1390 = vector.load %arg5[%c0_1543, %c6_1544, %c0_1545, %c0_1546] : memref<1x8x16x16xf32, #tpu.memory_space<vmem>>, vector<1x1x16x16xf32>
    %1391 = vector.shape_cast %1390 : vector<1x1x16x16xf32> to vector<16x16xf32>
    %1392 = vector.shape_cast %1389 : vector<16x16xf32> to vector<1x1x16x16xf32>
    tpu.vector_store %arg5[%c0_1543, %c6_1544, %c0_1545, %c0_1546], %1392 {strides = array<i32>} : memref<1x8x16x16xf32, #tpu.memory_space<vmem>>, vector<1x1x16x16xf32>,
    %cst_1547 = arith.constant 0.000000e+00 : f32
    %1393 = vector.broadcast %cst_1547 : f32 to vector<16x16xf32>
    %c0_1548 = arith.constant 0 : index
    %c7_1549 = arith.constant 7 : index
    %c0_1550 = arith.constant 0 : index
    %1394 = vector.load %arg3[%c0_1548, %c7_1549, %c0_1550] : memref<1x8x27xf32, #tpu.memory_space<vmem>>, vector<1x1x1xf32>
    %1395 = vector.shape_cast %1394 : vector<1x1x1xf32> to vector<1x1xf32>
    %c0_1551 = arith.constant 0 : index
    %c0_1552 = arith.constant 0 : index
    %c0_1553 = arith.constant 0 : index
    %c0_1554 = arith.constant 0 : index
    %c0_1555 = arith.constant 0 : index
    %1396 = vector.load %arg2[%c0_1551, %c0_1552, %c0_1553, %c0_1554, %c0_1555] : memref<1x1x3x18x18xf32, #tpu.memory_space<vmem>>, vector<1x1x1x16x16xf32>
    %1397 = vector.shape_cast %1396 : vector<1x1x1x16x16xf32> to vector<16x16xf32>
    %1398 = vector.broadcast %1395 : vector<1x1xf32> to vector<16x16xf32>
    %1399 = arith.mulf %1398, %1397 : vector<16x16xf32>
    %1400 = arith.addf %1393, %1399 : vector<16x16xf32>
    %c0_1556 = arith.constant 0 : index
    %c7_1557 = arith.constant 7 : index
    %c1_1558 = arith.constant 1 : index
    %1401 = vector.load %arg3[%c0_1556, %c7_1557, %c1_1558] : memref<1x8x27xf32, #tpu.memory_space<vmem>>, vector<1x1x1xf32>
    %1402 = vector.shape_cast %1401 : vector<1x1x1xf32> to vector<1x1xf32>
    %c0_1559 = arith.constant 0 : index
    %c0_1560 = arith.constant 0 : index
    %c0_1561 = arith.constant 0 : index
    %c0_1562 = arith.constant 0 : index
    %c1_1563 = arith.constant 1 : index
    %1403 = vector.load %arg2[%c0_1559, %c0_1560, %c0_1561, %c0_1562, %c1_1563] : memref<1x1x3x18x18xf32, #tpu.memory_space<vmem>>, vector<1x1x1x16x16xf32>
    %1404 = vector.shape_cast %1403 : vector<1x1x1x16x16xf32> to vector<16x16xf32>
    %1405 = vector.broadcast %1402 : vector<1x1xf32> to vector<16x16xf32>
    %1406 = arith.mulf %1405, %1404 : vector<16x16xf32>
    %1407 = arith.addf %1400, %1406 : vector<16x16xf32>
    %c0_1564 = arith.constant 0 : index
    %c7_1565 = arith.constant 7 : index
    %c2_1566 = arith.constant 2 : index
    %1408 = vector.load %arg3[%c0_1564, %c7_1565, %c2_1566] : memref<1x8x27xf32, #tpu.memory_space<vmem>>, vector<1x1x1xf32>
    %1409 = vector.shape_cast %1408 : vector<1x1x1xf32> to vector<1x1xf32>
    %c0_1567 = arith.constant 0 : index
    %c0_1568 = arith.constant 0 : index
    %c0_1569 = arith.constant 0 : index
    %c0_1570 = arith.constant 0 : index
    %c2_1571 = arith.constant 2 : index
    %1410 = vector.load %arg2[%c0_1567, %c0_1568, %c0_1569, %c0_1570, %c2_1571] : memref<1x1x3x18x18xf32, #tpu.memory_space<vmem>>, vector<1x1x1x16x16xf32>
    %1411 = vector.shape_cast %1410 : vector<1x1x1x16x16xf32> to vector<16x16xf32>
    %1412 = vector.broadcast %1409 : vector<1x1xf32> to vector<16x16xf32>
    %1413 = arith.mulf %1412, %1411 : vector<16x16xf32>
    %1414 = arith.addf %1407, %1413 : vector<16x16xf32>
    %c0_1572 = arith.constant 0 : index
    %c7_1573 = arith.constant 7 : index
    %c3_1574 = arith.constant 3 : index
    %1415 = vector.load %arg3[%c0_1572, %c7_1573, %c3_1574] : memref<1x8x27xf32, #tpu.memory_space<vmem>>, vector<1x1x1xf32>
    %1416 = vector.shape_cast %1415 : vector<1x1x1xf32> to vector<1x1xf32>
    %c0_1575 = arith.constant 0 : index
    %c0_1576 = arith.constant 0 : index
    %c0_1577 = arith.constant 0 : index
    %c1_1578 = arith.constant 1 : index
    %c0_1579 = arith.constant 0 : index
    %1417 = vector.load %arg2[%c0_1575, %c0_1576, %c0_1577, %c1_1578, %c0_1579] : memref<1x1x3x18x18xf32, #tpu.memory_space<vmem>>, vector<1x1x1x16x16xf32>
    %1418 = vector.shape_cast %1417 : vector<1x1x1x16x16xf32> to vector<16x16xf32>
    %1419 = vector.broadcast %1416 : vector<1x1xf32> to vector<16x16xf32>
    %1420 = arith.mulf %1419, %1418 : vector<16x16xf32>
    %1421 = arith.addf %1414, %1420 : vector<16x16xf32>
    %c0_1580 = arith.constant 0 : index
    %c7_1581 = arith.constant 7 : index
    %c4_1582 = arith.constant 4 : index
    %1422 = vector.load %arg3[%c0_1580, %c7_1581, %c4_1582] : memref<1x8x27xf32, #tpu.memory_space<vmem>>, vector<1x1x1xf32>
    %1423 = vector.shape_cast %1422 : vector<1x1x1xf32> to vector<1x1xf32>
    %c0_1583 = arith.constant 0 : index
    %c0_1584 = arith.constant 0 : index
    %c0_1585 = arith.constant 0 : index
    %c1_1586 = arith.constant 1 : index
    %c1_1587 = arith.constant 1 : index
    %1424 = vector.load %arg2[%c0_1583, %c0_1584, %c0_1585, %c1_1586, %c1_1587] : memref<1x1x3x18x18xf32, #tpu.memory_space<vmem>>, vector<1x1x1x16x16xf32>
    %1425 = vector.shape_cast %1424 : vector<1x1x1x16x16xf32> to vector<16x16xf32>
    %1426 = vector.broadcast %1423 : vector<1x1xf32> to vector<16x16xf32>
    %1427 = arith.mulf %1426, %1425 : vector<16x16xf32>
    %1428 = arith.addf %1421, %1427 : vector<16x16xf32>
    %c0_1588 = arith.constant 0 : index
    %c7_1589 = arith.constant 7 : index
    %c5_1590 = arith.constant 5 : index
    %1429 = vector.load %arg3[%c0_1588, %c7_1589, %c5_1590] : memref<1x8x27xf32, #tpu.memory_space<vmem>>, vector<1x1x1xf32>
    %1430 = vector.shape_cast %1429 : vector<1x1x1xf32> to vector<1x1xf32>
    %c0_1591 = arith.constant 0 : index
    %c0_1592 = arith.constant 0 : index
    %c0_1593 = arith.constant 0 : index
    %c1_1594 = arith.constant 1 : index
    %c2_1595 = arith.constant 2 : index
    %1431 = vector.load %arg2[%c0_1591, %c0_1592, %c0_1593, %c1_1594, %c2_1595] : memref<1x1x3x18x18xf32, #tpu.memory_space<vmem>>, vector<1x1x1x16x16xf32>
    %1432 = vector.shape_cast %1431 : vector<1x1x1x16x16xf32> to vector<16x16xf32>
    %1433 = vector.broadcast %1430 : vector<1x1xf32> to vector<16x16xf32>
    %1434 = arith.mulf %1433, %1432 : vector<16x16xf32>
    %1435 = arith.addf %1428, %1434 : vector<16x16xf32>
    %c0_1596 = arith.constant 0 : index
    %c7_1597 = arith.constant 7 : index
    %c6_1598 = arith.constant 6 : index
    %1436 = vector.load %arg3[%c0_1596, %c7_1597, %c6_1598] : memref<1x8x27xf32, #tpu.memory_space<vmem>>, vector<1x1x1xf32>
    %1437 = vector.shape_cast %1436 : vector<1x1x1xf32> to vector<1x1xf32>
    %c0_1599 = arith.constant 0 : index
    %c0_1600 = arith.constant 0 : index
    %c0_1601 = arith.constant 0 : index
    %c2_1602 = arith.constant 2 : index
    %c0_1603 = arith.constant 0 : index
    %1438 = vector.load %arg2[%c0_1599, %c0_1600, %c0_1601, %c2_1602, %c0_1603] : memref<1x1x3x18x18xf32, #tpu.memory_space<vmem>>, vector<1x1x1x16x16xf32>
    %1439 = vector.shape_cast %1438 : vector<1x1x1x16x16xf32> to vector<16x16xf32>
    %1440 = vector.broadcast %1437 : vector<1x1xf32> to vector<16x16xf32>
    %1441 = arith.mulf %1440, %1439 : vector<16x16xf32>
    %1442 = arith.addf %1435, %1441 : vector<16x16xf32>
    %c0_1604 = arith.constant 0 : index
    %c7_1605 = arith.constant 7 : index
    %c7_1606 = arith.constant 7 : index
    %1443 = vector.load %arg3[%c0_1604, %c7_1605, %c7_1606] : memref<1x8x27xf32, #tpu.memory_space<vmem>>, vector<1x1x1xf32>
    %1444 = vector.shape_cast %1443 : vector<1x1x1xf32> to vector<1x1xf32>
    %c0_1607 = arith.constant 0 : index
    %c0_1608 = arith.constant 0 : index
    %c0_1609 = arith.constant 0 : index
    %c2_1610 = arith.constant 2 : index
    %c1_1611 = arith.constant 1 : index
    %1445 = vector.load %arg2[%c0_1607, %c0_1608, %c0_1609, %c2_1610, %c1_1611] : memref<1x1x3x18x18xf32, #tpu.memory_space<vmem>>, vector<1x1x1x16x16xf32>
    %1446 = vector.shape_cast %1445 : vector<1x1x1x16x16xf32> to vector<16x16xf32>
    %1447 = vector.broadcast %1444 : vector<1x1xf32> to vector<16x16xf32>
    %1448 = arith.mulf %1447, %1446 : vector<16x16xf32>
    %1449 = arith.addf %1442, %1448 : vector<16x16xf32>
    %c0_1612 = arith.constant 0 : index
    %c7_1613 = arith.constant 7 : index
    %c8_1614 = arith.constant 8 : index
    %1450 = vector.load %arg3[%c0_1612, %c7_1613, %c8_1614] : memref<1x8x27xf32, #tpu.memory_space<vmem>>, vector<1x1x1xf32>
    %1451 = vector.shape_cast %1450 : vector<1x1x1xf32> to vector<1x1xf32>
    %c0_1615 = arith.constant 0 : index
    %c0_1616 = arith.constant 0 : index
    %c0_1617 = arith.constant 0 : index
    %c2_1618 = arith.constant 2 : index
    %c2_1619 = arith.constant 2 : index
    %1452 = vector.load %arg2[%c0_1615, %c0_1616, %c0_1617, %c2_1618, %c2_1619] : memref<1x1x3x18x18xf32, #tpu.memory_space<vmem>>, vector<1x1x1x16x16xf32>
    %1453 = vector.shape_cast %1452 : vector<1x1x1x16x16xf32> to vector<16x16xf32>
    %1454 = vector.broadcast %1451 : vector<1x1xf32> to vector<16x16xf32>
    %1455 = arith.mulf %1454, %1453 : vector<16x16xf32>
    %1456 = arith.addf %1449, %1455 : vector<16x16xf32>
    %c0_1620 = arith.constant 0 : index
    %c7_1621 = arith.constant 7 : index
    %c9_1622 = arith.constant 9 : index
    %1457 = vector.load %arg3[%c0_1620, %c7_1621, %c9_1622] : memref<1x8x27xf32, #tpu.memory_space<vmem>>, vector<1x1x1xf32>
    %1458 = vector.shape_cast %1457 : vector<1x1x1xf32> to vector<1x1xf32>
    %c0_1623 = arith.constant 0 : index
    %c0_1624 = arith.constant 0 : index
    %c1_1625 = arith.constant 1 : index
    %c0_1626 = arith.constant 0 : index
    %c0_1627 = arith.constant 0 : index
    %1459 = vector.load %arg2[%c0_1623, %c0_1624, %c1_1625, %c0_1626, %c0_1627] : memref<1x1x3x18x18xf32, #tpu.memory_space<vmem>>, vector<1x1x1x16x16xf32>
    %1460 = vector.shape_cast %1459 : vector<1x1x1x16x16xf32> to vector<16x16xf32>
    %1461 = vector.broadcast %1458 : vector<1x1xf32> to vector<16x16xf32>
    %1462 = arith.mulf %1461, %1460 : vector<16x16xf32>
    %1463 = arith.addf %1456, %1462 : vector<16x16xf32>
    %c0_1628 = arith.constant 0 : index
    %c7_1629 = arith.constant 7 : index
    %c10_1630 = arith.constant 10 : index
    %1464 = vector.load %arg3[%c0_1628, %c7_1629, %c10_1630] : memref<1x8x27xf32, #tpu.memory_space<vmem>>, vector<1x1x1xf32>
    %1465 = vector.shape_cast %1464 : vector<1x1x1xf32> to vector<1x1xf32>
    %c0_1631 = arith.constant 0 : index
    %c0_1632 = arith.constant 0 : index
    %c1_1633 = arith.constant 1 : index
    %c0_1634 = arith.constant 0 : index
    %c1_1635 = arith.constant 1 : index
    %1466 = vector.load %arg2[%c0_1631, %c0_1632, %c1_1633, %c0_1634, %c1_1635] : memref<1x1x3x18x18xf32, #tpu.memory_space<vmem>>, vector<1x1x1x16x16xf32>
    %1467 = vector.shape_cast %1466 : vector<1x1x1x16x16xf32> to vector<16x16xf32>
    %1468 = vector.broadcast %1465 : vector<1x1xf32> to vector<16x16xf32>
    %1469 = arith.mulf %1468, %1467 : vector<16x16xf32>
    %1470 = arith.addf %1463, %1469 : vector<16x16xf32>
    %c0_1636 = arith.constant 0 : index
    %c7_1637 = arith.constant 7 : index
    %c11_1638 = arith.constant 11 : index
    %1471 = vector.load %arg3[%c0_1636, %c7_1637, %c11_1638] : memref<1x8x27xf32, #tpu.memory_space<vmem>>, vector<1x1x1xf32>
    %1472 = vector.shape_cast %1471 : vector<1x1x1xf32> to vector<1x1xf32>
    %c0_1639 = arith.constant 0 : index
    %c0_1640 = arith.constant 0 : index
    %c1_1641 = arith.constant 1 : index
    %c0_1642 = arith.constant 0 : index
    %c2_1643 = arith.constant 2 : index
    %1473 = vector.load %arg2[%c0_1639, %c0_1640, %c1_1641, %c0_1642, %c2_1643] : memref<1x1x3x18x18xf32, #tpu.memory_space<vmem>>, vector<1x1x1x16x16xf32>
    %1474 = vector.shape_cast %1473 : vector<1x1x1x16x16xf32> to vector<16x16xf32>
    %1475 = vector.broadcast %1472 : vector<1x1xf32> to vector<16x16xf32>
    %1476 = arith.mulf %1475, %1474 : vector<16x16xf32>
    %1477 = arith.addf %1470, %1476 : vector<16x16xf32>
    %c0_1644 = arith.constant 0 : index
    %c7_1645 = arith.constant 7 : index
    %c12_1646 = arith.constant 12 : index
    %1478 = vector.load %arg3[%c0_1644, %c7_1645, %c12_1646] : memref<1x8x27xf32, #tpu.memory_space<vmem>>, vector<1x1x1xf32>
    %1479 = vector.shape_cast %1478 : vector<1x1x1xf32> to vector<1x1xf32>
    %c0_1647 = arith.constant 0 : index
    %c0_1648 = arith.constant 0 : index
    %c1_1649 = arith.constant 1 : index
    %c1_1650 = arith.constant 1 : index
    %c0_1651 = arith.constant 0 : index
    %1480 = vector.load %arg2[%c0_1647, %c0_1648, %c1_1649, %c1_1650, %c0_1651] : memref<1x1x3x18x18xf32, #tpu.memory_space<vmem>>, vector<1x1x1x16x16xf32>
    %1481 = vector.shape_cast %1480 : vector<1x1x1x16x16xf32> to vector<16x16xf32>
    %1482 = vector.broadcast %1479 : vector<1x1xf32> to vector<16x16xf32>
    %1483 = arith.mulf %1482, %1481 : vector<16x16xf32>
    %1484 = arith.addf %1477, %1483 : vector<16x16xf32>
    %c0_1652 = arith.constant 0 : index
    %c7_1653 = arith.constant 7 : index
    %c13_1654 = arith.constant 13 : index
    %1485 = vector.load %arg3[%c0_1652, %c7_1653, %c13_1654] : memref<1x8x27xf32, #tpu.memory_space<vmem>>, vector<1x1x1xf32>
    %1486 = vector.shape_cast %1485 : vector<1x1x1xf32> to vector<1x1xf32>
    %c0_1655 = arith.constant 0 : index
    %c0_1656 = arith.constant 0 : index
    %c1_1657 = arith.constant 1 : index
    %c1_1658 = arith.constant 1 : index
    %c1_1659 = arith.constant 1 : index
    %1487 = vector.load %arg2[%c0_1655, %c0_1656, %c1_1657, %c1_1658, %c1_1659] : memref<1x1x3x18x18xf32, #tpu.memory_space<vmem>>, vector<1x1x1x16x16xf32>
    %1488 = vector.shape_cast %1487 : vector<1x1x1x16x16xf32> to vector<16x16xf32>
    %1489 = vector.broadcast %1486 : vector<1x1xf32> to vector<16x16xf32>
    %1490 = arith.mulf %1489, %1488 : vector<16x16xf32>
    %1491 = arith.addf %1484, %1490 : vector<16x16xf32>
    %c0_1660 = arith.constant 0 : index
    %c7_1661 = arith.constant 7 : index
    %c14_1662 = arith.constant 14 : index
    %1492 = vector.load %arg3[%c0_1660, %c7_1661, %c14_1662] : memref<1x8x27xf32, #tpu.memory_space<vmem>>, vector<1x1x1xf32>
    %1493 = vector.shape_cast %1492 : vector<1x1x1xf32> to vector<1x1xf32>
    %c0_1663 = arith.constant 0 : index
    %c0_1664 = arith.constant 0 : index
    %c1_1665 = arith.constant 1 : index
    %c1_1666 = arith.constant 1 : index
    %c2_1667 = arith.constant 2 : index
    %1494 = vector.load %arg2[%c0_1663, %c0_1664, %c1_1665, %c1_1666, %c2_1667] : memref<1x1x3x18x18xf32, #tpu.memory_space<vmem>>, vector<1x1x1x16x16xf32>
    %1495 = vector.shape_cast %1494 : vector<1x1x1x16x16xf32> to vector<16x16xf32>
    %1496 = vector.broadcast %1493 : vector<1x1xf32> to vector<16x16xf32>
    %1497 = arith.mulf %1496, %1495 : vector<16x16xf32>
    %1498 = arith.addf %1491, %1497 : vector<16x16xf32>
    %c0_1668 = arith.constant 0 : index
    %c7_1669 = arith.constant 7 : index
    %c15_1670 = arith.constant 15 : index
    %1499 = vector.load %arg3[%c0_1668, %c7_1669, %c15_1670] : memref<1x8x27xf32, #tpu.memory_space<vmem>>, vector<1x1x1xf32>
    %1500 = vector.shape_cast %1499 : vector<1x1x1xf32> to vector<1x1xf32>
    %c0_1671 = arith.constant 0 : index
    %c0_1672 = arith.constant 0 : index
    %c1_1673 = arith.constant 1 : index
    %c2_1674 = arith.constant 2 : index
    %c0_1675 = arith.constant 0 : index
    %1501 = vector.load %arg2[%c0_1671, %c0_1672, %c1_1673, %c2_1674, %c0_1675] : memref<1x1x3x18x18xf32, #tpu.memory_space<vmem>>, vector<1x1x1x16x16xf32>
    %1502 = vector.shape_cast %1501 : vector<1x1x1x16x16xf32> to vector<16x16xf32>
    %1503 = vector.broadcast %1500 : vector<1x1xf32> to vector<16x16xf32>
    %1504 = arith.mulf %1503, %1502 : vector<16x16xf32>
    %1505 = arith.addf %1498, %1504 : vector<16x16xf32>
    %c0_1676 = arith.constant 0 : index
    %c7_1677 = arith.constant 7 : index
    %c16_1678 = arith.constant 16 : index
    %1506 = vector.load %arg3[%c0_1676, %c7_1677, %c16_1678] : memref<1x8x27xf32, #tpu.memory_space<vmem>>, vector<1x1x1xf32>
    %1507 = vector.shape_cast %1506 : vector<1x1x1xf32> to vector<1x1xf32>
    %c0_1679 = arith.constant 0 : index
    %c0_1680 = arith.constant 0 : index
    %c1_1681 = arith.constant 1 : index
    %c2_1682 = arith.constant 2 : index
    %c1_1683 = arith.constant 1 : index
    %1508 = vector.load %arg2[%c0_1679, %c0_1680, %c1_1681, %c2_1682, %c1_1683] : memref<1x1x3x18x18xf32, #tpu.memory_space<vmem>>, vector<1x1x1x16x16xf32>
    %1509 = vector.shape_cast %1508 : vector<1x1x1x16x16xf32> to vector<16x16xf32>
    %1510 = vector.broadcast %1507 : vector<1x1xf32> to vector<16x16xf32>
    %1511 = arith.mulf %1510, %1509 : vector<16x16xf32>
    %1512 = arith.addf %1505, %1511 : vector<16x16xf32>
    %c0_1684 = arith.constant 0 : index
    %c7_1685 = arith.constant 7 : index
    %c17_1686 = arith.constant 17 : index
    %1513 = vector.load %arg3[%c0_1684, %c7_1685, %c17_1686] : memref<1x8x27xf32, #tpu.memory_space<vmem>>, vector<1x1x1xf32>
    %1514 = vector.shape_cast %1513 : vector<1x1x1xf32> to vector<1x1xf32>
    %c0_1687 = arith.constant 0 : index
    %c0_1688 = arith.constant 0 : index
    %c1_1689 = arith.constant 1 : index
    %c2_1690 = arith.constant 2 : index
    %c2_1691 = arith.constant 2 : index
    %1515 = vector.load %arg2[%c0_1687, %c0_1688, %c1_1689, %c2_1690, %c2_1691] : memref<1x1x3x18x18xf32, #tpu.memory_space<vmem>>, vector<1x1x1x16x16xf32>
    %1516 = vector.shape_cast %1515 : vector<1x1x1x16x16xf32> to vector<16x16xf32>
    %1517 = vector.broadcast %1514 : vector<1x1xf32> to vector<16x16xf32>
    %1518 = arith.mulf %1517, %1516 : vector<16x16xf32>
    %1519 = arith.addf %1512, %1518 : vector<16x16xf32>
    %c0_1692 = arith.constant 0 : index
    %c7_1693 = arith.constant 7 : index
    %c18_1694 = arith.constant 18 : index
    %1520 = vector.load %arg3[%c0_1692, %c7_1693, %c18_1694] : memref<1x8x27xf32, #tpu.memory_space<vmem>>, vector<1x1x1xf32>
    %1521 = vector.shape_cast %1520 : vector<1x1x1xf32> to vector<1x1xf32>
    %c0_1695 = arith.constant 0 : index
    %c0_1696 = arith.constant 0 : index
    %c2_1697 = arith.constant 2 : index
    %c0_1698 = arith.constant 0 : index
    %c0_1699 = arith.constant 0 : index
    %1522 = vector.load %arg2[%c0_1695, %c0_1696, %c2_1697, %c0_1698, %c0_1699] : memref<1x1x3x18x18xf32, #tpu.memory_space<vmem>>, vector<1x1x1x16x16xf32>
    %1523 = vector.shape_cast %1522 : vector<1x1x1x16x16xf32> to vector<16x16xf32>
    %1524 = vector.broadcast %1521 : vector<1x1xf32> to vector<16x16xf32>
    %1525 = arith.mulf %1524, %1523 : vector<16x16xf32>
    %1526 = arith.addf %1519, %1525 : vector<16x16xf32>
    %c0_1700 = arith.constant 0 : index
    %c7_1701 = arith.constant 7 : index
    %c19_1702 = arith.constant 19 : index
    %1527 = vector.load %arg3[%c0_1700, %c7_1701, %c19_1702] : memref<1x8x27xf32, #tpu.memory_space<vmem>>, vector<1x1x1xf32>
    %1528 = vector.shape_cast %1527 : vector<1x1x1xf32> to vector<1x1xf32>
    %c0_1703 = arith.constant 0 : index
    %c0_1704 = arith.constant 0 : index
    %c2_1705 = arith.constant 2 : index
    %c0_1706 = arith.constant 0 : index
    %c1_1707 = arith.constant 1 : index
    %1529 = vector.load %arg2[%c0_1703, %c0_1704, %c2_1705, %c0_1706, %c1_1707] : memref<1x1x3x18x18xf32, #tpu.memory_space<vmem>>, vector<1x1x1x16x16xf32>
    %1530 = vector.shape_cast %1529 : vector<1x1x1x16x16xf32> to vector<16x16xf32>
    %1531 = vector.broadcast %1528 : vector<1x1xf32> to vector<16x16xf32>
    %1532 = arith.mulf %1531, %1530 : vector<16x16xf32>
    %1533 = arith.addf %1526, %1532 : vector<16x16xf32>
    %c0_1708 = arith.constant 0 : index
    %c7_1709 = arith.constant 7 : index
    %c20_1710 = arith.constant 20 : index
    %1534 = vector.load %arg3[%c0_1708, %c7_1709, %c20_1710] : memref<1x8x27xf32, #tpu.memory_space<vmem>>, vector<1x1x1xf32>
    %1535 = vector.shape_cast %1534 : vector<1x1x1xf32> to vector<1x1xf32>
    %c0_1711 = arith.constant 0 : index
    %c0_1712 = arith.constant 0 : index
    %c2_1713 = arith.constant 2 : index
    %c0_1714 = arith.constant 0 : index
    %c2_1715 = arith.constant 2 : index
    %1536 = vector.load %arg2[%c0_1711, %c0_1712, %c2_1713, %c0_1714, %c2_1715] : memref<1x1x3x18x18xf32, #tpu.memory_space<vmem>>, vector<1x1x1x16x16xf32>
    %1537 = vector.shape_cast %1536 : vector<1x1x1x16x16xf32> to vector<16x16xf32>
    %1538 = vector.broadcast %1535 : vector<1x1xf32> to vector<16x16xf32>
    %1539 = arith.mulf %1538, %1537 : vector<16x16xf32>
    %1540 = arith.addf %1533, %1539 : vector<16x16xf32>
    %c0_1716 = arith.constant 0 : index
    %c7_1717 = arith.constant 7 : index
    %c21_1718 = arith.constant 21 : index
    %1541 = vector.load %arg3[%c0_1716, %c7_1717, %c21_1718] : memref<1x8x27xf32, #tpu.memory_space<vmem>>, vector<1x1x1xf32>
    %1542 = vector.shape_cast %1541 : vector<1x1x1xf32> to vector<1x1xf32>
    %c0_1719 = arith.constant 0 : index
    %c0_1720 = arith.constant 0 : index
    %c2_1721 = arith.constant 2 : index
    %c1_1722 = arith.constant 1 : index
    %c0_1723 = arith.constant 0 : index
    %1543 = vector.load %arg2[%c0_1719, %c0_1720, %c2_1721, %c1_1722, %c0_1723] : memref<1x1x3x18x18xf32, #tpu.memory_space<vmem>>, vector<1x1x1x16x16xf32>
    %1544 = vector.shape_cast %1543 : vector<1x1x1x16x16xf32> to vector<16x16xf32>
    %1545 = vector.broadcast %1542 : vector<1x1xf32> to vector<16x16xf32>
    %1546 = arith.mulf %1545, %1544 : vector<16x16xf32>
    %1547 = arith.addf %1540, %1546 : vector<16x16xf32>
    %c0_1724 = arith.constant 0 : index
    %c7_1725 = arith.constant 7 : index
    %c22_1726 = arith.constant 22 : index
    %1548 = vector.load %arg3[%c0_1724, %c7_1725, %c22_1726] : memref<1x8x27xf32, #tpu.memory_space<vmem>>, vector<1x1x1xf32>
    %1549 = vector.shape_cast %1548 : vector<1x1x1xf32> to vector<1x1xf32>
    %c0_1727 = arith.constant 0 : index
    %c0_1728 = arith.constant 0 : index
    %c2_1729 = arith.constant 2 : index
    %c1_1730 = arith.constant 1 : index
    %c1_1731 = arith.constant 1 : index
    %1550 = vector.load %arg2[%c0_1727, %c0_1728, %c2_1729, %c1_1730, %c1_1731] : memref<1x1x3x18x18xf32, #tpu.memory_space<vmem>>, vector<1x1x1x16x16xf32>
    %1551 = vector.shape_cast %1550 : vector<1x1x1x16x16xf32> to vector<16x16xf32>
    %1552 = vector.broadcast %1549 : vector<1x1xf32> to vector<16x16xf32>
    %1553 = arith.mulf %1552, %1551 : vector<16x16xf32>
    %1554 = arith.addf %1547, %1553 : vector<16x16xf32>
    %c0_1732 = arith.constant 0 : index
    %c7_1733 = arith.constant 7 : index
    %c23_1734 = arith.constant 23 : index
    %1555 = vector.load %arg3[%c0_1732, %c7_1733, %c23_1734] : memref<1x8x27xf32, #tpu.memory_space<vmem>>, vector<1x1x1xf32>
    %1556 = vector.shape_cast %1555 : vector<1x1x1xf32> to vector<1x1xf32>
    %c0_1735 = arith.constant 0 : index
    %c0_1736 = arith.constant 0 : index
    %c2_1737 = arith.constant 2 : index
    %c1_1738 = arith.constant 1 : index
    %c2_1739 = arith.constant 2 : index
    %1557 = vector.load %arg2[%c0_1735, %c0_1736, %c2_1737, %c1_1738, %c2_1739] : memref<1x1x3x18x18xf32, #tpu.memory_space<vmem>>, vector<1x1x1x16x16xf32>
    %1558 = vector.shape_cast %1557 : vector<1x1x1x16x16xf32> to vector<16x16xf32>
    %1559 = vector.broadcast %1556 : vector<1x1xf32> to vector<16x16xf32>
    %1560 = arith.mulf %1559, %1558 : vector<16x16xf32>
    %1561 = arith.addf %1554, %1560 : vector<16x16xf32>
    %c0_1740 = arith.constant 0 : index
    %c7_1741 = arith.constant 7 : index
    %c24_1742 = arith.constant 24 : index
    %1562 = vector.load %arg3[%c0_1740, %c7_1741, %c24_1742] : memref<1x8x27xf32, #tpu.memory_space<vmem>>, vector<1x1x1xf32>
    %1563 = vector.shape_cast %1562 : vector<1x1x1xf32> to vector<1x1xf32>
    %c0_1743 = arith.constant 0 : index
    %c0_1744 = arith.constant 0 : index
    %c2_1745 = arith.constant 2 : index
    %c2_1746 = arith.constant 2 : index
    %c0_1747 = arith.constant 0 : index
    %1564 = vector.load %arg2[%c0_1743, %c0_1744, %c2_1745, %c2_1746, %c0_1747] : memref<1x1x3x18x18xf32, #tpu.memory_space<vmem>>, vector<1x1x1x16x16xf32>
    %1565 = vector.shape_cast %1564 : vector<1x1x1x16x16xf32> to vector<16x16xf32>
    %1566 = vector.broadcast %1563 : vector<1x1xf32> to vector<16x16xf32>
    %1567 = arith.mulf %1566, %1565 : vector<16x16xf32>
    %1568 = arith.addf %1561, %1567 : vector<16x16xf32>
    %c0_1748 = arith.constant 0 : index
    %c7_1749 = arith.constant 7 : index
    %c25_1750 = arith.constant 25 : index
    %1569 = vector.load %arg3[%c0_1748, %c7_1749, %c25_1750] : memref<1x8x27xf32, #tpu.memory_space<vmem>>, vector<1x1x1xf32>
    %1570 = vector.shape_cast %1569 : vector<1x1x1xf32> to vector<1x1xf32>
    %c0_1751 = arith.constant 0 : index
    %c0_1752 = arith.constant 0 : index
    %c2_1753 = arith.constant 2 : index
    %c2_1754 = arith.constant 2 : index
    %c1_1755 = arith.constant 1 : index
    %1571 = vector.load %arg2[%c0_1751, %c0_1752, %c2_1753, %c2_1754, %c1_1755] : memref<1x1x3x18x18xf32, #tpu.memory_space<vmem>>, vector<1x1x1x16x16xf32>
    %1572 = vector.shape_cast %1571 : vector<1x1x1x16x16xf32> to vector<16x16xf32>
    %1573 = vector.broadcast %1570 : vector<1x1xf32> to vector<16x16xf32>
    %1574 = arith.mulf %1573, %1572 : vector<16x16xf32>
    %1575 = arith.addf %1568, %1574 : vector<16x16xf32>
    %c0_1756 = arith.constant 0 : index
    %c7_1757 = arith.constant 7 : index
    %c26_1758 = arith.constant 26 : index
    %1576 = vector.load %arg3[%c0_1756, %c7_1757, %c26_1758] : memref<1x8x27xf32, #tpu.memory_space<vmem>>, vector<1x1x1xf32>
    %1577 = vector.shape_cast %1576 : vector<1x1x1xf32> to vector<1x1xf32>
    %c0_1759 = arith.constant 0 : index
    %c0_1760 = arith.constant 0 : index
    %c2_1761 = arith.constant 2 : index
    %c2_1762 = arith.constant 2 : index
    %c2_1763 = arith.constant 2 : index
    %1578 = vector.load %arg2[%c0_1759, %c0_1760, %c2_1761, %c2_1762, %c2_1763] : memref<1x1x3x18x18xf32, #tpu.memory_space<vmem>>, vector<1x1x1x16x16xf32>
    %1579 = vector.shape_cast %1578 : vector<1x1x1x16x16xf32> to vector<16x16xf32>
    %1580 = vector.broadcast %1577 : vector<1x1xf32> to vector<16x16xf32>
    %1581 = arith.mulf %1580, %1579 : vector<16x16xf32>
    %1582 = arith.addf %1575, %1581 : vector<16x16xf32>
    %c0_1764 = arith.constant 0 : index
    %c7_1765 = arith.constant 7 : index
    %c0_1766 = arith.constant 0 : index
    %1583 = vector.load %arg4[%c0_1764, %c7_1765, %c0_1766] : memref<1x8x1xf32, #tpu.memory_space<vmem>>, vector<1x1x1xf32>
    %1584 = vector.shape_cast %1583 : vector<1x1x1xf32> to vector<1x1xf32>
    %1585 = vector.broadcast %1584 : vector<1x1xf32> to vector<16x16xf32>
    %1586 = arith.addf %1582, %1585 : vector<16x16xf32>
    %cst_1767 = arith.constant 0.000000e+00 : f32
    %1587 = vector.broadcast %cst_1767 : f32 to vector<16x16xf32>
    %1588 = arith.maximumf %1586, %1587 : vector<16x16xf32>
    %c0_1768 = arith.constant 0 : index
    %c7_1769 = arith.constant 7 : index
    %c0_1770 = arith.constant 0 : index
    %c0_1771 = arith.constant 0 : index
    %1589 = vector.load %arg5[%c0_1768, %c7_1769, %c0_1770, %c0_1771] : memref<1x8x16x16xf32, #tpu.memory_space<vmem>>, vector<1x1x16x16xf32>
    %1590 = vector.shape_cast %1589 : vector<1x1x16x16xf32> to vector<16x16xf32>
    %1591 = vector.shape_cast %1588 : vector<16x16xf32> to vector<1x1x16x16xf32>
    tpu.vector_store %arg5[%c0_1768, %c7_1769, %c0_1770, %c0_1771], %1591 {strides = array<i32>} : memref<1x8x16x16xf32, #tpu.memory_space<vmem>>, vector<1x1x16x16xf32>,
    return
  }
  func.func @transform_0(%arg0: i32, %arg1: i32) -> (i32, i32, i32, i32, i32) {
    %c0_i32 = arith.constant 0 : i32
    %c0_i32_0 = arith.constant 0 : i32
    %c0_i32_1 = arith.constant 0 : i32
    %c0_i32_2 = arith.constant 0 : i32
    return %arg0, %arg1, %c0_i32, %c0_i32_0, %c0_i32_1 : i32, i32, i32, i32, i32
  }
  func.func @transform_1(%arg0: i32, %arg1: i32) -> (i32, i32, i32) {
    %c0_i32 = arith.constant 0 : i32
    %c0_i32_0 = arith.constant 0 : i32
    %c0_i32_1 = arith.constant 0 : i32
    return %arg0, %c0_i32, %c0_i32_0 : i32, i32, i32
  }
  func.func @transform_2(%arg0: i32, %arg1: i32) -> (i32, i32, i32) {
    %c0_i32 = arith.constant 0 : i32
    %c0_i32_0 = arith.constant 0 : i32
    %c0_i32_1 = arith.constant 0 : i32
    return %arg0, %c0_i32, %c0_i32_0 : i32, i32, i32
  }
  func.func @transform_3(%arg0: i32, %arg1: i32) -> (i32, i32, i32, i32) {
    %c2_i32 = arith.constant 2 : i32
    %0 = arith.muli %arg0, %c2_i32 : i32
    %1 = arith.addi %0, %arg1 : i32
    %c0_i32 = arith.constant 0 : i32
    %c0_i32_0 = arith.constant 0 : i32
    %c0_i32_1 = arith.constant 0 : i32
    %c0_i32_2 = arith.constant 0 : i32
    return %1, %c0_i32, %c0_i32_0, %c0_i32_1 : i32, i32, i32, i32
  }
}

</mosaic_0001>

<bundles_post_ra>
// kernel: tpu_custom_call.1
= control target key start
LH: loop header
LB: loop body
LE: loop exit
PB: predicated region body
PF: predicated region fallthrough
CT: control target
= control target key end

     0   :  { %s6581_s0 = inlined_call_operand.vmem [shape: f32[2,2,3,18,18], index: 0, kind: input, shape index: {}]   ;;  %s6582_s1 = inlined_call_operand.vmem [shape: f32[2,8,27], index: 1, kind: input, shape index: {}]   ;;  %s6583_s2 = inlined_call_operand.vmem [shape: f32[2,8,1], index: 2, kind: input, shape index: {}]   ;;  %s6584_s3 = inlined_call_operand.hbm [shape: f32[4,8,16,16], index: 3, kind: output, shape index: {}]  }
   0x1   :  { %6676 = sst [smem:[#allocation23_spill]] %s6581_s0 }
   0x2   :  { %6677 = sst [smem:[#allocation24_spill]] %s6582_s1 }
   0x3   :  { %6678 = sst [smem:[#allocation25_spill]] %s6583_s2 }
   0x4   :  { %6679 = sst [smem:[#allocation26_spill]] %s6584_s3 }
   0x5   :  { %8 = vsyncpa [#allocation3], 0 }
   0x6   :  { %10 = vsyncpa [#allocation3 + $0x1], 0  ;;  %s4520_s12 = smov 0   ;;  %s4522_s13 = smov 0  }
   0x7   :  { %s4524_s14 = smov 0   ;;  %s4526_s15 = smov 0  }
   0x8   :  { %s4528_s16 = smov 0   ;;  %s4530_s17 = smov 0  }
   0x9   :  { %s4532_s18 = smov 0   ;;  %s4534_s19 = smov 0  }
   0xa LB: > { %6680 = sst [smem:[#allocation5_spill]] %s4441_s12  ;;  %s3697_s20 = sadd.s32 4294967295, %s4469_s19   ;;  %s4469_s19 = sphi %s4534_s19, %s16_s19   ;;  %s4465_s18 = sphi %s4532_s18, %s6767_s18   ;;  %s4461_s17 = sphi %s4530_s17, %s6766_s17   ;;  %s4457_s16 = sphi %s4528_s16, %s6765_s16   ;;  %s4453_s15 = sphi %s4526_s15, %s6764_s15   ;;  %s4449_s14 = sphi %s4524_s14, %s6763_s14   ;;  %s4445_s13 = sphi %s4522_s13, %s6762_s13   ;;  %s4441_s12 = sphi %s4520_s12, %s6761_s12  }
   0xb   : > { %6681 = sst [smem:[#allocation6_spill]] %s4445_s13  ;;  %s25_s21 = sadd.s32 1, %s4461_s17 }
   0xc   : > { %6682 = sst [smem:[#allocation7_spill]] %s4449_s14  ;;  %s28_s22 = sadd.s32 1, %s4465_s18 }
   0xd   : > { %6683 = sst [smem:[#allocation8_spill]] %s4453_s15  ;;  %p26_p0 = scmp.ge.s32.totalorder %s25_s21, 2 }
   0xe   : > { %6684 = sst [smem:[#allocation9_spill]] %s4457_s16  ;;  %s3699_s23 = sshll.u32 %s4465_s18, 1 }
   0xf   : > { %6685 = sst [smem:[#allocation10_spill]] %s4461_s17  ;;  %s3698_s24 = sadd.s32 4294967294, %s4469_s19  }
  0x10   : > { %6686 = sst [smem:[#allocation11_spill]] %s4465_s18  ;;  %s113_s25 = sadd.s32 %s4461_s17, %s3699_s23 }
  0x11   : > { %6687 = sst [smem:[#allocation12_spill]] %s4469_s19  ;;  %s6769_s21 = smov (%p26_p0, %s25_s21), 0 }
  0x12   : > { %6688 = sst [smem:[#allocation13_spill]] %s6769_s21  ;;  %s6771_s22 = smov (!%p26_p0, %s28_s22), %s4465_s18 }
  0x13   : > { %p129_p1 = scmp.ne.s32.totalorder %s4449_s14, %s4445_s13  ;;  %p130_p2 = scmp.eq.s32.totalorder %s3697_s20, 3 }
  0x14   : > { %p30_p3 = scmp.ge.s32.totalorder %s6771_s22, 2  ;;  %p135_p4 = scmp.ne.s32.totalorder %s4445_s13, %s4441_s12 }
  0x15   : > { %p4573_p5 = por %p130_p2, %p129_p1  ;;  %p136_p6 = scmp.eq.s32.totalorder %s3698_s24, 3 }
  0x16   : > { %s6773_s22 = smov (%p30_p3, %s6771_s22), 0  ;;  %p3703_p8 = scmp.ge.s32.totalorder %s4469_s19, 1 }
  0x17   : > { %s6689_s26 = scalar_select %p4573_p5, 1, 0 }
  0x18   : > { %6691 = sst [smem:[#allocation15_spill]] %s6773_s22  ;;  %p4579_p7 = por %p136_p6, %p135_p4 }
  0x19   : > { %6690 = sst [smem:[#allocation14_spill]] %s6689_s26  ;;  %s3700_s28 = sshll.u32 %s6773_s22, 1 }
  0x1a   : > { %s6692_s27 = scalar_select %p4579_p7, 1, 0 }
  0x1b   : > { %p180_p9 = scmp.lt.s32.totalorder %s4469_s19, 5  ;;  %s115_s29 = sadd.s32 %s3700_s28, %s6769_s21 }
  0x1c   : > { %6693 = sst [smem:[#allocation16_spill]] %s6692_s27  ;;  %s119_s30 = sadd.s32 1, %s4449_s14 }
  0x1d   : > { %s116_s4 = ssub.s32 %s113_s25, %s115_s29  ;;  %p181_p10 = pnand %p3703_p8, %p180_p9 }
  0x1e   : > { %p117_p11 = scmp.eq.s32.totalorder %s116_s4, 0 }
  0x1f   : > { %184 = sbr.rel (%p181_p10) target bundleno = 15436 (0x3c4c), region = 32 }
  0x20   : > { %s4589_s5 = scalar_select %p117_p11, %s4449_s14, %s119_s30  }
  0x22   : > { %6694 = sst [smem:[#allocation17_spill]] %s4589_s5 }
  0x26   : > { %p216_p12 = scmp.lt.s32.totalorder %s4457_s16, 1  ;;  %s6695_s1 = sld [smem:[#allocation24_spill]]  ;;  %vm651_vm0 = vcmask 130048  }
  0x27   : > { %s6636_s11 = smov 127   ;;  %s6634_s20 = smov 126  }
  0x28   : > { %s4593_s6 = scalar_select %p216_p12, %s4457_s16, 1 }
  0x29   : > { %s6626_s23 = smov 124   ;;  %s6628_s24 = smov 125  }
  0x2a   : > { %s6585_s7 = sshll.u32 %s4593_s6, 3  ;;  %s6586_s25 = smov 123  }
  0x2b   : > { %s6588_s28 = smov 122   ;;  %s6590_s29 = smov 121  }
  0x2c   : > { %s4601_s10 = scalar_lea.vmem %s6695_s1, %s6585_s7  ;;  %s6592_s30 = smov 120  }
  0x2d   : > { %v235_v0 = vld [vmem:[%s4601_s10] sm:$0x1]  ;;  %s6594_s4 = smov 118   ;;  %s6596_s8 = smov 119   ;;  %v4631_v1 = vld [vmem:[%s4601_s10 + $0x1] sm:$0x1] }
  0x2e   : > { %246 = vrot.lane.b32.xlu0 %v235_v0, %s6636_s11  ;;  %263 = vrot.lane.b32.xlu1 %v235_v0, %s6634_s20  ;;  %3827 = vpush %v235_v0  ;;  %s6598_s9 = smov 117   ;;  %s6612_s7 = smov 116  }
  0x2f   : > { %p218_p13 = scmp.lt.s32.totalorder %s4453_s15, 1  ;;  %s6703_s1 = sshll.u32 %s4593_s6, 3 }
  0x30   : > { %s6704_s2 = sld [smem:[#allocation25_spill]]  ;;  %s6706_s0 = sld [smem:[#allocation23_spill]] }
  0x31   : > { %s6708_s21 = smov 127  }
  0x32   : > { %291 = vrot.lane.b32.xlu1 %v235_v0, %s6626_s23  ;;  %282 = vrot.lane.b32.xlu0 %v235_v0, %s6628_s24 }
  0x36   : > { %308 = vrot.lane.b32.xlu0 %v235_v0, %s6586_s25  ;;  %327 = vrot.lane.b32.xlu1 %v235_v0, %s6588_s28  ;;  %s6600_s25 = smov 115   ;;  %s6602_s28 = smov 114  }
  0x37   : > { %s4663_s18 = scalar_lea.vmem %s6704_s2, %s6703_s1 }
  0x38   : > { %6705 = sst [smem:[#allocation18_spill]] %s4663_s18  ;;  %v642_v28 = vld [vmem:[%s4663_s18] sm:$0x1] }
  0x3a   : > { %336 = vrot.lane.b32.xlu0 %v235_v0, %s6590_s29  ;;  %353 = vrot.lane.b32.xlu1 %v235_v0, %s6592_s30  ;;  %s6604_s29 = smov 112   ;;  %s6606_s30 = smov 113  }
  0x3e   : > { %382 = vrot.lane.b32.xlu1 %v235_v0, %s6594_s4  ;;  %373 = vrot.lane.b32.xlu0 %v235_v0, %s6596_s8  ;;  %s6608_s4 = smov 111   ;;  %s6610_s8 = smov 110  }
  0x42   : > { %399 = vrot.lane.b32.xlu0 %v235_v0, %s6598_s9  ;;  %418 = vrot.lane.b32.xlu1 %v235_v0, %s6612_s7  ;;  %s6632_s9 = smov 109   ;;  %s6618_s7 = smov 102  }
  0x46   : > { %427 = vrot.lane.b32.xlu0 %v235_v0, %s6600_s25  ;;  %444 = vrot.lane.b32.xlu1 %v235_v0, %s6602_s28  ;;  %s6630_s25 = smov 108   ;;  %s6624_s28 = smov 106  }
  0x4a   : > { %472 = vrot.lane.b32.xlu1 %v235_v0, %s6604_s29  ;;  %463 = vrot.lane.b32.xlu0 %v235_v0, %s6606_s30  ;;  %s6622_s29 = smov 107   ;;  %s6620_s30 = smov 105  }
  0x4e   : > { %489 = vrot.lane.b32.xlu0 %v235_v0, %s6608_s4  ;;  %509 = vrot.lane.b32.xlu1 %v235_v0, %s6610_s8  ;;  %s6614_s4 = smov 104   ;;  %s6616_s8 = smov 103  }
  0x52   : > { %518 = vrot.lane.b32.xlu0 %v235_v0, %s6632_s9  ;;  %535 = vrot.lane.b32.xlu1 %v235_v0, %s6630_s25  ;;  %s3826_s25 = smul.u32 18, %s4593_s6 }
  0x56   : > { %563 = vrot.lane.b32.xlu1 %v235_v0, %s6624_s28  ;;  %554 = vrot.lane.b32.xlu0 %v235_v0, %s6622_s29  ;;  %s6700_s29 = smov 118   ;;  %s6701_s28 = smov 119  }
  0x5a   : > { %580 = vrot.lane.b32.xlu0 %v235_v0, %s6620_s30  ;;  %599 = vrot.lane.b32.xlu1 %v235_v0, %s6614_s4  ;;  %s6696_s4 = smov 123   ;;  %s6699_s30 = smov 120  }
  0x5e   : > { %608 = vrot.lane.b32.xlu0 %v235_v0, %s6616_s8  ;;  %625 = vrot.lane.b32.xlu1 %v235_v0, %s6618_s7  ;;  %s6697_s8 = smov 122   ;;  %s6698_s7 = smov 121  }
  0x62   : > { %665 = vrot.lane.b32.xlu0 %v4631_v1, %s6636_s11  ;;  %682 = vrot.lane.b32.xlu1 %v4631_v1, %s6634_s20 }
  0x66   : > { %710 = vrot.lane.b32.xlu1 %v4631_v1, %s6626_s23  ;;  %701 = vrot.lane.b32.xlu0 %v4631_v1, %s6628_s24  ;;  %s6702_s23 = smov 117  }
  0x67   : > { %s219_s24 = scalar_select %p218_p13, %s4453_s15, 1 }
  0x69   : > { %s3825_s9 = smul.u32 9, %s219_s24 }
  0x6a   : > { %727 = vrot.lane.b32.xlu0 %v4631_v1, %s6696_s4  ;;  %746 = vrot.lane.b32.xlu1 %v4631_v1, %s6697_s8 }
  0x6b   : > { %s222_s20 = sadd.s32 %s3826_s25, %s3825_s9  ;;  %s4670_s25 = spop %3827 }
  0x6c   : > { %s3705_s11 = sshll.u32 %s222_s20, 3 }
  0x6d   : > { %s4668_s5 = scalar_lea.vmem %s6706_s0, %s3705_s11  ;;  %s6709_s11 = smov 126  }
  0x6e   : > { %755 = vrot.lane.b32.xlu0 %v4631_v1, %s6698_s7  ;;  %772 = vrot.lane.b32.xlu1 %v4631_v1, %s6699_s30  ;;  %6707 = sst [smem:[#allocation19_spill]] %s4668_s5  ;;  %v4674_v29 = vld [vmem:[%s4668_s5] sm:$0xff]  ;;  %v4677_v30 = vld [vmem:[%s4668_s5 + $0x8] sm:$0xff] }
  0x6f   : > { %v4689_v39 = vld [vmem:[%s4668_s5 + $0x1] sm:$0xff]  ;;  %v4692_v40 = vld [vmem:[%s4668_s5 + $0x9] sm:$0xff]  ;;  %v4721_v63 = vld [vmem:[%s4668_s5 + $0x18] sm:$0xff] }
  0x70   : > { %v4705_v51 = vld [vmem:[%s4668_s5 + $0x2] sm:$0xff]  ;;  %v4708_v52 = vld [vmem:[%s4668_s5 + $0xa] sm:$0xff] }
  0x71   : > { %v4724_v0 = vld [vmem:[%s4668_s5 + $0x20] sm:$0xff] }
  0x72   : > { %800 = vrot.lane.b32.xlu1 %v4631_v1, %s6700_s29  ;;  %791 = vrot.lane.b32.xlu0 %v4631_v1, %s6701_s28 }
  0x76   : > { %817 = vrot.lane.b32.xlu0 %v4631_v1, %s6702_s23 }
  0xa0   : > { %v247_v2 = vpop.permute.xlu0 %246  ;;  %v264_v3 = vpop.permute.xlu1 %263 }
  0xa1   : > { %3829 = vpush %v247_v2 }
  0xa2   : > { %3831 = vpush %v264_v3 }
  0xa4   : > { %v292_v4 = vpop.permute.xlu1 %291  ;;  %v283_v5 = vpop.permute.xlu0 %282 }
  0xa5   : > { %3833 = vpush %v283_v5 }
  0xa6   : > { %3835 = vpush %v292_v4 }
  0xa8   : > { %v309_v6 = vpop.permute.xlu0 %308  ;;  %v328_v7 = vpop.permute.xlu1 %327 }
  0xa9   : > { %3837 = vpush %v309_v6 }
  0xaa   : > { %3839 = vpush %v328_v7 }
  0xac   : > { %v337_v8 = vpop.permute.xlu0 %336  ;;  %v354_v9 = vpop.permute.xlu1 %353 }
  0xad   : > { %3841 = vpush %v337_v8 }
  0xae   : > { %3843 = vpush %v354_v9  ;;  %v4737_v9 = vld [vmem:[%s4668_s5 + $0x19] sm:$0xff] }
  0xb0   : > { %v383_v10 = vpop.permute.xlu1 %382  ;;  %v374_v11 = vpop.permute.xlu0 %373 }
  0xb1   : > { %3845 = vpush %v374_v11 }
  0xb2   : > { %3847 = vpush %v383_v10  ;;  %v4740_v10 = vld [vmem:[%s4668_s5 + $0x21] sm:$0xff] }
  0xb4   : > { %v400_v12 = vpop.permute.xlu0 %399  ;;  %v419_v13 = vpop.permute.xlu1 %418 }
  0xb5   : > { %3849 = vpush %v400_v12 }
  0xb6   : > { %3851 = vpush %v419_v13 }
  0xb8   : > { %v428_v14 = vpop.permute.xlu0 %427  ;;  %v445_v15 = vpop.permute.xlu1 %444 }
  0xb9   : > { %3853 = vpush %v428_v14 }
  0xba   : > { %3855 = vpush %v445_v15 }
  0xbc   : > { %v473_v16 = vpop.permute.xlu1 %472  ;;  %v464_v17 = vpop.permute.xlu0 %463 }
  0xbd   : > { %3857 = vpush %v464_v17  ;;  %v4753_v17 = vld [vmem:[%s4668_s5 + $0x1a] sm:$0xff] }
  0xbe   : > { %3859 = vpush %v473_v16 }
  0xc0   : > { %v490_v18 = vpop.permute.xlu0 %489  ;;  %v510_v19 = vpop.permute.xlu1 %509 }
  0xc1   : > { %3861 = vpush %v490_v18  ;;  %v4756_v18 = vld [vmem:[%s4668_s5 + $0x22] sm:$0xff] }
  0xc2   : > { %3863 = vpush %v510_v19 }
  0xc4   : > { %v519_v20 = vpop.permute.xlu0 %518  ;;  %v536_v21 = vpop.permute.xlu1 %535 }
  0xc5   : > { %3865 = vpush %v519_v20 }
  0xc6   : > { %3867 = vpush %v536_v21 }
  0xc8   : > { %v564_v22 = vpop.permute.xlu1 %563  ;;  %v555_v23 = vpop.permute.xlu0 %554 }
  0xc9   : > { %3869 = vpush %v555_v23 }
  0xca   : > { %3871 = vpush %v564_v22 }
  0xcc   : > { %v581_v24 = vpop.permute.xlu0 %580  ;;  %v600_v25 = vpop.permute.xlu1 %599 }
  0xcd   : > { %3873 = vpush %v581_v24 }
  0xce   : > { %3875 = vpush %v600_v25  ;;  %v4769_v25 = vld [vmem:[%s4668_s5 + $0x30] sm:$0xff] }
  0xd0   : > { %v609_v26 = vpop.permute.xlu0 %608  ;;  %v626_v27 = vpop.permute.xlu1 %625 }
  0xd1   : > { %3877 = vpush %v609_v26  ;;  %v4772_v26 = vld [vmem:[%s4668_s5 + $0x38] sm:$0xff] }
  0xd2   : > { %s3830_s1 = spop %3829  ;;  %3879 = vpush %v626_v27 }
  0xd3   : > { %v249_v31 = vstv %s3830_s1  ;;  %s3832_s17 = spop %3831  ;;  %3881 = vpush %v642_v28 }
  0xd4   : > { %v251_v32 = vmul.f32 %v249_v31, %v4674_v29  ;;  %v252_v33 = vmul.f32 %v249_v31, %v4677_v30  ;;  %v266_v34 = vstv %s3832_s17  ;;  %v666_v35 = vpop.permute.xlu0 %665  ;;  %3883 = vpush %v4631_v1  ;;  %v683_v36 = vpop.permute.xlu1 %682 }
  0xd5   : > { %3885 = vpush %v666_v35  ;;  %v268_v37 = vmul.f32 %v266_v34, %v4674_v29  ;;  %v269_v38 = vmul.f32 %v266_v34, %v4677_v30  ;;  %v4785_v35 = vld [vmem:[%s4668_s5 + $0x31] sm:$0xff] }
  0xd6   : > { %257 = vrot.lane.b32.xlu1 %v252_v33, %s6708_s21  ;;  %255 = vrot.lane.b32.xlu0 %v251_v32, %s6708_s21  ;;  %s4686_s22 = spop %3833  ;;  %3887 = vpush %v683_v36  ;;  %v4788_v36 = vld [vmem:[%s4668_s5 + $0x39] sm:$0xff] }
  0xd7   : > { %s3836_s6 = spop %3835 }
  0xd8   : > { %v294_v41 = vstv %s3836_s6  ;;  %v711_v42 = vpop.permute.xlu1 %710  ;;  %v702_v43 = vpop.permute.xlu0 %701 }
  0xd9   : > { %3889 = vpush %v702_v43  ;;  %v296_v44 = vmul.f32 %v294_v41, %v4689_v39  ;;  %v297_v45 = vmul.f32 %v294_v41, %v4692_v40 }
  0xda   : > { %274 = vrot.lane.b32.xlu1 %v269_v38, %s6709_s11  ;;  %272 = vrot.lane.b32.xlu0 %v268_v37, %s6709_s11  ;;  %s3838_s20 = spop %3837  ;;  %3891 = vpush %v711_v42 }
  0xdb   : > { %v311_v46 = vstv %s3838_s20  ;;  %s4698_s9 = spop %3839 }
  0xdc   : > { %v728_v47 = vpop.permute.xlu0 %727  ;;  %v747_v48 = vpop.permute.xlu1 %746  ;;  %v313_v49 = vmul.f32 %v311_v46, %v4689_v39  ;;  %v314_v50 = vmul.f32 %v311_v46, %v4692_v40  ;;  %v4804_v46 = vld [vmem:[%s4668_s5 + $0x3a] sm:$0xff] }
  0xdd   : > { %3893 = vpush %v728_v47 }
  0xde   : > { %302 = vrot.lane.b32.xlu1 %v297_v45, %s6708_s21  ;;  %300 = vrot.lane.b32.xlu0 %v296_v44, %s6708_s21  ;;  %s3842_s24 = spop %3841  ;;  %3895 = vpush %v747_v48  ;;  %v4801_v45 = vld [vmem:[%s4668_s5 + $0x32] sm:$0xff] }
  0xdf   : > { %v339_v53 = vstv %s3842_s24  ;;  %s3844_s1 = spop %3843 }
  0xe0   : > { %v756_v54 = vpop.permute.xlu0 %755  ;;  %v773_v55 = vpop.permute.xlu1 %772  ;;  %v341_v56 = vmul.f32 %v339_v53, %v4705_v51  ;;  %v342_v57 = vmul.f32 %v339_v53, %v4708_v52  ;;  %v356_v58 = vstv %s3844_s1 }
  0xe1   : > { %3897 = vpush %v756_v54  ;;  %v358_v61 = vmul.f32 %v356_v58, %v4705_v51  ;;  %v359_v62 = vmul.f32 %v356_v58, %v4708_v52 }
  0xe2   : > { %317 = vrot.lane.b32.xlu1 %v313_v49, %s6709_s11  ;;  %319 = vrot.lane.b32.xlu0 %v314_v50, %s6709_s11  ;;  %s4714_s17 = spop %3845  ;;  %3899 = vpush %v773_v55 }
  0xe3   : > { %s3848_s6 = spop %3847 }
  0xe4   : > { %v801_v59 = vpop.permute.xlu1 %800  ;;  %v792_v60 = vpop.permute.xlu0 %791  ;;  %v385_v2 = vstv %s3848_s6 }
  0xe5   : > { %3901 = vpush %v792_v60  ;;  %v387_v4 = vmul.f32 %v4721_v63, %v385_v2  ;;  %v388_v5 = vmul.f32 %v4724_v0, %v385_v2 }
  0xe6   : > { %345 = vrot.lane.b32.xlu1 %v341_v56, %s6708_s21  ;;  %347 = vrot.lane.b32.xlu0 %v342_v57, %s6708_s21  ;;  %3903 = vpush %v801_v59  ;;  %s3850_s20 = spop %3849 }
  0xe7   : > { %s4730_s24 = spop %3851  ;;  %v402_v6 = vstv %s3850_s20 }
  0xe8   : > { %v818_v3 = vpop.permute.xlu0 %817  ;;  %v404_v7 = vmul.f32 %v4721_v63, %v402_v6  ;;  %v405_v8 = vmul.f32 %v4724_v0, %v402_v6 }
  0xe9   : > { %3905 = vpush %v818_v3 }
  0xea   : > { %364 = vrot.lane.b32.xlu1 %v359_v62, %s6709_s11  ;;  %362 = vrot.lane.b32.xlu0 %v358_v61, %s6709_s11  ;;  %s3854_s1 = spop %3853 }
  0xeb   : > { %v430_v11 = vstv %s3854_s1  ;;  %s3856_s6 = spop %3855 }
  0xec   : > { %v432_v12 = vmul.f32 %v4737_v9, %v430_v11  ;;  %v433_v13 = vmul.f32 %v4740_v10, %v430_v11  ;;  %v447_v14 = vstv %s3856_s6 }
  0xed   : > { %v449_v15 = vmul.f32 %v4737_v9, %v447_v14  ;;  %v450_v16 = vmul.f32 %v4740_v10, %v447_v14 }
  0xee   : > { %393 = vrot.lane.b32.xlu1 %v388_v5, %s6708_s21  ;;  %391 = vrot.lane.b32.xlu0 %v387_v4, %s6708_s21  ;;  %s4746_s20 = spop %3857 }
  0xef   : > { %s3860_s0 = spop %3859 }
  0xf0   : > { %v475_v19 = vstv %s3860_s0 }
  0xf1   : > { %v477_v20 = vmul.f32 %v4753_v17, %v475_v19  ;;  %v478_v21 = vmul.f32 %v4756_v18, %v475_v19 }
  0xf2   : > { %408 = vrot.lane.b32.xlu1 %v404_v7, %s6709_s11  ;;  %410 = vrot.lane.b32.xlu0 %v405_v8, %s6709_s11  ;;  %s3862_s1 = spop %3861 }
  0xf3   : > { %s4762_s6 = spop %3863  ;;  %v492_v22 = vstv %s3862_s1 }
  0xf4   : > { %v494_v23 = vmul.f32 %v4753_v17, %v492_v22  ;;  %v495_v24 = vmul.f32 %v4756_v18, %v492_v22  ;;  %v240_v22 = vstv %s4670_s25  ;;  %s6651_s25 = sand.u32 1, %s4445_s13   ;;  %s6722_s13 = smov 105  }
  0xf6   : > { %436 = vrot.lane.b32.xlu1 %v432_v12, %s6708_s21  ;;  %438 = vrot.lane.b32.xlu0 %v433_v13, %s6708_s21  ;;  %s3866_s2 = spop %3865 }
  0xf7   : > { %v521_v27 = vstv %s3866_s2  ;;  %s3868_s0 = spop %3867 }
  0xf8   : > { %v523_v28 = vmul.f32 %v4769_v25, %v521_v27  ;;  %v524_v31 = vmul.f32 %v4772_v26, %v521_v27  ;;  %v538_v32 = vstv %s3868_s0  ;;  %v242_v27 = vmul.f32 %v240_v22, %v4674_v29 }
  0xf9   : > { %v540_v33 = vmul.f32 %v4769_v25, %v538_v32  ;;  %v541_v34 = vmul.f32 %v4772_v26, %v538_v32 }
  0xfa   : > { %455 = vrot.lane.b32.xlu1 %v450_v16, %s6709_s11  ;;  %453 = vrot.lane.b32.xlu0 %v449_v15, %s6709_s11  ;;  %s4778_s1 = spop %3869 }
  0xfb   : > { %s3872_s14 = spop %3871 }
  0xfc   : > { %v566_v37 = vstv %s3872_s14 }
  0xfd   : > { %v568_v38 = vmul.f32 %v4785_v35, %v566_v37  ;;  %v569_v41 = vmul.f32 %v4788_v36, %v566_v37 }
  0xfe   : > { %483 = vrot.lane.b32.xlu1 %v478_v21, %s6708_s21  ;;  %481 = vrot.lane.b32.xlu0 %v477_v20, %s6708_s21  ;;  %s3874_s2 = spop %3873 }
  0xff   : > { %s4794_s0 = spop %3875  ;;  %v583_v42 = vstv %s3874_s2 }
 0x100   : > { %v585_v43 = vmul.f32 %v4785_v35, %v583_v42  ;;  %v586_v44 = vmul.f32 %v4788_v36, %v583_v42 }
 0x102   : > { %498 = vrot.lane.b32.xlu1 %v494_v23, %s6709_s11  ;;  %500 = vrot.lane.b32.xlu0 %v495_v24, %s6709_s11  ;;  %s3878_s27 = spop %3877 }
 0x103   : > { %v611_v47 = vstv %s3878_s27  ;;  %s3880_s14 = spop %3879 }
 0x104   : > { %s4806_s12 = spop %3881  ;;  %v613_v48 = vmul.f32 %v4801_v45, %v611_v47  ;;  %v614_v49 = vmul.f32 %v4804_v46, %v611_v47  ;;  %v628_v50 = vstv %s3880_s14 }
 0x105   : > { %s4812_s2 = spop %3883  ;;  %v630_v53 = vmul.f32 %v4801_v45, %v628_v50  ;;  %v631_v54 = vmul.f32 %v4804_v46, %v628_v50  ;;  %v330_v50 = vstv %s4698_s9 }
 0x106   : > { %527 = vrot.lane.b32.xlu1 %v523_v28, %s6708_s21  ;;  %529 = vrot.lane.b32.xlu0 %v524_v31, %s6708_s21  ;;  %s3886_s19 = spop %3885  ;;  %v243_v28 = vmul.f32 %v240_v22, %v4677_v30  ;;  %v285_v31 = vstv %s4686_s22  ;;  %s3704_s22 = sshll.u32 %s6651_s25, 7 }
 0x107   : > { %v668_v55 = vstv %s3886_s19  ;;  %s3888_s27 = spop %3887  ;;  %s4897_s9 = scalar_lea.vmem [#allocation2], %s3704_s22 }
 0x108   : > { %v670_v56 = vmul.f32 %v668_v55, %v4674_v29  ;;  %v671_v57 = vmul.f32 %v668_v55, %v4677_v30  ;;  %v685_v58 = vstv %s3888_s27  ;;  %6712 = sst [smem:[#allocation20_spill]] %s4897_s9 }
 0x109   : > { %v687_v59 = vmul.f32 %v685_v58, %v4674_v29  ;;  %v688_v60 = vmul.f32 %v685_v58, %v4677_v30  ;;  %v333_v58 = vmul.f32 %v330_v50, %v4708_v52 }
 0x10a   : > { %546 = vrot.lane.b32.xlu1 %v541_v34, %s6709_s11  ;;  %544 = vrot.lane.b32.xlu0 %v540_v33, %s6709_s11  ;;  %s4822_s14 = spop %3889 }
 0x10b   : > { %s3892_s3 = spop %3891 }
 0x10c   : > { %v713_v61 = vstv %s3892_s3 }
 0x10d   : > { %v715_v62 = vmul.f32 %v713_v61, %v4689_v39  ;;  %v716_v2 = vmul.f32 %v713_v61, %v4692_v40 }
 0x10e   : > { %574 = vrot.lane.b32.xlu1 %v569_v41, %s6708_s21  ;;  %572 = vrot.lane.b32.xlu0 %v568_v38, %s6708_s21  ;;  %s3894_s19 = spop %3893  ;;  %v287_v38 = vmul.f32 %v285_v31, %v4689_v39  ;;  %v288_v41 = vmul.f32 %v285_v31, %v4692_v40 }
 0x10f   : > { %s4832_s27 = spop %3895  ;;  %v730_v3 = vstv %s3894_s19 }
 0x110   : > { %v732_v4 = vmul.f32 %v730_v3, %v4689_v39  ;;  %v733_v5 = vmul.f32 %v730_v3, %v4692_v40 }
 0x112   : > { %589 = vrot.lane.b32.xlu1 %v585_v43, %s6709_s11  ;;  %591 = vrot.lane.b32.xlu0 %v586_v44, %s6709_s11  ;;  %s3898_s26 = spop %3897 }
 0x113   : > { %v758_v6 = vstv %s3898_s26  ;;  %s3900_s3 = spop %3899 }
 0x114   : > { %v760_v7 = vmul.f32 %v758_v6, %v4705_v51  ;;  %v761_v8 = vmul.f32 %v758_v6, %v4708_v52  ;;  %v775_v11 = vstv %s3900_s3  ;;  %s6711_s3 = smov 115  }
 0x115   : > { %v777_v12 = vmul.f32 %v775_v11, %v4705_v51  ;;  %v778_v13 = vmul.f32 %v775_v11, %v4708_v52 }
 0x116   : > { %617 = vrot.lane.b32.xlu1 %v613_v48, %s6708_s21  ;;  %619 = vrot.lane.b32.xlu0 %v614_v49, %s6708_s21  ;;  %s4842_s19 = spop %3901 }
 0x117   : > { %s3904_s15 = spop %3903 }
 0x118   : > { %v803_v14 = vstv %s3904_s15  ;;  %s6710_s15 = smov 116  }
 0x119   : > { %v805_v15 = vmul.f32 %v4721_v63, %v803_v14  ;;  %v806_v16 = vmul.f32 %v4724_v0, %v803_v14 }
 0x11a   : > { %636 = vrot.lane.b32.xlu1 %v631_v54, %s6709_s11  ;;  %634 = vrot.lane.b32.xlu0 %v630_v53, %s6709_s11  ;;  %s3906_s26 = spop %3905 }
 0x11b   : > { %v820_v19 = vstv %s3906_s26  ;;  %s6718_s26 = smov 110  }
 0x11c   : > { %v822_v20 = vmul.f32 %v4721_v63, %v820_v19  ;;  %v823_v21 = vmul.f32 %v4724_v0, %v820_v19 }
 0x11e   : > { %674 = vrot.lane.b32.xlu1 %v670_v56, %s6708_s21  ;;  %676 = vrot.lane.b32.xlu0 %v671_v57, %s6708_s21  ;;  %v332_v57 = vmul.f32 %v330_v50, %v4705_v51 }
 0x122   : > { %693 = vrot.lane.b32.xlu1 %v688_v60, %s6709_s11  ;;  %691 = vrot.lane.b32.xlu0 %v687_v59, %s6709_s11 }
 0x126   : > { %721 = vrot.lane.b32.xlu1 %v716_v2, %s6708_s21  ;;  %719 = vrot.lane.b32.xlu0 %v715_v62, %s6708_s21 }
 0x12a   : > { %736 = vrot.lane.b32.xlu1 %v732_v4, %s6709_s11  ;;  %738 = vrot.lane.b32.xlu0 %v733_v5, %s6709_s11  ;;  %v376_v4 = vstv %s4714_s17 }
 0x12b   : > { %v378_v11 = vmul.f32 %v4721_v63, %v376_v4 }
 0x12e   : > { %764 = vrot.lane.b32.xlu1 %v760_v7, %s6708_s21  ;;  %766 = vrot.lane.b32.xlu0 %v761_v8, %s6708_s21 }
 0x132   : > { %783 = vrot.lane.b32.xlu1 %v778_v13, %s6709_s11  ;;  %781 = vrot.lane.b32.xlu0 %v777_v12, %s6709_s11  ;;  %v379_v12 = vmul.f32 %v4724_v0, %v376_v4 }
 0x136   : > { %811 = vrot.lane.b32.xlu1 %v806_v16, %s6708_s21  ;;  %809 = vrot.lane.b32.xlu0 %v805_v15, %s6708_s21 }
 0x13a   : > { %826 = vrot.lane.b32.xlu1 %v822_v20, %s6709_s11  ;;  %828 = vrot.lane.b32.xlu0 %v823_v21, %s6709_s11  ;;  %v421_v21 = vstv %s4730_s24  ;;  %s6713_s24 = smov 114  }
 0x13b   : > { %v424_v31 = vmul.f32 %v4740_v10, %v421_v21 }
 0x13e   : > { %836 = vrot.lane.b32.xlu1 %v4631_v1, %s6710_s15  ;;  %845 = vrot.lane.b32.xlu0 %v4631_v1, %s6711_s3 }
 0x148   : > { %v258_v23 = vpop.permute.xlu1 %257  ;;  %v256_v24 = vpop.permute.xlu0 %255 }
 0x149   : > { %v262_v32 = vadd.f32 %v258_v23, %v243_v28  ;;  %v261_v33 = vadd.f32 %v256_v24, %v242_v27  ;;  %v423_v28 = vmul.f32 %v4737_v9, %v421_v21 }
 0x14c   : > { %v275_v34 = vpop.permute.xlu1 %274  ;;  %v273_v37 = vpop.permute.xlu0 %272 }
 0x14d   : > { %v279_v42 = vadd.f32 %v275_v34, %v262_v32  ;;  %v278_v43 = vadd.f32 %v273_v37, %v261_v33 }
 0x14f   : > { %v290_v44 = vadd.f32 %v288_v41, %v279_v42  ;;  %v289_v47 = vadd.f32 %v287_v38, %v278_v43  ;;  %v466_v42 = vstv %s4746_s20 }
 0x150   : > { %v303_v48 = vpop.permute.xlu1 %302  ;;  %v301_v49 = vpop.permute.xlu0 %300  ;;  %v469_v50 = vmul.f32 %v4756_v18, %v466_v42 }
 0x151   : > { %v307_v53 = vadd.f32 %v303_v48, %v290_v44  ;;  %v306_v54 = vadd.f32 %v301_v49, %v289_v47  ;;  %v468_v49 = vmul.f32 %v4753_v17, %v466_v42 }
 0x154   : > { %v318_v55 = vpop.permute.xlu1 %317  ;;  %v320_v56 = vpop.permute.xlu0 %319 }
 0x155   : > { %v323_v59 = vadd.f32 %v318_v55, %v306_v54  ;;  %v324_v60 = vadd.f32 %v320_v56, %v307_v53 }
 0x157   : > { %v334_v61 = vadd.f32 %v332_v57, %v323_v59  ;;  %v335_v62 = vadd.f32 %v333_v58, %v324_v60  ;;  %v512_v59 = vstv %s4762_s6  ;;  %s6714_s6 = smov 112  }
 0x158   : > { %v346_v2 = vpop.permute.xlu1 %345  ;;  %v348_v3 = vpop.permute.xlu0 %347  ;;  %v515_v4 = vmul.f32 %v4772_v26, %v512_v59 }
 0x159   : > { %v351_v5 = vadd.f32 %v346_v2, %v334_v61  ;;  %v352_v6 = vadd.f32 %v348_v3, %v335_v62  ;;  %v514_v3 = vmul.f32 %v4769_v25, %v512_v59  ;;  %v645_v59 = vstv %s4806_s12 }
 0x15c   : > { %v365_v7 = vpop.permute.xlu1 %364  ;;  %v363_v8 = vpop.permute.xlu0 %362 }
 0x15d   : > { %v369_v13 = vadd.f32 %v365_v7, %v352_v6  ;;  %v368_v14 = vadd.f32 %v363_v8, %v351_v5 }
 0x15f   : > { %v381_v15 = vadd.f32 %v379_v12, %v369_v13  ;;  %v380_v16 = vadd.f32 %v378_v11, %v368_v14  ;;  %v557_v13 = vstv %s4778_s1  ;;  %s6715_s1 = smov 113  }
 0x160   : > { %v394_v19 = vpop.permute.xlu1 %393  ;;  %v392_v20 = vpop.permute.xlu0 %391  ;;  %v560_v21 = vmul.f32 %v4788_v36, %v557_v13 }
 0x161   : > { %v398_v22 = vadd.f32 %v394_v19, %v381_v15  ;;  %v397_v23 = vadd.f32 %v392_v20, %v380_v16  ;;  %v559_v20 = vmul.f32 %v4785_v35, %v557_v13 }
 0x164   : > { %v409_v24 = vpop.permute.xlu1 %408  ;;  %v411_v27 = vpop.permute.xlu0 %410 }
 0x165   : > { %v414_v32 = vadd.f32 %v409_v24, %v397_v23  ;;  %v415_v33 = vadd.f32 %v411_v27, %v398_v22 }
 0x167   : > { %v425_v34 = vadd.f32 %v423_v28, %v414_v32  ;;  %v426_v37 = vadd.f32 %v424_v31, %v415_v33  ;;  %v602_v32 = vstv %s4794_s0 }
 0x168   : > { %v437_v38 = vpop.permute.xlu1 %436  ;;  %v439_v41 = vpop.permute.xlu0 %438  ;;  %v605_v42 = vmul.f32 %v4804_v46, %v602_v32 }
 0x169   : > { %v442_v43 = vadd.f32 %v437_v38, %v425_v34  ;;  %v443_v44 = vadd.f32 %v439_v41, %v426_v37  ;;  %v604_v41 = vmul.f32 %v4801_v45, %v602_v32 }
 0x16c   : > { %v456_v47 = vpop.permute.xlu1 %455  ;;  %v454_v48 = vpop.permute.xlu0 %453 }
 0x16d   : > { %v460_v53 = vadd.f32 %v456_v47, %v443_v44  ;;  %v459_v54 = vadd.f32 %v454_v48, %v442_v43 }
 0x16f   : > { %v471_v55 = vadd.f32 %v469_v50, %v460_v53  ;;  %v470_v56 = vadd.f32 %v468_v49, %v459_v54 }
 0x170   : > { %v484_v57 = vpop.permute.xlu1 %483  ;;  %v482_v58 = vpop.permute.xlu0 %481 }
 0x171   : > { %v488_v60 = vadd.f32 %v484_v57, %v471_v55  ;;  %v487_v61 = vadd.f32 %v482_v58, %v470_v56 }
 0x174   : > { %v499_v62 = vpop.permute.xlu1 %498  ;;  %v501_v2 = vpop.permute.xlu0 %500 }
 0x175   : > { %v504_v5 = vadd.f32 %v499_v62, %v487_v61  ;;  %v505_v6 = vadd.f32 %v501_v2, %v488_v60  ;;  %v659_v60 = vstv %s4812_s2 }
 0x177   : > { %v516_v7 = vadd.f32 %v514_v3, %v504_v5  ;;  %v517_v8 = vadd.f32 %v515_v4, %v505_v6  ;;  %v661_v4 = vmul.f32 %v659_v60, %v4674_v29  ;;  %v662_v5 = vmul.f32 %v659_v60, %v4677_v30 }
 0x178   : > { %v528_v11 = vpop.permute.xlu1 %527  ;;  %v530_v12 = vpop.permute.xlu0 %529 }
 0x179   : > { %v533_v14 = vadd.f32 %v528_v11, %v516_v7  ;;  %v534_v15 = vadd.f32 %v530_v12, %v517_v8  ;;  %v704_v8 = vstv %s4822_s14  ;;  %s6716_s14 = smov 111  }
 0x17a   : > { %v706_v29 = vmul.f32 %v704_v8, %v4689_v39  ;;  %v707_v30 = vmul.f32 %v704_v8, %v4692_v40 }
 0x17c   : > { %v547_v16 = vpop.permute.xlu1 %546  ;;  %v545_v19 = vpop.permute.xlu0 %544 }
 0x17d   : > { %v551_v22 = vadd.f32 %v547_v16, %v534_v15  ;;  %v550_v23 = vadd.f32 %v545_v19, %v533_v14 }
 0x17f   : > { %v562_v24 = vadd.f32 %v560_v21, %v551_v22  ;;  %v561_v27 = vadd.f32 %v559_v20, %v550_v23  ;;  %v749_v23 = vstv %s4832_s27 }
 0x180   : > { %v575_v28 = vpop.permute.xlu1 %574  ;;  %v573_v31 = vpop.permute.xlu0 %572  ;;  %v751_v32 = vmul.f32 %v749_v23, %v4705_v51 }
 0x181   : > { %v579_v33 = vadd.f32 %v575_v28, %v562_v24  ;;  %v578_v34 = vadd.f32 %v573_v31, %v561_v27 }
 0x184   : > { %v590_v37 = vpop.permute.xlu1 %589  ;;  %v592_v38 = vpop.permute.xlu0 %591 }
 0x185   : > { %v595_v43 = vadd.f32 %v590_v37, %v578_v34  ;;  %v596_v44 = vadd.f32 %v592_v38, %v579_v33  ;;  %v752_v33 = vmul.f32 %v749_v23, %v4708_v52 }
 0x187   : > { %v606_v47 = vadd.f32 %v604_v41, %v595_v43  ;;  %v607_v48 = vadd.f32 %v605_v42, %v596_v44  ;;  %v794_v42 = vstv %s4842_s19  ;;  %s6717_s19 = smov 109  }
 0x188   : > { %v618_v49 = vpop.permute.xlu1 %617  ;;  %v620_v50 = vpop.permute.xlu0 %619 }
 0x189   : > { %v623_v53 = vadd.f32 %v618_v49, %v606_v47  ;;  %v624_v54 = vadd.f32 %v620_v50, %v607_v48  ;;  %v796_v49 = vmul.f32 %v4721_v63, %v794_v42  ;;  %v797_v50 = vmul.f32 %v4724_v0, %v794_v42 }
 0x18c   : > { %v637_v55 = vpop.permute.xlu1 %636  ;;  %v635_v56 = vpop.permute.xlu0 %634 }
 0x18d   : > { %v641_v57 = vadd.f32 %v637_v55, %v624_v54  ;;  %v640_v58 = vadd.f32 %v635_v56, %v623_v53 }
 0x18f   : > { %v648_v61 = vadd.f32 %v645_v59, %v641_v57  ;;  %v647_v62 = vadd.f32 %v645_v59, %v640_v58 }
 0x190   : > { %v675_v2 = vpop.permute.xlu1 %674  ;;  %v677_v3 = vpop.permute.xlu0 %676 }
 0x191   : > { %v650_v6 = vmax.f32 %v648_v61, 0.0  ;;  %v649_v7 = vmax.f32 %v647_v62, 0.0  ;;  %v680_v11 = vadd.f32 %v675_v2, %v661_v4  ;;  %v681_v12 = vadd.f32 %v677_v3, %v662_v5 }
 0x193   : > { %653 = vst.msk [vmem:[%s4897_s9 + $0x8] sm:$0xff] %vm651_vm0, %v650_v6  ;;  %652 = vst.msk [vmem:[%s4897_s9] sm:$0xff] %vm651_vm0, %v649_v7 }
 0x194   : > { %v694_v13 = vpop.permute.xlu1 %693  ;;  %v692_v14 = vpop.permute.xlu0 %691 }
 0x195   : > { %v698_v15 = vadd.f32 %v694_v13, %v681_v12  ;;  %v697_v16 = vadd.f32 %v692_v14, %v680_v11 }
 0x197   : > { %v709_v19 = vadd.f32 %v707_v30, %v698_v15  ;;  %v708_v20 = vadd.f32 %v706_v29, %v697_v16 }
 0x198   : > { %v722_v21 = vpop.permute.xlu1 %721  ;;  %v720_v22 = vpop.permute.xlu0 %719 }
 0x199   : > { %v726_v24 = vadd.f32 %v722_v21, %v709_v19  ;;  %v725_v27 = vadd.f32 %v720_v22, %v708_v20 }
 0x19c   : > { %v737_v28 = vpop.permute.xlu1 %736  ;;  %v739_v31 = vpop.permute.xlu0 %738 }
 0x19d   : > { %v742_v34 = vadd.f32 %v737_v28, %v725_v27  ;;  %v743_v39 = vadd.f32 %v739_v31, %v726_v24 }
 0x19f   : > { %v753_v37 = vadd.f32 %v751_v32, %v742_v34  ;;  %v754_v40 = vadd.f32 %v752_v33, %v743_v39 }
 0x1a0   : > { %v765_v38 = vpop.permute.xlu1 %764  ;;  %v767_v41 = vpop.permute.xlu0 %766 }
 0x1a1   : > { %v770_v43 = vadd.f32 %v765_v38, %v753_v37  ;;  %v771_v44 = vadd.f32 %v767_v41, %v754_v40 }
 0x1a4   : > { %v784_v47 = vpop.permute.xlu1 %783  ;;  %v782_v48 = vpop.permute.xlu0 %781 }
 0x1a5   : > { %v788_v53 = vadd.f32 %v784_v47, %v771_v44  ;;  %v787_v54 = vadd.f32 %v782_v48, %v770_v43 }
 0x1a7   : > { %v4911_v51 = vadd.f32 %v797_v50, %v788_v53  ;;  %v4913_v52 = vadd.f32 %v796_v49, %v787_v54 }
 0x1a8   : > { %v4915_v55 = vpop.permute.xlu1 %811  ;;  %v4917_v56 = vpop.permute.xlu0 %809 }
 0x1ac   : > { %v4919_v57 = vpop.permute.xlu1 %826  ;;  %v4921_v58 = vpop.permute.xlu0 %828 }
 0x1b0   : > { %v837_v59 = vpop.permute.xlu1 %836  ;;  %v846_v60 = vpop.permute.xlu0 %845 }
 0x1b1   : > { %3907 = vpush %v837_v59 }
 0x1b2   : > { %3909 = vpush %v846_v60 }
 0x1e2   : > { %s4923_s12 = spop %3907 }
 0x1e3   : > { %s3910_s17 = spop %3909 }
 0x1e4   : > { %v848_v63 = vstv %s3910_s17 }
 0x1e5   : > { %v850_v0 = vmul.f32 %v4737_v9, %v848_v63  ;;  %v851_v61 = vmul.f32 %v4740_v10, %v848_v63 }
 0x1e7   : > { %856 = vrot.lane.b32.xlu0 %v851_v61, %s6708_s21  ;;  %854 = vrot.lane.b32.xlu1 %v850_v0, %s6708_s21 }
 0x1eb   : > { %862 = vrot.lane.b32.xlu1 %v4631_v1, %s6713_s24 }
 0x259   : > { %v4931_v62 = vpop.permute.xlu1 %854  ;;  %v4941_v6 = vpop.permute.xlu0 %856 }
 0x25d   : > { %v863_v2 = vpop.permute.xlu1 %862 }
 0x25e   : > { %3911 = vpush %v863_v2 }
 0x28f   : > { %s3912_s20 = spop %3911 }
 0x290   : > { %v865_v3 = vstv %s3912_s20  ;;  %s6719_s20 = smov 108  }
 0x291   : > { %v867_v4 = vmul.f32 %v4737_v9, %v865_v3  ;;  %v868_v5 = vmul.f32 %v4740_v10, %v865_v3 }
 0x293   : > { %873 = vrot.lane.b32.xlu1 %v868_v5, %s6709_s11  ;;  %871 = vrot.lane.b32.xlu0 %v867_v4, %s6709_s11 }
 0x297   : > { %890 = vrot.lane.b32.xlu1 %v4631_v1, %s6714_s6  ;;  %881 = vrot.lane.b32.xlu0 %v4631_v1, %s6715_s1 }
 0x305   : > { %v4943_v7 = vpop.permute.xlu1 %873  ;;  %v4945_v8 = vpop.permute.xlu0 %871 }
 0x309   : > { %v891_v11 = vpop.permute.xlu1 %890  ;;  %v882_v12 = vpop.permute.xlu0 %881 }
 0x30a   : > { %3913 = vpush %v882_v12 }
 0x30b   : > { %3915 = vpush %v891_v11 }
 0x33b   : > { %s4947_s0 = spop %3913 }
 0x33c   : > { %s3916_s2 = spop %3915 }
 0x33d   : > { %v893_v13 = vstv %s3916_s2 }
 0x33e   : > { %v895_v14 = vmul.f32 %v4753_v17, %v893_v13  ;;  %v896_v29 = vmul.f32 %v4756_v18, %v893_v13  ;;  %v1059_v13 = vld [vmem:[%s4663_s18 + $0x1] sm:$0x1] }
 0x340   : > { %901 = vrot.lane.b32.xlu1 %v896_v29, %s6708_s21  ;;  %899 = vrot.lane.b32.xlu0 %v895_v14, %s6708_s21  ;;  %v5023_v29 = vld [vmem:[%s4601_s10 + $0x2] sm:$0x1] }
 0x344   : > { %907 = vrot.lane.b32.xlu0 %v4631_v1, %s6716_s14 }
 0x3b2   : > { %v4955_v30 = vpop.permute.xlu0 %899  ;;  %v4965_v21 = vpop.permute.xlu1 %901 }
 0x3b6   : > { %v908_v15 = vpop.permute.xlu0 %907 }
 0x3b7   : > { %3917 = vpush %v908_v15 }
 0x3e8   : > { %s3918_s27 = spop %3917 }
 0x3e9   : > { %v910_v16 = vstv %s3918_s27  ;;  %s6720_s27 = smov 106  }
 0x3ea   : > { %v912_v19 = vmul.f32 %v4753_v17, %v910_v16  ;;  %v913_v20 = vmul.f32 %v4756_v18, %v910_v16 }
 0x3ec   : > { %918 = vrot.lane.b32.xlu0 %v913_v20, %s6709_s11  ;;  %916 = vrot.lane.b32.xlu1 %v912_v19, %s6709_s11  ;;  %v839_v20 = vstv %s4923_s12 }
 0x3f0   : > { %935 = vrot.lane.b32.xlu0 %v4631_v1, %s6717_s19  ;;  %926 = vrot.lane.b32.xlu1 %v4631_v1, %s6718_s26  ;;  %v4374_v1 = vld [vmem:[%s4601_s10 + $0x1] sm:$0x1] }
 0x45e   : > { %v4967_v22 = vpop.permute.xlu0 %918  ;;  %v4969_v23 = vpop.permute.xlu1 %916 }
 0x462   : > { %v936_v24 = vpop.permute.xlu0 %935  ;;  %v927_v27 = vpop.permute.xlu1 %926 }
 0x463   : > { %3919 = vpush %v927_v27  ;;  %v815_v27 = vadd.f32 %v4917_v56, %v4913_v52 }
 0x464   : > { %3921 = vpush %v936_v24  ;;  %v816_v24 = vadd.f32 %v4915_v55, %v4911_v51 }
 0x494   : > { %s4971_s22 = spop %3919 }
 0x495   : > { %s3922_s17 = spop %3921  ;;  %v929_v55 = vstv %s4971_s22 }
 0x496   : > { %v938_v28 = vstv %s3922_s17  ;;  %s6721_s17 = smov 107  }
 0x497   : > { %v940_v31 = vmul.f32 %v4769_v25, %v938_v28  ;;  %v941_v32 = vmul.f32 %v4772_v26, %v938_v28  ;;  %v841_v28 = vmul.f32 %v4737_v9, %v839_v20 }
 0x499   : > { %946 = vrot.lane.b32.xlu0 %v941_v32, %s6708_s21  ;;  %944 = vrot.lane.b32.xlu1 %v940_v31, %s6708_s21  ;;  %v842_v31 = vmul.f32 %v4740_v10, %v839_v20  ;;  %v832_v32 = vadd.f32 %v4919_v57, %v815_v27 }
 0x49d   : > { %952 = vrot.lane.b32.xlu1 %v4374_v1, %s6719_s20 }
 0x50b   : > { %v4979_v33 = vpop.permute.xlu1 %944  ;;  %v4987_v38 = vpop.permute.xlu0 %946 }
 0x50f   : > { %v953_v34 = vpop.permute.xlu1 %952 }
 0x510   : > { %3923 = vpush %v953_v34  ;;  %v884_v34 = vstv %s4947_s0 }
 0x511   : > { %v886_v51 = vmul.f32 %v4753_v17, %v884_v34  ;;  %v887_v52 = vmul.f32 %v4756_v18, %v884_v34 }
 0x541   : > { %s3924_s2 = spop %3923 }
 0x542   : > { %v955_v39 = vstv %s3924_s2 }
 0x543   : > { %v957_v37 = vmul.f32 %v4769_v25, %v955_v39  ;;  %v958_v40 = vmul.f32 %v4772_v26, %v955_v39 }
 0x545   : > { %963 = vrot.lane.b32.xlu1 %v958_v40, %s6709_s11  ;;  %961 = vrot.lane.b32.xlu0 %v957_v37, %s6709_s11  ;;  %v843_v37 = vadd.f32 %v841_v28, %v832_v32 }
 0x549   : > { %980 = vrot.lane.b32.xlu1 %v4374_v1, %s6720_s27  ;;  %971 = vrot.lane.b32.xlu0 %v4374_v1, %s6721_s17  ;;  %s6724_s17 = smov 104  }
 0x5b7   : > { %v4989_v41 = vpop.permute.xlu1 %963  ;;  %v4991_v42 = vpop.permute.xlu0 %961 }
 0x5bb   : > { %v981_v43 = vpop.permute.xlu1 %980  ;;  %v972_v44 = vpop.permute.xlu0 %971 }
 0x5bc   : > { %3925 = vpush %v972_v44 }
 0x5bd   : > { %3927 = vpush %v981_v43  ;;  %v860_v43 = vadd.f32 %v4931_v62, %v843_v37  ;;  %v932_v62 = vmul.f32 %v4772_v26, %v929_v55 }
 0x5bf   : > { %v877_v10 = vadd.f32 %v4945_v8, %v860_v43  ;;  %v5107_v43 = vld [vmem:[%s4668_s5 + $0x9] sm:$0xff] }
 0x5c1   : > { %v888_v57 = vadd.f32 %v886_v51, %v877_v10 }
 0x5c3   : > { %v905_v44 = vadd.f32 %v4955_v30, %v888_v57 }
 0x5c5   : > { %v922_v18 = vadd.f32 %v4969_v23, %v905_v44 }
 0x5ed   : > { %s4993_s2 = spop %3925 }
 0x5ee   : > { %s3928_s25 = spop %3927 }
 0x5ef   : > { %v983_v47 = vstv %s3928_s25  ;;  %s6723_s25 = smov 103  }
 0x5f0   : > { %v985_v48 = vmul.f32 %v4785_v35, %v983_v47  ;;  %v986_v49 = vmul.f32 %v4788_v36, %v983_v47  ;;  %v974_v47 = vstv %s4993_s2 }
 0x5f2   : > { %991 = vrot.lane.b32.xlu1 %v986_v49, %s6708_s21  ;;  %989 = vrot.lane.b32.xlu0 %v985_v48, %s6708_s21 }
 0x5f6   : > { %997 = vrot.lane.b32.xlu0 %v4374_v1, %s6722_s13 }
 0x664   : > { %v5000_v50 = vpop.permute.xlu0 %989  ;;  %v5008_v63 = vpop.permute.xlu1 %991 }
 0x668   : > { %v998_v53 = vpop.permute.xlu0 %997 }
 0x669   : > { %3929 = vpush %v998_v53  ;;  %v976_v53 = vmul.f32 %v4785_v35, %v974_v47 }
 0x69a   : > { %s3930_s16 = spop %3929 }
 0x69b   : > { %v1000_v54 = vstv %s3930_s16 }
 0x69c   : > { %v1002_v59 = vmul.f32 %v4785_v35, %v1000_v54  ;;  %v1003_v60 = vmul.f32 %v4788_v36, %v1000_v54 }
 0x69e   : > { %1008 = vrot.lane.b32.xlu0 %v1003_v60, %s6709_s11  ;;  %1006 = vrot.lane.b32.xlu1 %v1002_v59, %s6709_s11 }
 0x6a2   : > { %1025 = vrot.lane.b32.xlu0 %v4374_v1, %s6723_s25  ;;  %1016 = vrot.lane.b32.xlu1 %v4374_v1, %s6724_s17  ;;  %s6725_s17 = smov 102  }
 0x710   : > { %v5010_v0 = vpop.permute.xlu0 %1008  ;;  %v5012_v61 = vpop.permute.xlu1 %1006 }
 0x714   : > { %v1026_v2 = vpop.permute.xlu0 %1025  ;;  %v1017_v3 = vpop.permute.xlu1 %1016 }
 0x715   : > { %3931 = vpush %v1017_v3 }
 0x716   : > { %3933 = vpush %v1026_v2 }
 0x746   : > { %s5014_s16 = spop %3931 }
 0x747   : > { %s3934_s13 = spop %3933  ;;  %v1019_v26 = vstv %s5014_s16  ;;  %s6727_s16 = smov 124  }
 0x748   : > { %v1028_v4 = vstv %s3934_s13  ;;  %v1021_v60 = vmul.f32 %v4801_v45, %v1019_v26 }
 0x749   : > { %v1030_v5 = vmul.f32 %v4801_v45, %v1028_v4  ;;  %v1031_v11 = vmul.f32 %v4804_v46, %v1028_v4 }
 0x74b   : > { %1036 = vrot.lane.b32.xlu0 %v1031_v11, %s6708_s21  ;;  %1034 = vrot.lane.b32.xlu1 %v1030_v5, %s6708_s21 }
 0x74f   : > { %1042 = vrot.lane.b32.xlu1 %v4374_v1, %s6725_s17  ;;  %v833_v1 = vadd.f32 %v4921_v58, %v816_v24 }
 0x751   : > { %v844_v39 = vadd.f32 %v842_v31, %v833_v1 }
 0x753   : > { %v861_v40 = vadd.f32 %v4941_v6, %v844_v39  ;;  %v931_v6 = vmul.f32 %v4769_v25, %v929_v55 }
 0x755   : > { %v878_v9 = vadd.f32 %v4943_v7, %v861_v40  ;;  %v933_v48 = vadd.f32 %v931_v6, %v922_v18  ;;  %v5104_v40 = vld [vmem:[%s4668_s5 + $0x1] sm:$0xff] }
 0x757   : > { %v889_v56 = vadd.f32 %v887_v52, %v878_v9  ;;  %v950_v49 = vadd.f32 %v4979_v33, %v933_v48 }
 0x759   : > { %v906_v58 = vadd.f32 %v4965_v21, %v889_v56  ;;  %v977_v21 = vmul.f32 %v4788_v36, %v974_v47  ;;  %v967_v25 = vadd.f32 %v4991_v42, %v950_v49  ;;  %v5134_v47 = vld [vmem:[%s4668_s5 + $0x2] sm:$0xff] }
 0x75b   : > { %v923_v17 = vadd.f32 %v4967_v22, %v906_v58  ;;  %v978_v22 = vadd.f32 %v976_v53, %v967_v25 }
 0x75d   : > { %v934_v7 = vadd.f32 %v932_v62, %v923_v17  ;;  %v995_v59 = vadd.f32 %v5000_v50, %v978_v22 }
 0x75f   : > { %v951_v8 = vadd.f32 %v4987_v38, %v934_v7  ;;  %v1022_v38 = vmul.f32 %v4804_v46, %v1019_v26  ;;  %v1012_v35 = vadd.f32 %v5012_v61, %v995_v59  ;;  %v5137_v7 = vld [vmem:[%s4668_s5 + $0xa] sm:$0xff] }
 0x761   : > { %v968_v30 = vadd.f32 %v4989_v41, %v951_v8  ;;  %v1023_v41 = vadd.f32 %v1021_v60, %v1012_v35 }
 0x763   : > { %v979_v54 = vadd.f32 %v977_v21, %v968_v30 }
 0x765   : > { %v996_v23 = vadd.f32 %v5008_v63, %v979_v54 }
 0x767   : > { %v1013_v33 = vadd.f32 %v5010_v0, %v996_v23 }
 0x769   : > { %v1024_v2 = vadd.f32 %v1022_v38, %v1013_v33  ;;  %v5164_v38 = vld [vmem:[%s4668_s5 + $0x18] sm:$0xff]  ;;  %v5167_v33 = vld [vmem:[%s4668_s5 + $0x20] sm:$0xff] }
 0x7bd   : > { %v1035_v12 = vpop.permute.xlu1 %1034  ;;  %v1037_v36 = vpop.permute.xlu0 %1036 }
 0x7be   : > { %v1041_v42 = vadd.f32 %v1037_v36, %v1024_v2  ;;  %v1040_v3 = vadd.f32 %v1035_v12, %v1023_v41  ;;  %v5079_v12 = vld [vmem:[%s4668_s5 + $0x8] sm:$0xff] }
 0x7c1   : > { %v1043_v14 = vpop.permute.xlu1 %1042 }
 0x7c2   : > { %3935 = vpush %v1043_v14  ;;  %v5076_v14 = vld [vmem:[%s4668_s5] sm:$0xff] }
 0x7c3   : > { %3937 = vpush %v1059_v13  ;;  %6726 = vst [vmem:[#allocation21_spill] sm:$0xff] %v5076_v14 }
 0x7c4   : > { %3939 = vpush %v5023_v29 }
 0x7f3   : > { %s3936_s13 = spop %3935 }
 0x7f4   : > { %v1045_v15 = vstv %s3936_s13  ;;  %s3938_s12 = spop %3937  ;;  %s6728_s13 = smov 125  }
 0x7f5   : > { %v1047_v16 = vmul.f32 %v4801_v45, %v1045_v15  ;;  %v1048_v19 = vmul.f32 %v4804_v46, %v1045_v15  ;;  %v1062_v4 = vstv %s3938_s12  ;;  %s5073_s0 = spop %3939 }
 0x7f7   : > { %1053 = vrot.lane.b32.xlu1 %v1048_v19, %s6709_s11  ;;  %1051 = vrot.lane.b32.xlu0 %v1047_v16, %s6709_s11 }
 0x7fb   : > { %1082 = vrot.lane.b32.xlu0 %v5023_v29, %s6708_s21 }
 0x869   : > { %v1054_v63 = vpop.permute.xlu1 %1053  ;;  %v1052_v50 = vpop.permute.xlu0 %1051 }
 0x86a   : > { %v1058_v45 = vadd.f32 %v1054_v63, %v1041_v42  ;;  %v1057_v5 = vadd.f32 %v1052_v50, %v1040_v3 }
 0x86c   : > { %v1064_v46 = vadd.f32 %v1062_v4, %v1057_v5  ;;  %v1065_v11 = vadd.f32 %v1062_v4, %v1058_v45 }
 0x86d   : > { %v1083_v0 = vpop.permute.xlu0 %1082 }
 0x86e   : > { %v1066_v13 = vmax.f32 %v1064_v46, 0.0  ;;  %v1067_v61 = vmax.f32 %v1065_v11, 0.0  ;;  %3941 = vpush %v1083_v0  ;;  %v5194_v0 = vld [vmem:[%s4668_s5 + $0x19] sm:$0xff] }
 0x870   : > { %3732 = vst.msk [vmem:[%s4897_s9 + $0x10] sm:$0xff] %vm651_vm0, %v1066_v13  ;;  %3733 = vst.msk [vmem:[%s4897_s9 + $0x18] sm:$0xff] %vm651_vm0, %v1067_v61  ;;  %v5197_v13 = vld [vmem:[%s4668_s5 + $0x21] sm:$0xff] }
 0x89f   : > { %s3942_s22 = spop %3941 }
 0x8a0   : > { %v1085_v15 = vstv %s3942_s22 }
 0x8a1   : > { %v1087_v16 = vmul.f32 %v1085_v15, %v5076_v14  ;;  %v1088_v19 = vmul.f32 %v1085_v15, %v5079_v12 }
 0x8a3   : > { %1093 = vrot.lane.b32.xlu0 %v1088_v19, %s6708_s21  ;;  %1091 = vrot.lane.b32.xlu1 %v1087_v16, %s6708_s21 }
 0x8a7   : > { %1099 = vrot.lane.b32.xlu1 %v5023_v29, %s6709_s11 }
 0x915   : > { %v5087_v20 = vpop.permute.xlu1 %1091  ;;  %v5097_v32 = vpop.permute.xlu0 %1093 }
 0x919   : > { %v1100_v24 = vpop.permute.xlu1 %1099 }
 0x91a   : > { %3943 = vpush %v1100_v24 }
 0x94b   : > { %s3944_s2 = spop %3943 }
 0x94c   : > { %v1102_v27 = vstv %s3944_s2 }
 0x94d   : > { %v1104_v28 = vmul.f32 %v1102_v27, %v5076_v14  ;;  %v1105_v31 = vmul.f32 %v1102_v27, %v5079_v12 }
 0x94f   : > { %1110 = vrot.lane.b32.xlu1 %v1105_v31, %s6709_s11  ;;  %1108 = vrot.lane.b32.xlu0 %v1104_v28, %s6709_s11 }
 0x953   : > { %1127 = vrot.lane.b32.xlu1 %v5023_v29, %s6727_s16  ;;  %1118 = vrot.lane.b32.xlu0 %v5023_v29, %s6728_s13 }
 0x9c1   : > { %v5099_v1 = vpop.permute.xlu1 %1110  ;;  %v5101_v34 = vpop.permute.xlu0 %1108 }
 0x9c5   : > { %v1128_v39 = vpop.permute.xlu1 %1127  ;;  %v1119_v37 = vpop.permute.xlu0 %1118 }
 0x9c6   : > { %3945 = vpush %v1119_v37 }
 0x9c7   : > { %3947 = vpush %v1128_v39 }
 0x9f7   : > { %s5109_s12 = spop %3945 }
 0x9f8   : > { %s3948_s22 = spop %3947 }
 0x9f9   : > { %v1130_v51 = vstv %s3948_s22 }
 0x9fa   : > { %v1132_v52 = vmul.f32 %v1130_v51, %v5104_v40  ;;  %v1133_v9 = vmul.f32 %v1130_v51, %v5107_v43 }
 0x9fc   : > { %1138 = vrot.lane.b32.xlu1 %v1133_v9, %s6708_s21  ;;  %1136 = vrot.lane.b32.xlu0 %v1132_v52, %s6708_s21 }
 0xa00   : > { %1144 = vrot.lane.b32.xlu0 %v5023_v29, %s6696_s4 }
 0xa6e   : > { %v5117_v10 = vpop.permute.xlu0 %1136  ;;  %v5127_v44 = vpop.permute.xlu1 %1138 }
 0xa72   : > { %v1145_v55 = vpop.permute.xlu0 %1144 }
 0xa73   : > { %3949 = vpush %v1145_v55  ;;  %v5224_v55 = vld [vmem:[%s4668_s5 + $0x1a] sm:$0xff] }
 0xaa4   : > { %s3950_s2 = spop %3949 }
 0xaa5   : > { %v1147_v56 = vstv %s3950_s2 }
 0xaa6   : > { %v1149_v57 = vmul.f32 %v1147_v56, %v5104_v40  ;;  %v1150_v58 = vmul.f32 %v1147_v56, %v5107_v43  ;;  %v5227_v56 = vld [vmem:[%s4668_s5 + $0x22] sm:$0xff] }
 0xaa8   : > { %1155 = vrot.lane.b32.xlu0 %v1150_v58, %s6709_s11  ;;  %1153 = vrot.lane.b32.xlu1 %v1149_v57, %s6709_s11 }
 0xaac   : > { %1172 = vrot.lane.b32.xlu0 %v5023_v29, %s6698_s7  ;;  %1163 = vrot.lane.b32.xlu1 %v5023_v29, %s6697_s8 }
 0xb1a   : > { %v5129_v6 = vpop.permute.xlu0 %1155  ;;  %v5131_v62 = vpop.permute.xlu1 %1153 }
 0xb1e   : > { %v1173_v17 = vpop.permute.xlu0 %1172  ;;  %v1164_v18 = vpop.permute.xlu1 %1163 }
 0xb1f   : > { %3951 = vpush %v1164_v18 }
 0xb20   : > { %3953 = vpush %v1173_v17 }
 0xb50   : > { %s5139_s22 = spop %3951 }
 0xb51   : > { %s3954_s2 = spop %3953 }
 0xb52   : > { %v1175_v48 = vstv %s3954_s2 }
 0xb53   : > { %v1177_v8 = vmul.f32 %v1175_v48, %v5134_v47  ;;  %v1178_v49 = vmul.f32 %v1175_v48, %v5137_v7 }
 0xb55   : > { %1183 = vrot.lane.b32.xlu0 %v1178_v49, %s6708_s21  ;;  %1181 = vrot.lane.b32.xlu1 %v1177_v8, %s6708_s21 }
 0xb59   : > { %1189 = vrot.lane.b32.xlu1 %v5023_v29, %s6699_s30 }
 0xbc7   : > { %v5147_v53 = vpop.permute.xlu1 %1181  ;;  %v5157_v54 = vpop.permute.xlu0 %1183 }
 0xbcb   : > { %v1190_v21 = vpop.permute.xlu1 %1189 }
 0xbcc   : > { %3955 = vpush %v1190_v21 }
 0xbfd   : > { %s3956_s8 = spop %3955 }
 0xbfe   : > { %v1192_v30 = vstv %s3956_s8 }
 0xbff   : > { %v1194_v25 = vmul.f32 %v1192_v30, %v5134_v47  ;;  %v1195_v26 = vmul.f32 %v1192_v30, %v5137_v7 }
 0xc01   : > { %1200 = vrot.lane.b32.xlu1 %v1195_v26, %s6709_s11  ;;  %1198 = vrot.lane.b32.xlu0 %v1194_v25, %s6709_s11 }
 0xc05   : > { %1217 = vrot.lane.b32.xlu1 %v5023_v29, %s6700_s29  ;;  %1208 = vrot.lane.b32.xlu0 %v5023_v29, %s6701_s28 }
 0xc73   : > { %v5159_v22 = vpop.permute.xlu1 %1200  ;;  %v5161_v23 = vpop.permute.xlu0 %1198 }
 0xc77   : > { %v1218_v59 = vpop.permute.xlu1 %1217  ;;  %v1209_v60 = vpop.permute.xlu0 %1208 }
 0xc78   : > { %3957 = vpush %v1209_v60 }
 0xc79   : > { %3959 = vpush %v1218_v59 }
 0xca9   : > { %s5169_s8 = spop %3957 }
 0xcaa   : > { %s3960_s2 = spop %3959 }
 0xcab   : > { %v1220_v35 = vstv %s3960_s2 }
 0xcac   : > { %v1222_v36 = vmul.f32 %v5164_v38, %v1220_v35  ;;  %v1223_v2 = vmul.f32 %v5167_v33, %v1220_v35  ;;  %v5254_v35 = vld [vmem:[%s4668_s5 + $0x30] sm:$0xff] }
 0xcae   : > { %1228 = vrot.lane.b32.xlu1 %v1223_v2, %s6708_s21  ;;  %1226 = vrot.lane.b32.xlu0 %v1222_v36, %s6708_s21  ;;  %v5257_v36 = vld [vmem:[%s4668_s5 + $0x38] sm:$0xff] }
 0xcb2   : > { %1234 = vrot.lane.b32.xlu0 %v5023_v29, %s6702_s23 }
 0xd20   : > { %v5177_v41 = vpop.permute.xlu0 %1226  ;;  %v5187_v4 = vpop.permute.xlu1 %1228 }
 0xd24   : > { %v1235_v42 = vpop.permute.xlu0 %1234 }
 0xd25   : > { %3961 = vpush %v1235_v42 }
 0xd56   : > { %s3962_s28 = spop %3961 }
 0xd57   : > { %v1237_v3 = vstv %s3962_s28 }
 0xd58   : > { %v1239_v63 = vmul.f32 %v5164_v38, %v1237_v3  ;;  %v1240_v50 = vmul.f32 %v5167_v33, %v1237_v3 }
 0xd5a   : > { %1245 = vrot.lane.b32.xlu0 %v1240_v50, %s6709_s11  ;;  %1243 = vrot.lane.b32.xlu1 %v1239_v63, %s6709_s11 }
 0xd5e   : > { %1262 = vrot.lane.b32.xlu0 %v5023_v29, %s6711_s3  ;;  %1253 = vrot.lane.b32.xlu1 %v5023_v29, %s6710_s15 }
 0xdcc   : > { %v5189_v45 = vpop.permute.xlu0 %1245  ;;  %v5191_v5 = vpop.permute.xlu1 %1243 }
 0xdd0   : > { %v1263_v46 = vpop.permute.xlu0 %1262  ;;  %v1254_v11 = vpop.permute.xlu1 %1253 }
 0xdd1   : > { %3963 = vpush %v1254_v11 }
 0xdd2   : > { %3965 = vpush %v1263_v46 }
 0xe02   : > { %s5199_s28 = spop %3963 }
 0xe03   : > { %s3966_s2 = spop %3965 }
 0xe04   : > { %v1265_v61 = vstv %s3966_s2 }
 0xe05   : > { %v1267_v15 = vmul.f32 %v5194_v0, %v1265_v61  ;;  %v1268_v16 = vmul.f32 %v5197_v13, %v1265_v61 }
 0xe07   : > { %1273 = vrot.lane.b32.xlu0 %v1268_v16, %s6708_s21  ;;  %1271 = vrot.lane.b32.xlu1 %v1267_v15, %s6708_s21 }
 0xe0b   : > { %1279 = vrot.lane.b32.xlu1 %v5023_v29, %s6713_s24 }
 0xe79   : > { %v5207_v19 = vpop.permute.xlu1 %1271  ;;  %v5217_v39 = vpop.permute.xlu0 %1273 }
 0xe7d   : > { %v1280_v24 = vpop.permute.xlu1 %1279 }
 0xe7e   : > { %3967 = vpush %v1280_v24 }
 0xeaf   : > { %s3968_s15 = spop %3967 }
 0xeb0   : > { %v1282_v27 = vstv %s3968_s15 }
 0xeb1   : > { %v1284_v28 = vmul.f32 %v5194_v0, %v1282_v27  ;;  %v1285_v31 = vmul.f32 %v5197_v13, %v1282_v27 }
 0xeb3   : > { %1290 = vrot.lane.b32.xlu1 %v1285_v31, %s6709_s11  ;;  %1288 = vrot.lane.b32.xlu0 %v1284_v28, %s6709_s11  ;;  %v5284_v31 = vld [vmem:[%s4668_s5 + $0x31] sm:$0xff] }
 0xeb7   : > { %1307 = vrot.lane.b32.xlu1 %v5023_v29, %s6714_s6  ;;  %1298 = vrot.lane.b32.xlu0 %v5023_v29, %s6715_s1 }
 0xf25   : > { %v5219_v37 = vpop.permute.xlu1 %1290  ;;  %v5221_v51 = vpop.permute.xlu0 %1288 }
 0xf29   : > { %v1308_v52 = vpop.permute.xlu1 %1307  ;;  %v1299_v9 = vpop.permute.xlu0 %1298 }
 0xf2a   : > { %3969 = vpush %v1299_v9 }
 0xf2b   : > { %3971 = vpush %v1308_v52  ;;  %v5287_v52 = vld [vmem:[%s4668_s5 + $0x39] sm:$0xff] }
 0xf5b   : > { %s5229_s15 = spop %3969 }
 0xf5c   : > { %s3972_s2 = spop %3971 }
 0xf5d   : > { %v1310_v57 = vstv %s3972_s2 }
 0xf5e   : > { %v1312_v58 = vmul.f32 %v5224_v55, %v1310_v57  ;;  %v1313_v17 = vmul.f32 %v5227_v56, %v1310_v57 }
 0xf60   : > { %1318 = vrot.lane.b32.xlu1 %v1313_v17, %s6708_s21  ;;  %1316 = vrot.lane.b32.xlu0 %v1312_v58, %s6708_s21 }
 0xf64   : > { %1324 = vrot.lane.b32.xlu0 %v5023_v29, %s6716_s14 }
 0xfd2   : > { %v5237_v18 = vpop.permute.xlu0 %1316  ;;  %v5247_v30 = vpop.permute.xlu1 %1318 }
 0xfd6   : > { %v1325_v48 = vpop.permute.xlu0 %1324 }
 0xfd7   : > { %3973 = vpush %v1325_v48 }
0x1008   : > { %s3974_s1 = spop %3973 }
0x1009   : > { %v1327_v8 = vstv %s3974_s1 }
0x100a   : > { %v1329_v49 = vmul.f32 %v5224_v55, %v1327_v8  ;;  %v1330_v21 = vmul.f32 %v5227_v56, %v1327_v8 }
0x100c   : > { %1335 = vrot.lane.b32.xlu0 %v1330_v21, %s6709_s11  ;;  %1333 = vrot.lane.b32.xlu1 %v1329_v49, %s6709_s11 }
0x1010   : > { %1352 = vrot.lane.b32.xlu0 %v5023_v29, %s6717_s19  ;;  %1343 = vrot.lane.b32.xlu1 %v5023_v29, %s6718_s26 }
0x107e   : > { %v5249_v25 = vpop.permute.xlu0 %1335  ;;  %v5251_v26 = vpop.permute.xlu1 %1333 }
0x1082   : > { %v1353_v59 = vpop.permute.xlu0 %1352  ;;  %v1344_v60 = vpop.permute.xlu1 %1343 }
0x1083   : > { %3975 = vpush %v1344_v60 }
0x1084   : > { %3977 = vpush %v1353_v59 }
0x10b4   : > { %s5259_s1 = spop %3975 }
0x10b5   : > { %s3978_s2 = spop %3977 }
0x10b6   : > { %v1355_v2 = vstv %s3978_s2  ;;  %s6729_s2 = smov 107  }
0x10b7   : > { %v1357_v42 = vmul.f32 %v5254_v35, %v1355_v2  ;;  %v1358_v3 = vmul.f32 %v5257_v36, %v1355_v2 }
0x10b9   : > { %1363 = vrot.lane.b32.xlu0 %v1358_v3, %s6708_s21  ;;  %1361 = vrot.lane.b32.xlu1 %v1357_v42, %s6708_s21 }
0x10bd   : > { %1369 = vrot.lane.b32.xlu1 %v5023_v29, %s6719_s20 }
0x112b   : > { %v5267_v63 = vpop.permute.xlu1 %1361  ;;  %v5277_v15 = vpop.permute.xlu0 %1363 }
0x112f   : > { %v1370_v50 = vpop.permute.xlu1 %1369 }
0x1130   : > { %3979 = vpush %v1370_v50  ;;  %v5314_v50 = vld [vmem:[%s4668_s5 + $0x32] sm:$0xff] }
0x1161   : > { %s3980_s26 = spop %3979 }
0x1162   : > { %v1372_v46 = vstv %s3980_s26 }
0x1163   : > { %v1374_v11 = vmul.f32 %v5254_v35, %v1372_v46  ;;  %v1375_v61 = vmul.f32 %v5257_v36, %v1372_v46  ;;  %v5317_v46 = vld [vmem:[%s4668_s5 + $0x3a] sm:$0xff] }
0x1165   : > { %1380 = vrot.lane.b32.xlu1 %v1375_v61, %s6709_s11  ;;  %1378 = vrot.lane.b32.xlu0 %v1374_v11, %s6709_s11 }
0x1169   : > { %1397 = vrot.lane.b32.xlu1 %v5023_v29, %s6720_s27  ;;  %1388 = vrot.lane.b32.xlu0 %v5023_v29, %s6729_s2  ;;  %s6730_s2 = smov 105  }
0x11d7   : > { %v5279_v16 = vpop.permute.xlu1 %1380  ;;  %v5281_v24 = vpop.permute.xlu0 %1378 }
0x11db   : > { %v1398_v27 = vpop.permute.xlu1 %1397  ;;  %v1389_v28 = vpop.permute.xlu0 %1388 }
0x11dc   : > { %3981 = vpush %v1389_v28 }
0x11dd   : > { %3983 = vpush %v1398_v27 }
0x120d   : > { %s5289_s26 = spop %3981 }
0x120e   : > { %s3984_s27 = spop %3983 }
0x120f   : > { %v1400_v9 = vstv %s3984_s27  ;;  %s6731_s27 = smov 104  }
0x1210   : > { %v1402_v57 = vmul.f32 %v5284_v31, %v1400_v9  ;;  %v1403_v58 = vmul.f32 %v5287_v52, %v1400_v9  ;;  %v1476_v9 = vld [vmem:[%s4663_s18 + $0x2] sm:$0x1] }
0x1212   : > { %1408 = vrot.lane.b32.xlu1 %v1403_v58, %s6708_s21  ;;  %1406 = vrot.lane.b32.xlu0 %v1402_v57, %s6708_s21  ;;  %v5331_v58 = vld [vmem:[%s4601_s10 + $0x3] sm:$0x1] }
0x1213   : > { %6732 = vst [vmem:[#allocation22_spill] sm:$0xff] %v5331_v58 }
0x1216   : > { %1414 = vrot.lane.b32.xlu0 %v5023_v29, %s6730_s2 }
0x1284   : > { %v5297_v17 = vpop.permute.xlu0 %1406  ;;  %v5307_v59 = vpop.permute.xlu1 %1408 }
0x1288   : > { %v1415_v48 = vpop.permute.xlu0 %1414 }
0x1289   : > { %3985 = vpush %v1415_v48 }
0x12ba   : > { %s3986_s20 = spop %3985 }
0x12bb   : > { %v1417_v8 = vstv %s3986_s20 }
0x12bc   : > { %v1419_v49 = vmul.f32 %v5284_v31, %v1417_v8  ;;  %v1420_v21 = vmul.f32 %v5287_v52, %v1417_v8 }
0x12be   : > { %1425 = vrot.lane.b32.xlu0 %v1420_v21, %s6709_s11  ;;  %1423 = vrot.lane.b32.xlu1 %v1419_v49, %s6709_s11  ;;  %v1121_v21 = vstv %s5109_s12 }
0x12c2   : > { %1442 = vrot.lane.b32.xlu0 %v5023_v29, %s6723_s25  ;;  %1433 = vrot.lane.b32.xlu1 %v5023_v29, %s6731_s27 }
0x1330   : > { %v5309_v60 = vpop.permute.xlu0 %1425  ;;  %v5311_v2 = vpop.permute.xlu1 %1423 }
0x1334   : > { %v1443_v42 = vpop.permute.xlu0 %1442  ;;  %v1434_v3 = vpop.permute.xlu1 %1433 }
0x1335   : > { %3987 = vpush %v1434_v3 }
0x1336   : > { %3989 = vpush %v1443_v42 }
0x1366   : > { %s5319_s20 = spop %3987 }
0x1367   : > { %s3990_s25 = spop %3989 }
0x1368   : > { %v1445_v11 = vstv %s3990_s25 }
0x1369   : > { %v1447_v61 = vmul.f32 %v5314_v50, %v1445_v11  ;;  %v1448_v27 = vmul.f32 %v5317_v46, %v1445_v11 }
0x136b   : > { %1453 = vrot.lane.b32.xlu0 %v1448_v27, %s6708_s21  ;;  %1451 = vrot.lane.b32.xlu1 %v1447_v61, %s6708_s21  ;;  %v1123_v27 = vmul.f32 %v1121_v21, %v5104_v40 }
0x136f   : > { %1459 = vrot.lane.b32.xlu1 %v5023_v29, %s6725_s17  ;;  %v1076_v29 = vstv %s5073_s0 }
0x1370   : > { %v1078_v42 = vmul.f32 %v1076_v29, %v5076_v14  ;;  %v1079_v3 = vmul.f32 %v1076_v29, %v5079_v12 }
0x1372   : > { %v1098_v11 = vadd.f32 %v5097_v32, %v1079_v3  ;;  %v1097_v61 = vadd.f32 %v5087_v20, %v1078_v42  ;;  %v1211_v3 = vstv %s5169_s8 }
0x13dd   : > { %v5327_v28 = vpop.permute.xlu1 %1451 }
0x13e1   : > { %v1460_v57 = vpop.permute.xlu1 %1459 }
0x13e2   : > { %3991 = vpush %v1460_v57  ;;  %v1115_v57 = vadd.f32 %v5099_v1, %v1098_v11 }
0x13e3   : > { %3993 = vpush %v1476_v9  ;;  %v1124_v9 = vmul.f32 %v1121_v21, %v5107_v43 }
0x13e4   : > { %3995 = vpush %v5331_v58 }
0x1413   : > { %s3992_s25 = spop %3991 }
0x1414   : > { %v1462_v48 = vstv %s3992_s25  ;;  %s3994_s0 = spop %3993 }
0x1415   : > { %v1464_v8 = vmul.f32 %v5314_v50, %v1462_v48  ;;  %v1465_v49 = vmul.f32 %v5317_v46, %v1462_v48  ;;  %v1114_v48 = vadd.f32 %v5101_v34, %v1097_v61  ;;  %s5404_s12 = spop %3995 }
0x1417   : > { %1470 = vrot.lane.b32.xlu1 %v1465_v49, %s6709_s11  ;;  %1468 = vrot.lane.b32.xlu0 %v1464_v8, %s6709_s11  ;;  %v1166_v8 = vstv %s5139_s22  ;;  %v1126_v49 = vadd.f32 %v1124_v9, %v1115_v57  ;;  %v1256_v9 = vstv %s5199_s28 }
0x1418   : > { %v1168_v32 = vmul.f32 %v1166_v8, %v5134_v47  ;;  %v1169_v20 = vmul.f32 %v1166_v8, %v5137_v7 }
0x1419   : > { %v1143_v14 = vadd.f32 %v5127_v44, %v1126_v49  ;;  %v1213_v44 = vmul.f32 %v5164_v38, %v1211_v3  ;;  %v1301_v49 = vstv %s5229_s15 }
0x141b   : > { %1499 = vrot.lane.b32.xlu0 %v5331_v58, %s6708_s21  ;;  %v1125_v58 = vadd.f32 %v1123_v27, %v1114_v48  ;;  %v1160_v42 = vadd.f32 %v5129_v6, %v1143_v14 }
0x141d   : > { %v1142_v29 = vadd.f32 %v5117_v10, %v1125_v58  ;;  %v1171_v1 = vadd.f32 %v1169_v20, %v1160_v42  ;;  %v1214_v10 = vmul.f32 %v5167_v33, %v1211_v3 }
0x141f   : > { %v1159_v21 = vadd.f32 %v5131_v62, %v1142_v29  ;;  %v1188_v34 = vadd.f32 %v5157_v54, %v1171_v1  ;;  %v1258_v54 = vmul.f32 %v5194_v0, %v1256_v9 }
0x1421   : > { %v1170_v11 = vadd.f32 %v1168_v32, %v1159_v21  ;;  %v1205_v58 = vadd.f32 %v5159_v22, %v1188_v34  ;;  %v1346_v21 = vstv %s5259_s1 }
0x1423   : > { %v1187_v61 = vadd.f32 %v5147_v53, %v1170_v11  ;;  %v1216_v14 = vadd.f32 %v1214_v10, %v1205_v58  ;;  %v1259_v53 = vmul.f32 %v5197_v13, %v1256_v9  ;;  %v1436_v9 = vstv %s5319_s20 }
0x1425   : > { %v1204_v27 = vadd.f32 %v5161_v23, %v1187_v61  ;;  %v1233_v62 = vadd.f32 %v5187_v4, %v1216_v14  ;;  %v1303_v4 = vmul.f32 %v5224_v55, %v1301_v49  ;;  %v1391_v61 = vstv %s5289_s26  ;;  %s6735_s26 = smov 122  }
0x1426   : > { %v1393_v58 = vmul.f32 %v5284_v31, %v1391_v61 }
0x1427   : > { %v1215_v6 = vadd.f32 %v1213_v44, %v1204_v27  ;;  %v1250_v48 = vadd.f32 %v5189_v45, %v1233_v62  ;;  %v1438_v62 = vmul.f32 %v5314_v50, %v1436_v9 }
0x1429   : > { %v1232_v57 = vadd.f32 %v5177_v41, %v1215_v6  ;;  %v1261_v22 = vadd.f32 %v1259_v53, %v1250_v48  ;;  %v1304_v41 = vmul.f32 %v5227_v56, %v1301_v49 }
0x142b   : > { %v1249_v8 = vadd.f32 %v5191_v5, %v1232_v57  ;;  %v1278_v23 = vadd.f32 %v5217_v39, %v1261_v22  ;;  %v1348_v39 = vmul.f32 %v5254_v35, %v1346_v21 }
0x142d   : > { %v1260_v29 = vadd.f32 %v1258_v54, %v1249_v8  ;;  %v1295_v20 = vadd.f32 %v5219_v37, %v1278_v23  ;;  %v1454_v54 = vpop.permute.xlu0 %1453 }
0x142f   : > { %v1277_v32 = vadd.f32 %v5207_v19, %v1260_v29  ;;  %v1306_v45 = vadd.f32 %v1304_v41, %v1295_v20  ;;  %v1349_v19 = vmul.f32 %v5257_v36, %v1346_v21 }
0x1431   : > { %v1294_v42 = vadd.f32 %v5221_v51, %v1277_v32  ;;  %v1323_v5 = vadd.f32 %v5247_v30, %v1306_v45  ;;  %v1394_v30 = vmul.f32 %v5287_v52, %v1391_v61 }
0x1433   : > { %v1305_v3 = vadd.f32 %v1303_v4, %v1294_v42  ;;  %v1340_v11 = vadd.f32 %v5249_v25, %v1323_v5  ;;  %v6734_v42 = vld [vmem:[#allocation22_spill] sm:$0xff] }
0x1435   : > { %v1322_v1 = vadd.f32 %v5237_v18, %v1305_v3  ;;  %v1351_v37 = vadd.f32 %v1349_v19, %v1340_v11 }
0x1437   : > { %v1339_v34 = vadd.f32 %v5251_v26, %v1322_v1  ;;  %v1368_v51 = vadd.f32 %v5277_v15, %v1351_v37  ;;  %v1439_v15 = vmul.f32 %v5317_v46, %v1436_v9 }
0x1439   : > { %v1350_v44 = vadd.f32 %v1348_v39, %v1339_v34  ;;  %v1385_v18 = vadd.f32 %v5279_v16, %v1368_v51 }
0x143b   : > { %v1367_v10 = vadd.f32 %v5267_v63, %v1350_v44  ;;  %v1396_v14 = vadd.f32 %v1394_v30, %v1385_v18 }
0x143d   : > { %v1384_v27 = vadd.f32 %v5281_v24, %v1367_v10  ;;  %v1413_v26 = vadd.f32 %v5307_v59, %v1396_v14 }
0x143f   : > { %v1395_v25 = vadd.f32 %v1393_v58, %v1384_v27  ;;  %v1430_v63 = vadd.f32 %v5309_v60, %v1413_v26 }
0x1441   : > { %v1412_v6 = vadd.f32 %v5297_v17, %v1395_v25  ;;  %v1441_v53 = vadd.f32 %v1439_v15, %v1430_v63  ;;  %v1479_v17 = vstv %s3994_s0 }
0x1443   : > { %v1429_v57 = vadd.f32 %v5311_v2, %v1412_v6  ;;  %v1458_v24 = vadd.f32 %v1454_v54, %v1441_v53 }
0x1445   : > { %v1440_v16 = vadd.f32 %v1438_v62, %v1429_v57 }
0x1447   : > { %v1457_v48 = vadd.f32 %v5327_v28, %v1440_v16  ;;  %v6733_v28 = vld [vmem:[#allocation21_spill] sm:$0xff] }
0x1489   : > { %v1471_v59 = vpop.permute.xlu1 %1470  ;;  %v1469_v8 = vpop.permute.xlu0 %1468 }
0x148a   : > { %v1475_v49 = vadd.f32 %v1471_v59, %v1458_v24  ;;  %v1474_v22 = vadd.f32 %v1469_v8, %v1457_v48 }
0x148c   : > { %v1481_v29 = vadd.f32 %v1479_v17, %v1474_v22  ;;  %v1482_v23 = vadd.f32 %v1479_v17, %v1475_v49 }
0x148d   : > { %v1500_v32 = vpop.permute.xlu0 %1499 }
0x148e   : > { %v1483_v60 = vmax.f32 %v1481_v29, 0.0  ;;  %v1484_v4 = vmax.f32 %v1482_v23, 0.0  ;;  %3997 = vpush %v1500_v32 }
0x1490   : > { %3746 = vst.msk [vmem:[%s4897_s9 + $0x20] sm:$0xff] %vm651_vm0, %v1483_v60  ;;  %3747 = vst.msk [vmem:[%s4897_s9 + $0x28] sm:$0xff] %vm651_vm0, %v1484_v4 }
0x14bf   : > { %s3998_s22 = spop %3997 }
0x14c0   : > { %v1502_v2 = vstv %s3998_s22  ;;  %s6736_s22 = smov 119  }
0x14c1   : > { %v1504_v41 = vmul.f32 %v1502_v2, %v6733_v28  ;;  %v1505_v20 = vmul.f32 %v1502_v2, %v5079_v12 }
0x14c3   : > { %1510 = vrot.lane.b32.xlu0 %v1505_v20, %s6708_s21  ;;  %1508 = vrot.lane.b32.xlu1 %v1504_v41, %s6708_s21 }
0x14c7   : > { %1516 = vrot.lane.b32.xlu1 %v6734_v42, %s6709_s11 }
0x1535   : > { %v5412_v21 = vpop.permute.xlu1 %1508  ;;  %v5422_v39 = vpop.permute.xlu0 %1510 }
0x1539   : > { %v1517_v45 = vpop.permute.xlu1 %1516 }
0x153a   : > { %3999 = vpush %v1517_v45 }
0x156b   : > { %s4000_s8 = spop %3999 }
0x156c   : > { %v1519_v3 = vstv %s4000_s8 }
0x156d   : > { %v1521_v5 = vmul.f32 %v1519_v3, %v6733_v28  ;;  %v1522_v1 = vmul.f32 %v1519_v3, %v5079_v12 }
0x156f   : > { %1527 = vrot.lane.b32.xlu1 %v1522_v1, %s6709_s11  ;;  %1525 = vrot.lane.b32.xlu0 %v1521_v5, %s6709_s11 }
0x1573   : > { %1544 = vrot.lane.b32.xlu1 %v6734_v42, %s6727_s16  ;;  %1535 = vrot.lane.b32.xlu0 %v6734_v42, %s6728_s13 }
0x15e1   : > { %v5424_v19 = vpop.permute.xlu1 %1527  ;;  %v5426_v11 = vpop.permute.xlu0 %1525 }
0x15e5   : > { %v1545_v34 = vpop.permute.xlu1 %1544  ;;  %v1536_v61 = vpop.permute.xlu0 %1535 }
0x15e6   : > { %4001 = vpush %v1536_v61 }
0x15e7   : > { %4003 = vpush %v1545_v34 }
0x1617   : > { %s5428_s28 = spop %4001 }
0x1618   : > { %s4004_s15 = spop %4003 }
0x1619   : > { %v1547_v37 = vstv %s4004_s15 }
0x161a   : > { %v1549_v44 = vmul.f32 %v1547_v37, %v5104_v40  ;;  %v1550_v51 = vmul.f32 %v1547_v37, %v5107_v43 }
0x161c   : > { %1555 = vrot.lane.b32.xlu1 %v1550_v51, %s6708_s21  ;;  %1553 = vrot.lane.b32.xlu0 %v1549_v44, %s6708_s21 }
0x1620   : > { %1561 = vrot.lane.b32.xlu0 %v6734_v42, %s6696_s4 }
0x168e   : > { %v5436_v10 = vpop.permute.xlu0 %1553  ;;  %v5446_v9 = vpop.permute.xlu1 %1555 }
0x1692   : > { %v1562_v58 = vpop.permute.xlu0 %1561 }
0x1693   : > { %4005 = vpush %v1562_v58 }
0x16c4   : > { %s4006_s1 = spop %4005 }
0x16c5   : > { %v1564_v30 = vstv %s4006_s1 }
0x16c6   : > { %v1566_v18 = vmul.f32 %v1564_v30, %v5104_v40  ;;  %v1567_v27 = vmul.f32 %v1564_v30, %v5107_v43 }
0x16c8   : > { %1572 = vrot.lane.b32.xlu0 %v1567_v27, %s6709_s11  ;;  %1570 = vrot.lane.b32.xlu1 %v1566_v18, %s6709_s11 }
0x16cc   : > { %1589 = vrot.lane.b32.xlu0 %v6734_v42, %s6698_s7  ;;  %1580 = vrot.lane.b32.xlu1 %v6734_v42, %s6735_s26 }
0x173a   : > { %v5448_v14 = vpop.permute.xlu0 %1572  ;;  %v5450_v25 = vpop.permute.xlu1 %1570 }
0x173e   : > { %v1590_v26 = vpop.permute.xlu0 %1589  ;;  %v1581_v6 = vpop.permute.xlu1 %1580 }
0x173f   : > { %4007 = vpush %v1581_v6 }
0x1740   : > { %4009 = vpush %v1590_v26 }
0x1770   : > { %s5452_s20 = spop %4007 }
0x1771   : > { %s4010_s25 = spop %4009 }
0x1772   : > { %v1592_v62 = vstv %s4010_s25  ;;  %s6737_s25 = smov 116  }
0x1773   : > { %v1594_v15 = vmul.f32 %v1592_v62, %v5134_v47  ;;  %v1595_v63 = vmul.f32 %v1592_v62, %v5137_v7 }
0x1775   : > { %1600 = vrot.lane.b32.xlu0 %v1595_v63, %s6708_s21  ;;  %1598 = vrot.lane.b32.xlu1 %v1594_v15, %s6708_s21  ;;  %v1493_v63 = vstv %s5404_s12 }
0x1779   : > { %1606 = vrot.lane.b32.xlu1 %v6734_v42, %s6699_s30 }
0x17e7   : > { %v5460_v57 = vpop.permute.xlu1 %1598  ;;  %v5470_v48 = vpop.permute.xlu0 %1600 }
0x17eb   : > { %v1607_v54 = vpop.permute.xlu1 %1606 }
0x17ec   : > { %4011 = vpush %v1607_v54  ;;  %v1538_v54 = vstv %s5428_s28 }
0x181d   : > { %s4012_s0 = spop %4011 }
0x181e   : > { %v1609_v53 = vstv %s4012_s0 }
0x181f   : > { %v1611_v16 = vmul.f32 %v1609_v53, %v5134_v47  ;;  %v1612_v24 = vmul.f32 %v1609_v53, %v5137_v7  ;;  %v1496_v53 = vmul.f32 %v1493_v63, %v5079_v12 }
0x1821   : > { %1617 = vrot.lane.b32.xlu1 %v1612_v24, %s6709_s11  ;;  %1615 = vrot.lane.b32.xlu0 %v1611_v16, %s6709_s11  ;;  %v1495_v16 = vmul.f32 %v1493_v63, %v6733_v28  ;;  %v1515_v24 = vadd.f32 %v5422_v39, %v1496_v53 }
0x1825   : > { %1634 = vrot.lane.b32.xlu1 %v6734_v42, %s6700_s29  ;;  %1625 = vrot.lane.b32.xlu0 %v6734_v42, %s6736_s22 }
0x1893   : > { %v5472_v59 = vpop.permute.xlu1 %1617  ;;  %v5474_v8 = vpop.permute.xlu0 %1615 }
0x1897   : > { %v1635_v17 = vpop.permute.xlu1 %1634  ;;  %v1626_v49 = vpop.permute.xlu0 %1625 }
0x1898   : > { %4013 = vpush %v1626_v49  ;;  %v1514_v49 = vadd.f32 %v5412_v21, %v1495_v16 }
0x1899   : > { %4015 = vpush %v1635_v17  ;;  %v1541_v17 = vmul.f32 %v1538_v54, %v5107_v43 }
0x18c9   : > { %s5476_s8 = spop %4013 }
0x18ca   : > { %s4016_s15 = spop %4015 }
0x18cb   : > { %v1637_v22 = vstv %s4016_s15 }
0x18cc   : > { %v1639_v29 = vmul.f32 %v5164_v38, %v1637_v22  ;;  %v1640_v23 = vmul.f32 %v5167_v33, %v1637_v22  ;;  %v1540_v22 = vmul.f32 %v1538_v54, %v5104_v40 }
0x18ce   : > { %1645 = vrot.lane.b32.xlu1 %v1640_v23, %s6708_s21  ;;  %1643 = vrot.lane.b32.xlu0 %v1639_v29, %s6708_s21  ;;  %v1532_v29 = vadd.f32 %v5424_v19, %v1515_v24  ;;  %v1531_v23 = vadd.f32 %v5426_v11, %v1514_v49 }
0x18d2   : > { %1651 = vrot.lane.b32.xlu0 %v6734_v42, %s6702_s23 }
0x1940   : > { %v5484_v32 = vpop.permute.xlu0 %1643  ;;  %v5494_v20 = vpop.permute.xlu1 %1645 }
0x1944   : > { %v1652_v60 = vpop.permute.xlu0 %1651 }
0x1945   : > { %4017 = vpush %v1652_v60  ;;  %v1583_v60 = vstv %s5452_s20 }
0x1946   : > { %v1586_v28 = vmul.f32 %v1583_v60, %v5137_v7  ;;  %v1585_v43 = vmul.f32 %v1583_v60, %v5134_v47 }
0x1976   : > { %s4018_s1 = spop %4017 }
0x1977   : > { %v1654_v4 = vstv %s4018_s1 }
0x1978   : > { %v1656_v2 = vmul.f32 %v5164_v38, %v1654_v4  ;;  %v1657_v41 = vmul.f32 %v5167_v33, %v1654_v4  ;;  %v1543_v4 = vadd.f32 %v1541_v17, %v1532_v29 }
0x197a   : > { %1662 = vrot.lane.b32.xlu0 %v1657_v41, %s6709_s11  ;;  %1660 = vrot.lane.b32.xlu1 %v1656_v2, %s6709_s11  ;;  %v1542_v2 = vadd.f32 %v1540_v22, %v1531_v23  ;;  %v1560_v12 = vadd.f32 %v5446_v9, %v1543_v4  ;;  %v1628_v41 = vstv %s5476_s8  ;;  %s6739_s8 = smov 110  }
0x197b   : > { %v1630_v9 = vmul.f32 %v5164_v38, %v1628_v41 }
0x197c   : > { %v1559_v39 = vadd.f32 %v5436_v10, %v1542_v2  ;;  %v1577_v21 = vadd.f32 %v5448_v14, %v1560_v12 }
0x197e   : > { %1679 = vrot.lane.b32.xlu0 %v6734_v42, %s6711_s3  ;;  %1670 = vrot.lane.b32.xlu1 %v6734_v42, %s6737_s25  ;;  %v1576_v40 = vadd.f32 %v5450_v25, %v1559_v39  ;;  %v1588_v19 = vadd.f32 %v1586_v28, %v1577_v21 }
0x1980   : > { %v1605_v11 = vadd.f32 %v5470_v48, %v1588_v19 }
0x1982   : > { %v1622_v7 = vadd.f32 %v5472_v59, %v1605_v11 }
0x19ec   : > { %v5496_v45 = vpop.permute.xlu0 %1662  ;;  %v5498_v3 = vpop.permute.xlu1 %1660 }
0x19f0   : > { %v1680_v5 = vpop.permute.xlu0 %1679  ;;  %v1671_v1 = vpop.permute.xlu1 %1670 }
0x19f1   : > { %4019 = vpush %v1671_v1  ;;  %v1631_v1 = vmul.f32 %v5167_v33, %v1628_v41 }
0x19f2   : > { %4021 = vpush %v1680_v5  ;;  %v1587_v5 = vadd.f32 %v1585_v43, %v1576_v40 }
0x1a22   : > { %s5500_s0 = spop %4019 }
0x1a23   : > { %s4022_s15 = spop %4021  ;;  %v1673_v47 = vstv %s5500_s0 }
0x1a24   : > { %v1682_v34 = vstv %s4022_s15  ;;  %s6738_s15 = smov 113   ;;  %v1675_v48 = vmul.f32 %v5194_v0, %v1673_v47 }
0x1a25   : > { %v1684_v61 = vmul.f32 %v5194_v0, %v1682_v34  ;;  %v1685_v37 = vmul.f32 %v5197_v13, %v1682_v34  ;;  %v1604_v34 = vadd.f32 %v5460_v57, %v1587_v5 }
0x1a27   : > { %1690 = vrot.lane.b32.xlu0 %v1685_v37, %s6708_s21  ;;  %1688 = vrot.lane.b32.xlu1 %v1684_v61, %s6708_s21  ;;  %v1621_v10 = vadd.f32 %v5474_v8, %v1604_v34  ;;  %v1633_v61 = vadd.f32 %v1631_v1, %v1622_v7  ;;  %v1676_v37 = vmul.f32 %v5197_v13, %v1673_v47 }
0x1a29   : > { %v1632_v14 = vadd.f32 %v1630_v9, %v1621_v10  ;;  %v1650_v25 = vadd.f32 %v5494_v20, %v1633_v61 }
0x1a2b   : > { %1696 = vrot.lane.b32.xlu1 %v6734_v42, %s6713_s24  ;;  %v1667_v33 = vadd.f32 %v5496_v45, %v1650_v25 }
0x1a2d   : > { %v1678_v38 = vadd.f32 %v1676_v37, %v1667_v33 }
0x1a99   : > { %v1689_v44 = vpop.permute.xlu1 %1688  ;;  %v1691_v27 = vpop.permute.xlu0 %1690 }
0x1a9a   : > { %v1695_v59 = vadd.f32 %v1691_v27, %v1678_v38 }
0x1a9d   : > { %v1697_v51 = vpop.permute.xlu1 %1696 }
0x1a9e   : > { %4023 = vpush %v1697_v51  ;;  %v1649_v51 = vadd.f32 %v5484_v32, %v1632_v14 }
0x1aa0   : > { %v1666_v57 = vadd.f32 %v5498_v3, %v1649_v51 }
0x1acf   : > { %s4024_s1 = spop %4023 }
0x1ad0   : > { %v1699_v58 = vstv %s4024_s1 }
0x1ad1   : > { %v1701_v30 = vmul.f32 %v5194_v0, %v1699_v58  ;;  %v1702_v18 = vmul.f32 %v5197_v13, %v1699_v58  ;;  %v1677_v58 = vadd.f32 %v1675_v48, %v1666_v57 }
0x1ad3   : > { %1707 = vrot.lane.b32.xlu1 %v1702_v18, %s6709_s11  ;;  %1705 = vrot.lane.b32.xlu0 %v1701_v30, %s6709_s11  ;;  %v1694_v30 = vadd.f32 %v1689_v44, %v1677_v58 }
0x1ad7   : > { %1724 = vrot.lane.b32.xlu1 %v6734_v42, %s6714_s6  ;;  %1715 = vrot.lane.b32.xlu0 %v6734_v42, %s6738_s15 }
0x1b45   : > { %v1708_v26 = vpop.permute.xlu1 %1707  ;;  %v1706_v6 = vpop.permute.xlu0 %1705 }
0x1b46   : > { %v1712_v8 = vadd.f32 %v1708_v26, %v1695_v59 }
0x1b49   : > { %v1725_v62 = vpop.permute.xlu1 %1724  ;;  %v1716_v15 = vpop.permute.xlu0 %1715 }
0x1b4a   : > { %4025 = vpush %v1716_v15 }
0x1b4b   : > { %4027 = vpush %v1725_v62  ;;  %v1711_v62 = vadd.f32 %v1706_v6, %v1694_v30 }
0x1b7b   : > { %s4026_s12 = spop %4025 }
0x1b7c   : > { %v1718_v18 = vstv %s4026_s12  ;;  %s4028_s28 = spop %4027  ;;  %s6740_s12 = smov 108  }
0x1b7d   : > { %v1720_v20 = vmul.f32 %v5224_v55, %v1718_v18  ;;  %v1721_v13 = vmul.f32 %v5227_v56, %v1718_v18  ;;  %v1727_v32 = vstv %s4028_s28 }
0x1b7e   : > { %v1729_v0 = vmul.f32 %v5224_v55, %v1727_v32  ;;  %v1730_v45 = vmul.f32 %v5227_v56, %v1727_v32 }
0x1b7f   : > { %v1722_v15 = vadd.f32 %v1720_v20, %v1711_v62  ;;  %v1723_v3 = vadd.f32 %v1721_v13, %v1712_v8 }
0x1b80   : > { %1735 = vrot.lane.b32.xlu1 %v1730_v45, %s6708_s21  ;;  %1733 = vrot.lane.b32.xlu0 %v1729_v0, %s6708_s21 }
0x1b84   : > { %1741 = vrot.lane.b32.xlu0 %v6734_v42, %s6716_s14 }
0x1bf2   : > { %v1734_v44 = vpop.permute.xlu0 %1733  ;;  %v1736_v54 = vpop.permute.xlu1 %1735 }
0x1bf3   : > { %v1739_v49 = vadd.f32 %v1734_v44, %v1722_v15 }
0x1bf6   : > { %v1742_v27 = vpop.permute.xlu0 %1741 }
0x1bf7   : > { %4029 = vpush %v1742_v27 }
0x1c28   : > { %s4030_s20 = spop %4029 }
0x1c29   : > { %v1744_v26 = vstv %s4030_s20  ;;  %s6741_s20 = smov 106  }
0x1c2a   : > { %v1746_v6 = vmul.f32 %v5224_v55, %v1744_v26  ;;  %v1747_v63 = vmul.f32 %v5227_v56, %v1744_v26  ;;  %v1740_v55 = vadd.f32 %v1736_v54, %v1723_v3 }
0x1c2c   : > { %1752 = vrot.lane.b32.xlu0 %v1747_v63, %s6709_s11  ;;  %1750 = vrot.lane.b32.xlu1 %v1746_v6, %s6709_s11 }
0x1c30   : > { %1769 = vrot.lane.b32.xlu0 %v6734_v42, %s6717_s19  ;;  %1760 = vrot.lane.b32.xlu1 %v6734_v42, %s6739_s8 }
0x1c9e   : > { %v1753_v53 = vpop.permute.xlu0 %1752  ;;  %v1751_v16 = vpop.permute.xlu1 %1750 }
0x1c9f   : > { %v1757_v56 = vadd.f32 %v1753_v53, %v1740_v55  ;;  %v1756_v29 = vadd.f32 %v1751_v16, %v1739_v49  ;;  %v1893_v53 = vld [vmem:[%s4663_s18 + $0x3] sm:$0x1] }
0x1ca2   : > { %v1770_v24 = vpop.permute.xlu0 %1769  ;;  %v1761_v17 = vpop.permute.xlu1 %1760 }
0x1ca3   : > { %4031 = vpush %v1761_v17 }
0x1ca4   : > { %4033 = vpush %v1770_v24  ;;  %v5605_v24 = vld [vmem:[%s4601_s10 + $0x4] sm:$0x1] }
0x1cd4   : > { %s4032_s0 = spop %4031 }
0x1cd5   : > { %v1763_v22 = vstv %s4032_s0  ;;  %s4034_s1 = spop %4033  ;;  %s6742_s0 = smov 107  }
0x1cd6   : > { %v1765_v23 = vmul.f32 %v5254_v35, %v1763_v22  ;;  %v1766_v60 = vmul.f32 %v5257_v36, %v1763_v22  ;;  %v1772_v4 = vstv %s4034_s1 }
0x1cd7   : > { %v1774_v2 = vmul.f32 %v5254_v35, %v1772_v4  ;;  %v1775_v12 = vmul.f32 %v5257_v36, %v1772_v4 }
0x1cd8   : > { %v1767_v28 = vadd.f32 %v1765_v23, %v1756_v29  ;;  %v1768_v39 = vadd.f32 %v1766_v60, %v1757_v56 }
0x1cd9   : > { %1780 = vrot.lane.b32.xlu0 %v1775_v12, %s6708_s21  ;;  %1778 = vrot.lane.b32.xlu1 %v1774_v2, %s6708_s21 }
0x1cdd   : > { %1786 = vrot.lane.b32.xlu1 %v6734_v42, %s6740_s12 }
0x1d4b   : > { %v1779_v43 = vpop.permute.xlu1 %1778  ;;  %v1781_v5 = vpop.permute.xlu0 %1780 }
0x1d4c   : > { %v1784_v7 = vadd.f32 %v1779_v43, %v1767_v28  ;;  %v5621_v43 = vld [vmem:[%s4668_s5] sm:$0xff] }
0x1d4f   : > { %v1787_v21 = vpop.permute.xlu1 %1786 }
0x1d50   : > { %4035 = vpush %v1787_v21  ;;  %v5624_v21 = vld [vmem:[%s4668_s5 + $0x8] sm:$0xff] }
0x1d81   : > { %s4036_s28 = spop %4035 }
0x1d82   : > { %v1789_v40 = vstv %s4036_s28 }
0x1d83   : > { %v1791_v41 = vmul.f32 %v5254_v35, %v1789_v40  ;;  %v1792_v19 = vmul.f32 %v5257_v36, %v1789_v40  ;;  %v1785_v35 = vadd.f32 %v1781_v5, %v1768_v39 }
0x1d85   : > { %1797 = vrot.lane.b32.xlu1 %v1792_v19, %s6709_s11  ;;  %1795 = vrot.lane.b32.xlu0 %v1791_v41, %s6709_s11 }
0x1d89   : > { %1814 = vrot.lane.b32.xlu1 %v6734_v42, %s6741_s20  ;;  %1805 = vrot.lane.b32.xlu0 %v6734_v42, %s6742_s0 }
0x1df7   : > { %v1798_v11 = vpop.permute.xlu1 %1797  ;;  %v1796_v1 = vpop.permute.xlu0 %1795 }
0x1df8   : > { %v1802_v36 = vadd.f32 %v1798_v11, %v1785_v35  ;;  %v1801_v47 = vadd.f32 %v1796_v1, %v1784_v7 }
0x1dfb   : > { %v1815_v34 = vpop.permute.xlu1 %1814  ;;  %v1806_v9 = vpop.permute.xlu0 %1805 }
0x1dfc   : > { %4037 = vpush %v1806_v9 }
0x1dfd   : > { %4039 = vpush %v1815_v34 }
0x1e2d   : > { %s4038_s1 = spop %4037 }
0x1e2e   : > { %v1808_v10 = vstv %s4038_s1  ;;  %s4040_s28 = spop %4039 }
0x1e2f   : > { %v1810_v61 = vmul.f32 %v5284_v31, %v1808_v10  ;;  %v1811_v14 = vmul.f32 %v5287_v52, %v1808_v10  ;;  %v1817_v25 = vstv %s4040_s28  ;;  %s6743_s28 = smov 103  }
0x1e30   : > { %v1819_v37 = vmul.f32 %v5284_v31, %v1817_v25  ;;  %v1820_v51 = vmul.f32 %v5287_v52, %v1817_v25 }
0x1e31   : > { %v1812_v48 = vadd.f32 %v1810_v61, %v1801_v47  ;;  %v1813_v33 = vadd.f32 %v1811_v14, %v1802_v36  ;;  %v5641_v61 = vld [vmem:[%s4668_s5 + $0x1] sm:$0xff]  ;;  %v5644_v14 = vld [vmem:[%s4668_s5 + $0x9] sm:$0xff] }
0x1e32   : > { %1825 = vrot.lane.b32.xlu1 %v1820_v51, %s6708_s21  ;;  %1823 = vrot.lane.b32.xlu0 %v1819_v37, %s6708_s21 }
0x1e36   : > { %1831 = vrot.lane.b32.xlu0 %v6734_v42, %s6730_s2 }
0x1ea4   : > { %v1824_v57 = vpop.permute.xlu0 %1823  ;;  %v1826_v8 = vpop.permute.xlu1 %1825 }
0x1ea5   : > { %v1829_v32 = vadd.f32 %v1824_v57, %v1812_v48 }
0x1ea8   : > { %v1832_v38 = vpop.permute.xlu0 %1831 }
0x1ea9   : > { %4041 = vpush %v1832_v38 }
0x1eda   : > { %s4042_s1 = spop %4041 }
0x1edb   : > { %v1834_v58 = vstv %s4042_s1 }
0x1edc   : > { %v1836_v59 = vmul.f32 %v5284_v31, %v1834_v58  ;;  %v1837_v30 = vmul.f32 %v5287_v52, %v1834_v58  ;;  %v1830_v31 = vadd.f32 %v1826_v8, %v1813_v33 }
0x1ede   : > { %1842 = vrot.lane.b32.xlu0 %v1837_v30, %s6709_s11  ;;  %1840 = vrot.lane.b32.xlu1 %v1836_v59, %s6709_s11 }
0x1ee2   : > { %1859 = vrot.lane.b32.xlu0 %v6734_v42, %s6743_s28  ;;  %1850 = vrot.lane.b32.xlu1 %v6734_v42, %s6731_s27 }
0x1f50   : > { %v1843_v18 = vpop.permute.xlu0 %1842  ;;  %v1841_v62 = vpop.permute.xlu1 %1840 }
0x1f51   : > { %v1847_v52 = vadd.f32 %v1843_v18, %v1830_v31  ;;  %v1846_v45 = vadd.f32 %v1841_v62, %v1829_v32 }
0x1f54   : > { %v1860_v20 = vpop.permute.xlu0 %1859  ;;  %v1851_v13 = vpop.permute.xlu1 %1850 }
0x1f55   : > { %4043 = vpush %v1851_v13 }
0x1f56   : > { %4045 = vpush %v1860_v20 }
0x1f86   : > { %s4044_s1 = spop %4043 }
0x1f87   : > { %v1853_v0 = vstv %s4044_s1  ;;  %s4046_s2 = spop %4045 }
0x1f88   : > { %v1855_v15 = vmul.f32 %v5314_v50, %v1853_v0  ;;  %v1856_v3 = vmul.f32 %v5317_v46, %v1853_v0  ;;  %v1862_v44 = vstv %s4046_s2 }
0x1f89   : > { %v1864_v27 = vmul.f32 %v5314_v50, %v1862_v44  ;;  %v1865_v26 = vmul.f32 %v5317_v46, %v1862_v44 }
0x1f8a   : > { %v1857_v6 = vadd.f32 %v1855_v15, %v1846_v45  ;;  %v1858_v63 = vadd.f32 %v1856_v3, %v1847_v52 }
0x1f8b   : > { %1870 = vrot.lane.b32.xlu0 %v1865_v26, %s6708_s21  ;;  %1868 = vrot.lane.b32.xlu1 %v1864_v27, %s6708_s21 }
0x1f8f   : > { %1876 = vrot.lane.b32.xlu1 %v6734_v42, %s6725_s17 }
0x1ffd   : > { %v1869_v54 = vpop.permute.xlu1 %1868  ;;  %v1871_v42 = vpop.permute.xlu0 %1870 }
0x1ffe   : > { %v1875_v56 = vadd.f32 %v1871_v42, %v1858_v63  ;;  %v1874_v22 = vadd.f32 %v1869_v54, %v1857_v6  ;;  %v5669_v63 = vld [vmem:[%s4668_s5 + $0x2] sm:$0xff]  ;;  %v5672_v54 = vld [vmem:[%s4668_s5 + $0xa] sm:$0xff] }
0x2001   : > { %v1877_v16 = vpop.permute.xlu1 %1876 }
0x2002   : > { %4047 = vpush %v1877_v16 }
0x2003   : > { %4049 = vpush %v1893_v53 }
0x2004   : > { %4051 = vpush %v5605_v24 }
0x2033   : > { %s4048_s2 = spop %4047 }
0x2034   : > { %v1879_v17 = vstv %s4048_s2  ;;  %s4050_s1 = spop %4049 }
0x2035   : > { %v1881_v55 = vmul.f32 %v5314_v50, %v1879_v17  ;;  %v1882_v49 = vmul.f32 %v5317_v46, %v1879_v17  ;;  %v1896_v50 = vstv %s4050_s1  ;;  %s5618_s2 = spop %4051 }
0x2036   : > { %v1910_v20 = vstv %s5618_s2 }
0x2037   : > { %1887 = vrot.lane.b32.xlu1 %v1882_v49, %s6709_s11  ;;  %1885 = vrot.lane.b32.xlu0 %v1881_v55, %s6709_s11  ;;  %v1913_v31 = vmul.f32 %v1910_v20, %v5624_v21  ;;  %v1912_v32 = vmul.f32 %v1910_v20, %v5621_v43 }
0x203b   : > { %1916 = vrot.lane.b32.xlu0 %v5605_v24, %s6708_s21 }
0x20a9   : > { %v1888_v29 = vpop.permute.xlu1 %1887  ;;  %v1886_v23 = vpop.permute.xlu0 %1885 }
0x20aa   : > { %v1892_v60 = vadd.f32 %v1888_v29, %v1875_v56  ;;  %v1891_v46 = vadd.f32 %v1886_v23, %v1874_v22 }
0x20ac   : > { %v1898_v4 = vadd.f32 %v1896_v50, %v1891_v46  ;;  %v1899_v2 = vadd.f32 %v1896_v50, %v1892_v60 }
0x20ad   : > { %v1917_v12 = vpop.permute.xlu0 %1916 }
0x20ae   : > { %v1900_v28 = vmax.f32 %v1898_v4, 0.0  ;;  %v1901_v39 = vmax.f32 %v1899_v2, 0.0  ;;  %4053 = vpush %v1917_v12 }
0x20b0   : > { %3760 = vst.msk [vmem:[%s4897_s9 + $0x30] sm:$0xff] %vm651_vm0, %v1900_v28  ;;  %3761 = vst.msk [vmem:[%s4897_s9 + $0x38] sm:$0xff] %vm651_vm0, %v1901_v39 }
0x20df   : > { %s4054_s17 = spop %4053 }
0x20e0   : > { %v1919_v40 = vstv %s4054_s17 }
0x20e1   : > { %v1921_v41 = vmul.f32 %v1919_v40, %v5621_v43  ;;  %v1922_v19 = vmul.f32 %v1919_v40, %v5624_v21 }
0x20e3   : > { %1927 = vrot.lane.b32.xlu0 %v1922_v19, %s6708_s21  ;;  %1925 = vrot.lane.b32.xlu1 %v1921_v41, %s6708_s21 }
0x20e7   : > { %1933 = vrot.lane.b32.xlu1 %v5605_v24, %s6709_s11 }
0x2155   : > { %v1926_v5 = vpop.permute.xlu1 %1925  ;;  %v1928_v35 = vpop.permute.xlu0 %1927 }
0x2156   : > { %v1932_v52 = vadd.f32 %v1928_v35, %v1913_v31  ;;  %v1931_v45 = vadd.f32 %v1926_v5, %v1912_v32  ;;  %v5713_v31 = vld [vmem:[%s4668_s5 + $0x19] sm:$0xff]  ;;  %v5716_v32 = vld [vmem:[%s4668_s5 + $0x21] sm:$0xff] }
0x2159   : > { %v1934_v11 = vpop.permute.xlu1 %1933 }
0x215a   : > { %4055 = vpush %v1934_v11  ;;  %v5691_v11 = vld [vmem:[%s4668_s5 + $0x18] sm:$0xff] }
0x218b   : > { %s4056_s1 = spop %4055 }
0x218c   : > { %v1936_v1 = vstv %s4056_s1 }
0x218d   : > { %v1938_v34 = vmul.f32 %v1936_v1, %v5621_v43  ;;  %v1939_v9 = vmul.f32 %v1936_v1, %v5624_v21  ;;  %v5694_v1 = vld [vmem:[%s4668_s5 + $0x20] sm:$0xff] }
0x218f   : > { %1944 = vrot.lane.b32.xlu1 %v1939_v9, %s6709_s11  ;;  %1942 = vrot.lane.b32.xlu0 %v1938_v34, %s6709_s11 }
0x2193   : > { %1961 = vrot.lane.b32.xlu1 %v5605_v24, %s6727_s16  ;;  %1952 = vrot.lane.b32.xlu0 %v5605_v24, %s6728_s13 }
0x2201   : > { %v1945_v7 = vpop.permute.xlu1 %1944  ;;  %v1943_v36 = vpop.permute.xlu0 %1942 }
0x2202   : > { %v1949_v3 = vadd.f32 %v1945_v7, %v1932_v52  ;;  %v1948_v44 = vadd.f32 %v1943_v36, %v1931_v45 }
0x2205   : > { %v1962_v10 = vpop.permute.xlu1 %1961  ;;  %v1953_v47 = vpop.permute.xlu0 %1952 }
0x2206   : > { %4057 = vpush %v1953_v47 }
0x2207   : > { %4059 = vpush %v1962_v10 }
0x2237   : > { %s5646_s17 = spop %4057 }
0x2238   : > { %s4060_s1 = spop %4059  ;;  %v1955_v13 = vstv %s5646_s17 }
0x2239   : > { %v1964_v25 = vstv %s4060_s1  ;;  %v1958_v0 = vmul.f32 %v1955_v13, %v5644_v14  ;;  %v1957_v15 = vmul.f32 %v1955_v13, %v5641_v61 }
0x223a   : > { %v1966_v37 = vmul.f32 %v1964_v25, %v5641_v61  ;;  %v1967_v51 = vmul.f32 %v1964_v25, %v5644_v14 }
0x223b   : > { %v1960_v27 = vadd.f32 %v1958_v0, %v1949_v3  ;;  %v1959_v26 = vadd.f32 %v1957_v15, %v1948_v44 }
0x223c   : > { %1972 = vrot.lane.b32.xlu1 %v1967_v51, %s6708_s21  ;;  %1970 = vrot.lane.b32.xlu0 %v1966_v37, %s6708_s21 }
0x2240   : > { %1978 = vrot.lane.b32.xlu0 %v5605_v24, %s6696_s4 }
0x22ae   : > { %v1971_v48 = vpop.permute.xlu0 %1970  ;;  %v1973_v59 = vpop.permute.xlu1 %1972 }
0x22af   : > { %v1977_v6 = vadd.f32 %v1973_v59, %v1960_v27  ;;  %v1976_v53 = vadd.f32 %v1971_v48, %v1959_v26 }
0x22b2   : > { %v1979_v33 = vpop.permute.xlu0 %1978 }
0x22b3   : > { %4061 = vpush %v1979_v33 }
0x22e4   : > { %s4062_s13 = spop %4061 }
0x22e5   : > { %v1981_v57 = vstv %s4062_s13 }
0x22e6   : > { %v1983_v38 = vmul.f32 %v1981_v57, %v5641_v61  ;;  %v1984_v58 = vmul.f32 %v1981_v57, %v5644_v14 }
0x22e8   : > { %1989 = vrot.lane.b32.xlu0 %v1984_v58, %s6709_s11  ;;  %1987 = vrot.lane.b32.xlu1 %v1983_v38, %s6709_s11 }
0x22ec   : > { %2006 = vrot.lane.b32.xlu0 %v5605_v24, %s6698_s7  ;;  %1997 = vrot.lane.b32.xlu1 %v5605_v24, %s6735_s26 }
0x235a   : > { %v1990_v30 = vpop.permute.xlu0 %1989  ;;  %v1988_v8 = vpop.permute.xlu1 %1987 }
0x235b   : > { %v1994_v16 = vadd.f32 %v1990_v30, %v1977_v6  ;;  %v1993_v55 = vadd.f32 %v1988_v8, %v1976_v53 }
0x235e   : > { %v2007_v18 = vpop.permute.xlu0 %2006  ;;  %v1998_v62 = vpop.permute.xlu1 %1997 }
0x235f   : > { %4063 = vpush %v1998_v62 }
0x2360   : > { %4065 = vpush %v2007_v18 }
0x2390   : > { %s4064_s13 = spop %4063 }
0x2391   : > { %v2000_v17 = vstv %s4064_s13  ;;  %s4066_s2 = spop %4065 }
0x2392   : > { %v2002_v49 = vmul.f32 %v2000_v17, %v5669_v63  ;;  %v2003_v42 = vmul.f32 %v2000_v17, %v5672_v54  ;;  %v2009_v56 = vstv %s4066_s2 }
0x2393   : > { %v2011_v22 = vmul.f32 %v2009_v56, %v5669_v63  ;;  %v2012_v29 = vmul.f32 %v2009_v56, %v5672_v54 }
0x2394   : > { %v2004_v23 = vadd.f32 %v2002_v49, %v1993_v55  ;;  %v2005_v50 = vadd.f32 %v2003_v42, %v1994_v16 }
0x2395   : > { %2017 = vrot.lane.b32.xlu0 %v2012_v29, %s6708_s21  ;;  %2015 = vrot.lane.b32.xlu1 %v2011_v22, %s6708_s21 }
0x2399   : > { %2023 = vrot.lane.b32.xlu1 %v5605_v24, %s6699_s30 }
0x2407   : > { %v2016_v60 = vpop.permute.xlu1 %2015  ;;  %v2018_v28 = vpop.permute.xlu0 %2017 }
0x2408   : > { %v2022_v5 = vadd.f32 %v2018_v28, %v2005_v50  ;;  %v2021_v34 = vadd.f32 %v2016_v60, %v2004_v23 }
0x240b   : > { %v2024_v46 = vpop.permute.xlu1 %2023 }
0x240c   : > { %4067 = vpush %v2024_v46 }
0x243d   : > { %s4068_s17 = spop %4067 }
0x243e   : > { %v2026_v4 = vstv %s4068_s17 }
0x243f   : > { %v2028_v2 = vmul.f32 %v2026_v4, %v5669_v63  ;;  %v2029_v12 = vmul.f32 %v2026_v4, %v5672_v54  ;;  %v5735_v4 = vld [vmem:[%s4668_s5 + $0x1a] sm:$0xff] }
0x2441   : > { %2034 = vrot.lane.b32.xlu1 %v2029_v12, %s6709_s11  ;;  %2032 = vrot.lane.b32.xlu0 %v2028_v2, %s6709_s11  ;;  %v5738_v2 = vld [vmem:[%s4668_s5 + $0x22] sm:$0xff] }
0x2445   : > { %2051 = vrot.lane.b32.xlu1 %v5605_v24, %s6700_s29  ;;  %2042 = vrot.lane.b32.xlu0 %v5605_v24, %s6736_s22 }
0x24b3   : > { %v2035_v39 = vpop.permute.xlu1 %2034  ;;  %v2033_v40 = vpop.permute.xlu0 %2032 }
0x24b4   : > { %v2039_v9 = vadd.f32 %v2035_v39, %v2022_v5  ;;  %v2038_v7 = vadd.f32 %v2033_v40, %v2021_v34 }
0x24b7   : > { %v2052_v41 = vpop.permute.xlu1 %2051  ;;  %v2043_v19 = vpop.permute.xlu0 %2042 }
0x24b8   : > { %4069 = vpush %v2043_v19 }
0x24b9   : > { %4071 = vpush %v2052_v41 }
0x24e9   : > { %s4070_s1 = spop %4069 }
0x24ea   : > { %v2045_v35 = vstv %s4070_s1  ;;  %s4072_s13 = spop %4071 }
0x24eb   : > { %v2047_v36 = vmul.f32 %v5691_v11, %v2045_v35  ;;  %v2048_v10 = vmul.f32 %v5694_v1, %v2045_v35  ;;  %v2054_v47 = vstv %s4072_s13 }
0x24ec   : > { %v2056_v25 = vmul.f32 %v5691_v11, %v2054_v47  ;;  %v2057_v37 = vmul.f32 %v5694_v1, %v2054_v47 }
0x24ed   : > { %v2049_v51 = vadd.f32 %v2047_v36, %v2038_v7  ;;  %v2050_v48 = vadd.f32 %v2048_v10, %v2039_v9 }
0x24ee   : > { %2062 = vrot.lane.b32.xlu1 %v2057_v37, %s6708_s21  ;;  %2060 = vrot.lane.b32.xlu0 %v2056_v25, %s6708_s21 }
0x24f2   : > { %2068 = vrot.lane.b32.xlu0 %v5605_v24, %s6702_s23 }
0x2560   : > { %v2061_v33 = vpop.permute.xlu0 %2060  ;;  %v2063_v30 = vpop.permute.xlu1 %2062 }
0x2561   : > { %v2067_v13 = vadd.f32 %v2063_v30, %v2050_v48  ;;  %v2066_v52 = vadd.f32 %v2061_v33, %v2049_v51  ;;  %v5760_v30 = vld [vmem:[%s4668_s5 + $0x38] sm:$0xff] }
0x2564   : > { %v2069_v57 = vpop.permute.xlu0 %2068 }
0x2565   : > { %4073 = vpush %v2069_v57 }
0x2596   : > { %s4074_s2 = spop %4073 }
0x2597   : > { %v2071_v38 = vstv %s4074_s2 }
0x2598   : > { %v2073_v58 = vmul.f32 %v5691_v11, %v2071_v38  ;;  %v2074_v59 = vmul.f32 %v5694_v1, %v2071_v38 }
0x259a   : > { %2079 = vrot.lane.b32.xlu0 %v2074_v59, %s6709_s11  ;;  %2077 = vrot.lane.b32.xlu1 %v2073_v58, %s6709_s11  ;;  %v5757_v59 = vld [vmem:[%s4668_s5 + $0x30] sm:$0xff] }
0x259e   : > { %2096 = vrot.lane.b32.xlu0 %v5605_v24, %s6711_s3  ;;  %2087 = vrot.lane.b32.xlu1 %v5605_v24, %s6737_s25 }
0x260c   : > { %v2080_v8 = vpop.permute.xlu0 %2079  ;;  %v2078_v18 = vpop.permute.xlu1 %2077 }
0x260d   : > { %v2084_v0 = vadd.f32 %v2080_v8, %v2067_v13  ;;  %v2083_v15 = vadd.f32 %v2078_v18, %v2066_v52 }
0x2610   : > { %v2097_v62 = vpop.permute.xlu0 %2096  ;;  %v2088_v20 = vpop.permute.xlu1 %2087 }
0x2611   : > { %4075 = vpush %v2088_v20 }
0x2612   : > { %4077 = vpush %v2097_v62 }
0x2642   : > { %s4076_s17 = spop %4075 }
0x2643   : > { %v2090_v45 = vstv %s4076_s17  ;;  %s4078_s1 = spop %4077 }
0x2644   : > { %v2092_v3 = vmul.f32 %v5713_v31, %v2090_v45  ;;  %v2093_v44 = vmul.f32 %v5716_v32, %v2090_v45  ;;  %v2099_v27 = vstv %s4078_s1 }
0x2645   : > { %v2101_v26 = vmul.f32 %v5713_v31, %v2099_v27  ;;  %v2102_v6 = vmul.f32 %v5716_v32, %v2099_v27 }
0x2646   : > { %v2094_v53 = vadd.f32 %v2092_v3, %v2083_v15  ;;  %v2095_v16 = vadd.f32 %v2093_v44, %v2084_v0 }
0x2647   : > { %2107 = vrot.lane.b32.xlu0 %v2102_v6, %s6708_s21  ;;  %2105 = vrot.lane.b32.xlu1 %v2101_v26, %s6708_s21 }
0x264b   : > { %2113 = vrot.lane.b32.xlu1 %v5605_v24, %s6713_s24 }
0x26b9   : > { %v2106_v17 = vpop.permute.xlu1 %2105  ;;  %v2108_v22 = vpop.permute.xlu0 %2107 }
0x26ba   : > { %v2112_v46 = vadd.f32 %v2108_v22, %v2095_v16  ;;  %v2111_v12 = vadd.f32 %v2106_v17, %v2094_v53 }
0x26bd   : > { %v2114_v55 = vpop.permute.xlu1 %2113 }
0x26be   : > { %4079 = vpush %v2114_v55 }
0x26ef   : > { %s4080_s13 = spop %4079 }
0x26f0   : > { %v2116_v49 = vstv %s4080_s13 }
0x26f1   : > { %v2118_v42 = vmul.f32 %v5713_v31, %v2116_v49  ;;  %v2119_v56 = vmul.f32 %v5716_v32, %v2116_v49 }
0x26f3   : > { %2124 = vrot.lane.b32.xlu1 %v2119_v56, %s6709_s11  ;;  %2122 = vrot.lane.b32.xlu0 %v2118_v42, %s6709_s11 }
0x26f7   : > { %2141 = vrot.lane.b32.xlu1 %v5605_v24, %s6714_s6  ;;  %2132 = vrot.lane.b32.xlu0 %v5605_v24, %s6738_s15 }
0x2765   : > { %v2125_v29 = vpop.permute.xlu1 %2124  ;;  %v2123_v23 = vpop.permute.xlu0 %2122 }
0x2766   : > { %v2129_v28 = vadd.f32 %v2125_v29, %v2112_v46  ;;  %v2128_v40 = vadd.f32 %v2123_v23, %v2111_v12  ;;  %v5779_v29 = vld [vmem:[%s4668_s5 + $0x31] sm:$0xff]  ;;  %v5782_v23 = vld [vmem:[%s4668_s5 + $0x39] sm:$0xff] }
0x2769   : > { %v2142_v50 = vpop.permute.xlu1 %2141  ;;  %v2133_v60 = vpop.permute.xlu0 %2132 }
0x276a   : > { %4081 = vpush %v2133_v60 }
0x276b   : > { %4083 = vpush %v2142_v50 }
0x279b   : > { %s4082_s2 = spop %4081 }
0x279c   : > { %v2135_v39 = vstv %s4082_s2  ;;  %s4084_s17 = spop %4083 }
0x279d   : > { %v2137_v41 = vmul.f32 %v5735_v4, %v2135_v39  ;;  %v2138_v19 = vmul.f32 %v5738_v2, %v2135_v39  ;;  %v2144_v5 = vstv %s4084_s17 }
0x279e   : > { %v2146_v34 = vmul.f32 %v5735_v4, %v2144_v5  ;;  %v2147_v9 = vmul.f32 %v5738_v2, %v2144_v5 }
0x279f   : > { %v2139_v35 = vadd.f32 %v2137_v41, %v2128_v40  ;;  %v2140_v7 = vadd.f32 %v2138_v19, %v2129_v28 }
0x27a0   : > { %2152 = vrot.lane.b32.xlu1 %v2147_v9, %s6708_s21  ;;  %2150 = vrot.lane.b32.xlu0 %v2146_v34, %s6708_s21 }
0x27a4   : > { %2158 = vrot.lane.b32.xlu0 %v5605_v24, %s6716_s14 }
0x2812   : > { %v2151_v36 = vpop.permute.xlu0 %2150  ;;  %v2153_v51 = vpop.permute.xlu1 %2152 }
0x2813   : > { %v2157_v58 = vadd.f32 %v2153_v51, %v2140_v7  ;;  %v2156_v8 = vadd.f32 %v2151_v36, %v2139_v35 }
0x2816   : > { %v2159_v10 = vpop.permute.xlu0 %2158 }
0x2817   : > { %4085 = vpush %v2159_v10 }
0x2848   : > { %s4086_s1 = spop %4085 }
0x2849   : > { %v2161_v47 = vstv %s4086_s1 }
0x284a   : > { %v2163_v25 = vmul.f32 %v5735_v4, %v2161_v47  ;;  %v2164_v37 = vmul.f32 %v5738_v2, %v2161_v47 }
0x284c   : > { %2169 = vrot.lane.b32.xlu0 %v2164_v37, %s6709_s11  ;;  %2167 = vrot.lane.b32.xlu1 %v2163_v25, %s6709_s11 }
0x2850   : > { %2186 = vrot.lane.b32.xlu0 %v5605_v24, %s6717_s19  ;;  %2177 = vrot.lane.b32.xlu1 %v5605_v24, %s6739_s8 }
0x28be   : > { %v2170_v48 = vpop.permute.xlu0 %2169  ;;  %v2168_v33 = vpop.permute.xlu1 %2167 }
0x28bf   : > { %v2174_v18 = vadd.f32 %v2170_v48, %v2157_v58  ;;  %v2173_v20 = vadd.f32 %v2168_v33, %v2156_v8 }
0x28c2   : > { %v2187_v57 = vpop.permute.xlu0 %2186  ;;  %v2178_v38 = vpop.permute.xlu1 %2177 }
0x28c3   : > { %4087 = vpush %v2178_v38  ;;  %v5804_v38 = vld [vmem:[%s4668_s5 + $0x3a] sm:$0xff] }
0x28c4   : > { %4089 = vpush %v2187_v57  ;;  %v5801_v57 = vld [vmem:[%s4668_s5 + $0x32] sm:$0xff] }
0x28f4   : > { %s4088_s13 = spop %4087 }
0x28f5   : > { %v2180_v62 = vstv %s4088_s13  ;;  %s4090_s2 = spop %4089 }
0x28f6   : > { %v2182_v13 = vmul.f32 %v5757_v59, %v2180_v62  ;;  %v2183_v52 = vmul.f32 %v5760_v30, %v2180_v62  ;;  %v2189_v0 = vstv %s4090_s2  ;;  %s6744_s2 = smov 105  }
0x28f7   : > { %v2191_v45 = vmul.f32 %v5757_v59, %v2189_v0  ;;  %v2192_v15 = vmul.f32 %v5760_v30, %v2189_v0 }
0x28f8   : > { %v2184_v3 = vadd.f32 %v2182_v13, %v2173_v20  ;;  %v2185_v44 = vadd.f32 %v2183_v52, %v2174_v18 }
0x28f9   : > { %2197 = vrot.lane.b32.xlu0 %v2192_v15, %s6708_s21  ;;  %2195 = vrot.lane.b32.xlu1 %v2191_v45, %s6708_s21 }
0x28fd   : > { %2203 = vrot.lane.b32.xlu1 %v5605_v24, %s6740_s12 }
0x296b   : > { %v2196_v27 = vpop.permute.xlu1 %2195  ;;  %v2198_v17 = vpop.permute.xlu0 %2197 }
0x296c   : > { %v2202_v22 = vadd.f32 %v2198_v17, %v2185_v44  ;;  %v2201_v50 = vadd.f32 %v2196_v27, %v2184_v3  ;;  %v2310_v27 = vld [vmem:[%s4663_s18 + $0x4] sm:$0x1] }
0x296f   : > { %v2204_v26 = vpop.permute.xlu1 %2203 }
0x2970   : > { %4091 = vpush %v2204_v26 }
0x29a1   : > { %s4092_s17 = spop %4091 }
0x29a2   : > { %v2206_v6 = vstv %s4092_s17 }
0x29a3   : > { %v2208_v53 = vmul.f32 %v5757_v59, %v2206_v6  ;;  %v2209_v16 = vmul.f32 %v5760_v30, %v2206_v6  ;;  %v5816_v6 = vld [vmem:[%s4601_s10 + $0x5] sm:$0x1] }
0x29a5   : > { %2214 = vrot.lane.b32.xlu1 %v2209_v16, %s6709_s11  ;;  %2212 = vrot.lane.b32.xlu0 %v2208_v53, %s6709_s11 }
0x29a9   : > { %2231 = vrot.lane.b32.xlu1 %v5605_v24, %s6741_s20  ;;  %2222 = vrot.lane.b32.xlu0 %v5605_v24, %s6742_s0 }
0x2a17   : > { %v2215_v55 = vpop.permute.xlu1 %2214  ;;  %v2213_v49 = vpop.permute.xlu0 %2212 }
0x2a18   : > { %v2219_v60 = vadd.f32 %v2215_v55, %v2202_v22  ;;  %v2218_v12 = vadd.f32 %v2213_v49, %v2201_v50 }
0x2a1b   : > { %v2232_v42 = vpop.permute.xlu1 %2231  ;;  %v2223_v56 = vpop.permute.xlu0 %2222 }
0x2a1c   : > { %4093 = vpush %v2223_v56 }
0x2a1d   : > { %4095 = vpush %v2232_v42 }
0x2a4d   : > { %s4094_s1 = spop %4093 }
0x2a4e   : > { %v2225_v46 = vstv %s4094_s1  ;;  %s4096_s13 = spop %4095 }
0x2a4f   : > { %v2227_v28 = vmul.f32 %v5779_v29, %v2225_v46  ;;  %v2228_v39 = vmul.f32 %v5782_v23, %v2225_v46  ;;  %v2234_v40 = vstv %s4096_s13 }
0x2a50   : > { %v2236_v41 = vmul.f32 %v5779_v29, %v2234_v40  ;;  %v2237_v19 = vmul.f32 %v5782_v23, %v2234_v40 }
0x2a51   : > { %v2229_v5 = vadd.f32 %v2227_v28, %v2218_v12  ;;  %v2230_v34 = vadd.f32 %v2228_v39, %v2219_v60 }
0x2a52   : > { %2242 = vrot.lane.b32.xlu1 %v2237_v19, %s6708_s21  ;;  %2240 = vrot.lane.b32.xlu0 %v2236_v41, %s6708_s21 }
0x2a56   : > { %2248 = vrot.lane.b32.xlu0 %v5605_v24, %s6744_s2 }
0x2ac4   : > { %v2241_v9 = vpop.permute.xlu0 %2240  ;;  %v2243_v47 = vpop.permute.xlu1 %2242 }
0x2ac5   : > { %v2247_v33 = vadd.f32 %v2243_v47, %v2230_v34  ;;  %v2246_v58 = vadd.f32 %v2241_v9, %v2229_v5 }
0x2ac8   : > { %v2249_v35 = vpop.permute.xlu0 %2248 }
0x2ac9   : > { %4097 = vpush %v2249_v35 }
0x2afa   : > { %s4098_s17 = spop %4097 }
0x2afb   : > { %v2251_v7 = vstv %s4098_s17  ;;  %s6745_s17 = smov 102  }
0x2afc   : > { %v2253_v36 = vmul.f32 %v5779_v29, %v2251_v7  ;;  %v2254_v10 = vmul.f32 %v5782_v23, %v2251_v7 }
0x2afe   : > { %2259 = vrot.lane.b32.xlu0 %v2254_v10, %s6709_s11  ;;  %2257 = vrot.lane.b32.xlu1 %v2253_v36, %s6709_s11 }
0x2b02   : > { %2276 = vrot.lane.b32.xlu0 %v5605_v24, %s6743_s28  ;;  %2267 = vrot.lane.b32.xlu1 %v5605_v24, %s6731_s27 }
0x2b70   : > { %v2260_v25 = vpop.permute.xlu0 %2259  ;;  %v2258_v37 = vpop.permute.xlu1 %2257 }
0x2b71   : > { %v2264_v8 = vadd.f32 %v2260_v25, %v2247_v33  ;;  %v2263_v62 = vadd.f32 %v2258_v37, %v2246_v58 }
0x2b74   : > { %v2277_v51 = vpop.permute.xlu0 %2276  ;;  %v2268_v48 = vpop.permute.xlu1 %2267 }
0x2b75   : > { %4099 = vpush %v2268_v48 }
0x2b76   : > { %4101 = vpush %v2277_v51 }
0x2ba6   : > { %s4100_s1 = spop %4099 }
0x2ba7   : > { %v2270_v18 = vstv %s4100_s1  ;;  %s4102_s13 = spop %4101 }
0x2ba8   : > { %v2272_v20 = vmul.f32 %v5801_v57, %v2270_v18  ;;  %v2273_v13 = vmul.f32 %v5804_v38, %v2270_v18  ;;  %v2279_v52 = vstv %s4102_s13 }
0x2ba9   : > { %v2281_v0 = vmul.f32 %v5801_v57, %v2279_v52  ;;  %v2282_v45 = vmul.f32 %v5804_v38, %v2279_v52 }
0x2baa   : > { %v2274_v15 = vadd.f32 %v2272_v20, %v2263_v62  ;;  %v2275_v3 = vadd.f32 %v2273_v13, %v2264_v8 }
0x2bab   : > { %2287 = vrot.lane.b32.xlu0 %v2282_v45, %s6708_s21  ;;  %2285 = vrot.lane.b32.xlu1 %v2281_v0, %s6708_s21 }
0x2baf   : > { %2293 = vrot.lane.b32.xlu1 %v5605_v24, %s6745_s17 }
0x2c1d   : > { %v2286_v44 = vpop.permute.xlu1 %2285  ;;  %v2288_v24 = vpop.permute.xlu0 %2287 }
0x2c1e   : > { %v2292_v55 = vadd.f32 %v2288_v24, %v2275_v3  ;;  %v2291_v49 = vadd.f32 %v2286_v44, %v2274_v15 }
0x2c21   : > { %v2294_v26 = vpop.permute.xlu1 %2293 }
0x2c22   : > { %4103 = vpush %v2294_v26 }
0x2c23   : > { %4105 = vpush %v2310_v27 }
0x2c24   : > { %4107 = vpush %v5816_v6 }
0x2c53   : > { %s4104_s1 = spop %4103 }
0x2c54   : > { %v2296_v53 = vstv %s4104_s1  ;;  %s4106_s13 = spop %4105 }
0x2c55   : > { %v2298_v16 = vmul.f32 %v5801_v57, %v2296_v53  ;;  %v2299_v17 = vmul.f32 %v5804_v38, %v2296_v53  ;;  %v2313_v22 = vstv %s4106_s13  ;;  %s5829_s1 = spop %4107 }
0x2c56   : > { %v2327_v44 = vstv %s5829_s1 }
0x2c57   : > { %2304 = vrot.lane.b32.xlu1 %v2299_v17, %s6709_s11  ;;  %2302 = vrot.lane.b32.xlu0 %v2298_v16, %s6709_s11  ;;  %v2330_v26 = vmul.f32 %v2327_v44, %v5624_v21  ;;  %v2329_v53 = vmul.f32 %v2327_v44, %v5621_v43 }
0x2c5b   : > { %2333 = vrot.lane.b32.xlu0 %v5816_v6, %s6708_s21 }
0x2cc9   : > { %v2305_v42 = vpop.permute.xlu1 %2304  ;;  %v2303_v56 = vpop.permute.xlu0 %2302 }
0x2cca   : > { %v2309_v50 = vadd.f32 %v2305_v42, %v2292_v55  ;;  %v2308_v60 = vadd.f32 %v2303_v56, %v2291_v49 }
0x2ccc   : > { %v2315_v46 = vadd.f32 %v2313_v22, %v2308_v60  ;;  %v2316_v12 = vadd.f32 %v2313_v22, %v2309_v50 }
0x2ccd   : > { %v2334_v28 = vpop.permute.xlu0 %2333 }
0x2cce   : > { %v2317_v39 = vmax.f32 %v2315_v46, 0.0  ;;  %v2318_v40 = vmax.f32 %v2316_v12, 0.0  ;;  %4109 = vpush %v2334_v28 }
0x2cd0   : > { %3774 = vst.msk [vmem:[%s4897_s9 + $0x40] sm:$0xff] %vm651_vm0, %v2317_v39  ;;  %3775 = vst.msk [vmem:[%s4897_s9 + $0x48] sm:$0xff] %vm651_vm0, %v2318_v40 }
0x2cff   : > { %s4110_s5 = spop %4109 }
0x2d00   : > { %v2336_v41 = vstv %s4110_s5  ;;  %s6746_s5 = smov 125  }
0x2d01   : > { %v2338_v19 = vmul.f32 %v2336_v41, %v5621_v43  ;;  %v2339_v5 = vmul.f32 %v2336_v41, %v5624_v21 }
0x2d03   : > { %2344 = vrot.lane.b32.xlu0 %v2339_v5, %s6708_s21  ;;  %2342 = vrot.lane.b32.xlu1 %v2338_v19, %s6708_s21 }
0x2d07   : > { %2350 = vrot.lane.b32.xlu1 %v5816_v6, %s6709_s11 }
0x2d75   : > { %v2343_v34 = vpop.permute.xlu1 %2342  ;;  %v2345_v10 = vpop.permute.xlu0 %2344 }
0x2d76   : > { %v2349_v16 = vadd.f32 %v2345_v10, %v2330_v26  ;;  %v2348_v24 = vadd.f32 %v2343_v34, %v2329_v53 }
0x2d79   : > { %v2351_v9 = vpop.permute.xlu1 %2350 }
0x2d7a   : > { %4111 = vpush %v2351_v9 }
0x2dab   : > { %s4112_s13 = spop %4111 }
0x2dac   : > { %v2353_v35 = vstv %s4112_s13 }
0x2dad   : > { %v2355_v7 = vmul.f32 %v2353_v35, %v5621_v43  ;;  %v2356_v36 = vmul.f32 %v2353_v35, %v5624_v21 }
0x2daf   : > { %2361 = vrot.lane.b32.xlu1 %v2356_v36, %s6709_s11  ;;  %2359 = vrot.lane.b32.xlu0 %v2355_v7, %s6709_s11 }
0x2db3   : > { %2378 = vrot.lane.b32.xlu1 %v5816_v6, %s6727_s16  ;;  %2369 = vrot.lane.b32.xlu0 %v5816_v6, %s6746_s5 }
0x2e21   : > { %v2362_v47 = vpop.permute.xlu1 %2361  ;;  %v2360_v25 = vpop.permute.xlu0 %2359 }
0x2e22   : > { %v2366_v49 = vadd.f32 %v2362_v47, %v2349_v16  ;;  %v2365_v42 = vadd.f32 %v2360_v25, %v2348_v24 }
0x2e25   : > { %v2379_v37 = vpop.permute.xlu1 %2378  ;;  %v2370_v51 = vpop.permute.xlu0 %2369 }
0x2e26   : > { %4113 = vpush %v2370_v51 }
0x2e27   : > { %4115 = vpush %v2379_v37 }
0x2e57   : > { %s5845_s13 = spop %4113 }
0x2e58   : > { %s4116_s9 = spop %4115  ;;  %v2372_v27 = vstv %s5845_s13 }
0x2e59   : > { %v2381_v48 = vstv %s4116_s9  ;;  %v2375_v17 = vmul.f32 %v2372_v27, %v5644_v14  ;;  %v2374_v55 = vmul.f32 %v2372_v27, %v5641_v61 }
0x2e5a   : > { %v2383_v33 = vmul.f32 %v2381_v48, %v5641_v61  ;;  %v2384_v58 = vmul.f32 %v2381_v48, %v5644_v14 }
0x2e5b   : > { %v2377_v56 = vadd.f32 %v2375_v17, %v2366_v49  ;;  %v2376_v22 = vadd.f32 %v2374_v55, %v2365_v42 }
0x2e5c   : > { %2389 = vrot.lane.b32.xlu1 %v2384_v58, %s6708_s21  ;;  %2387 = vrot.lane.b32.xlu0 %v2383_v33, %s6708_s21 }
0x2e60   : > { %2395 = vrot.lane.b32.xlu0 %v5816_v6, %s6696_s4 }
0x2ece   : > { %v2388_v8 = vpop.permute.xlu0 %2387  ;;  %v2390_v52 = vpop.permute.xlu1 %2389 }
0x2ecf   : > { %v2394_v50 = vadd.f32 %v2390_v52, %v2377_v56  ;;  %v2393_v60 = vadd.f32 %v2388_v8, %v2376_v22 }
0x2ed2   : > { %v2396_v18 = vpop.permute.xlu0 %2395 }
0x2ed3   : > { %4117 = vpush %v2396_v18 }
0x2f04   : > { %s4118_s5 = spop %4117 }
0x2f05   : > { %v2398_v62 = vstv %s4118_s5 }
0x2f06   : > { %v2400_v20 = vmul.f32 %v2398_v62, %v5641_v61  ;;  %v2401_v13 = vmul.f32 %v2398_v62, %v5644_v14 }
0x2f08   : > { %2406 = vrot.lane.b32.xlu0 %v2401_v13, %s6709_s11  ;;  %2404 = vrot.lane.b32.xlu1 %v2400_v20, %s6709_s11 }
0x2f0c   : > { %2423 = vrot.lane.b32.xlu0 %v5816_v6, %s6698_s7  ;;  %2414 = vrot.lane.b32.xlu1 %v5816_v6, %s6735_s26 }
0x2f7a   : > { %v2407_v0 = vpop.permute.xlu0 %2406  ;;  %v2405_v45 = vpop.permute.xlu1 %2404 }
0x2f7b   : > { %v2411_v46 = vadd.f32 %v2407_v0, %v2394_v50  ;;  %v2410_v28 = vadd.f32 %v2405_v45, %v2393_v60 }
0x2f7e   : > { %v2424_v15 = vpop.permute.xlu0 %2423  ;;  %v2415_v3 = vpop.permute.xlu1 %2414 }
0x2f7f   : > { %4119 = vpush %v2415_v3 }
0x2f80   : > { %4121 = vpush %v2424_v15 }
0x2fb0   : > { %s4120_s9 = spop %4119 }
0x2fb1   : > { %v2417_v12 = vstv %s4120_s9  ;;  %s4122_s1 = spop %4121 }
0x2fb2   : > { %v2419_v21 = vmul.f32 %v2417_v12, %v5669_v63  ;;  %v2420_v43 = vmul.f32 %v2417_v12, %v5672_v54  ;;  %v2426_v39 = vstv %s4122_s1 }
0x2fb3   : > { %v2428_v14 = vmul.f32 %v2426_v39, %v5669_v63  ;;  %v2429_v61 = vmul.f32 %v2426_v39, %v5672_v54 }
0x2fb4   : > { %v2421_v40 = vadd.f32 %v2419_v21, %v2410_v28  ;;  %v2422_v41 = vadd.f32 %v2420_v43, %v2411_v46 }
0x2fb5   : > { %2434 = vrot.lane.b32.xlu0 %v2429_v61, %s6708_s21  ;;  %2432 = vrot.lane.b32.xlu1 %v2428_v14, %s6708_s21 }
0x2fb9   : > { %2440 = vrot.lane.b32.xlu1 %v5816_v6, %s6699_s30 }
0x3027   : > { %v2433_v19 = vpop.permute.xlu1 %2432  ;;  %v2435_v7 = vpop.permute.xlu0 %2434 }
0x3028   : > { %v2438_v37 = vadd.f32 %v2433_v19, %v2421_v40 }
0x302b   : > { %v2441_v5 = vpop.permute.xlu1 %2440 }
0x302c   : > { %4123 = vpush %v2441_v5 }
0x305d   : > { %s4124_s5 = spop %4123 }
0x305e   : > { %v2443_v34 = vstv %s4124_s5 }
0x305f   : > { %v2445_v9 = vmul.f32 %v2443_v34, %v5669_v63  ;;  %v2446_v35 = vmul.f32 %v2443_v34, %v5672_v54  ;;  %v2439_v63 = vadd.f32 %v2435_v7, %v2422_v41 }
0x3061   : > { %2451 = vrot.lane.b32.xlu1 %v2446_v35, %s6709_s11  ;;  %2449 = vrot.lane.b32.xlu0 %v2445_v9, %s6709_s11 }
0x3065   : > { %2468 = vrot.lane.b32.xlu1 %v5816_v6, %s6700_s29  ;;  %2459 = vrot.lane.b32.xlu0 %v5816_v6, %s6736_s22 }
0x30d3   : > { %v2452_v36 = vpop.permute.xlu1 %2451  ;;  %v2450_v10 = vpop.permute.xlu0 %2449 }
0x30d4   : > { %v2456_v54 = vadd.f32 %v2452_v36, %v2439_v63  ;;  %v2455_v48 = vadd.f32 %v2450_v10, %v2438_v37 }
0x30d7   : > { %v2469_v47 = vpop.permute.xlu1 %2468  ;;  %v2460_v25 = vpop.permute.xlu0 %2459 }
0x30d8   : > { %4125 = vpush %v2460_v25 }
0x30d9   : > { %4127 = vpush %v2469_v47 }
0x3109   : > { %s4126_s13 = spop %4125 }
0x310a   : > { %v2462_v51 = vstv %s4126_s13  ;;  %s4128_s9 = spop %4127 }
0x310b   : > { %v2464_v33 = vmul.f32 %v5691_v11, %v2462_v51  ;;  %v2465_v58 = vmul.f32 %v5694_v1, %v2462_v51  ;;  %v2471_v8 = vstv %s4128_s9 }
0x310c   : > { %v2473_v18 = vmul.f32 %v5691_v11, %v2471_v8  ;;  %v2474_v62 = vmul.f32 %v5694_v1, %v2471_v8 }
0x310d   : > { %v2466_v20 = vadd.f32 %v2464_v33, %v2455_v48  ;;  %v2467_v13 = vadd.f32 %v2465_v58, %v2456_v54 }
0x310e   : > { %2479 = vrot.lane.b32.xlu1 %v2474_v62, %s6708_s21  ;;  %2477 = vrot.lane.b32.xlu0 %v2473_v18, %s6708_s21 }
0x3112   : > { %2485 = vrot.lane.b32.xlu0 %v5816_v6, %s6702_s23 }
0x3180   : > { %v2478_v52 = vpop.permute.xlu0 %2477  ;;  %v2480_v44 = vpop.permute.xlu1 %2479 }
0x3181   : > { %v2483_v17 = vadd.f32 %v2478_v52, %v2466_v20 }
0x3184   : > { %v2486_v0 = vpop.permute.xlu0 %2485 }
0x3185   : > { %4129 = vpush %v2486_v0 }
0x31b6   : > { %s4130_s1 = spop %4129 }
0x31b7   : > { %v2488_v45 = vstv %s4130_s1 }
0x31b8   : > { %v2490_v15 = vmul.f32 %v5691_v11, %v2488_v45  ;;  %v2491_v3 = vmul.f32 %v5694_v1, %v2488_v45  ;;  %v2484_v11 = vadd.f32 %v2480_v44, %v2467_v13 }
0x31ba   : > { %2496 = vrot.lane.b32.xlu0 %v2491_v3, %s6709_s11  ;;  %2494 = vrot.lane.b32.xlu1 %v2490_v15, %s6709_s11 }
0x31be   : > { %2513 = vrot.lane.b32.xlu0 %v5816_v6, %s6711_s3  ;;  %2504 = vrot.lane.b32.xlu1 %v5816_v6, %s6737_s25 }
0x322c   : > { %v2497_v27 = vpop.permute.xlu0 %2496  ;;  %v2495_v26 = vpop.permute.xlu1 %2494 }
0x322d   : > { %v2501_v1 = vadd.f32 %v2497_v27, %v2484_v11  ;;  %v2500_v55 = vadd.f32 %v2495_v26, %v2483_v17 }
0x3230   : > { %v2514_v53 = vpop.permute.xlu0 %2513  ;;  %v2505_v16 = vpop.permute.xlu1 %2504 }
0x3231   : > { %4131 = vpush %v2505_v16 }
0x3232   : > { %4133 = vpush %v2514_v53 }
0x3262   : > { %s4132_s5 = spop %4131 }
0x3263   : > { %v2507_v24 = vstv %s4132_s5  ;;  %s4134_s13 = spop %4133 }
0x3264   : > { %v2509_v49 = vmul.f32 %v5713_v31, %v2507_v24  ;;  %v2510_v42 = vmul.f32 %v5716_v32, %v2507_v24  ;;  %v2516_v56 = vstv %s4134_s13 }
0x3265   : > { %v2518_v22 = vmul.f32 %v5713_v31, %v2516_v56  ;;  %v2519_v50 = vmul.f32 %v5716_v32, %v2516_v56 }
0x3266   : > { %v2511_v60 = vadd.f32 %v2509_v49, %v2500_v55  ;;  %v2512_v46 = vadd.f32 %v2510_v42, %v2501_v1 }
0x3267   : > { %2524 = vrot.lane.b32.xlu0 %v2519_v50, %s6708_s21  ;;  %2522 = vrot.lane.b32.xlu1 %v2518_v22, %s6708_s21 }
0x326b   : > { %2530 = vrot.lane.b32.xlu1 %v5816_v6, %s6713_s24 }
0x32d9   : > { %v2523_v12 = vpop.permute.xlu1 %2522  ;;  %v2525_v14 = vpop.permute.xlu0 %2524 }
0x32da   : > { %v2528_v5 = vadd.f32 %v2523_v12, %v2511_v60 }
0x32dd   : > { %v2531_v28 = vpop.permute.xlu1 %2530 }
0x32de   : > { %4135 = vpush %v2531_v28 }
0x330f   : > { %s4136_s9 = spop %4135 }
0x3310   : > { %v2533_v21 = vstv %s4136_s9 }
0x3311   : > { %v2535_v43 = vmul.f32 %v5713_v31, %v2533_v21  ;;  %v2536_v39 = vmul.f32 %v5716_v32, %v2533_v21  ;;  %v2529_v31 = vadd.f32 %v2525_v14, %v2512_v46 }
0x3313   : > { %2541 = vrot.lane.b32.xlu1 %v2536_v39, %s6709_s11  ;;  %2539 = vrot.lane.b32.xlu0 %v2535_v43, %s6709_s11 }
0x3317   : > { %2558 = vrot.lane.b32.xlu1 %v5816_v6, %s6714_s6  ;;  %2549 = vrot.lane.b32.xlu0 %v5816_v6, %s6738_s15 }
0x3385   : > { %v2542_v61 = vpop.permute.xlu1 %2541  ;;  %v2540_v40 = vpop.permute.xlu0 %2539 }
0x3386   : > { %v2546_v32 = vadd.f32 %v2542_v61, %v2529_v31  ;;  %v2545_v9 = vadd.f32 %v2540_v40, %v2528_v5 }
0x3389   : > { %v2559_v41 = vpop.permute.xlu1 %2558  ;;  %v2550_v19 = vpop.permute.xlu0 %2549 }
0x338a   : > { %4137 = vpush %v2550_v19 }
0x338b   : > { %4139 = vpush %v2559_v41 }
0x33bb   : > { %s4138_s1 = spop %4137 }
0x33bc   : > { %v2552_v34 = vstv %s4138_s1  ;;  %s4140_s5 = spop %4139 }
0x33bd   : > { %v2554_v35 = vmul.f32 %v5735_v4, %v2552_v34  ;;  %v2555_v7 = vmul.f32 %v5738_v2, %v2552_v34  ;;  %v2561_v36 = vstv %s4140_s5 }
0x33be   : > { %v2563_v10 = vmul.f32 %v5735_v4, %v2561_v36  ;;  %v2564_v47 = vmul.f32 %v5738_v2, %v2561_v36 }
0x33bf   : > { %v2556_v25 = vadd.f32 %v2554_v35, %v2545_v9  ;;  %v2557_v63 = vadd.f32 %v2555_v7, %v2546_v32 }
0x33c0   : > { %2569 = vrot.lane.b32.xlu1 %v2564_v47, %s6708_s21  ;;  %2567 = vrot.lane.b32.xlu0 %v2563_v10, %s6708_s21 }
0x33c4   : > { %2575 = vrot.lane.b32.xlu0 %v5816_v6, %s6716_s14 }
0x3432   : > { %v2568_v37 = vpop.permute.xlu0 %2567  ;;  %v2570_v58 = vpop.permute.xlu1 %2569 }
0x3433   : > { %v2573_v13 = vadd.f32 %v2568_v37, %v2556_v25 }
0x3436   : > { %v2576_v54 = vpop.permute.xlu0 %2575 }
0x3437   : > { %4141 = vpush %v2576_v54 }
0x3468   : > { %s4142_s13 = spop %4141 }
0x3469   : > { %v2578_v51 = vstv %s4142_s13 }
0x346a   : > { %v2580_v48 = vmul.f32 %v5735_v4, %v2578_v51  ;;  %v2581_v33 = vmul.f32 %v5738_v2, %v2578_v51  ;;  %v2574_v4 = vadd.f32 %v2570_v58, %v2557_v63 }
0x346c   : > { %2586 = vrot.lane.b32.xlu0 %v2581_v33, %s6709_s11  ;;  %2584 = vrot.lane.b32.xlu1 %v2580_v48, %s6709_s11 }
0x3470   : > { %2603 = vrot.lane.b32.xlu0 %v5816_v6, %s6717_s19  ;;  %2594 = vrot.lane.b32.xlu1 %v5816_v6, %s6739_s8 }
0x34de   : > { %v2587_v8 = vpop.permute.xlu0 %2586  ;;  %v2585_v18 = vpop.permute.xlu1 %2584 }
0x34df   : > { %v2591_v2 = vadd.f32 %v2587_v8, %v2574_v4  ;;  %v2590_v0 = vadd.f32 %v2585_v18, %v2573_v13  ;;  %v2727_v8 = vld [vmem:[%s4663_s18 + $0x5] sm:$0x1] }
0x34e2   : > { %v2604_v62 = vpop.permute.xlu0 %2603  ;;  %v2595_v20 = vpop.permute.xlu1 %2594 }
0x34e3   : > { %4143 = vpush %v2595_v20 }
0x34e4   : > { %4145 = vpush %v2604_v62  ;;  %v5973_v62 = vld [vmem:[%s4601_s10 + $0x6] sm:$0x1] }
0x3514   : > { %s4144_s9 = spop %4143 }
0x3515   : > { %v2597_v52 = vstv %s4144_s9  ;;  %s4146_s1 = spop %4145 }
0x3516   : > { %v2599_v45 = vmul.f32 %v5757_v59, %v2597_v52  ;;  %v2600_v15 = vmul.f32 %v5760_v30, %v2597_v52  ;;  %v2606_v3 = vstv %s4146_s1 }
0x3517   : > { %v2608_v44 = vmul.f32 %v5757_v59, %v2606_v3  ;;  %v2609_v27 = vmul.f32 %v5760_v30, %v2606_v3 }
0x3518   : > { %v2601_v26 = vadd.f32 %v2599_v45, %v2590_v0  ;;  %v2602_v53 = vadd.f32 %v2600_v15, %v2591_v2 }
0x3519   : > { %2614 = vrot.lane.b32.xlu0 %v2609_v27, %s6708_s21  ;;  %2612 = vrot.lane.b32.xlu1 %v2608_v44, %s6708_s21 }
0x351d   : > { %2620 = vrot.lane.b32.xlu1 %v5816_v6, %s6740_s12 }
0x358b   : > { %v2613_v16 = vpop.permute.xlu1 %2612  ;;  %v2615_v55 = vpop.permute.xlu0 %2614 }
0x358c   : > { %v2618_v50 = vadd.f32 %v2613_v16, %v2601_v26 }
0x358f   : > { %v2621_v11 = vpop.permute.xlu1 %2620 }
0x3590   : > { %4147 = vpush %v2621_v11 }
0x35c1   : > { %s4148_s5 = spop %4147 }
0x35c2   : > { %v2623_v17 = vstv %s4148_s5 }
0x35c3   : > { %v2625_v1 = vmul.f32 %v5757_v59, %v2623_v17  ;;  %v2626_v24 = vmul.f32 %v5760_v30, %v2623_v17  ;;  %v2619_v59 = vadd.f32 %v2615_v55, %v2602_v53 }
0x35c5   : > { %2631 = vrot.lane.b32.xlu1 %v2626_v24, %s6709_s11  ;;  %2629 = vrot.lane.b32.xlu0 %v2625_v1, %s6709_s11 }
0x35c9   : > { %2648 = vrot.lane.b32.xlu1 %v5816_v6, %s6741_s20  ;;  %2639 = vrot.lane.b32.xlu0 %v5816_v6, %s6742_s0 }
0x3637   : > { %v2632_v49 = vpop.permute.xlu1 %2631  ;;  %v2630_v42 = vpop.permute.xlu0 %2629 }
0x3638   : > { %v2636_v30 = vadd.f32 %v2632_v49, %v2619_v59  ;;  %v2635_v46 = vadd.f32 %v2630_v42, %v2618_v50 }
0x363b   : > { %v2649_v56 = vpop.permute.xlu1 %2648  ;;  %v2640_v22 = vpop.permute.xlu0 %2639 }
0x363c   : > { %4149 = vpush %v2640_v22 }
0x363d   : > { %4151 = vpush %v2649_v56 }
0x366d   : > { %s4150_s13 = spop %4149 }
0x366e   : > { %v2642_v60 = vstv %s4150_s13  ;;  %s4152_s9 = spop %4151 }
0x366f   : > { %v2644_v12 = vmul.f32 %v5779_v29, %v2642_v60  ;;  %v2645_v28 = vmul.f32 %v5782_v23, %v2642_v60  ;;  %v2651_v21 = vstv %s4152_s9 }
0x3670   : > { %v2653_v43 = vmul.f32 %v5779_v29, %v2651_v21  ;;  %v2654_v39 = vmul.f32 %v5782_v23, %v2651_v21 }
0x3671   : > { %v2646_v14 = vadd.f32 %v2644_v12, %v2635_v46  ;;  %v2647_v61 = vadd.f32 %v2645_v28, %v2636_v30 }
0x3672   : > { %2659 = vrot.lane.b32.xlu1 %v2654_v39, %s6708_s21  ;;  %2657 = vrot.lane.b32.xlu0 %v2653_v43, %s6708_s21 }
0x3676   : > { %2665 = vrot.lane.b32.xlu0 %v5816_v6, %s6744_s2 }
0x36e4   : > { %v2658_v40 = vpop.permute.xlu0 %2657  ;;  %v2660_v32 = vpop.permute.xlu1 %2659 }
0x36e5   : > { %v2663_v36 = vadd.f32 %v2658_v40, %v2646_v14  ;;  %v6073_v14 = vld [vmem:[%s4601_s10 + $0x7] sm:$0x1] }
0x36e8   : > { %v2666_v41 = vpop.permute.xlu0 %2665 }
0x36e9   : > { %4153 = vpush %v2666_v41 }
0x371a   : > { %s4154_s1 = spop %4153 }
0x371b   : > { %v2668_v19 = vstv %s4154_s1  ;;  %s6747_s1 = sld [smem:[#allocation20_spill]] }
0x371c   : > { %v2670_v31 = vmul.f32 %v5779_v29, %v2668_v19  ;;  %v2671_v5 = vmul.f32 %v5782_v23, %v2668_v19  ;;  %v2664_v29 = vadd.f32 %v2660_v32, %v2647_v61 }
0x371e   : > { %2676 = vrot.lane.b32.xlu0 %v2671_v5, %s6709_s11  ;;  %2674 = vrot.lane.b32.xlu1 %v2670_v31, %s6709_s11 }
0x3722   : > { %2693 = vrot.lane.b32.xlu0 %v5816_v6, %s6743_s28  ;;  %2684 = vrot.lane.b32.xlu1 %v5816_v6, %s6731_s27 }
0x3790   : > { %v2677_v34 = vpop.permute.xlu0 %2676  ;;  %v2675_v9 = vpop.permute.xlu1 %2674 }
0x3791   : > { %v2681_v23 = vadd.f32 %v2677_v34, %v2664_v29  ;;  %v2680_v47 = vadd.f32 %v2675_v9, %v2663_v36 }
0x3794   : > { %v2694_v35 = vpop.permute.xlu0 %2693  ;;  %v2685_v7 = vpop.permute.xlu1 %2684 }
0x3795   : > { %4155 = vpush %v2685_v7 }
0x3796   : > { %4157 = vpush %v2694_v35 }
0x37c6   : > { %s4156_s5 = spop %4155 }
0x37c7   : > { %v2687_v10 = vstv %s4156_s5  ;;  %s4158_s13 = spop %4157 }
0x37c8   : > { %v2689_v25 = vmul.f32 %v5801_v57, %v2687_v10  ;;  %v2690_v63 = vmul.f32 %v5804_v38, %v2687_v10  ;;  %v2696_v37 = vstv %s4158_s13  ;;  %s6748_s13 = sld [smem:[#allocation19_spill]] }
0x37c9   : > { %v2698_v54 = vmul.f32 %v5801_v57, %v2696_v37  ;;  %v2699_v51 = vmul.f32 %v5804_v38, %v2696_v37 }
0x37ca   : > { %v2691_v48 = vadd.f32 %v2689_v25, %v2680_v47  ;;  %v2692_v33 = vadd.f32 %v2690_v63, %v2681_v23 }
0x37cb   : > { %2704 = vrot.lane.b32.xlu0 %v2699_v51, %s6708_s21  ;;  %2702 = vrot.lane.b32.xlu1 %v2698_v54, %s6708_s21 }
0x37ce   : > { %v5989_v16 = vld [vmem:[%s6748_s13] sm:$0xff]  ;;  %v5992_v11 = vld [vmem:[%s6748_s13 + $0x8] sm:$0xff] }
0x37cf   : > { %2710 = vrot.lane.b32.xlu1 %v5816_v6, %s6745_s17  ;;  %v6017_v12 = vld [vmem:[%s6748_s13 + $0x1] sm:$0xff]  ;;  %v6020_v28 = vld [vmem:[%s6748_s13 + $0x9] sm:$0xff] }
0x383d   : > { %v2703_v58 = vpop.permute.xlu1 %2702  ;;  %v2705_v6 = vpop.permute.xlu0 %2704 }
0x383e   : > { %v2709_v2 = vadd.f32 %v2705_v6, %v2692_v33  ;;  %v2708_v52 = vadd.f32 %v2703_v58, %v2691_v48  ;;  %v6137_v6 = vld [vmem:[%s6748_s13 + $0xa] sm:$0xff] }
0x3841   : > { %v2711_v18 = vpop.permute.xlu1 %2710 }
0x3842   : > { %4159 = vpush %v2711_v18 }
0x3843   : > { %4161 = vpush %v2727_v8 }
0x3844   : > { %4163 = vpush %v5973_v62 }
0x3873   : > { %s4160_s9 = spop %4159 }
0x3874   : > { %v2713_v20 = vstv %s4160_s9  ;;  %s4162_s5 = spop %4161 }
0x3875   : > { %v2715_v4 = vmul.f32 %v5801_v57, %v2713_v20  ;;  %v2716_v13 = vmul.f32 %v5804_v38, %v2713_v20  ;;  %v2730_v57 = vstv %s4162_s5  ;;  %s5986_s9 = spop %4163 }
0x3877   : > { %2721 = vrot.lane.b32.xlu1 %v2716_v13, %s6709_s11  ;;  %2719 = vrot.lane.b32.xlu0 %v2715_v4, %s6709_s11  ;;  %v6134_v13 = vld [vmem:[%s6748_s13 + $0x2] sm:$0xff] }
0x387b   : > { %2750 = vrot.lane.b32.xlu0 %v5973_v62, %s6708_s21 }
0x38e9   : > { %v2722_v0 = vpop.permute.xlu1 %2721  ;;  %v2720_v45 = vpop.permute.xlu0 %2719 }
0x38ea   : > { %v2726_v15 = vadd.f32 %v2722_v0, %v2709_v2  ;;  %v2725_v38 = vadd.f32 %v2720_v45, %v2708_v52 }
0x38ec   : > { %v2732_v3 = vadd.f32 %v2730_v57, %v2725_v38  ;;  %v2733_v44 = vadd.f32 %v2730_v57, %v2726_v15 }
0x38ed   : > { %v2751_v27 = vpop.permute.xlu0 %2750 }
0x38ee   : > { %v2734_v26 = vmax.f32 %v2732_v3, 0.0  ;;  %v2735_v53 = vmax.f32 %v2733_v44, 0.0  ;;  %4165 = vpush %v2751_v27 }
0x38f0   : > { %3788 = vst.msk [vmem:[%s6747_s1 + $0x50] sm:$0xff] %vm651_vm0, %v2734_v26  ;;  %3789 = vst.msk [vmem:[%s6747_s1 + $0x58] sm:$0xff] %vm651_vm0, %v2735_v53 }
0x391f   : > { %s4166_s18 = spop %4165 }
0x3920   : > { %v2753_v17 = vstv %s4166_s18  ;;  %s6749_s18 = smov 125  }
0x3921   : > { %v2755_v1 = vmul.f32 %v2753_v17, %v5989_v16  ;;  %v2756_v24 = vmul.f32 %v2753_v17, %v5992_v11 }
0x3923   : > { %2761 = vrot.lane.b32.xlu0 %v2756_v24, %s6708_s21  ;;  %2759 = vrot.lane.b32.xlu1 %v2755_v1, %s6708_s21  ;;  %v6152_v24 = vld [vmem:[%s6748_s13 + $0x18] sm:$0xff] }
0x3927   : > { %2767 = vrot.lane.b32.xlu1 %v5973_v62, %s6709_s11 }
0x3995   : > { %v6000_v55 = vpop.permute.xlu1 %2759  ;;  %v6010_v59 = vpop.permute.xlu0 %2761 }
0x3999   : > { %v2768_v49 = vpop.permute.xlu1 %2767 }
0x399a   : > { %4167 = vpush %v2768_v49  ;;  %v6155_v49 = vld [vmem:[%s6748_s13 + $0x20] sm:$0xff] }
0x39cb   : > { %s4168_s5 = spop %4167 }
0x39cc   : > { %v2770_v42 = vstv %s4168_s5 }
0x39cd   : > { %v2772_v56 = vmul.f32 %v2770_v42, %v5989_v16  ;;  %v2773_v22 = vmul.f32 %v2770_v42, %v5992_v11 }
0x39cf   : > { %2778 = vrot.lane.b32.xlu1 %v2773_v22, %s6709_s11  ;;  %2776 = vrot.lane.b32.xlu0 %v2772_v56, %s6709_s11 }
0x39d3   : > { %2795 = vrot.lane.b32.xlu1 %v5973_v62, %s6727_s16  ;;  %2786 = vrot.lane.b32.xlu0 %v5973_v62, %s6749_s18 }
0x3a41   : > { %v6012_v50 = vpop.permute.xlu1 %2778  ;;  %v6014_v30 = vpop.permute.xlu0 %2776 }
0x3a45   : > { %v2796_v60 = vpop.permute.xlu1 %2795  ;;  %v2787_v46 = vpop.permute.xlu0 %2786 }
0x3a46   : > { %4169 = vpush %v2787_v46 }
0x3a47   : > { %4171 = vpush %v2796_v60 }
0x3a77   : > { %s6022_s5 = spop %4169 }
0x3a78   : > { %s4172_s1 = spop %4171 }
0x3a79   : > { %v2798_v21 = vstv %s4172_s1 }
0x3a7a   : > { %v2800_v43 = vmul.f32 %v2798_v21, %v6017_v12  ;;  %v2801_v39 = vmul.f32 %v2798_v21, %v6020_v28 }
0x3a7c   : > { %2806 = vrot.lane.b32.xlu1 %v2801_v39, %s6708_s21  ;;  %2804 = vrot.lane.b32.xlu0 %v2800_v43, %s6708_s21 }
0x3a80   : > { %2812 = vrot.lane.b32.xlu0 %v5973_v62, %s6696_s4  ;;  %2831 = vrot.lane.b32.xlu1 %v5973_v62, %s6735_s26 }
0x3a84   : > { %2840 = vrot.lane.b32.xlu0 %v5973_v62, %s6698_s7  ;;  %2857 = vrot.lane.b32.xlu1 %v5973_v62, %s6699_s30 }
0x3a88   : > { %2876 = vrot.lane.b32.xlu0 %v5973_v62, %s6736_s22  ;;  %2885 = vrot.lane.b32.xlu1 %v5973_v62, %s6700_s29 }
0x3a8c   : > { %2902 = vrot.lane.b32.xlu0 %v5973_v62, %s6702_s23  ;;  %2921 = vrot.lane.b32.xlu1 %v5973_v62, %s6737_s25 }
0x3a90   : > { %2930 = vrot.lane.b32.xlu0 %v5973_v62, %s6711_s3  ;;  %2947 = vrot.lane.b32.xlu1 %v5973_v62, %s6713_s24 }
0x3a94   : > { %2966 = vrot.lane.b32.xlu0 %v5973_v62, %s6738_s15  ;;  %2975 = vrot.lane.b32.xlu1 %v5973_v62, %s6714_s6 }
0x3a98   : > { %2992 = vrot.lane.b32.xlu0 %v5973_v62, %s6716_s14  ;;  %3011 = vrot.lane.b32.xlu1 %v5973_v62, %s6739_s8 }
0x3a9c   : > { %3020 = vrot.lane.b32.xlu0 %v5973_v62, %s6717_s19  ;;  %3037 = vrot.lane.b32.xlu1 %v5973_v62, %s6740_s12 }
0x3aa0   : > { %3056 = vrot.lane.b32.xlu0 %v5973_v62, %s6742_s0  ;;  %3065 = vrot.lane.b32.xlu1 %v5973_v62, %s6741_s20 }
0x3aa4   : > { %3082 = vrot.lane.b32.xlu0 %v5973_v62, %s6744_s2  ;;  %3101 = vrot.lane.b32.xlu1 %v5973_v62, %s6731_s27 }
0x3aa8   : > { %3110 = vrot.lane.b32.xlu0 %v5973_v62, %s6743_s28  ;;  %3127 = vrot.lane.b32.xlu1 %v5973_v62, %s6745_s17 }
0x3aac   : > { %3167 = vrot.lane.b32.xlu0 %v6073_v14, %s6708_s21  ;;  %3184 = vrot.lane.b32.xlu1 %v6073_v14, %s6709_s11 }
0x3ab0   : > { %3212 = vrot.lane.b32.xlu1 %v6073_v14, %s6727_s16  ;;  %3203 = vrot.lane.b32.xlu0 %v6073_v14, %s6749_s18 }
0x3ab4   : > { %3229 = vrot.lane.b32.xlu0 %v6073_v14, %s6696_s4  ;;  %3248 = vrot.lane.b32.xlu1 %v6073_v14, %s6735_s26 }
0x3ab8   : > { %3257 = vrot.lane.b32.xlu0 %v6073_v14, %s6698_s7  ;;  %3274 = vrot.lane.b32.xlu1 %v6073_v14, %s6699_s30  ;;  %s6750_s7 = sld [smem:[#allocation18_spill]] }
0x3abc   : > { %3302 = vrot.lane.b32.xlu1 %v6073_v14, %s6700_s29  ;;  %3293 = vrot.lane.b32.xlu0 %v6073_v14, %s6736_s22 }
0x3abe   : > { %v3144_v8 = vld [vmem:[%s6750_s7 + $0x6] sm:$0x1] }
0x3ac0   : > { %3319 = vrot.lane.b32.xlu0 %v6073_v14, %s6702_s23  ;;  %3338 = vrot.lane.b32.xlu1 %v6073_v14, %s6737_s25 }
0x3ac4   : > { %3347 = vrot.lane.b32.xlu0 %v6073_v14, %s6711_s3  ;;  %3364 = vrot.lane.b32.xlu1 %v6073_v14, %s6713_s24 }
0x3ac8   : > { %3392 = vrot.lane.b32.xlu1 %v6073_v14, %s6714_s6  ;;  %3383 = vrot.lane.b32.xlu0 %v6073_v14, %s6738_s15 }
0x3acc   : > { %3409 = vrot.lane.b32.xlu0 %v6073_v14, %s6716_s14  ;;  %3428 = vrot.lane.b32.xlu1 %v6073_v14, %s6739_s8 }
0x3ad0   : > { %3437 = vrot.lane.b32.xlu0 %v6073_v14, %s6717_s19  ;;  %3454 = vrot.lane.b32.xlu1 %v6073_v14, %s6740_s12 }
0x3ad4   : > { %3482 = vrot.lane.b32.xlu1 %v6073_v14, %s6741_s20  ;;  %3473 = vrot.lane.b32.xlu0 %v6073_v14, %s6742_s0 }
0x3ad8   : > { %3499 = vrot.lane.b32.xlu0 %v6073_v14, %s6744_s2  ;;  %3518 = vrot.lane.b32.xlu1 %v6073_v14, %s6731_s27 }
0x3adc   : > { %3527 = vrot.lane.b32.xlu0 %v6073_v14, %s6743_s28  ;;  %3544 = vrot.lane.b32.xlu1 %v6073_v14, %s6745_s17 }
0x3aee   : > { %v6127_v61 = vpop.permute.xlu1 %2806  ;;  %v6129_v40 = vpop.permute.xlu0 %2804 }
0x3af2   : > { %v2813_v41 = vpop.permute.xlu0 %2812  ;;  %v2832_v19 = vpop.permute.xlu1 %2831 }
0x3af3   : > { %4173 = vpush %v2813_v41 }
0x3af4   : > { %4175 = vpush %v2832_v19  ;;  %v6174_v19 = vld [vmem:[%s6748_s13 + $0x19] sm:$0xff] }
0x3af6   : > { %v2841_v31 = vpop.permute.xlu0 %2840  ;;  %v2858_v5 = vpop.permute.xlu1 %2857 }
0x3af7   : > { %4177 = vpush %v2841_v31  ;;  %v6177_v31 = vld [vmem:[%s6748_s13 + $0x21] sm:$0xff] }
0x3af8   : > { %4179 = vpush %v2858_v5 }
0x3afa   : > { %v2877_v32 = vpop.permute.xlu0 %2876  ;;  %v2886_v34 = vpop.permute.xlu1 %2885 }
0x3afb   : > { %4181 = vpush %v2877_v32 }
0x3afc   : > { %4183 = vpush %v2886_v34 }
0x3afe   : > { %v2903_v9 = vpop.permute.xlu0 %2902  ;;  %v2922_v35 = vpop.permute.xlu1 %2921 }
0x3aff   : > { %4185 = vpush %v2903_v9 }
0x3b00   : > { %4187 = vpush %v2922_v35 }
0x3b02   : > { %v2931_v7 = vpop.permute.xlu0 %2930  ;;  %v2948_v29 = vpop.permute.xlu1 %2947 }
0x3b03   : > { %4189 = vpush %v2931_v7 }
0x3b04   : > { %4191 = vpush %v2948_v29 }
0x3b06   : > { %v2967_v36 = vpop.permute.xlu0 %2966  ;;  %v2976_v23 = vpop.permute.xlu1 %2975 }
0x3b07   : > { %4193 = vpush %v2967_v36 }
0x3b08   : > { %4195 = vpush %v2976_v23 }
0x3b0a   : > { %v2993_v10 = vpop.permute.xlu0 %2992  ;;  %v3012_v47 = vpop.permute.xlu1 %3011 }
0x3b0b   : > { %4197 = vpush %v2993_v10  ;;  %v6196_v10 = vld [vmem:[%s6748_s13 + $0x1a] sm:$0xff] }
0x3b0c   : > { %4199 = vpush %v3012_v47  ;;  %v6199_v47 = vld [vmem:[%s6748_s13 + $0x22] sm:$0xff] }
0x3b0e   : > { %v3021_v25 = vpop.permute.xlu0 %3020  ;;  %v3038_v63 = vpop.permute.xlu1 %3037 }
0x3b0f   : > { %4201 = vpush %v3021_v25 }
0x3b10   : > { %4203 = vpush %v3038_v63 }
0x3b12   : > { %v3057_v37 = vpop.permute.xlu0 %3056  ;;  %v3066_v54 = vpop.permute.xlu1 %3065 }
0x3b13   : > { %4205 = vpush %v3057_v37 }
0x3b14   : > { %4207 = vpush %v3066_v54 }
0x3b16   : > { %v3083_v51 = vpop.permute.xlu0 %3082  ;;  %v3102_v48 = vpop.permute.xlu1 %3101 }
0x3b17   : > { %4209 = vpush %v3083_v51 }
0x3b18   : > { %4211 = vpush %v3102_v48  ;;  %v6213_v48 = vld [vmem:[%s6748_s13 + $0x30] sm:$0xff] }
0x3b1a   : > { %v3111_v33 = vpop.permute.xlu0 %3110  ;;  %v3128_v58 = vpop.permute.xlu1 %3127 }
0x3b1b   : > { %4213 = vpush %v3111_v33  ;;  %v6216_v33 = vld [vmem:[%s6748_s13 + $0x38] sm:$0xff] }
0x3b1c   : > { %4215 = vpush %v3128_v58 }
0x3b1d   : > { %4217 = vpush %v3144_v8 }
0x3b1e   : > { %v3168_v18 = vpop.permute.xlu0 %3167  ;;  %4219 = vpush %v6073_v14  ;;  %v3185_v62 = vpop.permute.xlu1 %3184 }
0x3b1f   : > { %4221 = vpush %v3168_v18 }
0x3b20   : > { %4223 = vpush %v3185_v62 }
0x3b22   : > { %v3213_v20 = vpop.permute.xlu1 %3212  ;;  %v3204_v4 = vpop.permute.xlu0 %3203 }
0x3b23   : > { %4225 = vpush %v3204_v4 }
0x3b24   : > { %s4174_s10 = spop %4173  ;;  %4227 = vpush %v3213_v20 }
0x3b25   : > { %v2815_v2 = vstv %s4174_s10  ;;  %s4176_s23 = spop %4175 }
0x3b26   : > { %v2817_v52 = vmul.f32 %v2815_v2, %v6017_v12  ;;  %v2818_v0 = vmul.f32 %v2815_v2, %v6020_v28  ;;  %v2834_v45 = vstv %s4176_s23  ;;  %v3230_v57 = vpop.permute.xlu0 %3229  ;;  %v3249_v15 = vpop.permute.xlu1 %3248 }
0x3b27   : > { %v6142_v38 = vmul.f32 %v2834_v45, %v6134_v13  ;;  %v6145_v3 = vmul.f32 %v2834_v45, %v6137_v6  ;;  %4229 = vpush %v3230_v57 }
0x3b28   : > { %2823 = vrot.lane.b32.xlu1 %v2818_v0, %s6709_s11  ;;  %2821 = vrot.lane.b32.xlu0 %v2817_v52, %s6709_s11  ;;  %s4178_s29 = spop %4177  ;;  %4231 = vpush %v3249_v15  ;;  %v6229_v52 = vld [vmem:[%s6748_s13 + $0x31] sm:$0xff]  ;;  %v6232_v0 = vld [vmem:[%s6748_s13 + $0x39] sm:$0xff] }
0x3b29   : > { %v2843_v44 = vstv %s4178_s29  ;;  %s4180_s30 = spop %4179 }
0x3b2a   : > { %v2845_v27 = vmul.f32 %v2843_v44, %v6134_v13  ;;  %v2846_v26 = vmul.f32 %v2843_v44, %v6137_v6  ;;  %v2860_v53 = vstv %s4180_s30  ;;  %v3258_v17 = vpop.permute.xlu0 %3257  ;;  %v3275_v1 = vpop.permute.xlu1 %3274 }
0x3b2b   : > { %4233 = vpush %v3258_v17  ;;  %v2862_v42 = vmul.f32 %v2860_v53, %v6134_v13  ;;  %v2863_v56 = vmul.f32 %v2860_v53, %v6137_v6  ;;  %v6248_v53 = vld [vmem:[%s6748_s13 + $0x3a] sm:$0xff] }
0x3b2c   : > { %2851 = vrot.lane.b32.xlu1 %v2846_v26, %s6708_s21  ;;  %2849 = vrot.lane.b32.xlu0 %v2845_v27, %s6708_s21  ;;  %s4182_s4 = spop %4181  ;;  %4235 = vpush %v3275_v1  ;;  %v6245_v26 = vld [vmem:[%s6748_s13 + $0x32] sm:$0xff] }
0x3b2d   : > { %v2879_v22 = vstv %s4182_s4  ;;  %s4184_s3 = spop %4183 }
0x3b2e   : > { %v6162_v60 = vmul.f32 %v6152_v24, %v2879_v22  ;;  %v6165_v46 = vmul.f32 %v6155_v49, %v2879_v22  ;;  %v2888_v21 = vstv %s4184_s3  ;;  %v3303_v43 = vpop.permute.xlu1 %3302  ;;  %v3294_v39 = vpop.permute.xlu0 %3293 }
0x3b2f   : > { %4237 = vpush %v3294_v39  ;;  %v2890_v14 = vmul.f32 %v6152_v24, %v2888_v21  ;;  %v2891_v41 = vmul.f32 %v6155_v49, %v2888_v21 }
0x3b30   : > { %2868 = vrot.lane.b32.xlu1 %v2863_v56, %s6709_s11  ;;  %2866 = vrot.lane.b32.xlu0 %v2862_v42, %s6709_s11  ;;  %s6171_s24 = spop %4185  ;;  %4239 = vpush %v3303_v43 }
0x3b31   : > { %s4188_s6 = spop %4187  ;;  %v2905_v9 = vstv %s6171_s24 }
0x3b32   : > { %v2924_v5 = vstv %s4188_s6  ;;  %v3320_v32 = vpop.permute.xlu0 %3319  ;;  %v3339_v34 = vpop.permute.xlu1 %3338  ;;  %v2907_v29 = vmul.f32 %v6152_v24, %v2905_v9 }
0x3b33   : > { %v6181_v35 = vmul.f32 %v6174_v19, %v2924_v5  ;;  %v6184_v7 = vmul.f32 %v6177_v31, %v2924_v5  ;;  %4241 = vpush %v3320_v32 }
0x3b34   : > { %2896 = vrot.lane.b32.xlu1 %v2891_v41, %s6708_s21  ;;  %2894 = vrot.lane.b32.xlu0 %v2890_v14, %s6708_s21  ;;  %4243 = vpush %v3339_v34  ;;  %s6188_s14 = spop %4189 }
0x3b35   : > { %s6193_s19 = spop %4191 }
0x3b36   : > { %v3348_v36 = vpop.permute.xlu0 %3347  ;;  %v3365_v23 = vpop.permute.xlu1 %3364 }
0x3b37   : > { %4245 = vpush %v3348_v36 }
0x3b38   : > { %2911 = vrot.lane.b32.xlu0 %v2907_v29, %s6709_s11  ;;  %s4194_s16 = spop %4193  ;;  %4247 = vpush %v3365_v23 }
0x3b39   : > { %v2969_v25 = vstv %s4194_s16  ;;  %s6208_s27 = spop %4195 }
0x3b3a   : > { %v6203_v63 = vmul.f32 %v6196_v10, %v2969_v25  ;;  %v6206_v37 = vmul.f32 %v6199_v47, %v2969_v25  ;;  %v3393_v54 = vpop.permute.xlu1 %3392  ;;  %v3384_v51 = vpop.permute.xlu0 %3383 }
0x3b3b   : > { %4249 = vpush %v3384_v51 }
0x3b3c   : > { %s6210_s26 = spop %4197  ;;  %4251 = vpush %v3393_v54 }
0x3b3d   : > { %s4200_s22 = spop %4199 }
0x3b3e   : > { %v3014_v58 = vstv %s4200_s22  ;;  %v3410_v8 = vpop.permute.xlu0 %3409  ;;  %v3429_v18 = vpop.permute.xlu1 %3428 }
0x3b3f   : > { %v6219_v62 = vmul.f32 %v6213_v48, %v3014_v58  ;;  %v6222_v20 = vmul.f32 %v6216_v33, %v3014_v58  ;;  %4253 = vpush %v3410_v8 }
0x3b40   : > { %4255 = vpush %v3429_v18  ;;  %s6224_s25 = spop %4201 }
0x3b41   : > { %s6226_s15 = spop %4203 }
0x3b42   : > { %v3438_v4 = vpop.permute.xlu0 %3437  ;;  %v3455_v2 = vpop.permute.xlu1 %3454 }
0x3b43   : > { %4257 = vpush %v3438_v4 }
0x3b44   : > { %s4206_s8 = spop %4205  ;;  %4259 = vpush %v3455_v2 }
0x3b45   : > { %v3059_v45 = vstv %s4206_s8  ;;  %s6240_s12 = spop %4207 }
0x3b46   : > { %v6235_v57 = vmul.f32 %v6229_v52, %v3059_v45  ;;  %v6238_v15 = vmul.f32 %v6232_v0, %v3059_v45  ;;  %v3483_v44 = vpop.permute.xlu1 %3482  ;;  %v3474_v27 = vpop.permute.xlu0 %3473 }
0x3b47   : > { %4261 = vpush %v3474_v27 }
0x3b48   : > { %s6242_s20 = spop %4209  ;;  %4263 = vpush %v3483_v44 }
0x3b49   : > { %s4212_s0 = spop %4211 }
0x3b4a   : > { %v3104_v17 = vstv %s4212_s0  ;;  %v3500_v1 = vpop.permute.xlu0 %3499  ;;  %v3519_v42 = vpop.permute.xlu1 %3518 }
0x3b4b   : > { %v6251_v56 = vmul.f32 %v6245_v26, %v3104_v17  ;;  %v6254_v22 = vmul.f32 %v6248_v53, %v3104_v17  ;;  %4265 = vpush %v3500_v1 }
0x3b4c   : > { %s6256_s28 = spop %4213  ;;  %4267 = vpush %v3519_v42 }
0x3b4d   : > { %s6258_s2 = spop %4215 }
0x3b4e   : > { %s6260_s17 = spop %4217  ;;  %v3528_v21 = vpop.permute.xlu0 %3527  ;;  %v3545_v43 = vpop.permute.xlu1 %3544 }
0x3b4f   : > { %s6262_s1 = spop %4219  ;;  %4269 = vpush %v3528_v21 }
0x3b50   : > { %s4222_s13 = spop %4221  ;;  %4271 = vpush %v3545_v43 }
0x3b51   : > { %v3170_v39 = vstv %s4222_s13  ;;  %s4224_s18 = spop %4223 }
0x3b52   : > { %v3172_v14 = vmul.f32 %v3170_v39, %v5989_v16  ;;  %v3173_v41 = vmul.f32 %v3170_v39, %v5992_v11  ;;  %v3187_v5 = vstv %s4224_s18 }
0x3b53   : > { %v3189_v32 = vmul.f32 %v3187_v5, %v5989_v16  ;;  %v3190_v34 = vmul.f32 %v3187_v5, %v5992_v11 }
0x3b54   : > { %3178 = vrot.lane.b32.xlu0 %v3173_v41, %s6708_s21  ;;  %3176 = vrot.lane.b32.xlu1 %v3172_v14, %s6708_s21  ;;  %s6270_s10 = spop %4225 }
0x3b55   : > { %s4228_s23 = spop %4227 }
0x3b56   : > { %v3215_v29 = vstv %s4228_s23 }
0x3b57   : > { %v3217_v36 = vmul.f32 %v3215_v29, %v6017_v12  ;;  %v3218_v23 = vmul.f32 %v3215_v29, %v6020_v28  ;;  %v2908_v29 = vmul.f32 %v6155_v49, %v2905_v9 }
0x3b58   : > { %3195 = vrot.lane.b32.xlu0 %v3190_v34, %s6709_s11  ;;  %3193 = vrot.lane.b32.xlu1 %v3189_v32, %s6709_s11  ;;  %s4230_s29 = spop %4229 }
0x3b59   : > { %v3232_v25 = vstv %s4230_s29  ;;  %s4232_s30 = spop %4231 }
0x3b5a   : > { %v3251_v54 = vstv %s4232_s30  ;;  %v3234_v8 = vmul.f32 %v3232_v25, %v6017_v12  ;;  %v3235_v18 = vmul.f32 %v3232_v25, %v6020_v28  ;;  %v2933_v25 = vstv %s6188_s14 }
0x3b5b   : > { %v6277_v51 = vmul.f32 %v3251_v54, %v6134_v13  ;;  %v6280_v58 = vmul.f32 %v3251_v54, %v6137_v6  ;;  %v2935_v9 = vmul.f32 %v6174_v19, %v2933_v25 }
0x3b5c   : > { %3223 = vrot.lane.b32.xlu0 %v3218_v23, %s6708_s21  ;;  %3221 = vrot.lane.b32.xlu1 %v3217_v36, %s6708_s21  ;;  %s4234_s4 = spop %4233 }
0x3b5d   : > { %v3260_v4 = vstv %s4234_s4  ;;  %s4236_s3 = spop %4235 }
0x3b5e   : > { %v3262_v2 = vmul.f32 %v3260_v4, %v6134_v13  ;;  %v3263_v45 = vmul.f32 %v3260_v4, %v6137_v6  ;;  %v3277_v44 = vstv %s4236_s3 }
0x3b5f   : > { %v3279_v42 = vmul.f32 %v3277_v44, %v6134_v13  ;;  %v3280_v21 = vmul.f32 %v3277_v44, %v6137_v6 }
0x3b60   : > { %3240 = vrot.lane.b32.xlu0 %v3235_v18, %s6709_s11  ;;  %3238 = vrot.lane.b32.xlu1 %v3234_v8, %s6709_s11  ;;  %s4238_s6 = spop %4237 }
0x3b61   : > { %v3296_v27 = vstv %s4238_s6  ;;  %s4240_s16 = spop %4239 }
0x3b62   : > { %v6291_v17 = vmul.f32 %v6152_v24, %v3296_v27  ;;  %v6294_v1 = vmul.f32 %v6155_v49, %v3296_v27  ;;  %v3305_v43 = vstv %s4240_s16 }
0x3b63   : > { %v3307_v13 = vmul.f32 %v6152_v24, %v3305_v43  ;;  %v3308_v6 = vmul.f32 %v6155_v49, %v3305_v43 }
0x3b64   : > { %3268 = vrot.lane.b32.xlu0 %v3263_v45, %s6708_s21  ;;  %3266 = vrot.lane.b32.xlu1 %v3262_v2, %s6708_s21  ;;  %s4242_s22 = spop %4241  ;;  %v2936_v2 = vmul.f32 %v6177_v31, %v2933_v25  ;;  %v2950_v45 = vstv %s6193_s19 }
0x3b65   : > { %s4244_s8 = spop %4243  ;;  %v3322_v5 = vstv %s4242_s22 }
0x3b66   : > { %v3341_v39 = vstv %s4244_s8  ;;  %v3324_v32 = vmul.f32 %v6152_v24, %v3322_v5  ;;  %v3325_v54 = vmul.f32 %v6155_v49, %v3322_v5 }
0x3b67   : > { %v6301_v14 = vmul.f32 %v6174_v19, %v3341_v39  ;;  %v6304_v41 = vmul.f32 %v6177_v31, %v3341_v39 }
0x3b68   : > { %3285 = vrot.lane.b32.xlu0 %v3280_v21, %s6709_s11  ;;  %3283 = vrot.lane.b32.xlu1 %v3279_v42, %s6709_s11  ;;  %s4246_s0 = spop %4245  ;;  %v2952_v21 = vmul.f32 %v6174_v19, %v2950_v45 }
0x3b69   : > { %s6310_s13 = spop %4247  ;;  %v3350_v24 = vstv %s4246_s0  ;;  %s4497_s0 = smov [#allocation2]  }
0x3b6a   : > { %v3352_v49 = vmul.f32 %v6174_v19, %v3350_v24  ;;  %v3353_v44 = vmul.f32 %v6177_v31, %v3350_v24  ;;  %v3367_v27 = vstv %s6310_s13  ;;  %s4379_s13 = sshll.u32 %s4497_s0, 4  ;;  %s4380_s13 = int_to_ptr.vmem [resolvable:$false] %s4379_s13 }
0x3b6c   : > { %3313 = vrot.lane.b32.xlu0 %v3308_v6, %s6708_s21  ;;  %3311 = vrot.lane.b32.xlu1 %v3307_v13, %s6708_s21  ;;  %s4250_s18 = spop %4249  ;;  %v3369_v13 = vmul.f32 %v6174_v19, %v3367_v27  ;;  %v2953_v6 = vmul.f32 %v6177_v31, %v2950_v45  ;;  %v3370_v19 = vmul.f32 %v6177_v31, %v3367_v27  ;;  %v2744_v27 = vstv %s5986_s9 }
0x3b6d   : > { %v3386_v34 = vstv %s4250_s18  ;;  %s6325_s23 = spop %4251  ;;  %s4381_s18 = scalar_lea.vmem %s4380_s13, 4096 }
0x3b6e   : > { %v6319_v36 = vmul.f32 %v6196_v10, %v3386_v34  ;;  %v6322_v23 = vmul.f32 %v6199_v47, %v3386_v34  ;;  %v3395_v25 = vstv %s6325_s23 }
0x3b70   : > { %2913 = vrot.lane.b32.xlu1 %v2908_v29, %s6709_s11  ;;  %3328 = vrot.lane.b32.xlu0 %v3324_v32, %s6709_s11  ;;  %s6330_s29 = spop %4253  ;;  %v2978_v32 = vstv %s6208_s27 }
0x3b71   : > { %s4256_s24 = spop %4255  ;;  %v2980_v24 = vmul.f32 %v6196_v10, %v2978_v32  ;;  %v2981_v31 = vmul.f32 %v6199_v47, %v2978_v32  ;;  %v2747_v32 = vmul.f32 %v2744_v27, %v5992_v11 }
0x3b72   : > { %v3431_v8 = vstv %s4256_s24 }
0x3b73   : > { %v6334_v18 = vmul.f32 %v6213_v48, %v3431_v8  ;;  %v6337_v4 = vmul.f32 %v6216_v33, %v3431_v8  ;;  %v2995_v8 = vstv %s6210_s26 }
0x3b74   : > { %3330 = vrot.lane.b32.xlu1 %v3325_v54, %s6709_s11  ;;  %2939 = vrot.lane.b32.xlu0 %v2935_v9, %s6708_s21  ;;  %s6343_s14 = spop %4257  ;;  %v3561_v54 = vld [vmem:[%s6750_s7 + $0x7] sm:$0x1]  ;;  %v3397_v9 = vmul.f32 %v6196_v10, %v3395_v25  ;;  %v2997_v45 = vmul.f32 %v6196_v10, %v2995_v8  ;;  %s6753_s7 = sld [smem:[#allocation20_spill]] }
0x3b75   : > { %s6346_s30 = spop %4259  ;;  %4273 = vpush %v3561_v54 }
0x3b78   : > { %2941 = vrot.lane.b32.xlu1 %v2936_v2, %s6708_s21  ;;  %3356 = vrot.lane.b32.xlu0 %v3352_v49, %s6708_s21  ;;  %s4262_s4 = spop %4261  ;;  %v3398_v49 = vmul.f32 %v6199_v47, %v3395_v25  ;;  %v3412_v2 = vstv %s6330_s29 }
0x3b79   : > { %v3476_v42 = vstv %s4262_s4  ;;  %s6359_s19 = spop %4263 }
0x3b7a   : > { %v6354_v43 = vmul.f32 %v6229_v52, %v3476_v42  ;;  %v6357_v39 = vmul.f32 %v6232_v0, %v3476_v42  ;;  %v2998_v42 = vmul.f32 %v6199_v47, %v2995_v8 }
0x3b7c   : > { %3358 = vrot.lane.b32.xlu1 %v3353_v44, %s6708_s21  ;;  %2956 = vrot.lane.b32.xlu0 %v2952_v21, %s6709_s11  ;;  %s6364_s3 = spop %4265  ;;  %v3414_v44 = vmul.f32 %v6196_v10, %v3412_v2  ;;  %v3023_v21 = vstv %s6224_s25  ;;  %v2766_v10 = vadd.f32 %v6010_v59, %v2747_v32 }
0x3b7d   : > { %s4268_s6 = spop %4267  ;;  %v3025_v25 = vmul.f32 %v6213_v48, %v3023_v21 }
0x3b7e   : > { %v3521_v5 = vstv %s4268_s6 }
0x3b7f   : > { %v6369_v34 = vmul.f32 %v6245_v26, %v3521_v5  ;;  %v6372_v29 = vmul.f32 %v6248_v53, %v3521_v5  ;;  %v2746_v5 = vmul.f32 %v2744_v27, %v5989_v16 }
0x3b80   : > { %2958 = vrot.lane.b32.xlu1 %v2953_v6, %s6709_s11  ;;  %3373 = vrot.lane.b32.xlu0 %v3369_v13, %s6709_s11  ;;  %v2789_v13 = vstv %s6022_s5  ;;  %v3415_v6 = vmul.f32 %v6199_v47, %v3412_v2  ;;  %s4270_s9 = spop %4269 }
0x3b81   : > { %v2765_v54 = vadd.f32 %v6000_v55, %v2746_v5  ;;  %v2792_v47 = vmul.f32 %v2789_v13, %v6020_v28  ;;  %v3040_v55 = vstv %s6226_s15  ;;  %s4272_s5 = spop %4271  ;;  %s6754_s15 = sld [smem:[#allocation6_spill]] }
0x3b83   : > { %v2782_v8 = vadd.f32 %v6014_v30, %v2765_v54 }
0x3b84   : > { %3375 = vrot.lane.b32.xlu1 %v3370_v19, %s6709_s11  ;;  %2984 = vrot.lane.b32.xlu0 %v2980_v24, %s6708_s21  ;;  %v3440_v19 = vstv %s6343_s14  ;;  %v2791_v24 = vmul.f32 %v2789_v13, %v6017_v12 }
0x3b86   : > { %v2793_v59 = vadd.f32 %v2791_v24, %v2782_v8 }
0x3b87   : > { %s6757_s16 = sand.u32 1, %s6754_s15  }
0x3b88   : > { %2986 = vrot.lane.b32.xlu1 %v2981_v31, %s6708_s21  ;;  %3401 = vrot.lane.b32.xlu0 %v3397_v9, %s6708_s21  ;;  %v3442_v9 = vmul.f32 %v6213_v48, %v3440_v19  ;;  %v2783_v31 = vadd.f32 %v6012_v50, %v2766_v10  ;;  %v2810_v27 = vadd.f32 %v6129_v40, %v2793_v59  ;;  %v3068_v10 = vstv %s6240_s12  ;;  %s6529_s22 = scalar_lea.sflag [#allocation3], %s6757_s16 }
0x3b89   : > { %v3042_v50 = vmul.f32 %v6213_v48, %v3040_v55  ;;  %v3043_v40 = vmul.f32 %v6216_v33, %v3040_v55 }
0x3b8a   : > { %v2794_v2 = vadd.f32 %v2792_v47, %v2783_v31 }
0x3b8c   : > { %3403 = vrot.lane.b32.xlu1 %v3398_v49, %s6708_s21  ;;  %3001 = vrot.lane.b32.xlu0 %v2997_v45, %s6709_s11  ;;  %v3026_v49 = vmul.f32 %v6216_v33, %v3023_v21  ;;  %v3443_v45 = vmul.f32 %v6216_v33, %v3440_v19 }
0x3b90   : > { %3003 = vrot.lane.b32.xlu1 %v2998_v42, %s6709_s11  ;;  %3418 = vrot.lane.b32.xlu0 %v3414_v44, %s6709_s11  ;;  %v2811_v44 = vadd.f32 %v6127_v61, %v2794_v2  ;;  %v3457_v42 = vstv %s6346_s30  ;;  %v3071_v2 = vmul.f32 %v6232_v0, %v3068_v10 }
0x3b91   : > { %v3459_v5 = vmul.f32 %v6213_v48, %v3457_v42  ;;  %v3460_v47 = vmul.f32 %v6216_v33, %v3457_v42  ;;  %v3485_v48 = vstv %s6359_s19 }
0x3b94   : > { %3420 = vrot.lane.b32.xlu1 %v3415_v6, %s6709_s11  ;;  %3029 = vrot.lane.b32.xlu0 %v3025_v25, %s6708_s21 }
0x3b98   : > { %3031 = vrot.lane.b32.xlu1 %v3026_v49, %s6708_s21  ;;  %3446 = vrot.lane.b32.xlu0 %v3442_v9, %s6708_s21  ;;  %v3070_v9 = vmul.f32 %v6229_v52, %v3068_v10  ;;  %v3487_v49 = vmul.f32 %v6229_v52, %v3485_v48  ;;  %v3547_v10 = vstv %s4272_s5 }
0x3b9a   : > { %v2824_v30 = vpop.permute.xlu1 %2823  ;;  %v2822_v13 = vpop.permute.xlu0 %2821 }
0x3b9b   : > { %v2828_v21 = vadd.f32 %v2824_v30, %v2811_v44  ;;  %v2827_v6 = vadd.f32 %v2822_v13, %v2810_v27  ;;  %v3085_v44 = vstv %s6242_s20  ;;  %v3502_v30 = vstv %s6364_s3 }
0x3b9c   : > { %3448 = vrot.lane.b32.xlu1 %v3443_v45, %s6708_s21  ;;  %3046 = vrot.lane.b32.xlu0 %v3042_v50, %s6709_s11  ;;  %v3488_v50 = vmul.f32 %v6232_v0, %v3485_v48  ;;  %v3550_v48 = vmul.f32 %v6248_v53, %v3547_v10 }
0x3b9d   : > { %v2839_v32 = vadd.f32 %v6145_v3, %v2828_v21  ;;  %v2838_v61 = vadd.f32 %v6142_v38, %v2827_v6  ;;  %v3504_v21 = vmul.f32 %v6229_v52, %v3502_v30 }
0x3b9e   : > { %v2852_v19 = vpop.permute.xlu1 %2851  ;;  %v2850_v25 = vpop.permute.xlu0 %2849 }
0x3b9f   : > { %v2856_v54 = vadd.f32 %v2852_v19, %v2839_v32  ;;  %v2855_v24 = vadd.f32 %v2850_v25, %v2838_v61  ;;  %v3113_v32 = vstv %s6256_s28  ;;  %v3505_v61 = vmul.f32 %v6232_v0, %v3502_v30  ;;  %s3589_s28 = sshll.u32 %s6753_s7, 4  ;;  %s6523_s28 = int_to_ptr.vmem [resolvable:$true] %s3589_s28 }
0x3ba0   : > { %3048 = vrot.lane.b32.xlu1 %v3043_v40, %s6709_s11  ;;  %3463 = vrot.lane.b32.xlu0 %v3459_v5, %s6709_s11  ;;  %v3088_v5 = vmul.f32 %v6232_v0, %v3085_v44  ;;  %v3530_v40 = vstv %s4270_s9  ;;  %v3115_v19 = vmul.f32 %v6245_v26, %v3113_v32  ;;  %v3130_v25 = vstv %s6258_s2  ;;  %s4375_s8 = scalar_lea.vmem %s6523_s28, 2048  ;;  %p4382_p3 = scmp.lt.s32.totalorder %s6523_s28, %s4380_s13 }
0x3ba1   : > { %v3533_v0 = vmul.f32 %v6248_v53, %v3530_v40  ;;  %p4376_p0 = scmp.ne.s32.totalorder %s6523_s28, %s4375_s8  ;;  %p4383_p4 = scmp.lt.s32.totalorder %s4381_s18, %s4375_s8 }
0x3ba2   : > { %v2869_v3 = vpop.permute.xlu1 %2868  ;;  %v2867_v31 = vpop.permute.xlu0 %2866 }
0x3ba3   : > { %v2873_v38 = vadd.f32 %v2869_v3, %v2856_v54  ;;  %v2872_v8 = vadd.f32 %v2867_v31, %v2855_v24  ;;  %v3132_v54 = vmul.f32 %v6245_v26, %v3130_v25  ;;  %v3549_v24 = vmul.f32 %v6245_v26, %v3547_v10  ;;  %p4377_p1 = pnand %p4376_p0, %p4573_p5  ;;  %p4384_p6 = por %p4383_p4, %p4382_p3 }
0x3ba4   : > { %3465 = vrot.lane.b32.xlu1 %v3460_v47, %s6709_s11  ;;  %3074 = vrot.lane.b32.xlu0 %v3070_v9, %s6708_s21  ;;  %v3133_v47 = vmul.f32 %v6248_v53, %v3130_v25  ;;  %v3161_v9 = vstv %s6262_s1  ;;  %s6756_s1 = sld [smem:[#allocation26_spill]] }
0x3ba5   : > { %v2884_v33 = vadd.f32 %v6165_v46, %v2873_v38  ;;  %v2883_v59 = vadd.f32 %v6162_v60, %v2872_v8  ;;  %v3087_v46 = vmul.f32 %v6229_v52, %v3085_v44  ;;  %v3116_v52 = vmul.f32 %v6248_v53, %v3113_v32  ;;  %p4378_p2 = pneg %p4377_p1 }
0x3ba6   : > { %v2897_v55 = vpop.permute.xlu1 %2896  ;;  %v2895_v45 = vpop.permute.xlu0 %2894  ;;  %v3163_v38 = vmul.f32 %v3161_v9, %v5989_v16  ;;  %v3206_v8 = vstv %s6270_s10  ;;  %s4274_s27 = spop %4273 }
0x3ba7   : > { %v6441_v27 = vadd.f32 %v2897_v55, %v2884_v33  ;;  %v2900_v42 = vadd.f32 %v2895_v45, %v2883_v59  ;;  %v3208_v53 = vmul.f32 %v3206_v8, %v6017_v12  ;;  %v3209_v55 = vmul.f32 %v3206_v8, %v6020_v28  ;;  %p4385_p8 = pnand %p4384_p6, %p4378_p2 }
0x3ba8   : > { %3076 = vrot.lane.b32.xlu1 %v3071_v2, %s6708_s21  ;;  %3491 = vrot.lane.b32.xlu0 %v3487_v49, %s6708_s21 }
0x3baa   : > { %v2912_v13 = vpop.permute.xlu0 %2911 }
0x3bab   : > { %v2917_v60 = vadd.f32 %v2912_v13, %v2900_v42 }
0x3bac   : > { %3493 = vrot.lane.b32.xlu1 %v3488_v50, %s6708_s21  ;;  %3091 = vrot.lane.b32.xlu0 %v3087_v46, %s6709_s11 }
0x3bad   : > { %v6452_v6 = vadd.f32 %v6181_v35, %v2917_v60  ;;  %v3532_v35 = vmul.f32 %v6245_v26, %v3530_v40  ;;  %v3164_v26 = vmul.f32 %v3161_v9, %v5992_v11 }
0x3bb0   : > { %3093 = vrot.lane.b32.xlu1 %v3088_v5, %s6709_s11  ;;  %3508 = vrot.lane.b32.xlu0 %v3504_v21, %s6709_s11 }
0x3bb4   : > { %3510 = vrot.lane.b32.xlu1 %v3505_v61, %s6709_s11  ;;  %3119 = vrot.lane.b32.xlu0 %v3115_v19, %s6708_s21 }
0x3bb8   : > { %3121 = vrot.lane.b32.xlu1 %v3116_v52, %s6708_s21  ;;  %3536 = vrot.lane.b32.xlu0 %v3532_v35, %s6708_s21 }
0x3bbc   : > { %3538 = vrot.lane.b32.xlu1 %v3533_v0, %s6708_s21  ;;  %3136 = vrot.lane.b32.xlu0 %v3132_v54, %s6709_s11  ;;  %s6751_s21 = sld [smem:[#allocation9_spill]] }
0x3bc0   : > { %3138 = vrot.lane.b32.xlu1 %v3133_v47, %s6709_s11  ;;  %3553 = vrot.lane.b32.xlu0 %v3549_v24, %s6709_s11 }
0x3bc2   : > { %s3819_s26 = sshll.u32 %s6751_s21, 1 }
0x3bc4   : > { %3555 = vrot.lane.b32.xlu1 %v3550_v48, %s6709_s11  ;;  %s6752_s11 = sld [smem:[#allocation8_spill]] }
0x3bc6   : > { %v3177_v3 = vpop.permute.xlu1 %3176  ;;  %v3179_v31 = vpop.permute.xlu0 %3178 }
0x3bc7   : > { %v3182_v49 = vadd.f32 %v3177_v3, %v3163_v38  ;;  %v3183_v33 = vadd.f32 %v3179_v31, %v3164_v26 }
0x3bca   : > { %v3194_v59 = vpop.permute.xlu1 %3193  ;;  %v3196_v2 = vpop.permute.xlu0 %3195  ;;  %s3582_s25 = sadd.s32 %s6752_s11, %s3819_s26 }
0x3bcb   : > { %v3199_v45 = vadd.f32 %v3194_v59, %v3182_v49  ;;  %v3200_v44 = vadd.f32 %v3196_v2, %v3183_v33  ;;  %s3824_s20 = sshll.u32 %s3582_s25, 11 }
0x3bcc   : > { %s6521_s10 = scalar_lea.hbm %s6756_s1, %s3824_s20 }
0x3bcd   : > { %v3210_v42 = vadd.f32 %v3208_v53, %v3199_v45  ;;  %v3211_v50 = vadd.f32 %v3209_v55, %v3200_v44 }
0x3bce   : > { %v3222_v30 = vpop.permute.xlu1 %3221  ;;  %v3224_v46 = vpop.permute.xlu0 %3223 }
0x3bcf   : > { %v3227_v13 = vadd.f32 %v3222_v30, %v3210_v42  ;;  %v3228_v60 = vadd.f32 %v3224_v46, %v3211_v50 }
0x3bd2   : > { %v3239_v16 = vpop.permute.xlu1 %3238  ;;  %v3241_v21 = vpop.permute.xlu0 %3240 }
0x3bd3   : > { %v3244_v11 = vadd.f32 %v3239_v16, %v3227_v13  ;;  %v3245_v5 = vadd.f32 %v3241_v21, %v3228_v60 }
0x3bd5   : > { %v3255_v32 = vadd.f32 %v6277_v51, %v3244_v11  ;;  %v3256_v61 = vadd.f32 %v6280_v58, %v3245_v5 }
0x3bd6   : > { %v3267_v40 = vpop.permute.xlu1 %3266  ;;  %v3269_v12 = vpop.permute.xlu0 %3268 }
0x3bd7   : > { %v3272_v19 = vadd.f32 %v3267_v40, %v3255_v32  ;;  %v3273_v28 = vadd.f32 %v3269_v12, %v3256_v61 }
0x3bda   : > { %v3284_v35 = vpop.permute.xlu1 %3283  ;;  %v3286_v52 = vpop.permute.xlu0 %3285 }
0x3bdb   : > { %v3289_v25 = vadd.f32 %v3284_v35, %v3272_v19  ;;  %v3290_v0 = vadd.f32 %v3286_v52, %v3273_v28 }
0x3bdd   : > { %v3300_v10 = vadd.f32 %v6291_v17, %v3289_v25  ;;  %v3301_v54 = vadd.f32 %v6294_v1, %v3290_v0 }
0x3bde   : > { %v3312_v24 = vpop.permute.xlu1 %3311  ;;  %v3314_v47 = vpop.permute.xlu0 %3313 }
0x3bdf   : > { %v3317_v48 = vadd.f32 %v3312_v24, %v3300_v10  ;;  %v3318_v31 = vadd.f32 %v3314_v47, %v3301_v54 }
0x3be2   : > { %v2914_v9 = vpop.permute.xlu1 %2913  ;;  %v3329_v3 = vpop.permute.xlu0 %3328 }
0x3be3   : > { %v2918_v51 = vadd.f32 %v2914_v9, %v6441_v27  ;;  %v3334_v58 = vadd.f32 %v3329_v3, %v3317_v48 }
0x3be5   : > { %v2929_v38 = vadd.f32 %v6184_v7, %v2918_v51  ;;  %v3345_v26 = vadd.f32 %v6301_v14, %v3334_v58 }
0x3be6   : > { %v3331_v8 = vpop.permute.xlu1 %3330  ;;  %v2940_v49 = vpop.permute.xlu0 %2939 }
0x3be7   : > { %v3335_v33 = vadd.f32 %v3331_v8, %v3318_v31  ;;  %v2945_v2 = vadd.f32 %v2940_v49, %v6452_v6 }
0x3be9   : > { %v3346_v17 = vadd.f32 %v6304_v41, %v3335_v33 }
0x3bea   : > { %v2942_v59 = vpop.permute.xlu1 %2941  ;;  %v3357_v1 = vpop.permute.xlu0 %3356 }
0x3beb   : > { %v2946_v44 = vadd.f32 %v2942_v59, %v2929_v38  ;;  %v3362_v27 = vadd.f32 %v3357_v1, %v3345_v26 }
0x3bee   : > { %v3359_v53 = vpop.permute.xlu1 %3358  ;;  %v2957_v55 = vpop.permute.xlu0 %2956 }
0x3bef   : > { %v2962_v45 = vadd.f32 %v2957_v55, %v2945_v2  ;;  %v3363_v46 = vadd.f32 %v3359_v53, %v3346_v17 }
0x3bf1   : > { %v2973_v42 = vadd.f32 %v6203_v63, %v2962_v45 }
0x3bf2   : > { %v2959_v50 = vpop.permute.xlu1 %2958  ;;  %v3374_v7 = vpop.permute.xlu0 %3373 }
0x3bf3   : > { %v2963_v30 = vadd.f32 %v2959_v50, %v2946_v44  ;;  %v3379_v14 = vadd.f32 %v3374_v7, %v3362_v27 }
0x3bf5   : > { %v2974_v13 = vadd.f32 %v6206_v37, %v2963_v30  ;;  %v3390_v41 = vadd.f32 %v6319_v36, %v3379_v14 }
0x3bf6   : > { %v3376_v60 = vpop.permute.xlu1 %3375  ;;  %v2985_v16 = vpop.permute.xlu0 %2984 }
0x3bf7   : > { %v3380_v21 = vadd.f32 %v3376_v60, %v3363_v46  ;;  %v2990_v32 = vadd.f32 %v2985_v16, %v2973_v42 }
0x3bf9   : > { %v3391_v6 = vadd.f32 %v6322_v23, %v3380_v21 }
0x3bfa   : > { %v2987_v11 = vpop.permute.xlu1 %2986  ;;  %v3402_v5 = vpop.permute.xlu0 %3401 }
0x3bfb   : > { %v2991_v12 = vadd.f32 %v2987_v11, %v2974_v13  ;;  %v3407_v19 = vadd.f32 %v3402_v5, %v3390_v41 }
0x3bfe   : > { %v3404_v61 = vpop.permute.xlu1 %3403  ;;  %v3002_v40 = vpop.permute.xlu0 %3001 }
0x3bff   : > { %v3007_v63 = vadd.f32 %v3002_v40, %v2990_v32  ;;  %v3408_v36 = vadd.f32 %v3404_v61, %v3391_v6 }
0x3c01   : > { %v3018_v28 = vadd.f32 %v6219_v62, %v3007_v63  ;;  %v3147_v63 = vstv %s6260_s17 }
0x3c02   : > { %v3004_v35 = vpop.permute.xlu1 %3003  ;;  %v3419_v52 = vpop.permute.xlu0 %3418 }
0x3c03   : > { %v3008_v37 = vadd.f32 %v3004_v35, %v2991_v12  ;;  %v3424_v25 = vadd.f32 %v3419_v52, %v3407_v19  ;;  %v3564_v35 = vstv %s4274_s27 }
0x3c05   : > { %v3019_v0 = vadd.f32 %v6222_v20, %v3008_v37  ;;  %v3435_v10 = vadd.f32 %v6334_v18, %v3424_v25 }
0x3c06   : > { %v3421_v23 = vpop.permute.xlu1 %3420  ;;  %v3030_v54 = vpop.permute.xlu0 %3029 }
0x3c07   : > { %v3425_v24 = vadd.f32 %v3421_v23, %v3408_v36  ;;  %v3035_v3 = vadd.f32 %v3030_v54, %v3018_v28 }
0x3c09   : > { %v3436_v47 = vadd.f32 %v6337_v4, %v3425_v24 }
0x3c0a   : > { %v3032_v48 = vpop.permute.xlu1 %3031  ;;  %v3447_v9 = vpop.permute.xlu0 %3446 }
0x3c0b   : > { %v3036_v31 = vadd.f32 %v3032_v48, %v3019_v0  ;;  %v3452_v38 = vadd.f32 %v3447_v9, %v3435_v10 }
0x3c0e   : > { %v3449_v51 = vpop.permute.xlu1 %3448  ;;  %v3047_v58 = vpop.permute.xlu0 %3046 }
0x3c0f   : > { %v3052_v62 = vadd.f32 %v3047_v58, %v3035_v3  ;;  %v3453_v18 = vadd.f32 %v3449_v51, %v3436_v47 }
0x3c11   : > { %v3063_v26 = vadd.f32 %v6235_v57, %v3052_v62 }
0x3c12   : > { %v3049_v8 = vpop.permute.xlu1 %3048  ;;  %v3464_v49 = vpop.permute.xlu0 %3463 }
0x3c13   : > { %v3053_v20 = vadd.f32 %v3049_v8, %v3036_v31  ;;  %v3469_v33 = vadd.f32 %v3464_v49, %v3452_v38 }
0x3c15   : > { %v3064_v17 = vadd.f32 %v6238_v15, %v3053_v20  ;;  %v3480_v59 = vadd.f32 %v6354_v43, %v3469_v33 }
0x3c16   : > { %v3466_v4 = vpop.permute.xlu1 %3465  ;;  %v3075_v1 = vpop.permute.xlu0 %3074 }
0x3c17   : > { %v3470_v2 = vadd.f32 %v3466_v4, %v3453_v18  ;;  %v3080_v44 = vadd.f32 %v3075_v1, %v3063_v26 }
0x3c19   : > { %v3481_v53 = vadd.f32 %v6357_v39, %v3470_v2 }
0x3c1a   : > { %v3077_v55 = vpop.permute.xlu1 %3076  ;;  %v3492_v45 = vpop.permute.xlu0 %3491 }
0x3c1b   : > { %v3081_v50 = vadd.f32 %v3077_v55, %v3064_v17  ;;  %v3497_v7 = vadd.f32 %v3492_v45, %v3480_v59 }
0x3c1e   : > { %v3494_v27 = vpop.permute.xlu1 %3493  ;;  %v3092_v42 = vpop.permute.xlu0 %3091 }
0x3c1f   : > { %v3097_v57 = vadd.f32 %v3092_v42, %v3080_v44  ;;  %v3498_v13 = vadd.f32 %v3494_v27, %v3481_v53 }
0x3c21   : > { %v3108_v30 = vadd.f32 %v6251_v56, %v3097_v57 }
0x3c22   : > { %v3094_v14 = vpop.permute.xlu1 %3093  ;;  %v3509_v46 = vpop.permute.xlu0 %3508 }
0x3c23   : > { %v3098_v15 = vadd.f32 %v3094_v14, %v3081_v50  ;;  %v3514_v43 = vadd.f32 %v3509_v46, %v3497_v7 }
0x3c25   : > { %v3109_v41 = vadd.f32 %v6254_v22, %v3098_v15  ;;  %v3525_v39 = vadd.f32 %v6369_v34, %v3514_v43 }
0x3c26   : > { %v3511_v60 = vpop.permute.xlu1 %3510  ;;  %v3120_v16 = vpop.permute.xlu0 %3119 }
0x3c27   : > { %v3515_v21 = vadd.f32 %v3511_v60, %v3498_v13  ;;  %v3125_v32 = vadd.f32 %v3120_v16, %v3108_v30 }
0x3c29   : > { %v3526_v6 = vadd.f32 %v6372_v29, %v3515_v21 }
0x3c2a   : > { %v3122_v11 = vpop.permute.xlu1 %3121  ;;  %v3537_v5 = vpop.permute.xlu0 %3536 }
0x3c2b   : > { %v3126_v12 = vadd.f32 %v3122_v11, %v3109_v41  ;;  %v3542_v22 = vadd.f32 %v3537_v5, %v3525_v39 }
0x3c2e   : > { %v3539_v56 = vpop.permute.xlu1 %3538  ;;  %v3137_v61 = vpop.permute.xlu0 %3136 }
0x3c2f   : > { %v3142_v40 = vadd.f32 %v3137_v61, %v3125_v32  ;;  %v3543_v25 = vadd.f32 %v3539_v56, %v3526_v6 }
0x3c31   : > { %v3149_v19 = vadd.f32 %v3147_v63, %v3142_v40 }
0x3c32   : > { %v3139_v34 = vpop.permute.xlu1 %3138  ;;  %v3554_v28 = vpop.permute.xlu0 %3553 }
0x3c33   : > { %v3151_v29 = vmax.f32 %v3149_v19, 0.0  ;;  %v3143_v52 = vadd.f32 %v3139_v34, %v3126_v12  ;;  %v3559_v37 = vadd.f32 %v3554_v28, %v3542_v22 }
0x3c35   : > { %3802 = vst.msk [vmem:[%s6753_s7 + $0x60] sm:$0xff] %vm651_vm0, %v3151_v29  ;;  %v3150_v36 = vadd.f32 %v3147_v63, %v3143_v52  ;;  %v3566_v0 = vadd.f32 %v3564_v35, %v3559_v37 }
0x3c36   : > { %v3556_v10 = vpop.permute.xlu1 %3555 }
0x3c37   : > { %v3152_v23 = vmax.f32 %v3150_v36, 0.0  ;;  %v3568_v54 = vmax.f32 %v3566_v0, 0.0  ;;  %v3560_v24 = vadd.f32 %v3556_v10, %v3543_v25 }
0x3c39   : > { %3803 = vst.msk [vmem:[%s6753_s7 + $0x68] sm:$0xff] %vm651_vm0, %v3152_v23  ;;  %3816 = vst.msk [vmem:[%s6753_s7 + $0x70] sm:$0xff] %vm651_vm0, %v3568_v54  ;;  %v3567_v47 = vadd.f32 %v3564_v35, %v3560_v24 }
0x3c3b   : > { %v3569_v48 = vmax.f32 %v3567_v47, 0.0 }
0x3c3d   : > { %3817 = vst.msk [vmem:[%s6753_s7 + $0x78] sm:$0xff] %vm651_vm0, %v3569_v48 }
0x3c3e   : > { %4388 = shalt.err (!%p4385_p8)
}
0x3c3f   : > { %s4389_s23 = scalar_lea.hbm %s6521_s10, 2048  ;;  %s4393_s14 = scalar_lea.hbm %s6756_s1, 8192 }
0x3c40   : > { %p4390_p9 = scmp.ne.s32.totalorder %s6521_s10, %s4389_s23  ;;  %p4394_p12 = scmp.lt.u32.totalorder %s6521_s10, %s6756_s1 }
0x3c41   : > { %p4395_p13 = scmp.lt.u32.totalorder %s4393_s14, %s4389_s23  ;;  %p4397_p1 = scmp.lt.u32.totalorder %s4389_s23, %s6521_s10 }
0x3c42   : > { %p4391_p10 = pnand %p4390_p9, %p4573_p5 }
0x3c43   : > { %p4396_p0 = por %p4395_p13, %p4394_p12 }
0x3c44   : > { %p4392_p11 = pneg %p4391_p10 }
0x3c45   : > { %p4398_p2 = por %p4397_p1, %p4396_p0 }
0x3c47   : > { %p4399_p3 = pnand %p4398_p2, %p4392_p11 }
0x3c49   : > { %4402 = shalt.err (!%p4399_p3)
}
0x3c4a   : > { %s4498_s19 = smov 128   ;;  %s4499_s3 = smov 8  }
0x3c4b   : > { %4275 = dma.vmem_to_hbm [thread:$0]  (%p4573_p5), %s6523_s28, 2048, %s6521_s10, %s6529_s22, %s4498_s19, %s4498_s19, %s4499_s3  }
0x3c4c PF: > { %s6758_s6 = sld [smem:[#allocation12_spill]]  ;;  %s6759_s9 = sld [smem:[#allocation5_spill]] }
0x3c52   : > { %p4281_p4 = scmp.ge.s32.totalorder %s6758_s6, 2  ;;  %s3604_s21 = sand.u32 1, %s6759_s9  }
0x3c53   : > { %s3605_s11 = scalar_lea.sflag [#allocation3], %s3604_s21 }
0x3c54   : > { %p4278_p6 = pnand %p4281_p4, %p4579_p7 }
0x3c56   : > { %4436 = dma.done.wait (!%p4278_p6), %s3605_s11, 2048  }
0x3c57   : > { %4438 = vsyncadd (!%p4278_p6), %s3605_s11, 4294965248  ;;  %s16_s19 = sadd.s32 1, %s6758_s6   ;;  %s6761_s12 = sld [smem:[#allocation6_spill]] }
0x3c58   : > { %p13_p8 = scmp.ge.s32.totalorder %s16_s19, 6   ;;  %s6762_s13 = sld [smem:[#allocation7_spill]] }
0x3c59   : > { %s6763_s14 = sld [smem:[#allocation17_spill]]  ;;  %s6764_s15 = sld [smem:[#allocation10_spill]] }
0x3c5a   : > { %s6765_s16 = sld [smem:[#allocation11_spill]]  ;;  %s6766_s17 = sld [smem:[#allocation13_spill]] }
0x3c5b   : > { %s6767_s18 = sld [smem:[#allocation15_spill]]  ;;  %15 = sbr.rel (!%p13_p8) target bundleno = 10 (0xa), region = 82 }
0x3c62   :  { %3610 = vsyncpa [#allocation3], 1 }
0x3c63   :  { %3612 = vsyncpa [#allocation3 + $0x1], 1 }

</bundles_post_ra>
